<compile_context>
chip_gen: v7x
topology: tpu7x:2x2x1
jax: 0.10.0
libtpu: 0.0.40
codegen_flags: <defaults>
</compile_context>

<pallas_src>
import numpy as np
import jax
import jax.numpy as jnp
from jax import lax
from jax.experimental import pallas as pl
from jax.experimental.pallas import tpu as pltpu


# ----------------------------- Pallas kernels ------------------------------

def _conv_matmul_kernel(p_ref, w_ref, b_ref, o_ref):
    # One conv layer for one head: im2col-patches @ weight + bias, LeakyReLU.
    acc = jnp.dot(p_ref[...], w_ref[...], preferred_element_type=jnp.float32)
    acc = acc + b_ref[...]
    acc = jnp.where(acc >= 0.0, acc, 0.01 * acc)      # PyTorch LeakyReLU(0.01)
    o_ref[...] = acc.astype(o_ref.dtype)


def conv_layer(patches, w, b):
    """Run one conv layer for both heads in a single pallas_call.

    patches: [P, M, K] bf16   (P == 1 -> the same patches feed both heads)
    w:       [H, K, OC] bf16  (H = 2 heads: 0 = target, 1 = predictor)
    b:       [H, 1, OC] f32
    returns: [H, M, OC] bf16
    """
    P, M, K = patches.shape
    H, _, OC = w.shape
    p_map = (lambda h: (h, 0, 0)) if P == H else (lambda h: (0, 0, 0))
    return pl.pallas_call(
        _conv_matmul_kernel,
        out_shape=jax.ShapeDtypeStruct((H, M, OC), jnp.bfloat16),
        grid=(H,),
        in_specs=[pl.BlockSpec((None, M, K), p_map),
                  pl.BlockSpec((None, K, OC), lambda h: (h, 0, 0)),
                  pl.BlockSpec((None, 1, OC), lambda h: (h, 0, 0))],
        out_specs=pl.BlockSpec((None, M, OC), lambda h: (h, 0, 0)),
        compiler_params=pltpu.CompilerParams(
            dimension_semantics=("parallel",)),
    )(patches, w, b)


def _fc_heads_kernel(x_ref, w1_ref, b1_ref, w2_ref, b2_ref, w3_ref, b3_ref,
                     o_ref):
    # Head 0 (target): out = fc1(x)                        (no activation)
    # Head 1 (pred.) : out = fc3(relu(fc2(relu(fc1(x)))))  (all in VMEM)
    h = pl.program_id(0)
    z1 = jnp.dot(x_ref[...], w1_ref[...],
                 preferred_element_type=jnp.float32) + b1_ref[...]

    @pl.when(h == 0)
    def _():
        o_ref[...] = z1

    @pl.when(h == 1)
    def _():
        a1 = jnp.maximum(z1, 0.0).astype(w2_ref.dtype)
        z2 = jnp.dot(a1, w2_ref[...],
                     preferred_element_type=jnp.float32) + b2_ref[...]
        a2 = jnp.maximum(z2, 0.0).astype(w3_ref.dtype)
        o_ref[...] = jnp.dot(a2, w3_ref[...],
                             preferred_element_type=jnp.float32) + b3_ref[...]


def fc_heads(flat, w1, b1, w2, b2, w3, b3):
    """Fused FC stack for both heads. flat: [2, N, 3136] bf16 -> [2, N, 512] f32."""
    H, M, K = flat.shape
    F = w1.shape[-1]
    return pl.pallas_call(
        _fc_heads_kernel,
        out_shape=jax.ShapeDtypeStruct((H, M, F), jnp.float32),
        grid=(H,),
        in_specs=[pl.BlockSpec((None, M, K), lambda h: (h, 0, 0)),
                  pl.BlockSpec((None, K, F), lambda h: (h, 0, 0)),
                  pl.BlockSpec((None, 1, F), lambda h: (h, 0, 0)),
                  pl.BlockSpec((F, F), lambda h: (0, 0)),
                  pl.BlockSpec((1, F), lambda h: (0, 0)),
                  pl.BlockSpec((F, F), lambda h: (0, 0)),
                  pl.BlockSpec((1, F), lambda h: (0, 0))],
        out_specs=pl.BlockSpec((None, M, F), lambda h: (h, 0, 0)),
        compiler_params=pltpu.CompilerParams(
            dimension_semantics=("parallel",)),
    )(flat, w1, b1, w2, b2, w3, b3)


# ------------------------------- glue (JAX) --------------------------------

def extract_patches_nhwc(x, k, s):
    # x: [N, H, W, C] -> [N, OH, OW, C*k*k], feature order (c, kh, kw),
    # which matches the PyTorch conv-weight flatten (OC, IC*KH*KW).
    return lax.conv_general_dilated_patches(
        x, filter_shape=(k, k), window_strides=(s, s), padding="VALID",
        dimension_numbers=("NHWC", "HWIO", "NHWC"))


def _out_hw(x, k, s):
    return (x - k) // s + 1


def rnd_forward(obs, obs_mean, obs_var, params):
    # Atari path of RND.forward (done=None, no obs_rms update inside forward).
    # TODO(synk): MazeHead (5x5 small-image) branch not implemented.
    if obs.shape[3:] != (5, 5):
        obs = obs[:, :, -1:, :, :]                  # keep last frame -> C = 1
    T, B = obs.shape[0], obs.shape[1]
    C, H, W = obs.shape[2], obs.shape[3], obs.shape[4]
    N = T * B

    # --- normalize + clip (plain jnp; tiny elementwise op, eps avoids 0/0) ---
    x = obs.reshape(N, C, H, W).astype(jnp.float32)
    mean = obs_mean.reshape(1, C, H, W).astype(jnp.float32)
    var = obs_var.reshape(1, C, H, W).astype(jnp.float32)
    xn = jnp.clip((x - mean) * lax.rsqrt(var + 1e-8), -5.0, 5.0)
    # C == 1, so NCHW -> NHWC is a pure reshape (no data movement).
    xn = xn.reshape(N, H, W, C).astype(jnp.bfloat16)

    h1, w1 = _out_hw(H, 8, 4), _out_hw(W, 8, 4)     # 20, 20
    h2, w2 = _out_hw(h1, 4, 2), _out_hw(w1, 4, 2)   # 9, 9
    h3, w3 = _out_hw(h2, 3, 1), _out_hw(w2, 3, 1)   # 7, 7

    # --- conv1: 8x8 stride 4, 1 -> 32 (shared input, both heads, 1 call) ---
    p1 = extract_patches_nhwc(xn, 8, 4)                   # [N, 20, 20, 64]
    p1 = p1.reshape(1, N * h1 * w1, C * 8 * 8)
    a1 = conv_layer(p1, params["c1w"], params["c1b"])     # [2, N*400, 32]
    a1 = a1.reshape(2 * N, h1, w1, 32)

    # --- conv2: 4x4 stride 2, 32 -> 64 (both heads, 1 call) ---
    p2 = extract_patches_nhwc(a1, 4, 2)                   # [2N, 9, 9, 512]
    p2 = p2.reshape(2, N * h2 * w2, 32 * 4 * 4)
    a2 = conv_layer(p2, params["c2w"], params["c2b"])     # [2, N*81, 64]
    a2 = a2.reshape(2 * N, h2, w2, 64)

    # --- conv3: 3x3 stride 1, 64 -> 64 (both heads, 1 call) ---
    p3 = extract_patches_nhwc(a2, 3, 1)                   # [2N, 7, 7, 576]
    p3 = p3.reshape(2, N * h3 * w3, 64 * 3 * 3)
    a3 = conv_layer(p3, params["c3w"], params["c3b"])     # [2, N*49, 64]

    # --- fused FC stack (fc1 both heads; fc2/fc3 predictor only, 1 call) ---
    flat = a3.reshape(2, N, h3 * w3 * 64)                 # NHWC flatten (h,w,c)
    feats = fc_heads(flat, params["fc1w"], params["fc1b"],
                     params["fc2w"], params["fc2b"],
                     params["fc3w"], params["fc3b"])      # [2, N, 512] f32

    phi = feats[0].reshape(T, B, -1)
    predicted_phi = feats[1].reshape(T, B, -1)
    return phi, predicted_phi, T, B


# --------------------------- parameter construction ------------------------

def make_pt_head_params(key, predictor):
    # PyTorch-layout weights: conv (OC, IC*KH*KW), linear (out, in);
    # orthogonal init gain sqrt(2) (PyTorch flatten semantics), zero bias.
    gain = float(np.sqrt(2.0))
    ortho = jax.nn.initializers.orthogonal(scale=gain)
    ks = jax.random.split(key, 6)
    p = {
        "c1w": ortho(ks[0], (32, 1 * 8 * 8), jnp.float32),
        "c1b": jnp.zeros((32,), jnp.float32),
        "c2w": ortho(ks[1], (64, 32 * 4 * 4), jnp.float32),
        "c2b": jnp.zeros((64,), jnp.float32),
        "c3w": ortho(ks[2], (64, 64 * 3 * 3), jnp.float32),
        "c3b": jnp.zeros((64,), jnp.float32),
        "fc1w": ortho(ks[3], (512, 7 * 7 * 64), jnp.float32),
        "fc1b": jnp.zeros((512,), jnp.float32),
    }
    if predictor:
        p["fc2w"] = ortho(ks[4], (512, 512), jnp.float32)
        p["fc2b"] = jnp.zeros((512,), jnp.float32)
        p["fc3w"] = ortho(ks[5], (512, 512), jnp.float32)
        p["fc3b"] = jnp.zeros((512,), jnp.float32)
    return p


def pack_rnd_params(target_pt, forward_pt):
    # Convert PyTorch-layout weights to the kernel layout ONCE:
    #  - conv: (OC, IC*KH*KW) -> (IC*KH*KW, OC); row order (ic,kh,kw) matches
    #    the conv_general_dilated_patches feature order, so no reorder needed.
    #  - fc1: reorder input features (c,h,w) -> (h,w,c) for the NHWC flatten.
    #  - stack the two heads (0 = target, 1 = predictor), cast weights to bf16.
    def conv_w(w):
        return w.T.astype(jnp.bfloat16)

    def fc1_w(w):
        return (w.reshape(512, 64, 7, 7).transpose(0, 2, 3, 1)
                 .reshape(512, 7 * 7 * 64).T.astype(jnp.bfloat16))

    def stack_w(fn, a, b):
        return jnp.stack([fn(a), fn(b)], axis=0)

    def stack_b(a, b):
        return jnp.stack([a.reshape(1, -1), b.reshape(1, -1)],
                         axis=0).astype(jnp.float32)

    return {
        "c1w": stack_w(conv_w, target_pt["c1w"], forward_pt["c1w"]),   # [2,64,32]
        "c1b": stack_b(target_pt["c1b"], forward_pt["c1b"]),           # [2,1,32]
        "c2w": stack_w(conv_w, target_pt["c2w"], forward_pt["c2w"]),   # [2,512,64]
        "c2b": stack_b(target_pt["c2b"], forward_pt["c2b"]),
        "c3w": stack_w(conv_w, target_pt["c3w"], forward_pt["c3w"]),   # [2,576,64]
        "c3b": stack_b(target_pt["c3b"], forward_pt["c3b"]),
        "fc1w": stack_w(fc1_w, target_pt["fc1w"], forward_pt["fc1w"]), # [2,3136,512]
        "fc1b": stack_b(target_pt["fc1b"], forward_pt["fc1b"]),        # [2,1,512]
        "fc2w": forward_pt["fc2w"].T.astype(jnp.bfloat16),             # [512,512]
        "fc2b": forward_pt["fc2b"].reshape(1, -1).astype(jnp.float32),
        "fc3w": forward_pt["fc3w"].T.astype(jnp.bfloat16),
        "fc3b": forward_pt["fc3b"].reshape(1, -1).astype(jnp.float32),
    }


# ---------------------------------- main ------------------------------------

if __name__ == "__main__":
    key = jax.random.PRNGKey(0)
    k_obs, k_tgt, k_fwd = jax.random.split(key, 3)

    # Atari path of RND: 84x84 inputs -> conv_feature_size = 7*7*64 = 3136.
    T, B, C, H, W = 2, 2, 4, 84, 84
    obs = jax.random.normal(k_obs, (T, B, C, H, W), dtype=jnp.float32)

    # Fresh RunningMeanStd: mean=0, var=1, shape (1, c=1, H, W).
    obs_mean = jnp.zeros((1, 1, H, W), jnp.float32)
    obs_var = jnp.ones((1, 1, H, W), jnp.float32)

    target_pt = make_pt_head_params(k_tgt, predictor=False)
    forward_pt = make_pt_head_params(k_fwd, predictor=True)
    params = pack_rnd_params(target_pt, forward_pt)

    fwd = jax.jit(rnd_forward)
    phi, predicted_phi, t_out, b_out = fwd(obs, obs_mean, obs_var, params)
    jax.block_until_ready((phi, predicted_phi))

    assert phi.shape == (T, B, 512), phi.shape
    assert predicted_phi.shape == (T, B, 512), predicted_phi.shape
    assert (int(t_out), int(b_out)) == (T, B)
    assert bool(jnp.all(jnp.isfinite(phi)))
    assert bool(jnp.all(jnp.isfinite(predicted_phi)))
    print("KERNEL_OK")
</pallas_src>

<mosaic_0001>
module attributes {stable_mosaic.version = 11 : i64} {
  func.func @_conv_matmul_kernel(%arg0: i32, %arg1: memref<1x1600x64xbf16, #tpu.memory_space<vmem>>, %arg2: memref<1x64x32xbf16, #tpu.memory_space<vmem>>, %arg3: memref<1x1x32xf32, #tpu.memory_space<vmem>>, %arg4: memref<1x1600x32xbf16, #tpu.memory_space<vmem>>) attributes {dimension_semantics = [#tpu.dimension_semantics<parallel>], iteration_bounds = array<i64: 2>, scalar_prefetch = 0 : i64, scratch_operands = 0 : i64, tpu.core_type = #tpu.core_type<tc>, window_params = [{pipeline_mode = #tpu.pipeline_mode<synchronous>, transform_indices = @transform_0, window_bounds = array<i64: 1, 1600, 64>}, {transform_indices = @transform_1, window_bounds = array<i64: 1, 64, 32>}, {transform_indices = @transform_2, window_bounds = array<i64: 1, 1, 32>}, {transform_indices = @transform_3, window_bounds = array<i64: 1, 1600, 32>}]} {
    %c0 = arith.constant 0 : index
    %c0_0 = arith.constant 0 : index
    %c0_1 = arith.constant 0 : index
    %0 = vector.load %arg1[%c0, %c0_0, %c0_1] : memref<1x1600x64xbf16, #tpu.memory_space<vmem>>, vector<1x1600x64xbf16>
    %1 = vector.shape_cast %0 : vector<1x1600x64xbf16> to vector<1600x64xbf16>
    %c0_2 = arith.constant 0 : index
    %c0_3 = arith.constant 0 : index
    %c0_4 = arith.constant 0 : index
    %2 = vector.load %arg2[%c0_2, %c0_3, %c0_4] : memref<1x64x32xbf16, #tpu.memory_space<vmem>>, vector<1x64x32xbf16>
    %3 = vector.shape_cast %2 : vector<1x64x32xbf16> to vector<64x32xbf16>
    %cst = arith.constant dense<0.000000e+00> : vector<1600x32xf32>
    %4 = tpu.matmul %1, %3, %cst {dimension_numbers = #tpu.dot_dimension_numbers<[1], [0], [0], [1], [0, 0, 1, 1], [], []>} : vector<1600x64xbf16>, vector<64x32xbf16>, vector<1600x32xf32> -> vector<1600x32xf32>
    %c0_5 = arith.constant 0 : index
    %c0_6 = arith.constant 0 : index
    %c0_7 = arith.constant 0 : index
    %5 = vector.load %arg3[%c0_5, %c0_6, %c0_7] : memref<1x1x32xf32, #tpu.memory_space<vmem>>, vector<1x1x32xf32>
    %6 = vector.shape_cast %5 : vector<1x1x32xf32> to vector<1x32xf32>
    %7 = vector.broadcast %6 : vector<1x32xf32> to vector<1600x32xf32>
    %8 = arith.addf %4, %7 : vector<1600x32xf32>
    %cst_8 = arith.constant 0.000000e+00 : f32
    %9 = vector.broadcast %cst_8 : f32 to vector<1600x32xf32>
    %10 = arith.cmpf oge, %8, %9 : vector<1600x32xf32>
    %cst_9 = arith.constant 0.00999999977 : f32
    %11 = vector.broadcast %cst_9 : f32 to vector<1600x32xf32>
    %12 = arith.mulf %11, %8 : vector<1600x32xf32>
    %13 = arith.select %10, %8, %12 : vector<1600x32xi1>, vector<1600x32xf32>
    %14 = arith.truncf %13 : vector<1600x32xf32> to vector<1600x32xbf16>
    %c0_10 = arith.constant 0 : index
    %c0_11 = arith.constant 0 : index
    %c0_12 = arith.constant 0 : index
    %15 = vector.load %arg4[%c0_10, %c0_11, %c0_12] : memref<1x1600x32xbf16, #tpu.memory_space<vmem>>, vector<1x1600x32xbf16>
    %16 = vector.shape_cast %15 : vector<1x1600x32xbf16> to vector<1600x32xbf16>
    %17 = vector.shape_cast %14 : vector<1600x32xbf16> to vector<1x1600x32xbf16>
    tpu.vector_store %arg4[%c0_10, %c0_11, %c0_12], %17 {strides = array<i32>} : memref<1x1600x32xbf16, #tpu.memory_space<vmem>>, vector<1x1600x32xbf16>,
    return
  }
  func.func @transform_0(%arg0: i32) -> (i32, i32, i32) {
    %c0_i32 = arith.constant 0 : i32
    %c0_i32_0 = arith.constant 0 : i32
    %c0_i32_1 = arith.constant 0 : i32
    %c0_i32_2 = arith.constant 0 : i32
    return %c0_i32, %c0_i32_0, %c0_i32_1 : i32, i32, i32
  }
  func.func @transform_1(%arg0: i32) -> (i32, i32, i32) {
    %c0_i32 = arith.constant 0 : i32
    %c0_i32_0 = arith.constant 0 : i32
    %c0_i32_1 = arith.constant 0 : i32
    return %arg0, %c0_i32, %c0_i32_0 : i32, i32, i32
  }
  func.func @transform_2(%arg0: i32) -> (i32, i32, i32) {
    %c0_i32 = arith.constant 0 : i32
    %c0_i32_0 = arith.constant 0 : i32
    %c0_i32_1 = arith.constant 0 : i32
    return %arg0, %c0_i32, %c0_i32_0 : i32, i32, i32
  }
  func.func @transform_3(%arg0: i32) -> (i32, i32, i32) {
    %c0_i32 = arith.constant 0 : i32
    %c0_i32_0 = arith.constant 0 : i32
    %c0_i32_1 = arith.constant 0 : i32
    return %arg0, %c0_i32, %c0_i32_0 : i32, i32, i32
  }
}

module attributes {stable_mosaic.version = 11 : i64} {
  func.func @_conv_matmul_kernel(%arg0: i32, %arg1: memref<1x324x512xbf16, #tpu.memory_space<vmem>>, %arg2: memref<1x512x64xbf16, #tpu.memory_space<vmem>>, %arg3: memref<1x1x64xf32, #tpu.memory_space<vmem>>, %arg4: memref<1x324x64xbf16, #tpu.memory_space<vmem>>) attributes {dimension_semantics = [#tpu.dimension_semantics<parallel>], iteration_bounds = array<i64: 2>, scalar_prefetch = 0 : i64, scratch_operands = 0 : i64, tpu.core_type = #tpu.core_type<tc>, window_params = [{transform_indices = @transform_0, window_bounds = array<i64: 1, 324, 512>}, {transform_indices = @transform_1, window_bounds = array<i64: 1, 512, 64>}, {transform_indices = @transform_2, window_bounds = array<i64: 1, 1, 64>}, {transform_indices = @transform_3, window_bounds = array<i64: 1, 324, 64>}]} {
    %c0 = arith.constant 0 : index
    %c0_0 = arith.constant 0 : index
    %c0_1 = arith.constant 0 : index
    %0 = vector.load %arg1[%c0, %c0_0, %c0_1] : memref<1x324x512xbf16, #tpu.memory_space<vmem>>, vector<1x324x512xbf16>
    %1 = vector.shape_cast %0 : vector<1x324x512xbf16> to vector<324x512xbf16>
    %c0_2 = arith.constant 0 : index
    %c0_3 = arith.constant 0 : index
    %c0_4 = arith.constant 0 : index
    %2 = vector.load %arg2[%c0_2, %c0_3, %c0_4] : memref<1x512x64xbf16, #tpu.memory_space<vmem>>, vector<1x512x64xbf16>
    %3 = vector.shape_cast %2 : vector<1x512x64xbf16> to vector<512x64xbf16>
    %cst = arith.constant dense<0.000000e+00> : vector<324x64xf32>
    %4 = tpu.matmul %1, %3, %cst {dimension_numbers = #tpu.dot_dimension_numbers<[1], [0], [0], [1], [0, 0, 1, 1], [], []>} : vector<324x512xbf16>, vector<512x64xbf16>, vector<324x64xf32> -> vector<324x64xf32>
    %c0_5 = arith.constant 0 : index
    %c0_6 = arith.constant 0 : index
    %c0_7 = arith.constant 0 : index
    %5 = vector.load %arg3[%c0_5, %c0_6, %c0_7] : memref<1x1x64xf32, #tpu.memory_space<vmem>>, vector<1x1x64xf32>
    %6 = vector.shape_cast %5 : vector<1x1x64xf32> to vector<1x64xf32>
    %7 = vector.broadcast %6 : vector<1x64xf32> to vector<324x64xf32>
    %8 = arith.addf %4, %7 : vector<324x64xf32>
    %cst_8 = arith.constant 0.000000e+00 : f32
    %9 = vector.broadcast %cst_8 : f32 to vector<324x64xf32>
    %10 = arith.cmpf oge, %8, %9 : vector<324x64xf32>
    %cst_9 = arith.constant 0.00999999977 : f32
    %11 = vector.broadcast %cst_9 : f32 to vector<324x64xf32>
    %12 = arith.mulf %11, %8 : vector<324x64xf32>
    %13 = arith.select %10, %8, %12 : vector<324x64xi1>, vector<324x64xf32>
    %14 = arith.truncf %13 : vector<324x64xf32> to vector<324x64xbf16>
    %c0_10 = arith.constant 0 : index
    %c0_11 = arith.constant 0 : index
    %c0_12 = arith.constant 0 : index
    %15 = vector.load %arg4[%c0_10, %c0_11, %c0_12] : memref<1x324x64xbf16, #tpu.memory_space<vmem>>, vector<1x324x64xbf16>
    %16 = vector.shape_cast %15 : vector<1x324x64xbf16> to vector<324x64xbf16>
    %17 = vector.shape_cast %14 : vector<324x64xbf16> to vector<1x324x64xbf16>
    tpu.vector_store %arg4[%c0_10, %c0_11, %c0_12], %17 {strides = array<i32>} : memref<1x324x64xbf16, #tpu.memory_space<vmem>>, vector<1x324x64xbf16>,
    return
  }
  func.func @transform_0(%arg0: i32) -> (i32, i32, i32) {
    %c0_i32 = arith.constant 0 : i32
    %c0_i32_0 = arith.constant 0 : i32
    %c0_i32_1 = arith.constant 0 : i32
    return %arg0, %c0_i32, %c0_i32_0 : i32, i32, i32
  }
  func.func @transform_1(%arg0: i32) -> (i32, i32, i32) {
    %c0_i32 = arith.constant 0 : i32
    %c0_i32_0 = arith.constant 0 : i32
    %c0_i32_1 = arith.constant 0 : i32
    return %arg0, %c0_i32, %c0_i32_0 : i32, i32, i32
  }
  func.func @transform_2(%arg0: i32) -> (i32, i32, i32) {
    %c0_i32 = arith.constant 0 : i32
    %c0_i32_0 = arith.constant 0 : i32
    %c0_i32_1 = arith.constant 0 : i32
    return %arg0, %c0_i32, %c0_i32_0 : i32, i32, i32
  }
  func.func @transform_3(%arg0: i32) -> (i32, i32, i32) {
    %c0_i32 = arith.constant 0 : i32
    %c0_i32_0 = arith.constant 0 : i32
    %c0_i32_1 = arith.constant 0 : i32
    return %arg0, %c0_i32, %c0_i32_0 : i32, i32, i32
  }
}

module attributes {stable_mosaic.version = 11 : i64} {
  func.func @_conv_matmul_kernel(%arg0: i32, %arg1: memref<1x196x576xbf16, #tpu.memory_space<vmem>>, %arg2: memref<1x576x64xbf16, #tpu.memory_space<vmem>>, %arg3: memref<1x1x64xf32, #tpu.memory_space<vmem>>, %arg4: memref<1x196x64xbf16, #tpu.memory_space<vmem>>) attributes {dimension_semantics = [#tpu.dimension_semantics<parallel>], iteration_bounds = array<i64: 2>, scalar_prefetch = 0 : i64, scratch_operands = 0 : i64, tpu.core_type = #tpu.core_type<tc>, window_params = [{transform_indices = @transform_0, window_bounds = array<i64: 1, 196, 576>}, {transform_indices = @transform_1, window_bounds = array<i64: 1, 576, 64>}, {transform_indices = @transform_2, window_bounds = array<i64: 1, 1, 64>}, {transform_indices = @transform_3, window_bounds = array<i64: 1, 196, 64>}]} {
    %c0 = arith.constant 0 : index
    %c0_0 = arith.constant 0 : index
    %c0_1 = arith.constant 0 : index
    %0 = vector.load %arg1[%c0, %c0_0, %c0_1] : memref<1x196x576xbf16, #tpu.memory_space<vmem>>, vector<1x196x576xbf16>
    %1 = vector.shape_cast %0 : vector<1x196x576xbf16> to vector<196x576xbf16>
    %c0_2 = arith.constant 0 : index
    %c0_3 = arith.constant 0 : index
    %c0_4 = arith.constant 0 : index
    %2 = vector.load %arg2[%c0_2, %c0_3, %c0_4] : memref<1x576x64xbf16, #tpu.memory_space<vmem>>, vector<1x576x64xbf16>
    %3 = vector.shape_cast %2 : vector<1x576x64xbf16> to vector<576x64xbf16>
    %cst = arith.constant dense<0.000000e+00> : vector<196x64xf32>
    %4 = tpu.matmul %1, %3, %cst {dimension_numbers = #tpu.dot_dimension_numbers<[1], [0], [0], [1], [0, 0, 1, 1], [], []>} : vector<196x576xbf16>, vector<576x64xbf16>, vector<196x64xf32> -> vector<196x64xf32>
    %c0_5 = arith.constant 0 : index
    %c0_6 = arith.constant 0 : index
    %c0_7 = arith.constant 0 : index
    %5 = vector.load %arg3[%c0_5, %c0_6, %c0_7] : memref<1x1x64xf32, #tpu.memory_space<vmem>>, vector<1x1x64xf32>
    %6 = vector.shape_cast %5 : vector<1x1x64xf32> to vector<1x64xf32>
    %7 = vector.broadcast %6 : vector<1x64xf32> to vector<196x64xf32>
    %8 = arith.addf %4, %7 : vector<196x64xf32>
    %cst_8 = arith.constant 0.000000e+00 : f32
    %9 = vector.broadcast %cst_8 : f32 to vector<196x64xf32>
    %10 = arith.cmpf oge, %8, %9 : vector<196x64xf32>
    %cst_9 = arith.constant 0.00999999977 : f32
    %11 = vector.broadcast %cst_9 : f32 to vector<196x64xf32>
    %12 = arith.mulf %11, %8 : vector<196x64xf32>
    %13 = arith.select %10, %8, %12 : vector<196x64xi1>, vector<196x64xf32>
    %14 = arith.truncf %13 : vector<196x64xf32> to vector<196x64xbf16>
    %c0_10 = arith.constant 0 : index
    %c0_11 = arith.constant 0 : index
    %c0_12 = arith.constant 0 : index
    %15 = vector.load %arg4[%c0_10, %c0_11, %c0_12] : memref<1x196x64xbf16, #tpu.memory_space<vmem>>, vector<1x196x64xbf16>
    %16 = vector.shape_cast %15 : vector<1x196x64xbf16> to vector<196x64xbf16>
    %17 = vector.shape_cast %14 : vector<196x64xbf16> to vector<1x196x64xbf16>
    tpu.vector_store %arg4[%c0_10, %c0_11, %c0_12], %17 {strides = array<i32>} : memref<1x196x64xbf16, #tpu.memory_space<vmem>>, vector<1x196x64xbf16>,
    return
  }
  func.func @transform_0(%arg0: i32) -> (i32, i32, i32) {
    %c0_i32 = arith.constant 0 : i32
    %c0_i32_0 = arith.constant 0 : i32
    %c0_i32_1 = arith.constant 0 : i32
    return %arg0, %c0_i32, %c0_i32_0 : i32, i32, i32
  }
  func.func @transform_1(%arg0: i32) -> (i32, i32, i32) {
    %c0_i32 = arith.constant 0 : i32
    %c0_i32_0 = arith.constant 0 : i32
    %c0_i32_1 = arith.constant 0 : i32
    return %arg0, %c0_i32, %c0_i32_0 : i32, i32, i32
  }
  func.func @transform_2(%arg0: i32) -> (i32, i32, i32) {
    %c0_i32 = arith.constant 0 : i32
    %c0_i32_0 = arith.constant 0 : i32
    %c0_i32_1 = arith.constant 0 : i32
    return %arg0, %c0_i32, %c0_i32_0 : i32, i32, i32
  }
  func.func @transform_3(%arg0: i32) -> (i32, i32, i32) {
    %c0_i32 = arith.constant 0 : i32
    %c0_i32_0 = arith.constant 0 : i32
    %c0_i32_1 = arith.constant 0 : i32
    return %arg0, %c0_i32, %c0_i32_0 : i32, i32, i32
  }
}

module attributes {stable_mosaic.version = 11 : i64} {
  func.func @_fc_heads_kernel(%arg0: i32, %arg1: memref<1x4x3136xbf16, #tpu.memory_space<vmem>>, %arg2: memref<1x3136x512xbf16, #tpu.memory_space<vmem>>, %arg3: memref<1x1x512xf32, #tpu.memory_space<vmem>>, %arg4: memref<512x512xbf16, #tpu.memory_space<vmem>>, %arg5: memref<1x512xf32, #tpu.memory_space<vmem>>, %arg6: memref<512x512xbf16, #tpu.memory_space<vmem>>, %arg7: memref<1x512xf32, #tpu.memory_space<vmem>>, %arg8: memref<1x4x512xf32, #tpu.memory_space<vmem>>) attributes {dimension_semantics = [#tpu.dimension_semantics<parallel>], iteration_bounds = array<i64: 2>, scalar_prefetch = 0 : i64, scratch_operands = 0 : i64, tpu.core_type = #tpu.core_type<tc>, window_params = [{transform_indices = @transform_0, window_bounds = array<i64: 1, 4, 3136>}, {transform_indices = @transform_1, window_bounds = array<i64: 1, 3136, 512>}, {transform_indices = @transform_2, window_bounds = array<i64: 1, 1, 512>}, {pipeline_mode = #tpu.pipeline_mode<synchronous>, transform_indices = @transform_3, window_bounds = array<i64: 512, 512>}, {pipeline_mode = #tpu.pipeline_mode<synchronous>, transform_indices = @transform_4, window_bounds = array<i64: 1, 512>}, {pipeline_mode = #tpu.pipeline_mode<synchronous>, transform_indices = @transform_5, window_bounds = array<i64: 512, 512>}, {pipeline_mode = #tpu.pipeline_mode<synchronous>, transform_indices = @transform_6, window_bounds = array<i64: 1, 512>}, {transform_indices = @transform_7, window_bounds = array<i64: 1, 4, 512>}]} {
    %c0 = arith.constant 0 : index
    %c0_0 = arith.constant 0 : index
    %c0_1 = arith.constant 0 : index
    %0 = vector.load %arg1[%c0, %c0_0, %c0_1] : memref<1x4x3136xbf16, #tpu.memory_space<vmem>>, vector<1x4x3136xbf16>
    %1 = vector.shape_cast %0 : vector<1x4x3136xbf16> to vector<4x3136xbf16>
    %c0_2 = arith.constant 0 : index
    %c0_3 = arith.constant 0 : index
    %c0_4 = arith.constant 0 : index
    %2 = vector.load %arg2[%c0_2, %c0_3, %c0_4] : memref<1x3136x512xbf16, #tpu.memory_space<vmem>>, vector<1x3136x512xbf16>
    %3 = vector.shape_cast %2 : vector<1x3136x512xbf16> to vector<3136x512xbf16>
    %cst = arith.constant dense<0.000000e+00> : vector<4x512xf32>
    %4 = tpu.matmul %1, %3, %cst {dimension_numbers = #tpu.dot_dimension_numbers<[1], [0], [0], [1], [0, 0, 1, 1], [], []>} : vector<4x3136xbf16>, vector<3136x512xbf16>, vector<4x512xf32> -> vector<4x512xf32>
    %c0_5 = arith.constant 0 : index
    %c0_6 = arith.constant 0 : index
    %c0_7 = arith.constant 0 : index
    %5 = vector.load %arg3[%c0_5, %c0_6, %c0_7] : memref<1x1x512xf32, #tpu.memory_space<vmem>>, vector<1x1x512xf32>
    %6 = vector.shape_cast %5 : vector<1x1x512xf32> to vector<1x512xf32>
    %7 = vector.broadcast %6 : vector<1x512xf32> to vector<4x512xf32>
    %8 = arith.addf %4, %7 : vector<4x512xf32>
    %c0_i32 = arith.constant 0 : i32
    %9 = arith.cmpi eq, %arg0, %c0_i32 : i32
    %10 = arith.extui %9 : i1 to i32
    %c0_i32_8 = arith.constant 0 : i32
    %11 = arith.cmpi ne, %10, %c0_i32_8 : i32
    scf.if %11 {
      %c0_10 = arith.constant 0 : index
      %c0_11 = arith.constant 0 : index
      %c0_12 = arith.constant 0 : index
      %15 = vector.load %arg8[%c0_10, %c0_11, %c0_12] : memref<1x4x512xf32, #tpu.memory_space<vmem>>, vector<1x4x512xf32>
      %16 = vector.shape_cast %15 : vector<1x4x512xf32> to vector<4x512xf32>
      %17 = vector.shape_cast %8 : vector<4x512xf32> to vector<1x4x512xf32>
      tpu.vector_store %arg8[%c0_10, %c0_11, %c0_12], %17 {strides = array<i32>} : memref<1x4x512xf32, #tpu.memory_space<vmem>>, vector<1x4x512xf32>,
    } else {
    }
    %c1_i32 = arith.constant 1 : i32
    %12 = arith.cmpi eq, %arg0, %c1_i32 : i32
    %13 = arith.extui %12 : i1 to i32
    %c0_i32_9 = arith.constant 0 : i32
    %14 = arith.cmpi ne, %13, %c0_i32_9 : i32
    scf.if %14 {
      %cst_10 = arith.constant 0.000000e+00 : f32
      %15 = vector.broadcast %cst_10 : f32 to vector<4x512xf32>
      %16 = arith.maximumf %8, %15 : vector<4x512xf32>
      %17 = arith.truncf %16 : vector<4x512xf32> to vector<4x512xbf16>
      %c0_11 = arith.constant 0 : index
      %c0_12 = arith.constant 0 : index
      %18 = vector.load %arg4[%c0_11, %c0_12] : memref<512x512xbf16, #tpu.memory_space<vmem>>, vector<512x512xbf16>
      %cst_13 = arith.constant dense<0.000000e+00> : vector<4x512xf32>
      %19 = tpu.matmul %17, %18, %cst_13 {dimension_numbers = #tpu.dot_dimension_numbers<[1], [0], [0], [1], [0, 0, 1, 1], [], []>} : vector<4x512xbf16>, vector<512x512xbf16>, vector<4x512xf32> -> vector<4x512xf32>
      %c0_14 = arith.constant 0 : index
      %c0_15 = arith.constant 0 : index
      %20 = vector.load %arg5[%c0_14, %c0_15] : memref<1x512xf32, #tpu.memory_space<vmem>>, vector<1x512xf32>
      %21 = vector.broadcast %20 : vector<1x512xf32> to vector<4x512xf32>
      %22 = arith.addf %19, %21 : vector<4x512xf32>
      %cst_16 = arith.constant 0.000000e+00 : f32
      %23 = vector.broadcast %cst_16 : f32 to vector<4x512xf32>
      %24 = arith.maximumf %22, %23 : vector<4x512xf32>
      %25 = arith.truncf %24 : vector<4x512xf32> to vector<4x512xbf16>
      %c0_17 = arith.constant 0 : index
      %c0_18 = arith.constant 0 : index
      %26 = vector.load %arg6[%c0_17, %c0_18] : memref<512x512xbf16, #tpu.memory_space<vmem>>, vector<512x512xbf16>
      %cst_19 = arith.constant dense<0.000000e+00> : vector<4x512xf32>
      %27 = tpu.matmul %25, %26, %cst_19 {dimension_numbers = #tpu.dot_dimension_numbers<[1], [0], [0], [1], [0, 0, 1, 1], [], []>} : vector<4x512xbf16>, vector<512x512xbf16>, vector<4x512xf32> -> vector<4x512xf32>
      %c0_20 = arith.constant 0 : index
      %c0_21 = arith.constant 0 : index
      %28 = vector.load %arg7[%c0_20, %c0_21] : memref<1x512xf32, #tpu.memory_space<vmem>>, vector<1x512xf32>
      %29 = vector.broadcast %28 : vector<1x512xf32> to vector<4x512xf32>
      %30 = arith.addf %27, %29 : vector<4x512xf32>
      %c0_22 = arith.constant 0 : index
      %c0_23 = arith.constant 0 : index
      %c0_24 = arith.constant 0 : index
      %31 = vector.load %arg8[%c0_22, %c0_23, %c0_24] : memref<1x4x512xf32, #tpu.memory_space<vmem>>, vector<1x4x512xf32>
      %32 = vector.shape_cast %31 : vector<1x4x512xf32> to vector<4x512xf32>
      %33 = vector.shape_cast %30 : vector<4x512xf32> to vector<1x4x512xf32>
      tpu.vector_store %arg8[%c0_22, %c0_23, %c0_24], %33 {strides = array<i32>} : memref<1x4x512xf32, #tpu.memory_space<vmem>>, vector<1x4x512xf32>,
    } else {
    }
    return
  }
  func.func @transform_0(%arg0: i32) -> (i32, i32, i32) {
    %c0_i32 = arith.constant 0 : i32
    %c0_i32_0 = arith.constant 0 : i32
    %c0_i32_1 = arith.constant 0 : i32
    return %arg0, %c0_i32, %c0_i32_0 : i32, i32, i32
  }
  func.func @transform_1(%arg0: i32) -> (i32, i32, i32) {
    %c0_i32 = arith.constant 0 : i32
    %c0_i32_0 = arith.constant 0 : i32
    %c0_i32_1 = arith.constant 0 : i32
    return %arg0, %c0_i32, %c0_i32_0 : i32, i32, i32
  }
  func.func @transform_2(%arg0: i32) -> (i32, i32, i32) {
    %c0_i32 = arith.constant 0 : i32
    %c0_i32_0 = arith.constant 0 : i32
    %c0_i32_1 = arith.constant 0 : i32
    return %arg0, %c0_i32, %c0_i32_0 : i32, i32, i32
  }
  func.func @transform_3(%arg0: i32) -> (i32, i32) {
    %c0_i32 = arith.constant 0 : i32
    %c0_i32_0 = arith.constant 0 : i32
    %c0_i32_1 = arith.constant 0 : i32
    return %c0_i32, %c0_i32_0 : i32, i32
  }
  func.func @transform_4(%arg0: i32) -> (i32, i32) {
    %c0_i32 = arith.constant 0 : i32
    %c0_i32_0 = arith.constant 0 : i32
    %c0_i32_1 = arith.constant 0 : i32
    return %c0_i32, %c0_i32_0 : i32, i32
  }
  func.func @transform_5(%arg0: i32) -> (i32, i32) {
    %c0_i32 = arith.constant 0 : i32
    %c0_i32_0 = arith.constant 0 : i32
    %c0_i32_1 = arith.constant 0 : i32
    return %c0_i32, %c0_i32_0 : i32, i32
  }
  func.func @transform_6(%arg0: i32) -> (i32, i32) {
    %c0_i32 = arith.constant 0 : i32
    %c0_i32_0 = arith.constant 0 : i32
    %c0_i32_1 = arith.constant 0 : i32
    return %c0_i32, %c0_i32_0 : i32, i32
  }
  func.func @transform_7(%arg0: i32) -> (i32, i32, i32) {
    %c0_i32 = arith.constant 0 : i32
    %c0_i32_0 = arith.constant 0 : i32
    %c0_i32_1 = arith.constant 0 : i32
    return %arg0, %c0_i32, %c0_i32_0 : i32, i32, i32
  }
}

</mosaic_0001>

<bundles_post_ra>
// kernel: rnd_forward.4
= control target key start
LH: loop header
LB: loop body
LE: loop exit
PB: predicated region body
PF: predicated region fallthrough
CT: control target
= control target key end

     0   :  { %s4803_s12 = smov 0   ;;  %s6336_s0 = inlined_call_operand.vmem [shape: bf16[1,1600,64], index: 0, kind: input, shape index: {}]   ;;  %s6337_s1 = inlined_call_operand.vmem [shape: bf16[2,64,32], index: 1, kind: input, shape index: {}]   ;;  %s6338_s2 = inlined_call_operand.vmem [shape: f32[2,1,32], index: 2, kind: input, shape index: {}]   ;;  %s6339_s3 = inlined_call_operand.vmem [shape: bf16[2,1600,32], index: 3, kind: output, shape index: {}]  }
   0x1 LB: > { %s3724_s13 = sadd.s32 4294967295, %s4781_s12   ;;  %p3728_p0 = scmp.ge.s32.totalorder %s4781_s12, 1  ;;  %s4781_s12 = sphi %s4803_s12, %s13_s12  }
   0x2   : > { %p145_p1 = scmp.lt.s32.totalorder %s4781_s12, 3 }
   0x4   : > { %p146_p2 = pnand %p3728_p0, %p145_p1 }
   0x5   : > { %p172_p3 = scmp.lt.s32.totalorder (!%p146_p2), %s3724_s13, 1  ;;  %v4673_v0 = vld [vmem:[%s6336_s0] sm:$0xff] (!%p146_p2)   ;;  %vm925_vm0 = vcmask (!%p146_p2), 523264   ;;  %v4674_v1 = vld [vmem:[%s6336_s0 + $0x190] sm:$0xff] (!%p146_p2)   ;;  %v4675_v6 = vld [vmem:[%s6336_s0 + $0x8] sm:$0xff] (!%p146_p2)   ;;  %vm3459_vm1 = vcmask (!%p146_p2), 257024  }
   0x6   : > { %149 = sbr.rel (%p146_p2) target bundleno = 502 (0x1f6), region = 32  ;;  %4452 = vmatprep.mubr.msk.bf16.mxu0 (!%p146_p2), %vm925_vm0, %v4673_v0  ;;  %4552 = vmatprep.mubr.msk.bf16.mxu1 (!%p146_p2), %vm925_vm0, %v4674_v1  ;;  %v4676_v7 = vld [vmem:[%s6336_s0 + $0x198] sm:$0xff] (!%p146_p2)   ;;  %v4677_v8 = vld [vmem:[%s6336_s0 + $0x10] sm:$0xff] (!%p146_p2)   ;;  %v4678_v9 = vld [vmem:[%s6336_s0 + $0x1a0] sm:$0xff] (!%p146_p2)  }
   0x7   : > { %v4679_v10 = vld [vmem:[%s6336_s0 + $0x18] sm:$0xff] (!%p146_p2)   ;;  %v4680_v11 = vld [vmem:[%s6336_s0 + $0x1a8] sm:$0xff] (!%p146_p2)   ;;  %v4681_v12 = vld [vmem:[%s6336_s0 + $0x20] sm:$0xff] (!%p146_p2)  }
   0x8   : > { %v4682_v13 = vld [vmem:[%s6336_s0 + $0x1b0] sm:$0xff] (!%p146_p2)   ;;  %v4683_v14 = vld [vmem:[%s6336_s0 + $0x28] sm:$0xff] (!%p146_p2)   ;;  %v4684_v15 = vld [vmem:[%s6336_s0 + $0x1b8] sm:$0xff] (!%p146_p2)  }
   0x9   : > { %v4685_v16 = vld [vmem:[%s6336_s0 + $0x30] sm:$0xff] (!%p146_p2)   ;;  %v4686_v17 = vld [vmem:[%s6336_s0 + $0x1c0] sm:$0xff] (!%p146_p2)   ;;  %v4687_v18 = vld [vmem:[%s6336_s0 + $0x38] sm:$0xff] (!%p146_p2)  }
   0xa   : > { %v4688_v19 = vld [vmem:[%s6336_s0 + $0x1c8] sm:$0xff] (!%p146_p2)   ;;  %v4689_v20 = vld [vmem:[%s6336_s0 + $0x40] sm:$0xff] (!%p146_p2)   ;;  %v4690_v21 = vld [vmem:[%s6336_s0 + $0x1d0] sm:$0xff] (!%p146_p2)  }
   0xb   : > { %v4691_v22 = vld [vmem:[%s6336_s0 + $0x48] sm:$0xff] (!%p146_p2)   ;;  %v4692_v23 = vld [vmem:[%s6336_s0 + $0x1d8] sm:$0xff] (!%p146_p2)   ;;  %v4693_v24 = vld [vmem:[%s6336_s0 + $0x50] sm:$0xff] (!%p146_p2)  }
   0xc   : > { %v4694_v25 = vld [vmem:[%s6336_s0 + $0x1e0] sm:$0xff] (!%p146_p2)   ;;  %v4695_v26 = vld [vmem:[%s6336_s0 + $0x58] sm:$0xff] (!%p146_p2)   ;;  %v4696_v27 = vld [vmem:[%s6336_s0 + $0x1e8] sm:$0xff] (!%p146_p2)  }
   0xd   : > { %s6341_s13 = smov (!%p172_p3, %s3724_s13), 1  ;;  %v4697_v28 = vld [vmem:[%s6336_s0 + $0x60] sm:$0xff]   ;;  %v4698_v29 = vld [vmem:[%s6336_s0 + $0x1f0] sm:$0xff]   ;;  %v4699_v30 = vld [vmem:[%s6336_s0 + $0x68] sm:$0xff]  }
   0xe   : > { %s4139_s18 = sshll.u32 %s6341_s13, 5  ;;  %v4700_v31 = vld [vmem:[%s6336_s0 + $0x1f8] sm:$0xff]   ;;  %v4701_v32 = vld [vmem:[%s6336_s0 + $0x70] sm:$0xff]   ;;  %v4702_v33 = vld [vmem:[%s6336_s0 + $0x200] sm:$0xff]   ;;  %s5221_s20 = scalar_lea.vmem %s6338_s2, %s6341_s13 }
   0xf   : > { %s176_s21 = scalar_lea.vmem %s6337_s1, %s4139_s18  ;;  %v4703_v34 = vld [vmem:[%s6336_s0 + $0x78] sm:$0xff]   ;;  %v4704_v35 = vld [vmem:[%s6336_s0 + $0x208] sm:$0xff]   ;;  %v4705_v36 = vld [vmem:[%s6336_s0 + $0x80] sm:$0xff]  }
  0x10   : > { %v4669_v2 = vld [vmem:[%s176_s21] sm:$0xff]   ;;  %v4670_v3 = vld [vmem:[%s176_s21 + $0x8] sm:$0xff]   ;;  %v4671_v4 = vld [vmem:[%s176_s21 + $0x10] sm:$0xff]  }
  0x11   : > { %4444 = vmatprep.subr.bf16.mxu0 %v4669_v2  ;;  %4652 = vmatprep.subr.bf16.mxu1 %v4669_v2  ;;  %v4672_v5 = vld [vmem:[%s176_s21 + $0x18] sm:$0xff]   ;;  %v4706_v37 = vld [vmem:[%s6336_s0 + $0x210] sm:$0xff]   ;;  %v4707_v38 = vld [vmem:[%s6336_s0 + $0x88] sm:$0xff]   ;;  %s4660_s21 = smul.u32 800, %s6341_s13 }
  0x12   : > { %4445 = vmatpush3.bf16.msra.mxu0 %v4669_v2  ;;  %4656 = vmatpush3.bf16.msra.mxu1 %v4669_v2  ;;  %v4708_v39 = vld [vmem:[%s6336_s0 + $0x218] sm:$0xff]   ;;  %v4709_v40 = vld [vmem:[%s6336_s0 + $0x90] sm:$0xff]   ;;  %v4710_v41 = vld [vmem:[%s6336_s0 + $0x220] sm:$0xff]  }
  0x13   : > { %4446 = vmatprep.subr.bf16.mxu0 %v4670_v3  ;;  %4653 = vmatprep.subr.bf16.mxu1 %v4670_v3  ;;  %v4711_v42 = vld [vmem:[%s6336_s0 + $0x98] sm:$0xff]   ;;  %v4712_v43 = vld [vmem:[%s6336_s0 + $0x228] sm:$0xff]   ;;  %v4713_v44 = vld [vmem:[%s6336_s0 + $0xa0] sm:$0xff]   ;;  %s5234_s23 = scalar_lea.vmem %s6339_s3, %s4660_s21 }
  0x14   : > { %v4714_v45 = vld [vmem:[%s6336_s0 + $0x230] sm:$0xff]   ;;  %v4715_v46 = vld [vmem:[%s6336_s0 + $0xa8] sm:$0xff]   ;;  %v4716_v47 = vld [vmem:[%s6336_s0 + $0x238] sm:$0xff]  }
  0x15   : > { %v4717_v48 = vld [vmem:[%s6336_s0 + $0xb0] sm:$0xff]   ;;  %v4718_v49 = vld [vmem:[%s6336_s0 + $0x240] sm:$0xff]   ;;  %v4719_v50 = vld [vmem:[%s6336_s0 + $0xb8] sm:$0xff]  }
  0x16   : > { %4447 = vmatpush3.bf16.msra.mxu0 %v4670_v3  ;;  %4657 = vmatpush3.bf16.msra.mxu1 %v4670_v3  ;;  %v4720_v51 = vld [vmem:[%s6336_s0 + $0x248] sm:$0xff]   ;;  %v4721_v52 = vld [vmem:[%s6336_s0 + $0xc0] sm:$0xff]   ;;  %v4722_v53 = vld [vmem:[%s6336_s0 + $0x250] sm:$0xff]  }
  0x17   : > { %4448 = vmatprep.subr.bf16.mxu0 %v4671_v4  ;;  %4654 = vmatprep.subr.bf16.mxu1 %v4671_v4  ;;  %v4723_v54 = vld [vmem:[%s6336_s0 + $0xc8] sm:$0xff]   ;;  %v4724_v55 = vld [vmem:[%s6336_s0 + $0x258] sm:$0xff]   ;;  %v4725_v56 = vld [vmem:[%s6336_s0 + $0xd0] sm:$0xff]  }
  0x18   : > { %v4726_v57 = vld [vmem:[%s6336_s0 + $0x260] sm:$0xff]   ;;  %v4727_v58 = vld [vmem:[%s6336_s0 + $0xd8] sm:$0xff]   ;;  %v4728_v59 = vld [vmem:[%s6336_s0 + $0x268] sm:$0xff]  }
  0x19   : > { %v4729_v60 = vld [vmem:[%s6336_s0 + $0xe0] sm:$0xff]   ;;  %v4730_v61 = vld [vmem:[%s6336_s0 + $0x270] sm:$0xff]   ;;  %v4731_v62 = vld [vmem:[%s6336_s0 + $0xe8] sm:$0xff]  }
  0x1a   : > { %4449 = vmatpush3.bf16.msra.mxu0 %v4671_v4  ;;  %4658 = vmatpush3.bf16.msra.mxu1 %v4671_v4  ;;  %v4732_v63 = vld [vmem:[%s6336_s0 + $0x278] sm:$0xff]   ;;  %v4733_v0 = vld [vmem:[%s6336_s0 + $0xf0] sm:$0xff]   ;;  %v4734_v1 = vld [vmem:[%s6336_s0 + $0x280] sm:$0xff]  }
  0x1b   : > { %4450 = vmatprep.subr.bf16.mxu0 %v4672_v5  ;;  %4655 = vmatprep.subr.bf16.mxu1 %v4672_v5  ;;  %v4735_v2 = vld [vmem:[%s6336_s0 + $0xf8] sm:$0xff]   ;;  %v4736_v3 = vld [vmem:[%s6336_s0 + $0x288] sm:$0xff]   ;;  %v4737_v4 = vld [vmem:[%s6336_s0 + $0x100] sm:$0xff]  }
  0x1e   : > { %4451 = vmatpush3.bf16.msra.mxu0 %v4672_v5  ;;  %4659 = vmatpush3.bf16.msra.mxu1 %v4672_v5  ;;  %v4738_v5 = vld [vmem:[%s6336_s0 + $0x290] sm:$0xff]  }
  0x21   : > { %4453 = vmatmul.mubr.msk.bf16.vlgmr.msra.gmra.mrb[0].mxu0 %vm925_vm0, %v4675_v6  ;;  %4553 = vmatmul.mubr.msk.bf16.vlgmr.msra.gmra.mrb[0].mxu1 %vm925_vm0, %v4676_v7  ;;  %v4739_v6 = vld [vmem:[%s6336_s0 + $0x108] sm:$0xff]   ;;  %v4740_v7 = vld [vmem:[%s6336_s0 + $0x298] sm:$0xff]  }
  0x22   : > { %4456 = vmatprep.mubr.msk.bf16.mxu0 %vm925_vm0, %v4677_v8  ;;  %4556 = vmatprep.mubr.msk.bf16.mxu1 %vm925_vm0, %v4678_v9  ;;  %v4741_v8 = vld [vmem:[%s6336_s0 + $0x110] sm:$0xff]   ;;  %v4742_v9 = vld [vmem:[%s6336_s0 + $0x2a0] sm:$0xff]  }
  0x29   : > { %4457 = vmatmul.mubr.msk.bf16.gmra.mrb[4].mxu0 %vm925_vm0, %v4679_v10  ;;  %4557 = vmatmul.mubr.msk.bf16.gmra.mrb[4].mxu1 %vm925_vm0, %v4680_v11  ;;  %v4743_v10 = vld [vmem:[%s6336_s0 + $0x118] sm:$0xff]   ;;  %v4744_v11 = vld [vmem:[%s6336_s0 + $0x2a8] sm:$0xff]  }
  0x2a   : > { %4460 = vmatprep.mubr.msk.bf16.mxu0 %vm925_vm0, %v4681_v12  ;;  %4560 = vmatprep.mubr.msk.bf16.mxu1 %vm925_vm0, %v4682_v13  ;;  %v4745_v12 = vld [vmem:[%s6336_s0 + $0x120] sm:$0xff]   ;;  %v4746_v13 = vld [vmem:[%s6336_s0 + $0x2b0] sm:$0xff]  }
  0x31   : > { %4461 = vmatmul.mubr.msk.bf16.gmra.mrb[8].mxu0 %vm925_vm0, %v4683_v14  ;;  %4561 = vmatmul.mubr.msk.bf16.gmra.mrb[8].mxu1 %vm925_vm0, %v4684_v15  ;;  %v4747_v14 = vld [vmem:[%s6336_s0 + $0x128] sm:$0xff]   ;;  %v4748_v15 = vld [vmem:[%s6336_s0 + $0x2b8] sm:$0xff]  }
  0x32   : > { %4464 = vmatprep.mubr.msk.bf16.mxu0 %vm925_vm0, %v4685_v16  ;;  %4564 = vmatprep.mubr.msk.bf16.mxu1 %vm925_vm0, %v4686_v17  ;;  %v4749_v16 = vld [vmem:[%s6336_s0 + $0x130] sm:$0xff]   ;;  %v4750_v17 = vld [vmem:[%s6336_s0 + $0x2c0] sm:$0xff]  }
  0x39   : > { %4465 = vmatmul.mubr.msk.bf16.gmra.mrb[12].mxu0 %vm925_vm0, %v4687_v18  ;;  %4565 = vmatmul.mubr.msk.bf16.gmra.mrb[12].mxu1 %vm925_vm0, %v4688_v19  ;;  %v4751_v18 = vld [vmem:[%s6336_s0 + $0x138] sm:$0xff]   ;;  %v4752_v19 = vld [vmem:[%s6336_s0 + $0x2c8] sm:$0xff]  }
  0x3a   : > { %4468 = vmatprep.mubr.msk.bf16.mxu0 %vm925_vm0, %v4689_v20  ;;  %4568 = vmatprep.mubr.msk.bf16.mxu1 %vm925_vm0, %v4690_v21  ;;  %v4753_v20 = vld [vmem:[%s6336_s0 + $0x140] sm:$0xff]   ;;  %v4754_v21 = vld [vmem:[%s6336_s0 + $0x2d0] sm:$0xff]  }
  0x41   : > { %4469 = vmatmul.mubr.msk.bf16.gmra.mrb[16].mxu0 %vm925_vm0, %v4691_v22  ;;  %4569 = vmatmul.mubr.msk.bf16.gmra.mrb[16].mxu1 %vm925_vm0, %v4692_v23  ;;  %v4755_v22 = vld [vmem:[%s6336_s0 + $0x148] sm:$0xff]   ;;  %v4756_v23 = vld [vmem:[%s6336_s0 + $0x2d8] sm:$0xff]  }
  0x42   : > { %4472 = vmatprep.mubr.msk.bf16.mxu0 %vm925_vm0, %v4693_v24  ;;  %4572 = vmatprep.mubr.msk.bf16.mxu1 %vm925_vm0, %v4694_v25  ;;  %v4757_v24 = vld [vmem:[%s6336_s0 + $0x150] sm:$0xff]   ;;  %v4758_v25 = vld [vmem:[%s6336_s0 + $0x2e0] sm:$0xff]  }
  0x49   : > { %4473 = vmatmul.mubr.msk.bf16.gmra.mrb[20].mxu0 %vm925_vm0, %v4695_v26  ;;  %4573 = vmatmul.mubr.msk.bf16.gmra.mrb[20].mxu1 %vm925_vm0, %v4696_v27  ;;  %v4759_v26 = vld [vmem:[%s6336_s0 + $0x158] sm:$0xff]   ;;  %v4760_v27 = vld [vmem:[%s6336_s0 + $0x2e8] sm:$0xff]  }
  0x4a   : > { %4476 = vmatprep.mubr.msk.bf16.mxu0 %vm925_vm0, %v4697_v28  ;;  %4576 = vmatprep.mubr.msk.bf16.mxu1 %vm925_vm0, %v4698_v29  ;;  %v4761_v28 = vld [vmem:[%s6336_s0 + $0x160] sm:$0xff]   ;;  %v4762_v29 = vld [vmem:[%s6336_s0 + $0x2f0] sm:$0xff]  }
  0x51   : > { %4477 = vmatmul.mubr.msk.bf16.gmra.mrb[24].mxu0 %vm925_vm0, %v4699_v30  ;;  %4577 = vmatmul.mubr.msk.bf16.gmra.mrb[24].mxu1 %vm925_vm0, %v4700_v31  ;;  %v4763_v30 = vld [vmem:[%s6336_s0 + $0x168] sm:$0xff]   ;;  %v4764_v31 = vld [vmem:[%s6336_s0 + $0x2f8] sm:$0xff]  }
  0x52   : > { %4480 = vmatprep.mubr.msk.bf16.mxu0 %vm925_vm0, %v4701_v32  ;;  %4580 = vmatprep.mubr.msk.bf16.mxu1 %vm925_vm0, %v4702_v33  ;;  %v4765_v32 = vld [vmem:[%s6336_s0 + $0x170] sm:$0xff]   ;;  %v4766_v33 = vld [vmem:[%s6336_s0 + $0x300] sm:$0xff]  }
  0x59   : > { %4481 = vmatmul.mubr.msk.bf16.gmra.mrb[28].mxu0 %vm925_vm0, %v4703_v34  ;;  %4581 = vmatmul.mubr.msk.bf16.gmra.mrb[28].mxu1 %vm925_vm0, %v4704_v35  ;;  %v4767_v34 = vld [vmem:[%s6336_s0 + $0x178] sm:$0xff]   ;;  %v4768_v35 = vld [vmem:[%s6336_s0 + $0x308] sm:$0xff]  }
  0x5a   : > { %4484 = vmatprep.mubr.msk.bf16.mxu0 %vm925_vm0, %v4705_v36  ;;  %4584 = vmatprep.mubr.msk.bf16.mxu1 %vm925_vm0, %v4706_v37  ;;  %v4769_v36 = vld [vmem:[%s6336_s0 + $0x180] sm:$0xff]   ;;  %v4770_v37 = vld [vmem:[%s6336_s0 + $0x310] sm:$0xff]  }
  0x61   : > { %4485 = vmatmul.mubr.msk.bf16.gmra.mrb[32].mxu0 %vm925_vm0, %v4707_v38  ;;  %4585 = vmatmul.mubr.msk.bf16.gmra.mrb[32].mxu1 %vm925_vm0, %v4708_v39  ;;  %v4771_v38 = vld [vmem:[%s6336_s0 + $0x188] sm:$0xff]   ;;  %v4772_v39 = vld [vmem:[%s6336_s0 + $0x318] sm:$0xff]  }
  0x62   : > { %4488 = vmatprep.mubr.msk.bf16.mxu0 %vm925_vm0, %v4709_v40  ;;  %4588 = vmatprep.mubr.msk.bf16.mxu1 %vm925_vm0, %v4710_v41  ;;  %v5224_v40 = vld [vmem:[%s5221_s20] ss:$0 sm:$0xff] }
  0x69   : > { %4489 = vmatmul.mubr.msk.bf16.gmra.mrb[36].mxu0 %vm925_vm0, %v4711_v42  ;;  %4589 = vmatmul.mubr.msk.bf16.gmra.mrb[36].mxu1 %vm925_vm0, %v4712_v43 }
  0x6a   : > { %4492 = vmatprep.mubr.msk.bf16.mxu0 %vm925_vm0, %v4713_v44  ;;  %4592 = vmatprep.mubr.msk.bf16.mxu1 %vm925_vm0, %v4714_v45 }
  0x71   : > { %4493 = vmatmul.mubr.msk.bf16.gmra.mrb[40].mxu0 %vm925_vm0, %v4715_v46  ;;  %4593 = vmatmul.mubr.msk.bf16.gmra.mrb[40].mxu1 %vm925_vm0, %v4716_v47 }
  0x72   : > { %4496 = vmatprep.mubr.msk.bf16.mxu0 %vm925_vm0, %v4717_v48  ;;  %4596 = vmatprep.mubr.msk.bf16.mxu1 %vm925_vm0, %v4718_v49 }
  0x79   : > { %4497 = vmatmul.mubr.msk.bf16.gmra.mrb[44].mxu0 %vm925_vm0, %v4719_v50  ;;  %4597 = vmatmul.mubr.msk.bf16.gmra.mrb[44].mxu1 %vm925_vm0, %v4720_v51 }
  0x7a   : > { %4500 = vmatprep.mubr.msk.bf16.mxu0 %vm925_vm0, %v4721_v52  ;;  %4600 = vmatprep.mubr.msk.bf16.mxu1 %vm925_vm0, %v4722_v53 }
  0x81   : > { %4501 = vmatmul.mubr.msk.bf16.gmra.mrb[48].mxu0 %vm925_vm0, %v4723_v54  ;;  %4601 = vmatmul.mubr.msk.bf16.gmra.mrb[48].mxu1 %vm925_vm0, %v4724_v55 }
  0x82   : > { %4504 = vmatprep.mubr.msk.bf16.mxu0 %vm925_vm0, %v4725_v56  ;;  %4604 = vmatprep.mubr.msk.bf16.mxu1 %vm925_vm0, %v4726_v57 }
  0x89   : > { %4505 = vmatmul.mubr.msk.bf16.gmra.mrb[52].mxu0 %vm925_vm0, %v4727_v58  ;;  %4605 = vmatmul.mubr.msk.bf16.gmra.mrb[52].mxu1 %vm925_vm0, %v4728_v59 }
  0x8a   : > { %4508 = vmatprep.mubr.msk.bf16.mxu0 %vm925_vm0, %v4729_v60  ;;  %4608 = vmatprep.mubr.msk.bf16.mxu1 %vm925_vm0, %v4730_v61 }
  0x91   : > { %4509 = vmatmul.mubr.msk.bf16.gmra.mrb[56].mxu0 %vm925_vm0, %v4731_v62  ;;  %4609 = vmatmul.mubr.msk.bf16.gmra.mrb[56].mxu1 %vm925_vm0, %v4732_v63 }
  0x92   : > { %4512 = vmatprep.mubr.msk.bf16.mxu0 %vm925_vm0, %v4733_v0  ;;  %4612 = vmatprep.mubr.msk.bf16.mxu1 %vm925_vm0, %v4734_v1 }
  0x99   : > { %4513 = vmatmul.mubr.msk.bf16.gmra.mrb[60].mxu0 %vm925_vm0, %v4735_v2  ;;  %4613 = vmatmul.mubr.msk.bf16.gmra.mrb[60].mxu1 %vm925_vm0, %v4736_v3 }
  0x9a   : > { %4516 = vmatprep.mubr.msk.bf16.mxu0 %vm925_vm0, %v4737_v4  ;;  %4616 = vmatprep.mubr.msk.bf16.mxu1 %vm925_vm0, %v4738_v5 }
  0xa1   : > { %4517 = vmatmul.mubr.msk.bf16.gmra.mrb[64].mxu0 %vm925_vm0, %v4739_v6  ;;  %4617 = vmatmul.mubr.msk.bf16.gmra.mrb[64].mxu1 %vm925_vm0, %v4740_v7 }
  0xa2   : > { %4520 = vmatprep.mubr.msk.bf16.mxu0 %vm925_vm0, %v4741_v8  ;;  %4620 = vmatprep.mubr.msk.bf16.mxu1 %vm925_vm0, %v4742_v9 }
  0xa9   : > { %4521 = vmatmul.mubr.msk.bf16.gmra.mrb[68].mxu0 %vm925_vm0, %v4743_v10  ;;  %4621 = vmatmul.mubr.msk.bf16.gmra.mrb[68].mxu1 %vm925_vm0, %v4744_v11 }
  0xaa   : > { %4524 = vmatprep.mubr.msk.bf16.mxu0 %vm925_vm0, %v4745_v12  ;;  %4624 = vmatprep.mubr.msk.bf16.mxu1 %vm925_vm0, %v4746_v13 }
  0xb1   : > { %4525 = vmatmul.mubr.msk.bf16.gmra.mrb[72].mxu0 %vm925_vm0, %v4747_v14  ;;  %4625 = vmatmul.mubr.msk.bf16.gmra.mrb[72].mxu1 %vm925_vm0, %v4748_v15 }
  0xb2   : > { %4528 = vmatprep.mubr.msk.bf16.mxu0 %vm925_vm0, %v4749_v16  ;;  %4628 = vmatprep.mubr.msk.bf16.mxu1 %vm925_vm0, %v4750_v17 }
  0xb9   : > { %4529 = vmatmul.mubr.msk.bf16.gmra.mrb[76].mxu0 %vm925_vm0, %v4751_v18  ;;  %4629 = vmatmul.mubr.msk.bf16.gmra.mrb[76].mxu1 %vm925_vm0, %v4752_v19 }
  0xba   : > { %4532 = vmatprep.mubr.msk.bf16.mxu0 %vm925_vm0, %v4753_v20  ;;  %4632 = vmatprep.mubr.msk.bf16.mxu1 %vm925_vm0, %v4754_v21 }
  0xc1   : > { %4533 = vmatmul.mubr.msk.bf16.gmra.mrb[80].mxu0 %vm925_vm0, %v4755_v22  ;;  %4633 = vmatmul.mubr.msk.bf16.gmra.mrb[80].mxu1 %vm925_vm0, %v4756_v23 }
  0xc2   : > { %4536 = vmatprep.mubr.msk.bf16.mxu0 %vm925_vm0, %v4757_v24  ;;  %4636 = vmatprep.mubr.msk.bf16.mxu1 %vm925_vm0, %v4758_v25 }
  0xc9   : > { %4537 = vmatmul.mubr.msk.bf16.gmra.mrb[84].mxu0 %vm925_vm0, %v4759_v26  ;;  %4637 = vmatmul.mubr.msk.bf16.gmra.mrb[84].mxu1 %vm925_vm0, %v4760_v27 }
  0xca   : > { %4540 = vmatprep.mubr.msk.bf16.mxu0 %vm925_vm0, %v4761_v28  ;;  %4640 = vmatprep.mubr.msk.bf16.mxu1 %vm925_vm0, %v4762_v29 }
  0xd1   : > { %4541 = vmatmul.mubr.msk.bf16.gmra.mrb[88].mxu0 %vm925_vm0, %v4763_v30  ;;  %4641 = vmatmul.mubr.msk.bf16.gmra.mrb[88].mxu1 %vm925_vm0, %v4764_v31 }
  0xd2   : > { %4544 = vmatprep.mubr.msk.bf16.mxu0 %vm925_vm0, %v4765_v32  ;;  %4644 = vmatprep.mubr.msk.bf16.mxu1 %vm925_vm0, %v4766_v33 }
  0xd9   : > { %4545 = vmatmul.mubr.msk.bf16.gmra.mrb[92].mxu0 %vm925_vm0, %v4767_v34  ;;  %4645 = vmatmul.mubr.msk.bf16.gmra.mrb[92].mxu1 %vm925_vm0, %v4768_v35 }
  0xda   : > { %4548 = vmatprep.mubr.msk.bf16.mxu0 %vm925_vm0, %v4769_v36  ;;  %4648 = vmatprep.mubr.msk.bf16.mxu1 %vm925_vm0, %v4770_v37 }
  0xe1   : > { %4549 = vmatmul.mubr.msk.bf16.gmra.mrb[96].mxu0 %vm925_vm0, %v4771_v38  ;;  %4649 = vmatmul.mubr.msk.bf16.gmra.mrb[96].mxu1 %vm925_vm0, %v4772_v39 }
  0xf4   : > { %v4454_v41 = vpop.f32.mrb[0].mxu0  ;;  %v4554_v42 = vpop.f32.mrb[0].mxu1 }
  0xf5   : > { %v1269_v43 = vadd.f32 %v4454_v41, %v5224_v40  ;;  %v1669_v44 = vadd.f32 %v4554_v42, %v5224_v40  ;;  %v1260_v45 = vpop.f32.mrb[1].mxu0  ;;  %v1660_v46 = vpop.f32.mrb[1].mxu1 }
  0xf6   : > { %v1261_v47 = vadd.f32 %v5224_v40, %v1260_v45  ;;  %v1661_v48 = vadd.f32 %v5224_v40, %v1660_v46  ;;  %v4455_v49 = vpop.f32.mrb[2].mxu0  ;;  %v4555_v50 = vpop.f32.mrb[2].mxu1 }
  0xf7   : > { %vm2061_vm2 = vcmp.ge.f32.partialorder %v1269_v43, 0.0  ;;  %v2261_v51 = vmul.f32 0.01, %v1269_v43  ;;  %vm2161_vm3 = vcmp.ge.f32.partialorder %v1669_v44, 0.0  ;;  %v2361_v52 = vmul.f32 0.01, %v1669_v44 }
  0xf8   : > { %vm2059_vm4 = vcmp.ge.f32.partialorder %v1261_v47, 0.0  ;;  %v2259_v53 = vmul.f32 0.01, %v1261_v47  ;;  %vm2159_vm5 = vcmp.ge.f32.partialorder %v1661_v48, 0.0  ;;  %v2359_v54 = vmul.f32 0.01, %v1661_v48 }
  0xf9   : > { %v2461_v55 = vsel %vm2061_vm2, %v1269_v43, %v2261_v51  ;;  %v2561_v56 = vsel %vm2161_vm3, %v1669_v44, %v2361_v52  ;;  %v1272_v57 = vadd.f32 %v4455_v49, %v5224_v40  ;;  %v1672_v58 = vadd.f32 %v4555_v50, %v5224_v40  ;;  %v1263_v59 = vpop.f32.mrb[3].mxu0  ;;  %v1663_v60 = vpop.f32.mrb[3].mxu1 }
  0xfa   : > { %v4142_v61 = vpack.c.bf16 %v2461_v55, %v2461_v55  ;;  %v4242_v62 = vpack.c.bf16 %v2561_v56, %v2561_v56  ;;  %v2459_v63 = vsel %vm2059_vm4, %v1261_v47, %v2259_v53  ;;  %v2559_v0 = vsel %vm2159_vm5, %v1661_v48, %v2359_v54 }
  0xfb   : > { %v4140_v1 = vpack.c.bf16 %v2459_v63, %v2459_v63  ;;  %v4240_v2 = vpack.c.bf16 %v2559_v0, %v2559_v0  ;;  %vm2062_vm6 = vcmp.ge.f32.partialorder %v1272_v57, 0.0  ;;  %v2262_v3 = vmul.f32 0.01, %v1272_v57 }
  0xfc   : > { %3462 = vst.msk [vmem:[%s5234_s23 + $0x8] sm:$0xf] %vm3459_vm1, %v4142_v61  ;;  %3562 = vst.msk [vmem:[%s5234_s23 + $0x198] sm:$0xf] %vm3459_vm1, %v4242_v62  ;;  %vm2162_vm7 = vcmp.ge.f32.partialorder %v1672_v58, 0.0  ;;  %v1264_v5 = vadd.f32 %v5224_v40, %v1263_v59  ;;  %v1664_v6 = vadd.f32 %v5224_v40, %v1663_v60  ;;  %v4458_v7 = vpop.f32.mrb[4].mxu0 }
  0xfd   : > { %v2362_v4 = vmul.f32 0.01, %v1672_v58  ;;  %v4558_v8 = vpop.f32.mrb[4].mxu1  ;;  %3460 = vst.msk [vmem:[%s5234_s23] sm:$0xf] %vm3459_vm1, %v4140_v1  ;;  %v2462_v9 = vsel %vm2062_vm6, %v1272_v57, %v2262_v3  ;;  %v1285_v10 = vadd.f32 %v4458_v7, %v5224_v40  ;;  %v1276_v12 = vpop.f32.mrb[5].mxu0 }
  0xfe   : > { %3560 = vst.msk [vmem:[%s5234_s23 + $0x190] sm:$0xf] %vm3459_vm1, %v4240_v2  ;;  %v1685_v11 = vadd.f32 %v4558_v8, %v5224_v40  ;;  %v1676_v13 = vpop.f32.mrb[5].mxu1  ;;  %v4143_v14 = vpack.c.bf16 %v2462_v9, %v2462_v9  ;;  %vm2060_vm8 = vcmp.ge.f32.partialorder %v1264_v5, 0.0  ;;  %v2260_v16 = vmul.f32 0.01, %v1264_v5 }
  0xff   : > { %v2562_v15 = vsel %vm2162_vm7, %v1672_v58, %v2362_v4  ;;  %v4459_v17 = vpop.f32.mrb[6].mxu0  ;;  %v4559_v18 = vpop.f32.mrb[6].mxu1  ;;  %vm2160_vm9 = vcmp.ge.f32.partialorder %v1664_v6, 0.0  ;;  %v2360_v20 = vmul.f32 0.01, %v1664_v6  ;;  %vm2065_vm10 = vcmp.ge.f32.partialorder %v1285_v10, 0.0 }
 0x100   : > { %v4243_v19 = vpack.c.bf16 %v2562_v15, %v2562_v15  ;;  %v1279_v21 = vpop.f32.mrb[7].mxu0  ;;  %v1679_v22 = vpop.f32.mrb[7].mxu1  ;;  %3463 = vst.msk [vmem:[%s5234_s23 + $0xc] sm:$0xf] %vm3459_vm1, %v4143_v14  ;;  %v2460_v23 = vsel %vm2060_vm8, %v1264_v5, %v2260_v16  ;;  %v2265_v24 = vmul.f32 0.01, %v1285_v10  ;;  %v1277_v28 = vadd.f32 %v5224_v40, %v1276_v12 }
 0x101   : > { %vm2165_vm11 = vcmp.ge.f32.partialorder %v1685_v11, 0.0  ;;  %v2365_v25 = vmul.f32 0.01, %v1685_v11  ;;  %v4141_v26 = vpack.c.bf16 %v2460_v23, %v2460_v23  ;;  %v2560_v27 = vsel %vm2160_vm9, %v1664_v6, %v2360_v20 }
 0x102   : > { %3563 = vst.msk [vmem:[%s5234_s23 + $0x19c] sm:$0xf] %vm3459_vm1, %v4243_v19  ;;  %v1677_v29 = vadd.f32 %v5224_v40, %v1676_v13  ;;  %v4241_v30 = vpack.c.bf16 %v2560_v27, %v2560_v27  ;;  %v2465_v31 = vsel %vm2065_vm10, %v1285_v10, %v2265_v24  ;;  %v1288_v33 = vadd.f32 %v4459_v17, %v5224_v40 }
 0x103   : > { %v2565_v32 = vsel %vm2165_vm11, %v1685_v11, %v2365_v25  ;;  %3461 = vst.msk [vmem:[%s5234_s23 + $0x4] sm:$0xf] %vm3459_vm1, %v4141_v26  ;;  %v4146_v34 = vpack.c.bf16 %v2465_v31, %v2465_v31  ;;  %vm2063_vm12 = vcmp.ge.f32.partialorder %v1277_v28, 0.0  ;;  %v2263_v36 = vmul.f32 0.01, %v1277_v28 }
 0x104   : > { %v4246_v35 = vpack.c.bf16 %v2565_v32, %v2565_v32  ;;  %3561 = vst.msk [vmem:[%s5234_s23 + $0x194] sm:$0xf] %vm3459_vm1, %v4241_v30  ;;  %vm2163_vm13 = vcmp.ge.f32.partialorder %v1677_v29, 0.0  ;;  %v2363_v37 = vmul.f32 0.01, %v1677_v29  ;;  %vm2066_vm14 = vcmp.ge.f32.partialorder %v1288_v33, 0.0 }
 0x105   : > { %v2266_v38 = vmul.f32 0.01, %v1288_v33  ;;  %3466 = vst.msk [vmem:[%s5234_s23 + $0x18] sm:$0xf] %vm3459_vm1, %v4146_v34  ;;  %v2463_v39 = vsel %vm2063_vm12, %v1277_v28, %v2263_v36  ;;  %v1688_v41 = vadd.f32 %v4559_v18, %v5224_v40  ;;  %v1280_v42 = vadd.f32 %v5224_v40, %v1279_v21  ;;  %v4462_v44 = vpop.f32.mrb[8].mxu0  ;;  %v4562_v45 = vpop.f32.mrb[8].mxu1 }
 0x106   : > { %3566 = vst.msk [vmem:[%s5234_s23 + $0x1a8] sm:$0xf] %vm3459_vm1, %v4246_v35  ;;  %v1680_v43 = vadd.f32 %v5224_v40, %v1679_v22  ;;  %v4144_v46 = vpack.c.bf16 %v2463_v39, %v2463_v39  ;;  %v2563_v47 = vsel %vm2163_vm13, %v1677_v29, %v2363_v37  ;;  %v1301_v49 = vadd.f32 %v4462_v44, %v5224_v40  ;;  %v1292_v50 = vpop.f32.mrb[9].mxu0  ;;  %v1692_v51 = vpop.f32.mrb[9].mxu1 }
 0x107   : > { %v2466_v48 = vsel %vm2066_vm14, %v1288_v33, %v2266_v38  ;;  %v4244_v52 = vpack.c.bf16 %v2563_v47, %v2563_v47  ;;  %vm2166_vm15 = vcmp.ge.f32.partialorder %v1688_v41, 0.0  ;;  %v2366_v54 = vmul.f32 0.01, %v1688_v41  ;;  %v4463_v55 = vpop.f32.mrb[10].mxu0  ;;  %v4563_v56 = vpop.f32.mrb[10].mxu1 }
 0x108   : > { %v4147_v53 = vpack.c.bf16 %v2466_v48, %v2466_v48  ;;  %3464 = vst.msk [vmem:[%s5234_s23 + $0x10] sm:$0xf] %vm3459_vm1, %v4144_v46  ;;  %vm2064_vm0 = vcmp.ge.f32.partialorder %v1280_v42, 0.0  ;;  %v2264_v57 = vmul.f32 0.01, %v1280_v42  ;;  %vm2164_vm2 = vcmp.ge.f32.partialorder %v1680_v43, 0.0 }
 0x109   : > { %v2364_v58 = vmul.f32 0.01, %v1680_v43  ;;  %3564 = vst.msk [vmem:[%s5234_s23 + $0x1a0] sm:$0xf] %vm3459_vm1, %v4244_v52  ;;  %v2566_v59 = vsel %vm2166_vm15, %v1688_v41, %v2366_v54  ;;  %vm2069_vm3 = vcmp.ge.f32.partialorder %v1301_v49, 0.0  ;;  %v1701_v61 = vadd.f32 %v4562_v45, %v5224_v40  ;;  %v1295_v62 = vpop.f32.mrb[11].mxu0 }
 0x10a   : > { %3467 = vst.msk [vmem:[%s5234_s23 + $0x1c] sm:$0xf] %vm3459_vm1, %v4147_v53  ;;  %v2269_v60 = vmul.f32 0.01, %v1301_v49  ;;  %v1695_v63 = vpop.f32.mrb[11].mxu1  ;;  %v4247_v0 = vpack.c.bf16 %v2566_v59, %v2566_v59  ;;  %v2464_v1 = vsel %vm2064_vm0, %v1280_v42, %v2264_v57  ;;  %v1293_v3 = vadd.f32 %v5224_v40, %v1292_v50 }
 0x10b   : > { %v2564_v2 = vsel %vm2164_vm2, %v1680_v43, %v2364_v58  ;;  %v4145_v4 = vpack.c.bf16 %v2464_v1, %v2464_v1  ;;  %vm2169_vm4 = vcmp.ge.f32.partialorder %v1701_v61, 0.0  ;;  %v2369_v8 = vmul.f32 0.01, %v1701_v61 }
 0x10c   : > { %v4245_v5 = vpack.c.bf16 %v2564_v2, %v2564_v2  ;;  %v2469_v6 = vsel %vm2069_vm3, %v1301_v49, %v2269_v60  ;;  %3567 = vst.msk [vmem:[%s5234_s23 + $0x1ac] sm:$0xf] %vm3459_vm1, %v4247_v0  ;;  %vm2067_vm5 = vcmp.ge.f32.partialorder %v1293_v3, 0.0  ;;  %v2267_v9 = vmul.f32 0.01, %v1293_v3  ;;  %v4466_v10 = vpop.f32.mrb[12].mxu0 }
 0x10d   : > { %v4150_v7 = vpack.c.bf16 %v2469_v6, %v2469_v6  ;;  %3465 = vst.msk [vmem:[%s5234_s23 + $0x14] sm:$0xf] %vm3459_vm1, %v4145_v4  ;;  %v1693_v11 = vadd.f32 %v5224_v40, %v1692_v51  ;;  %v1304_v12 = vadd.f32 %v4463_v55, %v5224_v40  ;;  %v1704_v13 = vadd.f32 %v4563_v56, %v5224_v40  ;;  %v4566_v15 = vpop.f32.mrb[12].mxu1  ;;  %v1308_v16 = vpop.f32.mrb[13].mxu0 }
 0x10e   : > { %3565 = vst.msk [vmem:[%s5234_s23 + $0x1a4] sm:$0xf] %vm3459_vm1, %v4245_v5  ;;  %v1296_v14 = vadd.f32 %v5224_v40, %v1295_v62  ;;  %v2569_v17 = vsel %vm2169_vm4, %v1701_v61, %v2369_v8  ;;  %v2467_v18 = vsel %vm2067_vm5, %v1293_v3, %v2267_v9  ;;  %v1696_v19 = vadd.f32 %v5224_v40, %v1695_v63  ;;  %v1708_v21 = vpop.f32.mrb[13].mxu1  ;;  %v4467_v22 = vpop.f32.mrb[14].mxu0 }
 0x10f   : > { %3470 = vst.msk [vmem:[%s5234_s23 + $0x28] sm:$0xf] %vm3459_vm1, %v4150_v7  ;;  %v1317_v20 = vadd.f32 %v4466_v10, %v5224_v40  ;;  %v4250_v23 = vpack.c.bf16 %v2569_v17, %v2569_v17  ;;  %v4148_v24 = vpack.c.bf16 %v2467_v18, %v2467_v18  ;;  %vm2167_vm6 = vcmp.ge.f32.partialorder %v1693_v11, 0.0  ;;  %v4567_v26 = vpop.f32.mrb[14].mxu1  ;;  %v1311_v27 = vpop.f32.mrb[15].mxu0 }
 0x110   : > { %v2367_v25 = vmul.f32 0.01, %v1693_v11  ;;  %vm2070_vm7 = vcmp.ge.f32.partialorder %v1304_v12, 0.0  ;;  %v2270_v28 = vmul.f32 0.01, %v1304_v12  ;;  %vm2170_vm8 = vcmp.ge.f32.partialorder %v1704_v13, 0.0 }
 0x111   : > { %v2370_v29 = vmul.f32 0.01, %v1704_v13  ;;  %3570 = vst.msk [vmem:[%s5234_s23 + $0x1b8] sm:$0xf] %vm3459_vm1, %v4250_v23  ;;  %3468 = vst.msk [vmem:[%s5234_s23 + $0x20] sm:$0xf] %vm3459_vm1, %v4148_v24  ;;  %v1717_v44 = vadd.f32 %v4566_v15, %v5224_v40  ;;  %v1309_v48 = vadd.f32 %v5224_v40, %v1308_v16  ;;  %v1709_v49 = vadd.f32 %v5224_v40, %v1708_v21 }
 0x112   : > { %v2567_v30 = vsel %vm2167_vm6, %v1693_v11, %v2367_v25  ;;  %vm2068_vm9 = vcmp.ge.f32.partialorder %v1296_v14, 0.0  ;;  %v2268_v31 = vmul.f32 0.01, %v1296_v14  ;;  %vm2168_vm10 = vcmp.ge.f32.partialorder %v1696_v19, 0.0  ;;  %v1711_v32 = vpop.f32.mrb[15].mxu1 }
 0x113   : > { %v4248_v33 = vpack.c.bf16 %v2567_v30, %v2567_v30  ;;  %v2470_v34 = vsel %vm2070_vm7, %v1304_v12, %v2270_v28  ;;  %v2570_v35 = vsel %vm2170_vm8, %v1704_v13, %v2370_v29  ;;  %v2368_v36 = vmul.f32 0.01, %v1696_v19 }
 0x114   : > { %v4151_v37 = vpack.c.bf16 %v2470_v34, %v2470_v34  ;;  %v4251_v38 = vpack.c.bf16 %v2570_v35, %v2570_v35  ;;  %v2468_v39 = vsel %vm2068_vm9, %v1296_v14, %v2268_v31  ;;  %vm2073_vm11 = vcmp.ge.f32.partialorder %v1317_v20, 0.0  ;;  %v4470_v45 = vpop.f32.mrb[16].mxu0  ;;  %v4570_v46 = vpop.f32.mrb[16].mxu1 }
 0x115   : > { %3568 = vst.msk [vmem:[%s5234_s23 + $0x1b0] sm:$0xf] %vm3459_vm1, %v4248_v33  ;;  %v4149_v41 = vpack.c.bf16 %v2468_v39, %v2468_v39  ;;  %v2568_v42 = vsel %vm2168_vm10, %v1696_v19, %v2368_v36  ;;  %v2273_v43 = vmul.f32 0.01, %v1317_v20  ;;  %v1320_v50 = vadd.f32 %v4467_v22, %v5224_v40  ;;  %v1324_v51 = vpop.f32.mrb[17].mxu0  ;;  %v1724_v52 = vpop.f32.mrb[17].mxu1 }
 0x116   : > { %3471 = vst.msk [vmem:[%s5234_s23 + $0x2c] sm:$0xf] %vm3459_vm1, %v4151_v37  ;;  %3571 = vst.msk [vmem:[%s5234_s23 + $0x1bc] sm:$0xf] %vm3459_vm1, %v4251_v38  ;;  %v4249_v47 = vpack.c.bf16 %v2568_v42, %v2568_v42  ;;  %vm2173_vm12 = vcmp.ge.f32.partialorder %v1717_v44, 0.0  ;;  %v1720_v55 = vadd.f32 %v4567_v26, %v5224_v40  ;;  %v5310_v56 = vpop.f32.mrb[18].mxu0  ;;  %v1312_v7 = vadd.f32 %v5224_v40, %v1311_v27 }
 0x117   : > { %3469 = vst.msk [vmem:[%s5234_s23 + $0x24] sm:$0xf] %vm3459_vm1, %v4149_v41  ;;  %v2473_v53 = vsel %vm2073_vm11, %v1317_v20, %v2273_v43  ;;  %v2373_v54 = vmul.f32 0.01, %v1717_v44  ;;  %v5312_v57 = vpop.f32.mrb[18].mxu1  ;;  %vm2071_vm13 = vcmp.ge.f32.partialorder %v1309_v48, 0.0  ;;  %v1712_v11 = vadd.f32 %v5224_v40, %v1711_v32 }
 0x118   : > { %3569 = vst.msk [vmem:[%s5234_s23 + $0x1b4] sm:$0xf] %vm3459_vm1, %v4249_v47  ;;  %v4154_v58 = vpack.c.bf16 %v2473_v53, %v2473_v53  ;;  %v2271_v59 = vmul.f32 0.01, %v1309_v48  ;;  %vm2171_vm14 = vcmp.ge.f32.partialorder %v1709_v49, 0.0  ;;  %v5316_v60 = vpop.f32.mrb[19].mxu0  ;;  %v1333_v14 = vadd.f32 %v4470_v45, %v5224_v40 }
 0x119   : > { %v5318_v61 = vpop.f32.mrb[19].mxu1  ;;  %v2573_v62 = vsel %vm2173_vm12, %v1717_v44, %v2373_v54  ;;  %v2371_v63 = vmul.f32 0.01, %v1709_v49  ;;  %vm2074_vm15 = vcmp.ge.f32.partialorder %v1320_v50, 0.0  ;;  %v2274_v0 = vmul.f32 0.01, %v1320_v50 }
 0x11a   : > { %3474 = vst.msk [vmem:[%s5234_s23 + $0x38] sm:$0xf] %vm3459_vm1, %v4154_v58  ;;  %v4254_v1 = vpack.c.bf16 %v2573_v62, %v2573_v62  ;;  %v2471_v2 = vsel %vm2071_vm13, %v1309_v48, %v2271_v59  ;;  %vm2174_vm0 = vcmp.ge.f32.partialorder %v1720_v55, 0.0  ;;  %v2374_v3 = vmul.f32 0.01, %v1720_v55 }
 0x11b   : > { %v4152_v4 = vpack.c.bf16 %v2471_v2, %v2471_v2  ;;  %v2571_v5 = vsel %vm2171_vm14, %v1709_v49, %v2371_v63  ;;  %v2474_v6 = vsel %vm2074_vm15, %v1320_v50, %v2274_v0  ;;  %vm2072_vm2 = vcmp.ge.f32.partialorder %v1312_v7, 0.0 }
 0x11c   : > { %3574 = vst.msk [vmem:[%s5234_s23 + $0x1c8] sm:$0xf] %vm3459_vm1, %v4254_v1  ;;  %v4252_v8 = vpack.c.bf16 %v2571_v5, %v2571_v5  ;;  %v4155_v9 = vpack.c.bf16 %v2474_v6, %v2474_v6  ;;  %v2574_v10 = vsel %vm2174_vm0, %v1720_v55, %v2374_v3  ;;  %v2272_v13 = vmul.f32 0.01, %v1312_v7  ;;  %v4474_v15 = vpop.f32.mrb[20].mxu0  ;;  %v4574_v16 = vpop.f32.mrb[20].mxu1 }
 0x11d   : > { %3472 = vst.msk [vmem:[%s5234_s23 + $0x30] sm:$0xf] %vm3459_vm1, %v4152_v4  ;;  %v4255_v12 = vpack.c.bf16 %v2574_v10, %v2574_v10  ;;  %vm2172_vm3 = vcmp.ge.f32.partialorder %v1712_v11, 0.0  ;;  %v2372_v17 = vmul.f32 0.01, %v1712_v11  ;;  %v1733_v18 = vadd.f32 %v4570_v46, %v5224_v40  ;;  %v1340_v20 = vpop.f32.mrb[21].mxu0 }
 0x11e   : > { %3572 = vst.msk [vmem:[%s5234_s23 + $0x1c0] sm:$0xf] %vm3459_vm1, %v4252_v8  ;;  %3475 = vst.msk [vmem:[%s5234_s23 + $0x3c] sm:$0xf] %vm3459_vm1, %v4155_v9  ;;  %v1325_v19 = vadd.f32 %v5224_v40, %v1324_v51  ;;  %v5335_v21 = vpop.f32.mrb[21].mxu1  ;;  %v2472_v22 = vsel %vm2072_vm2, %v1312_v7, %v2272_v13  ;;  %vm2077_vm4 = vcmp.ge.f32.partialorder %v1333_v14, 0.0  ;;  %v1725_v24 = vadd.f32 %v5224_v40, %v1724_v52 }
 0x11f   : > { %3575 = vst.msk [vmem:[%s5234_s23 + $0x1cc] sm:$0xf] %vm3459_vm1, %v4255_v12  ;;  %v2277_v23 = vmul.f32 0.01, %v1333_v14  ;;  %v5340_v25 = vpop.f32.mrb[22].mxu0  ;;  %v5342_v26 = vpop.f32.mrb[22].mxu1  ;;  %v4153_v27 = vpack.c.bf16 %v2472_v22, %v2472_v22  ;;  %v2572_v28 = vsel %vm2172_vm3, %v1712_v11, %v2372_v17  ;;  %v1336_v41 = vadd.f32 %v5310_v56, %v5224_v40 }
 0x120   : > { %vm2177_vm5 = vcmp.ge.f32.partialorder %v1733_v18, 0.0  ;;  %v2377_v29 = vmul.f32 0.01, %v1733_v18  ;;  %v5344_v30 = vpop.f32.mrb[23].mxu0  ;;  %v5346_v31 = vpop.f32.mrb[23].mxu1  ;;  %v4253_v32 = vpack.c.bf16 %v2572_v28, %v2572_v28  ;;  %vm2075_vm6 = vcmp.ge.f32.partialorder %v1325_v19, 0.0 }
 0x121   : > { %v2477_v33 = vsel %vm2077_vm4, %v1333_v14, %v2277_v23  ;;  %v2275_v34 = vmul.f32 0.01, %v1325_v19  ;;  %3473 = vst.msk [vmem:[%s5234_s23 + $0x34] sm:$0xf] %vm3459_vm1, %v4153_v27  ;;  %vm2175_vm7 = vcmp.ge.f32.partialorder %v1725_v24, 0.0  ;;  %v1736_v42 = vadd.f32 %v5312_v57, %v5224_v40 }
 0x122   : > { %v4158_v35 = vpack.c.bf16 %v2477_v33, %v2477_v33  ;;  %v2577_v36 = vsel %vm2177_vm5, %v1733_v18, %v2377_v29  ;;  %v2375_v37 = vmul.f32 0.01, %v1725_v24  ;;  %3573 = vst.msk [vmem:[%s5234_s23 + $0x1c4] sm:$0xf] %vm3459_vm1, %v4253_v32  ;;  %v1328_v45 = vadd.f32 %v5224_v40, %v5316_v60 }
 0x123   : > { %v4258_v38 = vpack.c.bf16 %v2577_v36, %v2577_v36  ;;  %v2475_v39 = vsel %vm2075_vm6, %v1325_v19, %v2275_v34  ;;  %v1728_v46 = vadd.f32 %v5224_v40, %v5318_v61  ;;  %vm2078_vm8 = vcmp.ge.f32.partialorder %v1336_v41, 0.0 }
 0x124   : > { %3478 = vst.msk [vmem:[%s5234_s23 + $0x48] sm:$0xf] %vm3459_vm1, %v4158_v35  ;;  %v4156_v43 = vpack.c.bf16 %v2475_v39, %v2475_v39  ;;  %v2575_v44 = vsel %vm2175_vm7, %v1725_v24, %v2375_v37  ;;  %v2278_v48 = vmul.f32 0.01, %v1336_v41  ;;  %vm2178_vm9 = vcmp.ge.f32.partialorder %v1736_v42, 0.0  ;;  %v5364_v49 = vpop.f32.mrb[24].mxu0 }
 0x125   : > { %3578 = vst.msk [vmem:[%s5234_s23 + $0x1d8] sm:$0xf] %vm3459_vm1, %v4258_v38  ;;  %v4256_v47 = vpack.c.bf16 %v2575_v44, %v2575_v44  ;;  %v5366_v50 = vpop.f32.mrb[24].mxu1  ;;  %v2378_v51 = vmul.f32 0.01, %v1736_v42  ;;  %vm2076_vm10 = vcmp.ge.f32.partialorder %v1328_v45, 0.0  ;;  %v1349_v55 = vadd.f32 %v4474_v15, %v5224_v40 }
 0x126   : > { %3476 = vst.msk [vmem:[%s5234_s23 + $0x40] sm:$0xf] %vm3459_vm1, %v4156_v43  ;;  %v2276_v52 = vmul.f32 0.01, %v1328_v45  ;;  %vm2176_vm11 = vcmp.ge.f32.partialorder %v1728_v46, 0.0  ;;  %v2478_v53 = vsel %vm2078_vm8, %v1336_v41, %v2278_v48  ;;  %v1749_v56 = vadd.f32 %v4574_v16, %v5224_v40  ;;  %v5374_v57 = vpop.f32.mrb[25].mxu0 }
 0x127   : > { %3576 = vst.msk [vmem:[%s5234_s23 + $0x1d0] sm:$0xf] %vm3459_vm1, %v4256_v47  ;;  %v2376_v54 = vmul.f32 0.01, %v1728_v46  ;;  %v5376_v58 = vpop.f32.mrb[25].mxu1  ;;  %v4159_v59 = vpack.c.bf16 %v2478_v53, %v2478_v53  ;;  %v2578_v60 = vsel %vm2178_vm9, %v1736_v42, %v2378_v51  ;;  %v1341_v62 = vadd.f32 %v5224_v40, %v1340_v20  ;;  %v5380_v63 = vpop.f32.mrb[26].mxu0 }
 0x128   : > { %v2476_v61 = vsel %vm2076_vm10, %v1328_v45, %v2276_v52  ;;  %v5382_v0 = vpop.f32.mrb[26].mxu1  ;;  %v4259_v1 = vpack.c.bf16 %v2578_v60, %v2578_v60  ;;  %vm2081_vm12 = vcmp.ge.f32.partialorder %v1349_v55, 0.0  ;;  %v5385_v4 = vpop.f32.mrb[27].mxu0  ;;  %v2281_v7 = vmul.f32 0.01, %v1349_v55 }
 0x129   : > { %v4157_v2 = vpack.c.bf16 %v2476_v61, %v2476_v61  ;;  %v2576_v3 = vsel %vm2176_vm11, %v1728_v46, %v2376_v54  ;;  %v5387_v5 = vpop.f32.mrb[27].mxu1  ;;  %3479 = vst.msk [vmem:[%s5234_s23 + $0x4c] sm:$0xf] %vm3459_vm1, %v4159_v59  ;;  %vm2181_vm13 = vcmp.ge.f32.partialorder %v1749_v56, 0.0  ;;  %v2381_v8 = vmul.f32 0.01, %v1749_v56 }
 0x12a   : > { %v4257_v6 = vpack.c.bf16 %v2576_v3, %v2576_v3  ;;  %3579 = vst.msk [vmem:[%s5234_s23 + $0x1dc] sm:$0xf] %vm3459_vm1, %v4259_v1  ;;  %vm2079_vm14 = vcmp.ge.f32.partialorder %v1341_v62, 0.0  ;;  %v2279_v9 = vmul.f32 0.01, %v1341_v62  ;;  %v1741_v10 = vadd.f32 %v5224_v40, %v5335_v21 }
 0x12b   : > { %3477 = vst.msk [vmem:[%s5234_s23 + $0x44] sm:$0xf] %vm3459_vm1, %v4157_v2  ;;  %v1352_v11 = vadd.f32 %v5340_v25, %v5224_v40  ;;  %v2481_v12 = vsel %vm2081_vm12, %v1349_v55, %v2281_v7  ;;  %v2581_v13 = vsel %vm2181_vm13, %v1749_v56, %v2381_v8  ;;  %v1752_v14 = vadd.f32 %v5342_v26, %v5224_v40 }
 0x12c   : > { %3577 = vst.msk [vmem:[%s5234_s23 + $0x1d4] sm:$0xf] %vm3459_vm1, %v4257_v6  ;;  %v1344_v15 = vadd.f32 %v5224_v40, %v5344_v30  ;;  %v4162_v16 = vpack.c.bf16 %v2481_v12, %v2481_v12  ;;  %v4262_v17 = vpack.c.bf16 %v2581_v13, %v2581_v13  ;;  %v2479_v18 = vsel %vm2079_vm14, %v1341_v62, %v2279_v9  ;;  %v5405_v19 = vpop.f32.mrb[28].mxu0  ;;  %v5407_v20 = vpop.f32.mrb[28].mxu1 }
 0x12d   : > { %vm2179_vm15 = vcmp.ge.f32.partialorder %v1741_v10, 0.0  ;;  %v4160_v21 = vpack.c.bf16 %v2479_v18, %v2479_v18  ;;  %v2379_v22 = vmul.f32 0.01, %v1741_v10  ;;  %vm2082_vm0 = vcmp.ge.f32.partialorder %v1352_v11, 0.0  ;;  %v5409_v24 = vpop.f32.mrb[29].mxu0  ;;  %v5421_v32 = vpop.f32.mrb[29].mxu1 }
 0x12e   : > { %v2282_v23 = vmul.f32 0.01, %v1352_v11  ;;  %3482 = vst.msk [vmem:[%s5234_s23 + $0x58] sm:$0xf] %vm3459_vm1, %v4162_v16  ;;  %3582 = vst.msk [vmem:[%s5234_s23 + $0x1e8] sm:$0xf] %vm3459_vm1, %v4262_v17  ;;  %v1744_v29 = vadd.f32 %v5224_v40, %v5346_v31  ;;  %v1365_v30 = vadd.f32 %v5364_v49, %v5224_v40  ;;  %v1765_v45 = vadd.f32 %v5366_v50, %v5224_v40 }
 0x12f   : > { %vm2182_vm2 = vcmp.ge.f32.partialorder %v1752_v14, 0.0  ;;  %v2382_v25 = vmul.f32 0.01, %v1752_v14  ;;  %vm2080_vm3 = vcmp.ge.f32.partialorder %v1344_v15, 0.0  ;;  %v2280_v26 = vmul.f32 0.01, %v1344_v15 }
 0x130   : > { %3480 = vst.msk [vmem:[%s5234_s23 + $0x50] sm:$0xf] %vm3459_vm1, %v4160_v21  ;;  %v2579_v27 = vsel %vm2179_vm15, %v1741_v10, %v2379_v22  ;;  %v2482_v28 = vsel %vm2082_vm0, %v1352_v11, %v2282_v23  ;;  %v5423_v33 = vpop.f32.mrb[30].mxu0  ;;  %v5425_v38 = vpop.f32.mrb[30].mxu1  ;;  %vm2180_vm4 = vcmp.ge.f32.partialorder %v1744_v29, 0.0  ;;  %vm2085_vm5 = vcmp.ge.f32.partialorder %v1365_v30, 0.0 }
 0x131   : > { %v4260_v34 = vpack.c.bf16 %v2579_v27, %v2579_v27  ;;  %v4163_v35 = vpack.c.bf16 %v2482_v28, %v2482_v28  ;;  %v2582_v36 = vsel %vm2182_vm2, %v1752_v14, %v2382_v25  ;;  %v2480_v37 = vsel %vm2080_vm3, %v1344_v15, %v2280_v26  ;;  %v5427_v39 = vpop.f32.mrb[31].mxu0  ;;  %v5429_v43 = vpop.f32.mrb[31].mxu1 }
 0x132   : > { %v4263_v41 = vpack.c.bf16 %v2582_v36, %v2582_v36  ;;  %v4161_v31 = vpack.c.bf16 %v2480_v37, %v2480_v37  ;;  %v2380_v42 = vmul.f32 0.01, %v1744_v29  ;;  %v2285_v44 = vmul.f32 0.01, %v1365_v30 }
 0x133   : > { %3580 = vst.msk [vmem:[%s5234_s23 + $0x1e0] sm:$0xf] %vm3459_vm1, %v4260_v34  ;;  %3483 = vst.msk [vmem:[%s5234_s23 + $0x5c] sm:$0xf] %vm3459_vm1, %v4163_v35  ;;  %v1357_v46 = vadd.f32 %v5224_v40, %v5374_v57  ;;  %v1757_v48 = vadd.f32 %v5224_v40, %v5376_v58  ;;  %v1368_v49 = vadd.f32 %v5380_v63, %v5224_v40  ;;  %vm2185_vm6 = vcmp.ge.f32.partialorder %v1765_v45, 0.0 }
 0x134   : > { %3583 = vst.msk [vmem:[%s5234_s23 + $0x1ec] sm:$0xf] %vm3459_vm1, %v4263_v41  ;;  %3481 = vst.msk [vmem:[%s5234_s23 + $0x54] sm:$0xf] %vm3459_vm1, %v4161_v31  ;;  %v2580_v47 = vsel %vm2180_vm4, %v1744_v29, %v2380_v42  ;;  %v1768_v51 = vadd.f32 %v5382_v0, %v5224_v40  ;;  %v2485_v50 = vsel %vm2085_vm5, %v1365_v30, %v2285_v44  ;;  %v2385_v53 = vmul.f32 0.01, %v1765_v45 }
 0x135   : > { %v4261_v52 = vpack.c.bf16 %v2580_v47, %v2580_v47  ;;  %v5449_v54 = vpop.f32.mrb[32].mxu0  ;;  %v5451_v55 = vpop.f32.mrb[32].mxu1  ;;  %v4166_v56 = vpack.c.bf16 %v2485_v50, %v2485_v50  ;;  %vm2083_vm7 = vcmp.ge.f32.partialorder %v1357_v46, 0.0  ;;  %v2283_v57 = vmul.f32 0.01, %v1357_v46 }
 0x136   : > { %vm2183_vm8 = vcmp.ge.f32.partialorder %v1757_v48, 0.0  ;;  %v5453_v58 = vpop.f32.mrb[33].mxu0  ;;  %v5455_v59 = vpop.f32.mrb[33].mxu1  ;;  %v2585_v60 = vsel %vm2185_vm6, %v1765_v45, %v2385_v53  ;;  %v2383_v61 = vmul.f32 0.01, %v1757_v48  ;;  %vm2086_vm9 = vcmp.ge.f32.partialorder %v1368_v49, 0.0 }
 0x137   : > { %3581 = vst.msk [vmem:[%s5234_s23 + $0x1e4] sm:$0xf] %vm3459_vm1, %v4261_v52  ;;  %v2286_v62 = vmul.f32 0.01, %v1368_v49  ;;  %v5459_v63 = vpop.f32.mrb[34].mxu0  ;;  %v4266_v0 = vpack.c.bf16 %v2585_v60, %v2585_v60  ;;  %v2483_v1 = vsel %vm2083_vm7, %v1357_v46, %v2283_v57  ;;  %vm2186_vm10 = vcmp.ge.f32.partialorder %v1768_v51, 0.0 }
 0x138   : > { %3486 = vst.msk [vmem:[%s5234_s23 + $0x68] sm:$0xf] %vm3459_vm1, %v4166_v56  ;;  %v2386_v2 = vmul.f32 0.01, %v1768_v51  ;;  %v5463_v3 = vpop.f32.mrb[34].mxu1  ;;  %v5465_v6 = vpop.f32.mrb[35].mxu0  ;;  %v4164_v7 = vpack.c.bf16 %v2483_v1, %v2483_v1  ;;  %v2583_v8 = vsel %vm2183_vm8, %v1757_v48, %v2383_v61  ;;  %v1360_v10 = vadd.f32 %v5224_v40, %v5385_v4 }
 0x139   : > { %v2486_v9 = vsel %vm2086_vm9, %v1368_v49, %v2286_v62  ;;  %v5470_v11 = vpop.f32.mrb[35].mxu1  ;;  %3586 = vst.msk [vmem:[%s5234_s23 + $0x1f8] sm:$0xf] %vm3459_vm1, %v4266_v0  ;;  %v4264_v12 = vpack.c.bf16 %v2583_v8, %v2583_v8  ;;  %v1760_v15 = vadd.f32 %v5224_v40, %v5387_v5  ;;  %v1381_v18 = vadd.f32 %v5405_v19, %v5224_v40 }
 0x13a   : > { %v4167_v13 = vpack.c.bf16 %v2486_v9, %v2486_v9  ;;  %v2586_v14 = vsel %vm2186_vm10, %v1768_v51, %v2386_v2  ;;  %3484 = vst.msk [vmem:[%s5234_s23 + $0x60] sm:$0xf] %vm3459_vm1, %v4164_v7  ;;  %vm2084_vm11 = vcmp.ge.f32.partialorder %v1360_v10, 0.0  ;;  %v2284_v17 = vmul.f32 0.01, %v1360_v10 }
 0x13b   : > { %v4267_v16 = vpack.c.bf16 %v2586_v14, %v2586_v14  ;;  %3584 = vst.msk [vmem:[%s5234_s23 + $0x1f0] sm:$0xf] %vm3459_vm1, %v4264_v12  ;;  %vm2184_vm12 = vcmp.ge.f32.partialorder %v1760_v15, 0.0  ;;  %v2384_v4 = vmul.f32 0.01, %v1760_v15  ;;  %v1781_v21 = vadd.f32 %v5407_v20, %v5224_v40 }
 0x13c   : > { %3487 = vst.msk [vmem:[%s5234_s23 + $0x6c] sm:$0xf] %vm3459_vm1, %v4167_v13  ;;  %v1373_v5 = vadd.f32 %v5224_v40, %v5409_v24  ;;  %v2484_v22 = vsel %vm2084_vm11, %v1360_v10, %v2284_v17  ;;  %vm2089_vm13 = vcmp.ge.f32.partialorder %v1381_v18, 0.0  ;;  %v2289_v23 = vmul.f32 0.01, %v1381_v18  ;;  %v5492_v25 = vpop.f32.mrb[36].mxu0 }
 0x13d   : > { %3587 = vst.msk [vmem:[%s5234_s23 + $0x1fc] sm:$0xf] %vm3459_vm1, %v4267_v16  ;;  %v1773_v19 = vadd.f32 %v5224_v40, %v5421_v32  ;;  %v5494_v26 = vpop.f32.mrb[36].mxu1  ;;  %v4165_v27 = vpack.c.bf16 %v2484_v22, %v2484_v22  ;;  %v2584_v28 = vsel %vm2184_vm12, %v1760_v15, %v2384_v4  ;;  %vm2189_vm14 = vcmp.ge.f32.partialorder %v1781_v21, 0.0  ;;  %v5496_v29 = vpop.f32.mrb[37].mxu0 }
 0x13e   : > { %v2389_v20 = vmul.f32 0.01, %v1781_v21  ;;  %v5498_v24 = vpop.f32.mrb[37].mxu1  ;;  %v4265_v30 = vpack.c.bf16 %v2584_v28, %v2584_v28  ;;  %v2489_v34 = vsel %vm2089_vm13, %v1381_v18, %v2289_v23  ;;  %vm2087_vm15 = vcmp.ge.f32.partialorder %v1373_v5, 0.0  ;;  %v5500_v36 = vpop.f32.mrb[38].mxu0 }
 0x13f   : > { %v2287_v35 = vmul.f32 0.01, %v1373_v5  ;;  %v5502_v32 = vpop.f32.mrb[38].mxu1  ;;  %3485 = vst.msk [vmem:[%s5234_s23 + $0x64] sm:$0xf] %vm3459_vm1, %v4165_v27  ;;  %v4170_v37 = vpack.c.bf16 %v2489_v34, %v2489_v34  ;;  %vm2187_vm0 = vcmp.ge.f32.partialorder %v1773_v19, 0.0  ;;  %v1384_v47 = vadd.f32 %v5423_v33, %v5224_v40 }
 0x140   : > { %v2589_v41 = vsel %vm2189_vm14, %v1781_v21, %v2389_v20  ;;  %v2387_v31 = vmul.f32 0.01, %v1773_v19  ;;  %v5506_v42 = vpop.f32.mrb[39].mxu0  ;;  %v5508_v44 = vpop.f32.mrb[39].mxu1  ;;  %3585 = vst.msk [vmem:[%s5234_s23 + $0x1f4] sm:$0xf] %vm3459_vm1, %v4265_v30  ;;  %v1784_v48 = vadd.f32 %v5425_v38, %v5224_v40  ;;  %v1376_v52 = vadd.f32 %v5224_v40, %v5427_v39 }
 0x141   : > { %v4270_v45 = vpack.c.bf16 %v2589_v41, %v2589_v41  ;;  %v2487_v46 = vsel %vm2087_vm15, %v1373_v5, %v2287_v35  ;;  %3490 = vst.msk [vmem:[%s5234_s23 + $0x78] sm:$0xf] %vm3459_vm1, %v4170_v37  ;;  %v1776_v50 = vadd.f32 %v5224_v40, %v5429_v43  ;;  %vm2090_vm2 = vcmp.ge.f32.partialorder %v1384_v47, 0.0 }
 0x142   : > { %v4168_v49 = vpack.c.bf16 %v2487_v46, %v2487_v46  ;;  %v2587_v51 = vsel %vm2187_vm0, %v1773_v19, %v2387_v31  ;;  %v2290_v56 = vmul.f32 0.01, %v1384_v47  ;;  %vm2190_vm3 = vcmp.ge.f32.partialorder %v1784_v48, 0.0 }
 0x143   : > { %3590 = vst.msk [vmem:[%s5234_s23 + $0x208] sm:$0xf] %vm3459_vm1, %v4270_v45  ;;  %v4268_v53 = vpack.c.bf16 %v2587_v51, %v2587_v51  ;;  %v2390_v33 = vmul.f32 0.01, %v1784_v48  ;;  %vm2088_vm4 = vcmp.ge.f32.partialorder %v1376_v52, 0.0  ;;  %vm2188_vm5 = vcmp.ge.f32.partialorder %v1776_v50, 0.0 }
 0x144   : > { %3488 = vst.msk [vmem:[%s5234_s23 + $0x70] sm:$0xf] %vm3459_vm1, %v4168_v49  ;;  %v2288_v38 = vmul.f32 0.01, %v1376_v52  ;;  %v2490_v57 = vsel %vm2090_vm2, %v1384_v47, %v2290_v56  ;;  %v2388_v60 = vmul.f32 0.01, %v1776_v50  ;;  %v1397_v39 = vadd.f32 %v5449_v54, %v5224_v40 }
 0x145   : > { %3588 = vst.msk [vmem:[%s5234_s23 + $0x200] sm:$0xf] %vm3459_vm1, %v4268_v53  ;;  %v1797_v43 = vadd.f32 %v5451_v55, %v5224_v40  ;;  %v5532_v61 = vpop.f32.mrb[40].mxu0  ;;  %v5534_v62 = vpop.f32.mrb[40].mxu1  ;;  %v4171_v0 = vpack.c.bf16 %v2490_v57, %v2490_v57  ;;  %v2590_v1 = vsel %vm2190_vm3, %v1784_v48, %v2390_v33  ;;  %v1389_v7 = vadd.f32 %v5224_v40, %v5453_v58  ;;  %v5595_v33 = vld [vmem:[%s5221_s20] ss:$0 sm:$0xff] }
 0x146   : > { %v2488_v2 = vsel %vm2088_vm4, %v1376_v52, %v2288_v38  ;;  %v5538_v8 = vpop.f32.mrb[41].mxu0  ;;  %v5540_v9 = vpop.f32.mrb[41].mxu1  ;;  %v4271_v54 = vpack.c.bf16 %v2590_v1, %v2590_v1  ;;  %v2588_v55 = vsel %vm2188_vm5, %v1776_v50, %v2388_v60  ;;  %vm2093_vm6 = vcmp.ge.f32.partialorder %v1397_v39, 0.0 }
 0x147   : > { %v4169_v10 = vpack.c.bf16 %v2488_v2, %v2488_v2  ;;  %v5543_v12 = vpop.f32.mrb[42].mxu0  ;;  %v5545_v13 = vpop.f32.mrb[42].mxu1  ;;  %3491 = vst.msk [vmem:[%s5234_s23 + $0x7c] sm:$0xf] %vm3459_vm1, %v4171_v0  ;;  %v4269_v14 = vpack.c.bf16 %v2588_v55, %v2588_v55  ;;  %v2293_v15 = vmul.f32 0.01, %v1397_v39  ;;  %v1789_v18 = vadd.f32 %v5224_v40, %v5455_v59 }
 0x148   : > { %vm2193_vm7 = vcmp.ge.f32.partialorder %v1797_v43, 0.0  ;;  %v2393_v58 = vmul.f32 0.01, %v1797_v43  ;;  %v5549_v16 = vpop.f32.mrb[43].mxu0  ;;  %3591 = vst.msk [vmem:[%s5234_s23 + $0x20c] sm:$0xf] %vm3459_vm1, %v4271_v54  ;;  %v1400_v4 = vadd.f32 %v5459_v63, %v5224_v40  ;;  %v1800_v23 = vadd.f32 %v5463_v3, %v5224_v40 }
 0x149   : > { %3489 = vst.msk [vmem:[%s5234_s23 + $0x74] sm:$0xf] %vm3459_vm1, %v4169_v10  ;;  %vm2091_vm8 = vcmp.ge.f32.partialorder %v1389_v7, 0.0  ;;  %v2291_v17 = vmul.f32 0.01, %v1389_v7  ;;  %v5559_v21 = vpop.f32.mrb[43].mxu1  ;;  %v2493_v5 = vsel %vm2093_vm6, %v1397_v39, %v2293_v15  ;;  %v1392_v19 = vadd.f32 %v5224_v40, %v5465_v6 }
 0x14a   : > { %3589 = vst.msk [vmem:[%s5234_s23 + $0x204] sm:$0xf] %vm3459_vm1, %v4269_v14  ;;  %v2593_v22 = vsel %vm2193_vm7, %v1797_v43, %v2393_v58  ;;  %v4174_v59 = vpack.c.bf16 %v2493_v5, %v2493_v5  ;;  %vm2191_vm9 = vcmp.ge.f32.partialorder %v1789_v18, 0.0  ;;  %v2391_v20 = vmul.f32 0.01, %v1789_v18 }
 0x14b   : > { %v4274_v27 = vpack.c.bf16 %v2593_v22, %v2593_v22  ;;  %v2491_v28 = vsel %vm2091_vm8, %v1389_v7, %v2291_v17  ;;  %vm2094_vm10 = vcmp.ge.f32.partialorder %v1400_v4, 0.0  ;;  %v2294_v30 = vmul.f32 0.01, %v1400_v4 }
 0x14c   : > { %v4172_v63 = vpack.c.bf16 %v2491_v28, %v2491_v28  ;;  %3494 = vst.msk [vmem:[%s5234_s23 + $0x88] sm:$0xf] %vm3459_vm1, %v4174_v59  ;;  %vm2194_vm11 = vcmp.ge.f32.partialorder %v1800_v23, 0.0  ;;  %v2394_v34 = vmul.f32 0.01, %v1800_v23  ;;  %vm2092_vm12 = vcmp.ge.f32.partialorder %v1392_v19, 0.0 }
 0x14d   : > { %3594 = vst.msk [vmem:[%s5234_s23 + $0x218] sm:$0xf] %vm3459_vm1, %v4274_v27  ;;  %v2292_v3 = vmul.f32 0.01, %v1392_v19  ;;  %v2591_v35 = vsel %vm2191_vm9, %v1789_v18, %v2391_v20  ;;  %v2494_v6 = vsel %vm2094_vm10, %v1400_v4, %v2294_v30  ;;  %v1792_v37 = vadd.f32 %v5224_v40, %v5470_v11  ;;  %v5578_v31 = vpop.f32.mrb[44].mxu0  ;;  %v5580_v45 = vpop.f32.mrb[44].mxu1 }
 0x14e   : > { %3492 = vst.msk [vmem:[%s5234_s23 + $0x80] sm:$0xf] %vm3459_vm1, %v4172_v63  ;;  %v1413_v41 = vadd.f32 %v5492_v25, %v5224_v40  ;;  %v4272_v46 = vpack.c.bf16 %v2591_v35, %v2591_v35  ;;  %v4175_v47 = vpack.c.bf16 %v2494_v6, %v2494_v6  ;;  %v2594_v48 = vsel %vm2194_vm11, %v1800_v23, %v2394_v34  ;;  %v5582_v51 = vpop.f32.mrb[45].mxu0  ;;  %v5584_v52 = vpop.f32.mrb[45].mxu1 }
 0x14f   : > { %v2492_v49 = vsel %vm2092_vm12, %v1392_v19, %v2292_v3  ;;  %v4275_v11 = vpack.c.bf16 %v2594_v48, %v2594_v48  ;;  %vm2192_vm13 = vcmp.ge.f32.partialorder %v1792_v37, 0.0  ;;  %v2392_v40 = vmul.f32 0.01, %v1792_v37  ;;  %v5586_v25 = vpop.f32.mrb[46].mxu0  ;;  %v5588_v53 = vpop.f32.mrb[46].mxu1 }
 0x150   : > { %v4173_v50 = vpack.c.bf16 %v2492_v49, %v2492_v49  ;;  %3592 = vst.msk [vmem:[%s5234_s23 + $0x210] sm:$0xf] %vm3459_vm1, %v4272_v46  ;;  %3495 = vst.msk [vmem:[%s5234_s23 + $0x8c] sm:$0xf] %vm3459_vm1, %v4175_v47  ;;  %vm2097_vm14 = vcmp.ge.f32.partialorder %v1413_v41, 0.0  ;;  %v1813_v38 = vadd.f32 %v5595_v33, %v5494_v26  ;;  %v1405_v57 = vadd.f32 %v5595_v33, %v5496_v29  ;;  %v5601_v60 = vpop.f32.mrb[47].mxu0 }
 0x151   : > { %v2297_v56 = vmul.f32 0.01, %v1413_v41  ;;  %v5603_v39 = vpop.f32.mrb[47].mxu1  ;;  %3595 = vst.msk [vmem:[%s5234_s23 + $0x21c] sm:$0xf] %vm3459_vm1, %v4275_v11  ;;  %v2592_v43 = vsel %vm2192_vm13, %v1792_v37, %v2392_v40  ;;  %v1805_v0 = vadd.f32 %v5595_v33, %v5498_v24  ;;  %v1416_v1 = vadd.f32 %v5595_v33, %v5500_v36 }
 0x152   : > { %3493 = vst.msk [vmem:[%s5234_s23 + $0x84] sm:$0xf] %vm3459_vm1, %v4173_v50  ;;  %v1816_v26 = vadd.f32 %v5595_v33, %v5502_v32  ;;  %v4273_v29 = vpack.c.bf16 %v2592_v43, %v2592_v43  ;;  %vm2197_vm15 = vcmp.ge.f32.partialorder %v1813_v38, 0.0  ;;  %v2397_v7 = vmul.f32 0.01, %v1813_v38 }
 0x153   : > { %v2497_v2 = vsel %vm2097_vm14, %v1413_v41, %v2297_v56  ;;  %vm2095_vm0 = vcmp.ge.f32.partialorder %v1405_v57, 0.0  ;;  %v2295_v10 = vmul.f32 0.01, %v1405_v57  ;;  %vm2195_vm2 = vcmp.ge.f32.partialorder %v1805_v0, 0.0 }
 0x154   : > { %v4178_v54 = vpack.c.bf16 %v2497_v2, %v2497_v2  ;;  %3593 = vst.msk [vmem:[%s5234_s23 + $0x214] sm:$0xf] %vm3459_vm1, %v4273_v29  ;;  %v2597_v55 = vsel %vm2197_vm15, %v1813_v38, %v2397_v7  ;;  %v2395_v14 = vmul.f32 0.01, %v1805_v0  ;;  %vm2098_vm3 = vcmp.ge.f32.partialorder %v1416_v1, 0.0  ;;  %v5617_v36 = vpop.f32.mrb[48].mxu0 }
 0x155   : > { %v2298_v24 = vmul.f32 0.01, %v1416_v1  ;;  %v4278_v32 = vpack.c.bf16 %v2597_v55, %v2597_v55  ;;  %v2495_v15 = vsel %vm2095_vm0, %v1405_v57, %v2295_v10  ;;  %vm2198_vm4 = vcmp.ge.f32.partialorder %v1816_v26, 0.0  ;;  %v5621_v17 = vpop.f32.mrb[48].mxu1  ;;  %v5623_v18 = vpop.f32.mrb[49].mxu0 }
 0x156   : > { %3498 = vst.msk [vmem:[%s5234_s23 + $0x98] sm:$0xf] %vm3459_vm1, %v4178_v54  ;;  %v2398_v58 = vmul.f32 0.01, %v1816_v26  ;;  %v4176_v4 = vpack.c.bf16 %v2495_v15, %v2495_v15  ;;  %v2595_v5 = vsel %vm2195_vm2, %v1805_v0, %v2395_v14  ;;  %v1408_v23 = vadd.f32 %v5595_v33, %v5506_v42  ;;  %v5627_v19 = vpop.f32.mrb[49].mxu1  ;;  %v5629_v59 = vpop.f32.mrb[50].mxu0 }
 0x157   : > { %v2498_v22 = vsel %vm2098_vm3, %v1416_v1, %v2298_v24  ;;  %3598 = vst.msk [vmem:[%s5234_s23 + $0x228] sm:$0xf] %vm3459_vm1, %v4278_v32  ;;  %v4276_v27 = vpack.c.bf16 %v2595_v5, %v2595_v5  ;;  %v1808_v20 = vadd.f32 %v5595_v33, %v5508_v44  ;;  %v5635_v30 = vpop.f32.mrb[50].mxu1  ;;  %v5637_v34 = vpop.f32.mrb[51].mxu0  ;;  %v1429_v35 = vadd.f32 %v5595_v33, %v5532_v61 }
 0x158   : > { %v4179_v28 = vpack.c.bf16 %v2498_v22, %v2498_v22  ;;  %v2598_v63 = vsel %vm2198_vm4, %v1816_v26, %v2398_v58  ;;  %3496 = vst.msk [vmem:[%s5234_s23 + $0x90] sm:$0xf] %vm3459_vm1, %v4176_v4  ;;  %vm2096_vm5 = vcmp.ge.f32.partialorder %v1408_v23, 0.0  ;;  %v2296_v3 = vmul.f32 0.01, %v1408_v23  ;;  %v5643_v6 = vpop.f32.mrb[51].mxu1 }
 0x159   : > { %v4279_v42 = vpack.c.bf16 %v2598_v63, %v2598_v63  ;;  %3596 = vst.msk [vmem:[%s5234_s23 + $0x220] sm:$0xf] %vm3459_vm1, %v4276_v27  ;;  %vm2196_vm6 = vcmp.ge.f32.partialorder %v1808_v20, 0.0  ;;  %v2396_v44 = vmul.f32 0.01, %v1808_v20  ;;  %v1829_v37 = vadd.f32 %v5595_v33, %v5534_v62 }
 0x15a   : > { %3499 = vst.msk [vmem:[%s5234_s23 + $0x9c] sm:$0xf] %vm3459_vm1, %v4179_v28  ;;  %v1421_v41 = vadd.f32 %v5595_v33, %v5538_v8  ;;  %v2496_v46 = vsel %vm2096_vm5, %v1408_v23, %v2296_v3  ;;  %vm2101_vm7 = vcmp.ge.f32.partialorder %v1429_v35, 0.0  ;;  %v2301_v61 = vmul.f32 0.01, %v1429_v35 }
 0x15b   : > { %3599 = vst.msk [vmem:[%s5234_s23 + $0x22c] sm:$0xf] %vm3459_vm1, %v4279_v42  ;;  %v1821_v47 = vadd.f32 %v5595_v33, %v5540_v9  ;;  %v4177_v48 = vpack.c.bf16 %v2496_v46, %v2496_v46  ;;  %v2596_v49 = vsel %vm2196_vm6, %v1808_v20, %v2396_v44  ;;  %vm2201_vm8 = vcmp.ge.f32.partialorder %v1829_v37, 0.0 }
 0x15c   : > { %v2401_v11 = vmul.f32 0.01, %v1829_v37  ;;  %v4277_v50 = vpack.c.bf16 %v2596_v49, %v2596_v49  ;;  %v2501_v40 = vsel %vm2101_vm7, %v1429_v35, %v2301_v61  ;;  %vm2099_vm9 = vcmp.ge.f32.partialorder %v1421_v41, 0.0  ;;  %v5657_v56 = vpop.f32.mrb[52].mxu0  ;;  %v5659_v8 = vpop.f32.mrb[52].mxu1 }
 0x15d   : > { %v2299_v62 = vmul.f32 0.01, %v1421_v41  ;;  %3497 = vst.msk [vmem:[%s5234_s23 + $0x94] sm:$0xf] %vm3459_vm1, %v4177_v48  ;;  %v4182_v38 = vpack.c.bf16 %v2501_v40, %v2501_v40  ;;  %vm2199_vm10 = vcmp.ge.f32.partialorder %v1821_v47, 0.0  ;;  %v5663_v43 = vpop.f32.mrb[53].mxu0  ;;  %v1432_v29 = vadd.f32 %v5595_v33, %v5543_v12 }
 0x15e   : > { %v2601_v57 = vsel %vm2201_vm8, %v1829_v37, %v2401_v11  ;;  %v2399_v9 = vmul.f32 0.01, %v1821_v47  ;;  %v5665_v0 = vpop.f32.mrb[53].mxu1  ;;  %3597 = vst.msk [vmem:[%s5234_s23 + $0x224] sm:$0xf] %vm3459_vm1, %v4277_v50  ;;  %v1832_v2 = vadd.f32 %v5595_v33, %v5545_v13  ;;  %v5673_v7 = vpop.f32.mrb[54].mxu0  ;;  %v1424_v14 = vadd.f32 %v5595_v33, %v5549_v16 }
 0x15f   : > { %v4282_v1 = vpack.c.bf16 %v2601_v57, %v2601_v57  ;;  %v2499_v26 = vsel %vm2099_vm9, %v1421_v41, %v2299_v62  ;;  %v5675_v54 = vpop.f32.mrb[54].mxu1  ;;  %3502 = vst.msk [vmem:[%s5234_s23 + $0xa8] sm:$0xf] %vm3459_vm1, %v4182_v38  ;;  %v1824_v24 = vadd.f32 %v5595_v33, %v5559_v21  ;;  %v5683_v12 = vpop.f32.mrb[55].mxu0  ;;  %vm2102_vm11 = vcmp.ge.f32.partialorder %v1432_v29, 0.0 }
 0x160   : > { %v4180_v10 = vpack.c.bf16 %v2499_v26, %v2499_v26  ;;  %v2599_v55 = vsel %vm2199_vm10, %v1821_v47, %v2399_v9  ;;  %v5685_v32 = vpop.f32.mrb[55].mxu1  ;;  %v2302_v15 = vmul.f32 0.01, %v1432_v29  ;;  %vm2202_vm12 = vcmp.ge.f32.partialorder %v1832_v2, 0.0 }
 0x161   : > { %3602 = vst.msk [vmem:[%s5234_s23 + $0x238] sm:$0xf] %vm3459_vm1, %v4282_v1  ;;  %v4280_v13 = vpack.c.bf16 %v2599_v55, %v2599_v55  ;;  %v2402_v58 = vmul.f32 0.01, %v1832_v2  ;;  %vm2100_vm13 = vcmp.ge.f32.partialorder %v1424_v14, 0.0  ;;  %vm2200_vm14 = vcmp.ge.f32.partialorder %v1824_v24, 0.0 }
 0x162   : > { %3500 = vst.msk [vmem:[%s5234_s23 + $0xa0] sm:$0xf] %vm3459_vm1, %v4180_v10  ;;  %v2300_v4 = vmul.f32 0.01, %v1424_v14  ;;  %v2502_v16 = vsel %vm2102_vm11, %v1432_v29, %v2302_v15  ;;  %v2400_v21 = vmul.f32 0.01, %v1824_v24  ;;  %v1445_v5 = vadd.f32 %v5595_v33, %v5578_v31 }
 0x163   : > { %3600 = vst.msk [vmem:[%s5234_s23 + $0x230] sm:$0xf] %vm3459_vm1, %v4280_v13  ;;  %v1845_v22 = vadd.f32 %v5595_v33, %v5580_v45  ;;  %v4183_v23 = vpack.c.bf16 %v2502_v16, %v2502_v16  ;;  %v2602_v27 = vsel %vm2202_vm12, %v1832_v2, %v2402_v58  ;;  %v1437_v63 = vadd.f32 %v5595_v33, %v5582_v51 }
 0x164   : > { %v2500_v28 = vsel %vm2100_vm13, %v1424_v14, %v2300_v4  ;;  %v4283_v20 = vpack.c.bf16 %v2602_v27, %v2602_v27  ;;  %v2600_v3 = vsel %vm2200_vm14, %v1824_v24, %v2400_v21  ;;  %vm2105_vm15 = vcmp.ge.f32.partialorder %v1445_v5, 0.0  ;;  %v5699_v35 = vpop.f32.mrb[56].mxu0  ;;  %v5701_v44 = vpop.f32.mrb[56].mxu1 }
 0x165   : > { %v4181_v42 = vpack.c.bf16 %v2500_v28, %v2500_v28  ;;  %3503 = vst.msk [vmem:[%s5234_s23 + $0xac] sm:$0xf] %vm3459_vm1, %v4183_v23  ;;  %v4281_v31 = vpack.c.bf16 %v2600_v3, %v2600_v3  ;;  %v2305_v45 = vmul.f32 0.01, %v1445_v5  ;;  %vm2205_vm0 = vcmp.ge.f32.partialorder %v1845_v22, 0.0  ;;  %v5705_v41 = vpop.f32.mrb[57].mxu0 }
 0x166   : > { %v2405_v37 = vmul.f32 0.01, %v1845_v22  ;;  %3603 = vst.msk [vmem:[%s5234_s23 + $0x23c] sm:$0xf] %vm3459_vm1, %v4283_v20  ;;  %vm2103_vm2 = vcmp.ge.f32.partialorder %v1437_v63, 0.0  ;;  %v1837_v46 = vadd.f32 %v5595_v33, %v5584_v52  ;;  %v1448_v61 = vadd.f32 %v5595_v33, %v5586_v25  ;;  %v5715_v47 = vpop.f32.mrb[57].mxu1 }
 0x167   : > { %3501 = vst.msk [vmem:[%s5234_s23 + $0xa4] sm:$0xf] %vm3459_vm1, %v4181_v42  ;;  %v2303_v51 = vmul.f32 0.01, %v1437_v63  ;;  %v5717_v48 = vpop.f32.mrb[58].mxu0  ;;  %v2505_v49 = vsel %vm2105_vm15, %v1445_v5, %v2305_v45  ;;  %v1848_v50 = vadd.f32 %v5595_v33, %v5588_v53  ;;  %v1440_v52 = vadd.f32 %v5595_v33, %v5601_v60  ;;  %v5726_v40 = vpop.f32.mrb[58].mxu1 }
 0x168   : > { %3601 = vst.msk [vmem:[%s5234_s23 + $0x234] sm:$0xf] %vm3459_vm1, %v4281_v31  ;;  %v2605_v11 = vsel %vm2205_vm0, %v1845_v22, %v2405_v37  ;;  %v5728_v25 = vpop.f32.mrb[59].mxu0  ;;  %v4186_v62 = vpack.c.bf16 %v2505_v49, %v2505_v49  ;;  %vm2203_vm3 = vcmp.ge.f32.partialorder %v1837_v46, 0.0  ;;  %v5730_v9 = vpop.f32.mrb[59].mxu1  ;;  %vm2106_vm4 = vcmp.ge.f32.partialorder %v1448_v61, 0.0 }
 0x169   : > { %v4286_v38 = vpack.c.bf16 %v2605_v11, %v2605_v11  ;;  %v2503_v57 = vsel %vm2103_vm2, %v1437_v63, %v2303_v51  ;;  %v2403_v26 = vmul.f32 0.01, %v1837_v46  ;;  %v2306_v29 = vmul.f32 0.01, %v1448_v61 }
 0x16a   : > { %v4184_v1 = vpack.c.bf16 %v2503_v57, %v2503_v57  ;;  %3506 = vst.msk [vmem:[%s5234_s23 + $0xb8] sm:$0xf] %vm3459_vm1, %v4186_v62  ;;  %vm2206_vm5 = vcmp.ge.f32.partialorder %v1848_v50, 0.0  ;;  %v2406_v53 = vmul.f32 0.01, %v1848_v50  ;;  %vm2104_vm6 = vcmp.ge.f32.partialorder %v1440_v52, 0.0 }
 0x16b   : > { %3606 = vst.msk [vmem:[%s5234_s23 + $0x248] sm:$0xf] %vm3459_vm1, %v4286_v38  ;;  %v2304_v60 = vmul.f32 0.01, %v1440_v52  ;;  %v2603_v2 = vsel %vm2203_vm3, %v1837_v46, %v2403_v26  ;;  %v2506_v10 = vsel %vm2106_vm4, %v1448_v61, %v2306_v29  ;;  %v1840_v55 = vadd.f32 %v5595_v33, %v5603_v39 }
 0x16c   : > { %3504 = vst.msk [vmem:[%s5234_s23 + $0xb0] sm:$0xf] %vm3459_vm1, %v4184_v1  ;;  %v1461_v14 = vadd.f32 %v5595_v33, %v5617_v36  ;;  %v4284_v24 = vpack.c.bf16 %v2603_v2, %v2603_v2  ;;  %v4187_v13 = vpack.c.bf16 %v2506_v10, %v2506_v10  ;;  %v2606_v15 = vsel %vm2206_vm5, %v1848_v50, %v2406_v53  ;;  %v5742_v4 = vpop.f32.mrb[60].mxu0  ;;  %v5744_v16 = vpop.f32.mrb[60].mxu1 }
 0x16d   : > { %v2504_v58 = vsel %vm2104_vm6, %v1440_v52, %v2304_v60  ;;  %v4287_v21 = vpack.c.bf16 %v2606_v15, %v2606_v15  ;;  %vm2204_vm7 = vcmp.ge.f32.partialorder %v1840_v55, 0.0  ;;  %v2404_v22 = vmul.f32 0.01, %v1840_v55  ;;  %v5746_v23 = vpop.f32.mrb[61].mxu0  ;;  %v5748_v39 = vpop.f32.mrb[61].mxu1 }
 0x16e   : > { %v4185_v5 = vpack.c.bf16 %v2504_v58, %v2504_v58  ;;  %3604 = vst.msk [vmem:[%s5234_s23 + $0x240] sm:$0xf] %vm3459_vm1, %v4284_v24  ;;  %3507 = vst.msk [vmem:[%s5234_s23 + $0xbc] sm:$0xf] %vm3459_vm1, %v4187_v13  ;;  %vm2109_vm8 = vcmp.ge.f32.partialorder %v1461_v14, 0.0  ;;  %v1861_v27 = vadd.f32 %v5595_v33, %v5621_v17  ;;  %v1453_v28 = vadd.f32 %v5595_v33, %v5623_v18  ;;  %v5758_v63 = vpop.f32.mrb[62].mxu0 }
 0x16f   : > { %v2309_v36 = vmul.f32 0.01, %v1461_v14  ;;  %v5760_v20 = vpop.f32.mrb[62].mxu1  ;;  %3607 = vst.msk [vmem:[%s5234_s23 + $0x24c] sm:$0xf] %vm3459_vm1, %v4287_v21  ;;  %v2604_v42 = vsel %vm2204_vm7, %v1840_v55, %v2404_v22  ;;  %v1853_v3 = vadd.f32 %v5595_v33, %v5627_v19  ;;  %v1464_v31 = vadd.f32 %v5595_v33, %v5629_v59  ;;  %v5772_v18 = vpop.f32.mrb[63].mxu0 }
 0x170   : > { %3505 = vst.msk [vmem:[%s5234_s23 + $0xb4] sm:$0xf] %vm3459_vm1, %v4185_v5  ;;  %v1864_v17 = vadd.f32 %v5595_v33, %v5635_v30  ;;  %v5774_v45 = vpop.f32.mrb[63].mxu1  ;;  %v4285_v37 = vpack.c.bf16 %v2604_v42, %v2604_v42  ;;  %vm2209_vm9 = vcmp.ge.f32.partialorder %v1861_v27, 0.0  ;;  %v2409_v46 = vmul.f32 0.01, %v1861_v27 }
 0x171   : > { %v2509_v51 = vsel %vm2109_vm8, %v1461_v14, %v2309_v36  ;;  %vm2107_vm10 = vcmp.ge.f32.partialorder %v1453_v28, 0.0  ;;  %v2307_v49 = vmul.f32 0.01, %v1453_v28  ;;  %vm2207_vm11 = vcmp.ge.f32.partialorder %v1853_v3, 0.0 }
 0x172   : > { %v4190_v61 = vpack.c.bf16 %v2509_v51, %v2509_v51  ;;  %3605 = vst.msk [vmem:[%s5234_s23 + $0x244] sm:$0xf] %vm3459_vm1, %v4285_v37  ;;  %v2609_v19 = vsel %vm2209_vm9, %v1861_v27, %v2409_v46  ;;  %v2407_v59 = vmul.f32 0.01, %v1853_v3  ;;  %vm2110_vm12 = vcmp.ge.f32.partialorder %v1464_v31, 0.0 }
 0x173   : > { %v2310_v30 = vmul.f32 0.01, %v1464_v31  ;;  %v4290_v11 = vpack.c.bf16 %v2609_v19, %v2609_v19  ;;  %v2507_v50 = vsel %vm2107_vm10, %v1453_v28, %v2307_v49  ;;  %vm2210_vm13 = vcmp.ge.f32.partialorder %v1864_v17, 0.0 }
 0x174   : > { %3510 = vst.msk [vmem:[%s5234_s23 + $0xc8] sm:$0xf] %vm3459_vm1, %v4190_v61  ;;  %v2410_v52 = vmul.f32 0.01, %v1864_v17  ;;  %v4188_v62 = vpack.c.bf16 %v2507_v50, %v2507_v50  ;;  %v2607_v38 = vsel %vm2207_vm11, %v1853_v3, %v2407_v59  ;;  %v1456_v1 = vadd.f32 %v5595_v33, %v5637_v34  ;;  %v5782_v26 = vpop.f32.mrb[64].mxu0  ;;  %v5784_v29 = vpop.f32.mrb[64].mxu1 }
 0x175   : > { %v2510_v57 = vsel %vm2110_vm12, %v1464_v31, %v2310_v30  ;;  %3610 = vst.msk [vmem:[%s5234_s23 + $0x258] sm:$0xf] %vm3459_vm1, %v4290_v11  ;;  %v4288_v53 = vpack.c.bf16 %v2607_v38, %v2607_v38  ;;  %v1856_v10 = vadd.f32 %v5595_v33, %v5643_v6  ;;  %v5790_v55 = vpop.f32.mrb[65].mxu0  ;;  %v5792_v14 = vpop.f32.mrb[65].mxu1  ;;  %v1477_v13 = vadd.f32 %v5595_v33, %v5657_v56 }
 0x176   : > { %v4191_v60 = vpack.c.bf16 %v2510_v57, %v2510_v57  ;;  %v2610_v2 = vsel %vm2210_vm13, %v1864_v17, %v2410_v52  ;;  %3508 = vst.msk [vmem:[%s5234_s23 + $0xc0] sm:$0xf] %vm3459_vm1, %v4188_v62  ;;  %vm2108_vm14 = vcmp.ge.f32.partialorder %v1456_v1, 0.0  ;;  %v2308_v24 = vmul.f32 0.01, %v1456_v1  ;;  %v5798_v15 = vpop.f32.mrb[66].mxu0 }
 0x177   : > { %v4291_v34 = vpack.c.bf16 %v2610_v2, %v2610_v2  ;;  %v5800_v58 = vpop.f32.mrb[66].mxu1  ;;  %3608 = vst.msk [vmem:[%s5234_s23 + $0x250] sm:$0xf] %vm3459_vm1, %v4288_v53  ;;  %vm2208_vm15 = vcmp.ge.f32.partialorder %v1856_v10, 0.0  ;;  %v2408_v6 = vmul.f32 0.01, %v1856_v10  ;;  %v1877_v21 = vadd.f32 %v5595_v33, %v5659_v8 }
 0x178   : > { %3511 = vst.msk [vmem:[%s5234_s23 + $0xcc] sm:$0xf] %vm3459_vm1, %v4191_v60  ;;  %v1469_v5 = vadd.f32 %v5595_v33, %v5663_v43  ;;  %v5810_v22 = vpop.f32.mrb[67].mxu0  ;;  %v5812_v56 = vpop.f32.mrb[67].mxu1  ;;  %v2508_v36 = vsel %vm2108_vm14, %v1456_v1, %v2308_v24  ;;  %vm2113_vm0 = vcmp.ge.f32.partialorder %v1477_v13, 0.0  ;;  %v1869_v28 = vadd.f32 %v5595_v33, %v5665_v0 }
 0x179   : > { %3611 = vst.msk [vmem:[%s5234_s23 + $0x25c] sm:$0xf] %vm3459_vm1, %v4291_v34  ;;  %v2313_v27 = vmul.f32 0.01, %v1477_v13  ;;  %v4189_v42 = vpack.c.bf16 %v2508_v36, %v2508_v36  ;;  %v2608_v3 = vsel %vm2208_vm15, %v1856_v10, %v2408_v6  ;;  %vm2213_vm2 = vcmp.ge.f32.partialorder %v1877_v21, 0.0 }
 0x17a   : > { %v2413_v8 = vmul.f32 0.01, %v1877_v21  ;;  %v4289_v31 = vpack.c.bf16 %v2608_v3, %v2608_v3  ;;  %vm2111_vm3 = vcmp.ge.f32.partialorder %v1469_v5, 0.0  ;;  %v2311_v17 = vmul.f32 0.01, %v1469_v5 }
 0x17b   : > { %v2513_v43 = vsel %vm2113_vm0, %v1477_v13, %v2313_v27  ;;  %3509 = vst.msk [vmem:[%s5234_s23 + $0xc4] sm:$0xf] %vm3459_vm1, %v4189_v42  ;;  %vm2211_vm4 = vcmp.ge.f32.partialorder %v1869_v28, 0.0  ;;  %v2411_v46 = vmul.f32 0.01, %v1869_v28  ;;  %v1480_v49 = vadd.f32 %v5595_v33, %v5673_v7 }
 0x17c   : > { %v4194_v37 = vpack.c.bf16 %v2513_v43, %v2513_v43  ;;  %v2613_v51 = vsel %vm2213_vm2, %v1877_v21, %v2413_v8  ;;  %3609 = vst.msk [vmem:[%s5234_s23 + $0x254] sm:$0xf] %vm3459_vm1, %v4289_v31  ;;  %v2511_v0 = vsel %vm2111_vm3, %v1469_v5, %v2311_v17  ;;  %v1880_v19 = vadd.f32 %v5595_v33, %v5675_v54  ;;  %v5826_v59 = vpop.f32.mrb[68].mxu0  ;;  %v5828_v30 = vpop.f32.mrb[68].mxu1 }
 0x17d   : > { %v4294_v61 = vpack.c.bf16 %v2613_v51, %v2613_v51  ;;  %v4192_v11 = vpack.c.bf16 %v2511_v0, %v2511_v0  ;;  %v2611_v50 = vsel %vm2211_vm4, %v1869_v28, %v2411_v46  ;;  %v1472_v52 = vadd.f32 %v5595_v33, %v5683_v12  ;;  %v5836_v7 = vpop.f32.mrb[69].mxu0  ;;  %v5838_v38 = vpop.f32.mrb[69].mxu1 }
 0x17e   : > { %3514 = vst.msk [vmem:[%s5234_s23 + $0xd8] sm:$0xf] %vm3459_vm1, %v4194_v37  ;;  %v1872_v62 = vadd.f32 %v5595_v33, %v5685_v32  ;;  %v4292_v54 = vpack.c.bf16 %v2611_v50, %v2611_v50  ;;  %vm2114_vm5 = vcmp.ge.f32.partialorder %v1480_v49, 0.0  ;;  %v2314_v57 = vmul.f32 0.01, %v1480_v49  ;;  %v5842_v1 = vpop.f32.mrb[70].mxu0 }
 0x17f   : > { %3614 = vst.msk [vmem:[%s5234_s23 + $0x268] sm:$0xf] %vm3459_vm1, %v4294_v61  ;;  %vm2214_vm6 = vcmp.ge.f32.partialorder %v1880_v19, 0.0  ;;  %v5844_v53 = vpop.f32.mrb[70].mxu1  ;;  %3512 = vst.msk [vmem:[%s5234_s23 + $0xd0] sm:$0xf] %vm3459_vm1, %v4192_v11  ;;  %v1493_v10 = vadd.f32 %v5595_v33, %v5699_v35  ;;  %v1893_v34 = vadd.f32 %v5595_v33, %v5701_v44  ;;  %v1485_v36 = vadd.f32 %v5595_v33, %v5705_v41 }
 0x180   : > { %v2414_v12 = vmul.f32 0.01, %v1880_v19  ;;  %vm2112_vm7 = vcmp.ge.f32.partialorder %v1472_v52, 0.0  ;;  %v2312_v60 = vmul.f32 0.01, %v1472_v52  ;;  %vm2212_vm8 = vcmp.ge.f32.partialorder %v1872_v62, 0.0 }
 0x181   : > { %3612 = vst.msk [vmem:[%s5234_s23 + $0x260] sm:$0xf] %vm3459_vm1, %v4292_v54  ;;  %v2514_v32 = vsel %vm2114_vm5, %v1480_v49, %v2314_v57  ;;  %v2412_v2 = vmul.f32 0.01, %v1872_v62  ;;  %v5854_v24 = vpop.f32.mrb[71].mxu0  ;;  %v5856_v13 = vpop.f32.mrb[71].mxu1  ;;  %v1885_v41 = vadd.f32 %v5595_v33, %v5715_v47  ;;  %v1496_v31 = vadd.f32 %v5595_v33, %v5717_v48 }
 0x182   : > { %v4195_v6 = vpack.c.bf16 %v2514_v32, %v2514_v32  ;;  %v2614_v21 = vsel %vm2214_vm6, %v1880_v19, %v2414_v12  ;;  %v2512_v5 = vsel %vm2112_vm7, %v1472_v52, %v2312_v60  ;;  %vm2117_vm9 = vcmp.ge.f32.partialorder %v1493_v10, 0.0 }
 0x183   : > { %v4295_v27 = vpack.c.bf16 %v2614_v21, %v2614_v21  ;;  %v4193_v28 = vpack.c.bf16 %v2512_v5, %v2512_v5  ;;  %v2612_v35 = vsel %vm2212_vm8, %v1872_v62, %v2412_v2  ;;  %v2317_v42 = vmul.f32 0.01, %v1493_v10 }
 0x184   : > { %3515 = vst.msk [vmem:[%s5234_s23 + $0xdc] sm:$0xf] %vm3459_vm1, %v4195_v6  ;;  %v4293_v44 = vpack.c.bf16 %v2612_v35, %v2612_v35  ;;  %vm2217_vm10 = vcmp.ge.f32.partialorder %v1893_v34, 0.0  ;;  %v2417_v3 = vmul.f32 0.01, %v1893_v34  ;;  %vm2115_vm11 = vcmp.ge.f32.partialorder %v1485_v36, 0.0 }
 0x185   : > { %3615 = vst.msk [vmem:[%s5234_s23 + $0x26c] sm:$0xf] %vm3459_vm1, %v4295_v27  ;;  %3513 = vst.msk [vmem:[%s5234_s23 + $0xd4] sm:$0xf] %vm3459_vm1, %v4193_v28  ;;  %v2315_v8 = vmul.f32 0.01, %v1485_v36  ;;  %v2517_v37 = vsel %vm2117_vm9, %v1493_v10, %v2317_v42  ;;  %v1896_v46 = vadd.f32 %v5595_v33, %v5726_v40  ;;  %v1488_v61 = vadd.f32 %v5595_v33, %v5728_v25 }
 0x186   : > { %v5871_v43 = vpop.f32.mrb[72].mxu0  ;;  %v5873_v17 = vpop.f32.mrb[72].mxu1  ;;  %3613 = vst.msk [vmem:[%s5234_s23 + $0x264] sm:$0xf] %vm3459_vm1, %v4293_v44  ;;  %v2617_v51 = vsel %vm2217_vm10, %v1893_v34, %v2417_v3  ;;  %v4198_v48 = vpack.c.bf16 %v2517_v37, %v2517_v37  ;;  %vm2215_vm12 = vcmp.ge.f32.partialorder %v1885_v41, 0.0  ;;  %vm2118_vm13 = vcmp.ge.f32.partialorder %v1496_v31, 0.0 }
 0x187   : > { %v5881_v47 = vpop.f32.mrb[73].mxu0  ;;  %v5883_v0 = vpop.f32.mrb[73].mxu1  ;;  %v4298_v49 = vpack.c.bf16 %v2617_v51, %v2617_v51  ;;  %v2515_v19 = vsel %vm2115_vm11, %v1485_v36, %v2315_v8  ;;  %v2415_v62 = vmul.f32 0.01, %v1885_v41  ;;  %v2318_v40 = vmul.f32 0.01, %v1496_v31 }
 0x188   : > { %v5885_v11 = vpop.f32.mrb[74].mxu0  ;;  %v5887_v50 = vpop.f32.mrb[74].mxu1  ;;  %v4196_v52 = vpack.c.bf16 %v2515_v19, %v2515_v19  ;;  %3518 = vst.msk [vmem:[%s5234_s23 + $0xe8] sm:$0xf] %vm3459_vm1, %v4198_v48  ;;  %vm2218_vm14 = vcmp.ge.f32.partialorder %v1896_v46, 0.0  ;;  %vm2116_vm15 = vcmp.ge.f32.partialorder %v1488_v61, 0.0  ;;  %v1888_v32 = vadd.f32 %v5595_v33, %v5730_v9 }
 0x189   : > { %v5889_v54 = vpop.f32.mrb[75].mxu0  ;;  %3618 = vst.msk [vmem:[%s5234_s23 + $0x278] sm:$0xf] %vm3459_vm1, %v4298_v49  ;;  %v2418_v25 = vmul.f32 0.01, %v1896_v46  ;;  %v2615_v12 = vsel %vm2215_vm12, %v1885_v41, %v2415_v62  ;;  %v2518_v60 = vsel %vm2118_vm13, %v1496_v31, %v2318_v40  ;;  %v1509_v2 = vadd.f32 %v5595_v33, %v5742_v4  ;;  %v5901_v10 = vpop.f32.mrb[75].mxu1 }
 0x18a   : > { %v2316_v57 = vmul.f32 0.01, %v1488_v61  ;;  %3516 = vst.msk [vmem:[%s5234_s23 + $0xe0] sm:$0xf] %vm3459_vm1, %v4196_v52  ;;  %v4296_v34 = vpack.c.bf16 %v2615_v12, %v2615_v12  ;;  %v4199_v6 = vpack.c.bf16 %v2518_v60, %v2518_v60  ;;  %vm2216_vm0 = vcmp.ge.f32.partialorder %v1888_v32, 0.0 }
 0x18b   : > { %v2618_v21 = vsel %vm2218_vm14, %v1896_v46, %v2418_v25  ;;  %v2416_v28 = vmul.f32 0.01, %v1888_v32  ;;  %vm2121_vm2 = vcmp.ge.f32.partialorder %v1509_v2, 0.0  ;;  %v2321_v9 = vmul.f32 0.01, %v1509_v2 }
 0x18c   : > { %v2516_v5 = vsel %vm2116_vm15, %v1488_v61, %v2316_v57  ;;  %v4299_v36 = vpack.c.bf16 %v2618_v21, %v2618_v21  ;;  %3616 = vst.msk [vmem:[%s5234_s23 + $0x270] sm:$0xf] %vm3459_vm1, %v4296_v34  ;;  %3519 = vst.msk [vmem:[%s5234_s23 + $0xec] sm:$0xf] %vm3459_vm1, %v4199_v6  ;;  %v1909_v4 = vadd.f32 %v5595_v33, %v5744_v16  ;;  %v5911_v44 = vpop.f32.mrb[76].mxu0  ;;  %v5913_v42 = vpop.f32.mrb[76].mxu1 }
 0x18d   : > { %v4197_v27 = vpack.c.bf16 %v2516_v5, %v2516_v5  ;;  %v1501_v35 = vadd.f32 %v5595_v33, %v5746_v23  ;;  %v2616_v3 = vsel %vm2216_vm0, %v1888_v32, %v2416_v28  ;;  %v1901_v8 = vadd.f32 %v5595_v33, %v5748_v39  ;;  %v5925_v23 = vpop.f32.mrb[77].mxu0  ;;  %v5927_v31 = vpop.f32.mrb[77].mxu1 }
 0x18e   : > { %3619 = vst.msk [vmem:[%s5234_s23 + $0x27c] sm:$0xf] %vm3459_vm1, %v4299_v36  ;;  %v1512_v41 = vadd.f32 %v5595_v33, %v5758_v63  ;;  %v1912_v16 = vadd.f32 %v5595_v33, %v5760_v20  ;;  %v4297_v37 = vpack.c.bf16 %v2616_v3, %v2616_v3  ;;  %v2521_v51 = vsel %vm2121_vm2, %v1509_v2, %v2321_v9  ;;  %v5929_v61 = vpop.f32.mrb[78].mxu0  ;;  %v5931_v48 = vpop.f32.mrb[78].mxu1 }
 0x18f   : > { %3517 = vst.msk [vmem:[%s5234_s23 + $0xe4] sm:$0xf] %vm3459_vm1, %v4197_v27  ;;  %vm2221_vm3 = vcmp.ge.f32.partialorder %v1909_v4, 0.0  ;;  %v2421_v46 = vmul.f32 0.01, %v1909_v4  ;;  %v4202_v39 = vpack.c.bf16 %v2521_v51, %v2521_v51  ;;  %vm2119_vm4 = vcmp.ge.f32.partialorder %v1501_v35, 0.0 }
 0x190   : > { %v2319_v63 = vmul.f32 0.01, %v1501_v35  ;;  %vm2219_vm5 = vcmp.ge.f32.partialorder %v1901_v8, 0.0  ;;  %v5933_v49 = vpop.f32.mrb[79].mxu0  ;;  %v5935_v20 = vpop.f32.mrb[79].mxu1  ;;  %vm2122_vm6 = vcmp.ge.f32.partialorder %v1512_v41, 0.0  ;;  %v1504_v2 = vadd.f32 %v5595_v33, %v5772_v18 }
 0x191   : > { %3617 = vst.msk [vmem:[%s5234_s23 + $0x274] sm:$0xf] %vm3459_vm1, %v4297_v37  ;;  %v2621_v19 = vsel %vm2221_vm3, %v1909_v4, %v2421_v46  ;;  %v2419_v52 = vmul.f32 0.01, %v1901_v8  ;;  %v2322_v62 = vmul.f32 0.01, %v1512_v41  ;;  %v1904_v5 = vadd.f32 %v5595_v33, %v5774_v45 }
 0x192   : > { %3522 = vst.msk [vmem:[%s5234_s23 + $0xf8] sm:$0xf] %vm3459_vm1, %v4202_v39  ;;  %v4302_v40 = vpack.c.bf16 %v2621_v19, %v2621_v19  ;;  %v2519_v25 = vsel %vm2119_vm4, %v1501_v35, %v2319_v63  ;;  %vm2222_vm7 = vcmp.ge.f32.partialorder %v1912_v16, 0.0  ;;  %v2422_v57 = vmul.f32 0.01, %v1912_v16 }
 0x193   : > { %v4200_v12 = vpack.c.bf16 %v2519_v25, %v2519_v25  ;;  %v2619_v60 = vsel %vm2219_vm5, %v1901_v8, %v2419_v52  ;;  %v2522_v32 = vsel %vm2122_vm6, %v1512_v41, %v2322_v62  ;;  %vm2120_vm8 = vcmp.ge.f32.partialorder %v1504_v2, 0.0 }
 0x194   : > { %3622 = vst.msk [vmem:[%s5234_s23 + $0x288] sm:$0xf] %vm3459_vm1, %v4302_v40  ;;  %v4300_v34 = vpack.c.bf16 %v2619_v60, %v2619_v60  ;;  %v4203_v6 = vpack.c.bf16 %v2522_v32, %v2522_v32  ;;  %v2622_v21 = vsel %vm2222_vm7, %v1912_v16, %v2422_v57  ;;  %v2320_v27 = vmul.f32 0.01, %v1504_v2  ;;  %v5951_v9 = vpop.f32.mrb[80].mxu0  ;;  %v5953_v18 = vpop.f32.mrb[80].mxu1 }
 0x195   : > { %3520 = vst.msk [vmem:[%s5234_s23 + $0xf0] sm:$0xf] %vm3459_vm1, %v4200_v12  ;;  %v4303_v36 = vpack.c.bf16 %v2622_v21, %v2622_v21  ;;  %v1525_v28 = vadd.f32 %v5595_v33, %v5782_v26  ;;  %vm2220_vm9 = vcmp.ge.f32.partialorder %v1904_v5, 0.0  ;;  %v2420_v4 = vmul.f32 0.01, %v1904_v5  ;;  %v5963_v3 = vpop.f32.mrb[81].mxu0 }
 0x196   : > { %3620 = vst.msk [vmem:[%s5234_s23 + $0x280] sm:$0xf] %vm3459_vm1, %v4300_v34  ;;  %3523 = vst.msk [vmem:[%s5234_s23 + $0xfc] sm:$0xf] %vm3459_vm1, %v4203_v6  ;;  %v1925_v45 = vadd.f32 %v5595_v33, %v5784_v29  ;;  %v1517_v35 = vadd.f32 %v5595_v33, %v5790_v55  ;;  %v5965_v8 = vpop.f32.mrb[81].mxu1  ;;  %v2520_v26 = vsel %vm2120_vm8, %v1504_v2, %v2320_v27  ;;  %v5971_v37 = vpop.f32.mrb[82].mxu0 }
 0x197   : > { %3623 = vst.msk [vmem:[%s5234_s23 + $0x28c] sm:$0xf] %vm3459_vm1, %v4303_v36  ;;  %vm2125_vm10 = vcmp.ge.f32.partialorder %v1525_v28, 0.0  ;;  %v2325_v41 = vmul.f32 0.01, %v1525_v28  ;;  %v1917_v16 = vadd.f32 %v5595_v33, %v5792_v14  ;;  %v5973_v51 = vpop.f32.mrb[82].mxu1  ;;  %v4201_v29 = vpack.c.bf16 %v2520_v26, %v2520_v26 }
 0x198   : > { %v2620_v55 = vsel %vm2220_vm9, %v1904_v5, %v2420_v4  ;;  %vm2225_vm11 = vcmp.ge.f32.partialorder %v1925_v45, 0.0  ;;  %v2425_v46 = vmul.f32 0.01, %v1925_v45  ;;  %v5975_v39 = vpop.f32.mrb[83].mxu0  ;;  %v5977_v63 = vpop.f32.mrb[83].mxu1  ;;  %vm2123_vm12 = vcmp.ge.f32.partialorder %v1517_v35, 0.0 }
 0x199   : > { %v4301_v19 = vpack.c.bf16 %v2620_v55, %v2620_v55  ;;  %v2525_v52 = vsel %vm2125_vm10, %v1525_v28, %v2325_v41  ;;  %v2323_v62 = vmul.f32 0.01, %v1517_v35  ;;  %3521 = vst.msk [vmem:[%s5234_s23 + $0xf4] sm:$0xf] %vm3459_vm1, %v4201_v29  ;;  %vm2223_vm13 = vcmp.ge.f32.partialorder %v1917_v16, 0.0 }
 0x19a   : > { %v4206_v14 = vpack.c.bf16 %v2525_v52, %v2525_v52  ;;  %v2625_v40 = vsel %vm2225_vm11, %v1925_v45, %v2425_v46  ;;  %v2423_v25 = vmul.f32 0.01, %v1917_v16  ;;  %v1528_v60 = vadd.f32 %v5595_v33, %v5798_v15 }
 0x19b   : > { %3621 = vst.msk [vmem:[%s5234_s23 + $0x284] sm:$0xf] %vm3459_vm1, %v4301_v19  ;;  %v4306_v57 = vpack.c.bf16 %v2625_v40, %v2625_v40  ;;  %v2523_v12 = vsel %vm2123_vm12, %v1517_v35, %v2323_v62  ;;  %v1928_v32 = vadd.f32 %v5595_v33, %v5800_v58  ;;  %v1520_v6 = vadd.f32 %v5595_v33, %v5810_v22 }
 0x19c   : > { %3526 = vst.msk [vmem:[%s5234_s23 + $0x108] sm:$0xf] %vm3459_vm1, %v4206_v14  ;;  %v4204_v2 = vpack.c.bf16 %v2523_v12, %v2523_v12  ;;  %v2623_v34 = vsel %vm2223_vm13, %v1917_v16, %v2423_v25  ;;  %v1920_v21 = vadd.f32 %v5595_v33, %v5812_v56  ;;  %vm2126_vm14 = vcmp.ge.f32.partialorder %v1528_v60, 0.0  ;;  %v5995_v15 = vpop.f32.mrb[84].mxu0  ;;  %v5997_v58 = vpop.f32.mrb[84].mxu1 }
 0x19d   : > { %3626 = vst.msk [vmem:[%s5234_s23 + $0x298] sm:$0xf] %vm3459_vm1, %v4306_v57  ;;  %v4304_v5 = vpack.c.bf16 %v2623_v34, %v2623_v34  ;;  %v2326_v36 = vmul.f32 0.01, %v1528_v60  ;;  %vm2226_vm15 = vcmp.ge.f32.partialorder %v1928_v32, 0.0  ;;  %vm2124_vm0 = vcmp.ge.f32.partialorder %v1520_v6, 0.0 }
 0x19e   : > { %3524 = vst.msk [vmem:[%s5234_s23 + $0x100] sm:$0xf] %vm3459_vm1, %v4204_v2  ;;  %v2426_v27 = vmul.f32 0.01, %v1928_v32  ;;  %v2324_v28 = vmul.f32 0.01, %v1520_v6  ;;  %v1541_v4 = vadd.f32 %v5595_v33, %v5826_v59  ;;  %v1941_v45 = vadd.f32 %v5595_v33, %v5828_v30 }
 0x19f   : > { %vm2224_vm2 = vcmp.ge.f32.partialorder %v1920_v21, 0.0  ;;  %3624 = vst.msk [vmem:[%s5234_s23 + $0x290] sm:$0xf] %vm3459_vm1, %v4304_v5  ;;  %v2526_v22 = vsel %vm2126_vm14, %v1528_v60, %v2326_v36  ;;  %v2424_v56 = vmul.f32 0.01, %v1920_v21  ;;  %v6007_v35 = vpop.f32.mrb[85].mxu0  ;;  %v1533_v55 = vadd.f32 %v5595_v33, %v5836_v7 }
 0x1a0   : > { %v6009_v26 = vpop.f32.mrb[85].mxu1  ;;  %v4207_v41 = vpack.c.bf16 %v2526_v22, %v2526_v22  ;;  %v2626_v16 = vsel %vm2226_vm15, %v1928_v32, %v2426_v27  ;;  %v2524_v29 = vsel %vm2124_vm0, %v1520_v6, %v2324_v28  ;;  %v6014_v46 = vpop.f32.mrb[86].mxu0  ;;  %vm2129_vm3 = vcmp.ge.f32.partialorder %v1541_v4, 0.0 }
 0x1a1   : > { %v6016_v59 = vpop.f32.mrb[86].mxu1  ;;  %v4307_v19 = vpack.c.bf16 %v2626_v16, %v2626_v16  ;;  %v4205_v52 = vpack.c.bf16 %v2524_v29, %v2524_v29  ;;  %v2624_v30 = vsel %vm2224_vm2, %v1920_v21, %v2424_v56  ;;  %v6019_v62 = vpop.f32.mrb[87].mxu0  ;;  %v2329_v25 = vmul.f32 0.01, %v1541_v4 }
 0x1a2   : > { %v6021_v14 = vpop.f32.mrb[87].mxu1  ;;  %3527 = vst.msk [vmem:[%s5234_s23 + $0x10c] sm:$0xf] %vm3459_vm1, %v4207_v41  ;;  %v4305_v40 = vpack.c.bf16 %v2624_v30, %v2624_v30  ;;  %vm2229_vm4 = vcmp.ge.f32.partialorder %v1941_v45, 0.0  ;;  %v2429_v7 = vmul.f32 0.01, %v1941_v45  ;;  %v1933_v12 = vadd.f32 %v5595_v33, %v5838_v38 }
 0x1a3   : > { %3627 = vst.msk [vmem:[%s5234_s23 + $0x29c] sm:$0xf] %vm3459_vm1, %v4307_v19  ;;  %3525 = vst.msk [vmem:[%s5234_s23 + $0x104] sm:$0xf] %vm3459_vm1, %v4205_v52  ;;  %vm2127_vm5 = vcmp.ge.f32.partialorder %v1533_v55, 0.0  ;;  %v1544_v60 = vadd.f32 %v5595_v33, %v5842_v1  ;;  %v2529_v32 = vsel %vm2129_vm3, %v1541_v4, %v2329_v25  ;;  %v1944_v34 = vadd.f32 %v5595_v33, %v5844_v53 }
 0x1a4   : > { %v2327_v57 = vmul.f32 0.01, %v1533_v55  ;;  %3625 = vst.msk [vmem:[%s5234_s23 + $0x294] sm:$0xf] %vm3459_vm1, %v4305_v40  ;;  %v2629_v2 = vsel %vm2229_vm4, %v1941_v45, %v2429_v7  ;;  %v1536_v6 = vadd.f32 %v5595_v33, %v5854_v24  ;;  %v4210_v21 = vpack.c.bf16 %v2529_v32, %v2529_v32  ;;  %v6039_v38 = vpop.f32.mrb[88].mxu0  ;;  %v6041_v1 = vpop.f32.mrb[88].mxu1 }
 0x1a5   : > { %v4310_v5 = vpack.c.bf16 %v2629_v2, %v2629_v2  ;;  %vm2227_vm6 = vcmp.ge.f32.partialorder %v1933_v12, 0.0  ;;  %v2427_v28 = vmul.f32 0.01, %v1933_v12  ;;  %vm2130_vm7 = vcmp.ge.f32.partialorder %v1544_v60, 0.0  ;;  %v6043_v56 = vpop.f32.mrb[89].mxu0  ;;  %v6055_v29 = vpop.f32.mrb[89].mxu1 }
 0x1a6   : > { %v2527_v36 = vsel %vm2127_vm5, %v1533_v55, %v2327_v57  ;;  %v2330_v22 = vmul.f32 0.01, %v1544_v60  ;;  %3530 = vst.msk [vmem:[%s5234_s23 + $0x118] sm:$0xf] %vm3459_vm1, %v4210_v21  ;;  %vm2230_vm8 = vcmp.ge.f32.partialorder %v1944_v34, 0.0  ;;  %vm2128_vm9 = vcmp.ge.f32.partialorder %v1536_v6, 0.0 }
 0x1a7   : > { %v4208_v27 = vpack.c.bf16 %v2527_v36, %v2527_v36  ;;  %3630 = vst.msk [vmem:[%s5234_s23 + $0x2a8] sm:$0xf] %vm3459_vm1, %v4310_v5  ;;  %v2430_v53 = vmul.f32 0.01, %v1944_v34  ;;  %v2328_v24 = vmul.f32 0.01, %v1536_v6  ;;  %v2627_v4 = vsel %vm2227_vm6, %v1933_v12, %v2427_v28 }
 0x1a8   : > { %v2530_v45 = vsel %vm2130_vm7, %v1544_v60, %v2330_v22  ;;  %v1936_v41 = vadd.f32 %v5595_v33, %v5856_v13  ;;  %v1557_v16 = vadd.f32 %v5595_v33, %v5871_v43  ;;  %v6057_v55 = vpop.f32.mrb[90].mxu0  ;;  %v4308_v19 = vpack.c.bf16 %v2627_v4, %v2627_v4  ;;  %v6059_v25 = vpop.f32.mrb[90].mxu1  ;;  %v6070_v60 = vld [vmem:[%s5221_s20] ss:$0 sm:$0xff] }
 0x1a9   : > { %3528 = vst.msk [vmem:[%s5234_s23 + $0x110] sm:$0xf] %vm3459_vm1, %v4208_v27  ;;  %v4211_v52 = vpack.c.bf16 %v2530_v45, %v2530_v45  ;;  %v2630_v30 = vsel %vm2230_vm8, %v1944_v34, %v2430_v53  ;;  %v2528_v40 = vsel %vm2128_vm9, %v1536_v6, %v2328_v24  ;;  %v6061_v7 = vpop.f32.mrb[91].mxu0  ;;  %v6063_v33 = vpop.f32.mrb[91].mxu1  ;;  %v1957_v32 = vadd.f32 %v6070_v60, %v5873_v17 }
 0x1aa   : > { %v4311_v13 = vpack.c.bf16 %v2630_v30, %v2630_v30  ;;  %v4209_v57 = vpack.c.bf16 %v2528_v40, %v2528_v40  ;;  %vm2228_vm10 = vcmp.ge.f32.partialorder %v1936_v41, 0.0  ;;  %v2428_v12 = vmul.f32 0.01, %v1936_v41  ;;  %3628 = vst.msk [vmem:[%s5234_s23 + $0x2a0] sm:$0xf] %vm3459_vm1, %v4308_v19 }
 0x1ab   : > { %3531 = vst.msk [vmem:[%s5234_s23 + $0x11c] sm:$0xf] %vm3459_vm1, %v4211_v52  ;;  %vm2133_vm11 = vcmp.ge.f32.partialorder %v1557_v16, 0.0  ;;  %v2333_v43 = vmul.f32 0.01, %v1557_v16  ;;  %v1549_v2 = vadd.f32 %v6070_v60, %v5881_v47  ;;  %v1949_v6 = vadd.f32 %v6070_v60, %v5883_v0 }
 0x1ac   : > { %3631 = vst.msk [vmem:[%s5234_s23 + $0x2ac] sm:$0xf] %vm3459_vm1, %v4311_v13  ;;  %3529 = vst.msk [vmem:[%s5234_s23 + $0x114] sm:$0xf] %vm3459_vm1, %v4209_v57  ;;  %v2628_v34 = vsel %vm2228_vm10, %v1936_v41, %v2428_v12  ;;  %v1560_v21 = vadd.f32 %v6070_v60, %v5885_v11  ;;  %v1960_v5 = vadd.f32 %v6070_v60, %v5887_v50  ;;  %vm2233_vm12 = vcmp.ge.f32.partialorder %v1957_v32, 0.0  ;;  %v6086_v27 = vpop.f32.mrb[92].mxu0 }
 0x1ad   : > { %v4309_v36 = vpack.c.bf16 %v2628_v34, %v2628_v34  ;;  %v2533_v17 = vsel %vm2133_vm11, %v1557_v16, %v2333_v43  ;;  %v2433_v47 = vmul.f32 0.01, %v1957_v32  ;;  %v6088_v28 = vpop.f32.mrb[92].mxu1  ;;  %vm2131_vm13 = vcmp.ge.f32.partialorder %v1549_v2, 0.0  ;;  %v6090_v0 = vpop.f32.mrb[93].mxu0 }
 0x1ae   : > { %v4214_v22 = vpack.c.bf16 %v2533_v17, %v2533_v17  ;;  %v2331_v53 = vmul.f32 0.01, %v1549_v2  ;;  %vm2231_vm14 = vcmp.ge.f32.partialorder %v1949_v6, 0.0  ;;  %v6092_v24 = vpop.f32.mrb[93].mxu1  ;;  %v2431_v50 = vmul.f32 0.01, %v1949_v6 }
 0x1af   : > { %3629 = vst.msk [vmem:[%s5234_s23 + $0x2a4] sm:$0xf] %vm3459_vm1, %v4309_v36  ;;  %v2633_v11 = vsel %vm2233_vm12, %v1957_v32, %v2433_v47  ;;  %vm2134_vm15 = vcmp.ge.f32.partialorder %v1560_v21, 0.0  ;;  %v2334_v4 = vmul.f32 0.01, %v1560_v21  ;;  %v6096_v45 = vpop.f32.mrb[94].mxu0  ;;  %v1552_v12 = vadd.f32 %v6070_v60, %v5889_v54 }
 0x1b0   : > { %3534 = vst.msk [vmem:[%s5234_s23 + $0x128] sm:$0xf] %vm3459_vm1, %v4214_v22  ;;  %v4314_v41 = vpack.c.bf16 %v2633_v11, %v2633_v11  ;;  %v2531_v16 = vsel %vm2131_vm13, %v1549_v2, %v2331_v53  ;;  %vm2234_vm0 = vcmp.ge.f32.partialorder %v1960_v5, 0.0  ;;  %v2434_v19 = vmul.f32 0.01, %v1960_v5  ;;  %v6100_v52 = vpop.f32.mrb[94].mxu1 }
 0x1b1   : > { %v6102_v30 = vpop.f32.mrb[95].mxu0  ;;  %v4212_v40 = vpack.c.bf16 %v2531_v16, %v2531_v16  ;;  %v2631_v13 = vsel %vm2231_vm14, %v1949_v6, %v2431_v50  ;;  %v2534_v57 = vsel %vm2134_vm15, %v1560_v21, %v2334_v4  ;;  %v6107_v43 = vpop.f32.mrb[95].mxu1  ;;  %v1952_v36 = vadd.f32 %v6070_v60, %v5901_v10 }
 0x1b2   : > { %3634 = vst.msk [vmem:[%s5234_s23 + $0x2b8] sm:$0xf] %vm3459_vm1, %v4314_v41  ;;  %v4312_v32 = vpack.c.bf16 %v2631_v13, %v2631_v13  ;;  %v4215_v2 = vpack.c.bf16 %v2534_v57, %v2534_v57  ;;  %v2634_v34 = vsel %vm2234_vm0, %v1960_v5, %v2434_v19  ;;  %vm2132_vm2 = vcmp.ge.f32.partialorder %v1552_v12, 0.0 }
 0x1b3   : > { %3532 = vst.msk [vmem:[%s5234_s23 + $0x120] sm:$0xf] %vm3459_vm1, %v4212_v40  ;;  %v4315_v17 = vpack.c.bf16 %v2634_v34, %v2634_v34  ;;  %v2332_v6 = vmul.f32 0.01, %v1552_v12  ;;  %v1573_v21 = vadd.f32 %v6070_v60, %v5911_v44  ;;  %vm2232_vm3 = vcmp.ge.f32.partialorder %v1952_v36, 0.0 }
 0x1b4   : > { %3632 = vst.msk [vmem:[%s5234_s23 + $0x2b0] sm:$0xf] %vm3459_vm1, %v4312_v32  ;;  %3535 = vst.msk [vmem:[%s5234_s23 + $0x12c] sm:$0xf] %vm3459_vm1, %v4215_v2  ;;  %v2432_v54 = vmul.f32 0.01, %v1952_v36  ;;  %v1973_v5 = vadd.f32 %v6070_v60, %v5913_v42  ;;  %v1565_v10 = vadd.f32 %v6070_v60, %v5925_v23  ;;  %v1965_v44 = vadd.f32 %v6070_v60, %v5927_v31 }
 0x1b5   : > { %3635 = vst.msk [vmem:[%s5234_s23 + $0x2bc] sm:$0xf] %vm3459_vm1, %v4315_v17  ;;  %v2532_v47 = vsel %vm2132_vm2, %v1552_v12, %v2332_v6  ;;  %vm2137_vm4 = vcmp.ge.f32.partialorder %v1573_v21, 0.0  ;;  %v2337_v22 = vmul.f32 0.01, %v1573_v21  ;;  %v6129_v53 = vpop.f32.mrb[96].mxu0  ;;  %v1576_v6 = vadd.f32 %v6070_v60, %v5929_v61 }
 0x1b6   : > { %v6131_v11 = vpop.f32.mrb[96].mxu1  ;;  %v4213_v50 = vpack.c.bf16 %v2532_v47, %v2532_v47  ;;  %v2632_v4 = vsel %vm2232_vm3, %v1952_v36, %v2432_v54  ;;  %vm2237_vm5 = vcmp.ge.f32.partialorder %v1973_v5, 0.0  ;;  %v2437_v42 = vmul.f32 0.01, %v1973_v5  ;;  %v6133_v41 = vpop.f32.mrb[97].mxu0 }
 0x1b7   : > { %v6135_v23 = vpop.f32.mrb[97].mxu1  ;;  %v4313_v16 = vpack.c.bf16 %v2632_v4, %v2632_v4  ;;  %v2537_v19 = vsel %vm2137_vm4, %v1573_v21, %v2337_v22  ;;  %vm2135_vm6 = vcmp.ge.f32.partialorder %v1565_v10, 0.0  ;;  %v2335_v40 = vmul.f32 0.01, %v1565_v10  ;;  %v6137_v13 = vpop.f32.mrb[98].mxu0 }
 0x1b8   : > { %v6139_v31 = vpop.f32.mrb[98].mxu1  ;;  %3533 = vst.msk [vmem:[%s5234_s23 + $0x124] sm:$0xf] %vm3459_vm1, %v4213_v50  ;;  %v4218_v57 = vpack.c.bf16 %v2537_v19, %v2537_v19  ;;  %v2637_v12 = vsel %vm2237_vm5, %v1973_v5, %v2437_v42  ;;  %vm2235_vm7 = vcmp.ge.f32.partialorder %v1965_v44, 0.0  ;;  %v2435_v32 = vmul.f32 0.01, %v1965_v44 }
 0x1b9   : > { %v6143_v2 = vpop.f32.mrb[99].mxu0  ;;  %v6145_v34 = vpop.f32.mrb[99].mxu1  ;;  %3633 = vst.msk [vmem:[%s5234_s23 + $0x2b4] sm:$0xf] %vm3459_vm1, %v4313_v16  ;;  %v4318_v36 = vpack.c.bf16 %v2637_v12, %v2637_v12  ;;  %v2535_v17 = vsel %vm2135_vm6, %v1565_v10, %v2335_v40  ;;  %v1976_v21 = vadd.f32 %v6070_v60, %v5931_v48  ;;  %v1568_v47 = vadd.f32 %v6070_v60, %v5933_v49 }
 0x1ba   : > { %3538 = vst.msk [vmem:[%s5234_s23 + $0x138] sm:$0xf] %vm3459_vm1, %v4218_v57  ;;  %v4216_v54 = vpack.c.bf16 %v2535_v17, %v2535_v17  ;;  %v2635_v5 = vsel %vm2235_vm7, %v1965_v44, %v2435_v32  ;;  %v1968_v22 = vadd.f32 %v6070_v60, %v5935_v20  ;;  %vm2138_vm8 = vcmp.ge.f32.partialorder %v1576_v6, 0.0 }
 0x1bb   : > { %3638 = vst.msk [vmem:[%s5234_s23 + $0x2c8] sm:$0xf] %vm3459_vm1, %v4318_v36  ;;  %v4316_v10 = vpack.c.bf16 %v2635_v5, %v2635_v5  ;;  %v2338_v50 = vmul.f32 0.01, %v1576_v6  ;;  %vm2238_vm9 = vcmp.ge.f32.partialorder %v1976_v21, 0.0  ;;  %vm2136_vm10 = vcmp.ge.f32.partialorder %v1568_v47, 0.0 }
 0x1bc   : > { %3536 = vst.msk [vmem:[%s5234_s23 + $0x130] sm:$0xf] %vm3459_vm1, %v4216_v54  ;;  %v2438_v61 = vmul.f32 0.01, %v1976_v21  ;;  %v2336_v48 = vmul.f32 0.01, %v1568_v47  ;;  %v1589_v20 = vadd.f32 %v6070_v60, %v5951_v9  ;;  %v1989_v4 = vadd.f32 %v6070_v60, %v5953_v18 }
 0x1bd   : > { %vm2236_vm11 = vcmp.ge.f32.partialorder %v1968_v22, 0.0  ;;  %3636 = vst.msk [vmem:[%s5234_s23 + $0x2c0] sm:$0xf] %vm3459_vm1, %v4316_v10  ;;  %v2538_v44 = vsel %vm2138_vm8, %v1576_v6, %v2338_v50  ;;  %v2436_v49 = vmul.f32 0.01, %v1968_v22  ;;  %v1581_v40 = vadd.f32 %v6070_v60, %v5963_v3 }
 0x1be   : > { %v4219_v42 = vpack.c.bf16 %v2538_v44, %v2538_v44  ;;  %v2638_v16 = vsel %vm2238_vm9, %v1976_v21, %v2438_v61  ;;  %v2536_v19 = vsel %vm2136_vm10, %v1568_v47, %v2336_v48  ;;  %vm2141_vm12 = vcmp.ge.f32.partialorder %v1589_v20, 0.0 }
 0x1bf   : > { %v4319_v57 = vpack.c.bf16 %v2638_v16, %v2638_v16  ;;  %v4217_v12 = vpack.c.bf16 %v2536_v19, %v2536_v19  ;;  %v2636_v32 = vsel %vm2236_vm11, %v1968_v22, %v2436_v49  ;;  %v2341_v17 = vmul.f32 0.01, %v1589_v20 }
 0x1c0   : > { %3539 = vst.msk [vmem:[%s5234_s23 + $0x13c] sm:$0xf] %vm3459_vm1, %v4219_v42  ;;  %v4317_v36 = vpack.c.bf16 %v2636_v32, %v2636_v32  ;;  %vm2241_vm13 = vcmp.ge.f32.partialorder %v1989_v4, 0.0  ;;  %v2441_v9 = vmul.f32 0.01, %v1989_v4  ;;  %vm2139_vm14 = vcmp.ge.f32.partialorder %v1581_v40, 0.0 }
 0x1c1   : > { %3639 = vst.msk [vmem:[%s5234_s23 + $0x2cc] sm:$0xf] %vm3459_vm1, %v4319_v57  ;;  %3537 = vst.msk [vmem:[%s5234_s23 + $0x134] sm:$0xf] %vm3459_vm1, %v4217_v12  ;;  %v2339_v18 = vmul.f32 0.01, %v1581_v40  ;;  %v1981_v3 = vadd.f32 %v6070_v60, %v5965_v8  ;;  %v1592_v6 = vadd.f32 %v6070_v60, %v5971_v37  ;;  %v2541_v21 = vsel %vm2141_vm12, %v1589_v20, %v2341_v17 }
 0x1c2   : > { %3637 = vst.msk [vmem:[%s5234_s23 + $0x2c4] sm:$0xf] %vm3459_vm1, %v4317_v36  ;;  %v2641_v54 = vsel %vm2241_vm13, %v1989_v4, %v2441_v9  ;;  %v1992_v5 = vadd.f32 %v6070_v60, %v5973_v51  ;;  %v1584_v47 = vadd.f32 %v6070_v60, %v5975_v39  ;;  %v4222_v22 = vpack.c.bf16 %v2541_v21, %v2541_v21 }
 0x1c3   : > { %v4322_v10 = vpack.c.bf16 %v2641_v54, %v2641_v54  ;;  %v2539_v50 = vsel %vm2139_vm14, %v1581_v40, %v2339_v18  ;;  %vm2239_vm15 = vcmp.ge.f32.partialorder %v1981_v3, 0.0  ;;  %v2439_v61 = vmul.f32 0.01, %v1981_v3 }
 0x1c4   : > { %v4220_v8 = vpack.c.bf16 %v2539_v50, %v2539_v50  ;;  %vm2142_vm0 = vcmp.ge.f32.partialorder %v1592_v6, 0.0  ;;  %v2342_v48 = vmul.f32 0.01, %v1592_v6  ;;  %3542 = vst.msk [vmem:[%s5234_s23 + $0x148] sm:$0xf] %vm3459_vm1, %v4222_v22  ;;  %vm2242_vm2 = vcmp.ge.f32.partialorder %v1992_v5, 0.0 }
 0x1c5   : > { %3642 = vst.msk [vmem:[%s5234_s23 + $0x2d8] sm:$0xf] %vm3459_vm1, %v4322_v10  ;;  %v2442_v37 = vmul.f32 0.01, %v1992_v5  ;;  %vm2140_vm3 = vcmp.ge.f32.partialorder %v1584_v47, 0.0  ;;  %v2639_v39 = vsel %vm2239_vm15, %v1981_v3, %v2439_v61  ;;  %v1984_v49 = vadd.f32 %v6070_v60, %v5977_v63 }
 0x1c6   : > { %v2340_v51 = vmul.f32 0.01, %v1584_v47  ;;  %3540 = vst.msk [vmem:[%s5234_s23 + $0x140] sm:$0xf] %vm3459_vm1, %v4220_v8  ;;  %v2542_v44 = vsel %vm2142_vm0, %v1592_v6, %v2342_v48  ;;  %v1605_v20 = vadd.f32 %v6070_v60, %v5995_v15  ;;  %v4320_v4 = vpack.c.bf16 %v2639_v39, %v2639_v39 }
 0x1c7   : > { %v4223_v42 = vpack.c.bf16 %v2542_v44, %v2542_v44  ;;  %v2642_v16 = vsel %vm2242_vm2, %v1992_v5, %v2442_v37  ;;  %vm2240_vm4 = vcmp.ge.f32.partialorder %v1984_v49, 0.0  ;;  %v2440_v12 = vmul.f32 0.01, %v1984_v49 }
 0x1c8   : > { %v2540_v19 = vsel %vm2140_vm3, %v1584_v47, %v2340_v51  ;;  %v4323_v40 = vpack.c.bf16 %v2642_v16, %v2642_v16  ;;  %3640 = vst.msk [vmem:[%s5234_s23 + $0x2d0] sm:$0xf] %vm3459_vm1, %v4320_v4  ;;  %vm2145_vm5 = vcmp.ge.f32.partialorder %v1605_v20, 0.0  ;;  %v2345_v32 = vmul.f32 0.01, %v1605_v20 }
 0x1c9   : > { %v4221_v57 = vpack.c.bf16 %v2540_v19, %v2540_v19  ;;  %3543 = vst.msk [vmem:[%s5234_s23 + $0x14c] sm:$0xf] %vm3459_vm1, %v4223_v42  ;;  %v2005_v63 = vadd.f32 %v6070_v60, %v5997_v58  ;;  %v1597_v15 = vadd.f32 %v6070_v60, %v6007_v35  ;;  %v2640_v36 = vsel %vm2240_vm4, %v1984_v49, %v2440_v12 }
 0x1ca   : > { %3643 = vst.msk [vmem:[%s5234_s23 + $0x2dc] sm:$0xf] %vm3459_vm1, %v4323_v40  ;;  %v1997_v17 = vadd.f32 %v6070_v60, %v6009_v26  ;;  %v1608_v9 = vadd.f32 %v6070_v60, %v6014_v46  ;;  %v2008_v18 = vadd.f32 %v6070_v60, %v6016_v59  ;;  %v4321_v58 = vpack.c.bf16 %v2640_v36, %v2640_v36 }
 0x1cb   : > { %3541 = vst.msk [vmem:[%s5234_s23 + $0x144] sm:$0xf] %vm3459_vm1, %v4221_v57  ;;  %v2545_v3 = vsel %vm2145_vm5, %v1605_v20, %v2345_v32  ;;  %vm2245_vm6 = vcmp.ge.f32.partialorder %v2005_v63, 0.0  ;;  %v2445_v6 = vmul.f32 0.01, %v2005_v63  ;;  %vm2143_vm7 = vcmp.ge.f32.partialorder %v1597_v15, 0.0 }
 0x1cc   : > { %v4226_v35 = vpack.c.bf16 %v2545_v3, %v2545_v3  ;;  %v2343_v21 = vmul.f32 0.01, %v1597_v15  ;;  %vm2243_vm8 = vcmp.ge.f32.partialorder %v1997_v17, 0.0  ;;  %3641 = vst.msk [vmem:[%s5234_s23 + $0x2d4] sm:$0xf] %vm3459_vm1, %v4321_v58  ;;  %vm2146_vm9 = vcmp.ge.f32.partialorder %v1608_v9, 0.0 }
 0x1cd   : > { %v2645_v54 = vsel %vm2245_vm6, %v2005_v63, %v2445_v6  ;;  %v2443_v26 = vmul.f32 0.01, %v1997_v17  ;;  %v2346_v5 = vmul.f32 0.01, %v1608_v9  ;;  %vm2246_vm10 = vcmp.ge.f32.partialorder %v2008_v18, 0.0 }
 0x1ce   : > { %3546 = vst.msk [vmem:[%s5234_s23 + $0x158] sm:$0xf] %vm3459_vm1, %v4226_v35  ;;  %v4326_v46 = vpack.c.bf16 %v2645_v54, %v2645_v54  ;;  %v2543_v59 = vsel %vm2143_vm7, %v1597_v15, %v2343_v21  ;;  %v2446_v47 = vmul.f32 0.01, %v2008_v18  ;;  %v1600_v8 = vadd.f32 %v6070_v60, %v6019_v62 }
 0x1cf   : > { %v4224_v22 = vpack.c.bf16 %v2543_v59, %v2543_v59  ;;  %v2643_v10 = vsel %vm2243_vm8, %v1997_v17, %v2443_v26  ;;  %v2546_v50 = vsel %vm2146_vm9, %v1608_v9, %v2346_v5  ;;  %v2000_v51 = vadd.f32 %v6070_v60, %v6021_v14 }
 0x1d0   : > { %3646 = vst.msk [vmem:[%s5234_s23 + $0x2e8] sm:$0xf] %vm3459_vm1, %v4326_v46  ;;  %v4324_v61 = vpack.c.bf16 %v2643_v10, %v2643_v10  ;;  %v4227_v48 = vpack.c.bf16 %v2546_v50, %v2546_v50  ;;  %v2646_v37 = vsel %vm2246_vm10, %v2008_v18, %v2446_v47  ;;  %vm2144_vm11 = vcmp.ge.f32.partialorder %v1600_v8, 0.0 }
 0x1d1   : > { %3544 = vst.msk [vmem:[%s5234_s23 + $0x150] sm:$0xf] %vm3459_vm1, %v4224_v22  ;;  %v4327_v39 = vpack.c.bf16 %v2646_v37, %v2646_v37  ;;  %v2344_v44 = vmul.f32 0.01, %v1600_v8  ;;  %v1621_v49 = vadd.f32 %v6070_v60, %v6039_v38  ;;  %vm2244_vm12 = vcmp.ge.f32.partialorder %v2000_v51, 0.0 }
 0x1d2   : > { %3644 = vst.msk [vmem:[%s5234_s23 + $0x2e0] sm:$0xf] %vm3459_vm1, %v4324_v61  ;;  %3547 = vst.msk [vmem:[%s5234_s23 + $0x15c] sm:$0xf] %vm3459_vm1, %v4227_v48  ;;  %v2444_v62 = vmul.f32 0.01, %v2000_v51  ;;  %v2021_v20 = vadd.f32 %v6070_v60, %v6041_v1  ;;  %v1613_v14 = vadd.f32 %v6070_v60, %v6043_v56  ;;  %v2013_v38 = vadd.f32 %v6070_v60, %v6055_v29 }
 0x1d3   : > { %3647 = vst.msk [vmem:[%s5234_s23 + $0x2ec] sm:$0xf] %vm3459_vm1, %v4327_v39  ;;  %v2544_v4 = vsel %vm2144_vm11, %v1600_v8, %v2344_v44  ;;  %vm2149_vm13 = vcmp.ge.f32.partialorder %v1621_v49, 0.0  ;;  %v2349_v42 = vmul.f32 0.01, %v1621_v49  ;;  %v1624_v36 = vadd.f32 %v6070_v60, %v6057_v55 }
 0x1d4   : > { %v4225_v16 = vpack.c.bf16 %v2544_v4, %v2544_v4  ;;  %v2644_v19 = vsel %vm2244_vm12, %v2000_v51, %v2444_v62  ;;  %vm2249_vm14 = vcmp.ge.f32.partialorder %v2021_v20, 0.0  ;;  %v2449_v40 = vmul.f32 0.01, %v2021_v20 }
 0x1d5   : > { %v4325_v57 = vpack.c.bf16 %v2644_v19, %v2644_v19  ;;  %v2549_v12 = vsel %vm2149_vm13, %v1621_v49, %v2349_v42  ;;  %vm2147_vm15 = vcmp.ge.f32.partialorder %v1613_v14, 0.0  ;;  %v2347_v1 = vmul.f32 0.01, %v1613_v14 }
 0x1d6   : > { %3545 = vst.msk [vmem:[%s5234_s23 + $0x154] sm:$0xf] %vm3459_vm1, %v4225_v16  ;;  %v4230_v56 = vpack.c.bf16 %v2549_v12, %v2549_v12  ;;  %v2649_v32 = vsel %vm2249_vm14, %v2021_v20, %v2449_v40  ;;  %vm2247_vm0 = vcmp.ge.f32.partialorder %v2013_v38, 0.0  ;;  %v2447_v63 = vmul.f32 0.01, %v2013_v38 }
 0x1d7   : > { %3645 = vst.msk [vmem:[%s5234_s23 + $0x2e4] sm:$0xf] %vm3459_vm1, %v4325_v57  ;;  %v4330_v29 = vpack.c.bf16 %v2649_v32, %v2649_v32  ;;  %v2547_v15 = vsel %vm2147_vm15, %v1613_v14, %v2347_v1  ;;  %v2024_v17 = vadd.f32 %v6070_v60, %v6059_v25  ;;  %v1616_v58 = vadd.f32 %v6070_v60, %v6061_v7 }
 0x1d8   : > { %3550 = vst.msk [vmem:[%s5234_s23 + $0x168] sm:$0xf] %vm3459_vm1, %v4230_v56  ;;  %v4228_v9 = vpack.c.bf16 %v2547_v15, %v2547_v15  ;;  %v2647_v18 = vsel %vm2247_vm0, %v2013_v38, %v2447_v63  ;;  %v2016_v3 = vadd.f32 %v6070_v60, %v6063_v33  ;;  %vm2150_vm2 = vcmp.ge.f32.partialorder %v1624_v36, 0.0 }
 0x1d9   : > { %3650 = vst.msk [vmem:[%s5234_s23 + $0x2f8] sm:$0xf] %vm3459_vm1, %v4330_v29  ;;  %v4328_v6 = vpack.c.bf16 %v2647_v18, %v2647_v18  ;;  %v2350_v35 = vmul.f32 0.01, %v1624_v36  ;;  %vm2250_vm3 = vcmp.ge.f32.partialorder %v2024_v17, 0.0  ;;  %vm2148_vm4 = vcmp.ge.f32.partialorder %v1616_v58, 0.0 }
 0x1da   : > { %3548 = vst.msk [vmem:[%s5234_s23 + $0x160] sm:$0xf] %vm3459_vm1, %v4228_v9  ;;  %v2450_v55 = vmul.f32 0.01, %v2024_v17  ;;  %v2348_v25 = vmul.f32 0.01, %v1616_v58  ;;  %v1637_v33 = vadd.f32 %v6070_v60, %v6086_v27  ;;  %v2037_v54 = vadd.f32 %v6070_v60, %v6088_v28 }
 0x1db   : > { %vm2248_vm5 = vcmp.ge.f32.partialorder %v2016_v3, 0.0  ;;  %3648 = vst.msk [vmem:[%s5234_s23 + $0x2f0] sm:$0xf] %vm3459_vm1, %v4328_v6  ;;  %v2550_v21 = vsel %vm2150_vm2, %v1624_v36, %v2350_v35  ;;  %v2448_v7 = vmul.f32 0.01, %v2016_v3  ;;  %v1629_v59 = vadd.f32 %v6070_v60, %v6090_v0 }
 0x1dc   : > { %v4231_v26 = vpack.c.bf16 %v2550_v21, %v2550_v21  ;;  %v2650_v5 = vsel %vm2250_vm3, %v2024_v17, %v2450_v55  ;;  %v2548_v46 = vsel %vm2148_vm4, %v1616_v58, %v2348_v25  ;;  %vm2153_vm6 = vcmp.ge.f32.partialorder %v1637_v33, 0.0 }
 0x1dd   : > { %v4331_v47 = vpack.c.bf16 %v2650_v5, %v2650_v5  ;;  %v4229_v22 = vpack.c.bf16 %v2548_v46, %v2548_v46  ;;  %v2648_v10 = vsel %vm2248_vm5, %v2016_v3, %v2448_v7  ;;  %v2353_v8 = vmul.f32 0.01, %v1637_v33 }
 0x1de   : > { %3551 = vst.msk [vmem:[%s5234_s23 + $0x16c] sm:$0xf] %vm3459_vm1, %v4231_v26  ;;  %v4329_v50 = vpack.c.bf16 %v2648_v10, %v2648_v10  ;;  %vm2253_vm7 = vcmp.ge.f32.partialorder %v2037_v54, 0.0  ;;  %v2453_v27 = vmul.f32 0.01, %v2037_v54  ;;  %vm2151_vm8 = vcmp.ge.f32.partialorder %v1629_v59, 0.0 }
 0x1df   : > { %3651 = vst.msk [vmem:[%s5234_s23 + $0x2fc] sm:$0xf] %vm3459_vm1, %v4331_v47  ;;  %3549 = vst.msk [vmem:[%s5234_s23 + $0x164] sm:$0xf] %vm3459_vm1, %v4229_v22  ;;  %v2351_v28 = vmul.f32 0.01, %v1629_v59  ;;  %v2029_v0 = vadd.f32 %v6070_v60, %v6092_v24  ;;  %v1640_v61 = vadd.f32 %v6070_v60, %v6096_v45  ;;  %v2553_v48 = vsel %vm2153_vm6, %v1637_v33, %v2353_v8 }
 0x1e0   : > { %3649 = vst.msk [vmem:[%s5234_s23 + $0x2f4] sm:$0xf] %vm3459_vm1, %v4329_v50  ;;  %v2653_v37 = vsel %vm2253_vm7, %v2037_v54, %v2453_v27  ;;  %v2040_v51 = vadd.f32 %v6070_v60, %v6100_v52  ;;  %v1632_v39 = vadd.f32 %v6070_v60, %v6102_v30  ;;  %v4234_v44 = vpack.c.bf16 %v2553_v48, %v2553_v48 }
 0x1e1   : > { %v4334_v49 = vpack.c.bf16 %v2653_v37, %v2653_v37  ;;  %v2551_v62 = vsel %vm2151_vm8, %v1629_v59, %v2351_v28  ;;  %vm2251_vm9 = vcmp.ge.f32.partialorder %v2029_v0, 0.0  ;;  %v2451_v20 = vmul.f32 0.01, %v2029_v0 }
 0x1e2   : > { %v4232_v24 = vpack.c.bf16 %v2551_v62, %v2551_v62  ;;  %vm2154_vm10 = vcmp.ge.f32.partialorder %v1640_v61, 0.0  ;;  %v2354_v14 = vmul.f32 0.01, %v1640_v61  ;;  %3554 = vst.msk [vmem:[%s5234_s23 + $0x178] sm:$0xf] %vm3459_vm1, %v4234_v44  ;;  %vm2254_vm11 = vcmp.ge.f32.partialorder %v2040_v51, 0.0 }
 0x1e3   : > { %3654 = vst.msk [vmem:[%s5234_s23 + $0x308] sm:$0xf] %vm3459_vm1, %v4334_v49  ;;  %v2454_v45 = vmul.f32 0.01, %v2040_v51  ;;  %vm2152_vm12 = vcmp.ge.f32.partialorder %v1632_v39, 0.0  ;;  %v2651_v30 = vsel %vm2251_vm9, %v2029_v0, %v2451_v20  ;;  %v2032_v42 = vadd.f32 %v6070_v60, %v6107_v43 }
 0x1e4   : > { %v2352_v52 = vmul.f32 0.01, %v1632_v39  ;;  %3552 = vst.msk [vmem:[%s5234_s23 + $0x170] sm:$0xf] %vm3459_vm1, %v4232_v24  ;;  %v2554_v4 = vsel %vm2154_vm10, %v1640_v61, %v2354_v14  ;;  %v1653_v38 = vadd.f32 %v6070_v60, %v6129_v53  ;;  %v4332_v16 = vpack.c.bf16 %v2651_v30, %v2651_v30 }
 0x1e5   : > { %v4235_v19 = vpack.c.bf16 %v2554_v4, %v2554_v4  ;;  %v2654_v40 = vsel %vm2254_vm11, %v2040_v51, %v2454_v45  ;;  %vm2252_vm13 = vcmp.ge.f32.partialorder %v2032_v42, 0.0  ;;  %v2452_v56 = vmul.f32 0.01, %v2032_v42 }
 0x1e6   : > { %v2552_v57 = vsel %vm2152_vm12, %v1632_v39, %v2352_v52  ;;  %v4335_v12 = vpack.c.bf16 %v2654_v40, %v2654_v40  ;;  %3652 = vst.msk [vmem:[%s5234_s23 + $0x300] sm:$0xf] %vm3459_vm1, %v4332_v16  ;;  %vm2157_vm14 = vcmp.ge.f32.partialorder %v1653_v38, 0.0  ;;  %v2357_v32 = vmul.f32 0.01, %v1653_v38 }
 0x1e7   : > { %v4233_v1 = vpack.c.bf16 %v2552_v57, %v2552_v57  ;;  %3555 = vst.msk [vmem:[%s5234_s23 + $0x17c] sm:$0xf] %vm3459_vm1, %v4235_v19  ;;  %v2053_v43 = vadd.f32 %v6070_v60, %v6131_v11  ;;  %v1645_v53 = vadd.f32 %v6070_v60, %v6133_v41  ;;  %v2652_v63 = vsel %vm2252_vm13, %v2032_v42, %v2452_v56 }
 0x1e8   : > { %3655 = vst.msk [vmem:[%s5234_s23 + $0x30c] sm:$0xf] %vm3459_vm1, %v4335_v12  ;;  %v2045_v29 = vadd.f32 %v6070_v60, %v6135_v23  ;;  %v1656_v15 = vadd.f32 %v6070_v60, %v6137_v13  ;;  %v2056_v36 = vadd.f32 %v6070_v60, %v6139_v31  ;;  %v4333_v11 = vpack.c.bf16 %v2652_v63, %v2652_v63 }
 0x1e9   : > { %3553 = vst.msk [vmem:[%s5234_s23 + $0x174] sm:$0xf] %vm3459_vm1, %v4233_v1  ;;  %v2557_v17 = vsel %vm2157_vm14, %v1653_v38, %v2357_v32  ;;  %vm2257_vm15 = vcmp.ge.f32.partialorder %v2053_v43, 0.0  ;;  %v2457_v9 = vmul.f32 0.01, %v2053_v43  ;;  %vm2155_vm0 = vcmp.ge.f32.partialorder %v1645_v53, 0.0 }
 0x1ea   : > { %v4238_v41 = vpack.c.bf16 %v2557_v17, %v2557_v17  ;;  %v2355_v18 = vmul.f32 0.01, %v1645_v53  ;;  %vm2255_vm2 = vcmp.ge.f32.partialorder %v2045_v29, 0.0  ;;  %3653 = vst.msk [vmem:[%s5234_s23 + $0x304] sm:$0xf] %vm3459_vm1, %v4333_v11  ;;  %vm2158_vm3 = vcmp.ge.f32.partialorder %v1656_v15, 0.0 }
 0x1eb   : > { %v2657_v58 = vsel %vm2257_vm15, %v2053_v43, %v2457_v9  ;;  %v2455_v23 = vmul.f32 0.01, %v2045_v29  ;;  %v2358_v3 = vmul.f32 0.01, %v1656_v15  ;;  %vm2258_vm4 = vcmp.ge.f32.partialorder %v2056_v36, 0.0 }
 0x1ec   : > { %3558 = vst.msk [vmem:[%s5234_s23 + $0x188] sm:$0xf] %vm3459_vm1, %v4238_v41  ;;  %v4338_v13 = vpack.c.bf16 %v2657_v58, %v2657_v58  ;;  %v2555_v31 = vsel %vm2155_vm0, %v1645_v53, %v2355_v18  ;;  %v2458_v6 = vmul.f32 0.01, %v2056_v36  ;;  %v1648_v21 = vadd.f32 %v6070_v60, %v6143_v2 }
 0x1ed   : > { %v4236_v35 = vpack.c.bf16 %v2555_v31, %v2555_v31  ;;  %v2655_v55 = vsel %vm2255_vm2, %v2045_v29, %v2455_v23  ;;  %v2558_v25 = vsel %vm2158_vm3, %v1656_v15, %v2358_v3  ;;  %v2048_v26 = vadd.f32 %v6070_v60, %v6145_v34 }
 0x1ee   : > { %3658 = vst.msk [vmem:[%s5234_s23 + $0x318] sm:$0xf] %vm3459_vm1, %v4338_v13  ;;  %v4336_v7 = vpack.c.bf16 %v2655_v55, %v2655_v55  ;;  %v4239_v33 = vpack.c.bf16 %v2558_v25, %v2558_v25  ;;  %v2658_v54 = vsel %vm2258_vm4, %v2056_v36, %v2458_v6  ;;  %vm2156_vm5 = vcmp.ge.f32.partialorder %v1648_v21, 0.0 }
 0x1ef   : > { %3556 = vst.msk [vmem:[%s5234_s23 + $0x180] sm:$0xf] %vm3459_vm1, %v4236_v35  ;;  %v4339_v5 = vpack.c.bf16 %v2658_v54, %v2658_v54  ;;  %v2356_v46 = vmul.f32 0.01, %v1648_v21  ;;  %vm2256_vm6 = vcmp.ge.f32.partialorder %v2048_v26, 0.0 }
 0x1f0   : > { %3656 = vst.msk [vmem:[%s5234_s23 + $0x310] sm:$0xf] %vm3459_vm1, %v4336_v7  ;;  %3559 = vst.msk [vmem:[%s5234_s23 + $0x18c] sm:$0xf] %vm3459_vm1, %v4239_v33  ;;  %v2456_v2 = vmul.f32 0.01, %v2048_v26 }
 0x1f1   : > { %3659 = vst.msk [vmem:[%s5234_s23 + $0x31c] sm:$0xf] %vm3459_vm1, %v4339_v5  ;;  %v2556_v59 = vsel %vm2156_vm5, %v1648_v21, %v2356_v46 }
 0x1f2   : > { %v4237_v47 = vpack.c.bf16 %v2556_v59, %v2556_v59  ;;  %v2656_v22 = vsel %vm2256_vm6, %v2048_v26, %v2456_v2 }
 0x1f3   : > { %v4337_v10 = vpack.c.bf16 %v2656_v22, %v2656_v22 }
 0x1f4   : > { %3557 = vst.msk [vmem:[%s5234_s23 + $0x184] sm:$0xf] %vm3459_vm1, %v4237_v47 }
 0x1f5   : > { %3657 = vst.msk [vmem:[%s5234_s23 + $0x314] sm:$0xf] %vm3459_vm1, %v4337_v10 }
 0x1f6 PF: > { %s13_s12 = sadd.s32 1, %s4781_s12  }
 0x1f7   : > { %p10_p4 = scmp.ge.s32.totalorder %s13_s12, 4  }
 0x1f9   :  { %12 = sbr.rel (!%p10_p4) target bundleno = 1 (0x1), region = 65 }

// kernel: rnd_forward.5
= control target key start
LH: loop header
LB: loop body
LE: loop exit
PB: predicated region body
PF: predicated region fallthrough
CT: control target
= control target key end

     0   :  { %s2261_s12 = smov 0   ;;  %s2566_s0 = inlined_call_operand.vmem [shape: bf16[2,324,512], index: 0, kind: input, shape index: {}]   ;;  %s2567_s1 = inlined_call_operand.vmem [shape: bf16[2,512,64], index: 1, kind: input, shape index: {}]   ;;  %s2568_s2 = inlined_call_operand.vmem [shape: f32[2,1,64], index: 2, kind: input, shape index: {}]   ;;  %s2569_s3 = inlined_call_operand.vmem [shape: bf16[2,324,64], index: 3, kind: output, shape index: {}]  }
   0x1 LB: > { %s1772_s13 = sadd.s32 4294967295, %s2238_s12   ;;  %p1776_p0 = scmp.ge.s32.totalorder %s2238_s12, 1  ;;  %s2238_s12 = sphi %s2261_s12, %s13_s12  }
   0x2   : > { %p155_p1 = scmp.lt.s32.totalorder %s2238_s12, 3 }
   0x4   : > { %p156_p2 = pnand %p1776_p0, %p155_p1 }
   0x5   : > { %p187_p3 = scmp.lt.s32.totalorder (!%p156_p2), %s1772_s13, 1  ;;  %v2240_v0 = vmov (!%p156_p2), 0   ;;  %vm1653_vm1 = vcmask (!%p156_p2), 519168  }
   0x6   : > { %159 = sbr.rel (%p156_p2) target bundleno = 462 (0x1ce), region = 32  ;;  %965 = vmatprep.subr.bf16.mxu1 (!%p156_p2), %v2240_v0  ;;  %1165 = vmatprep.subr.bf16.mxu0 (!%p156_p2), %v2240_v0 }
   0xd   : > { %s2571_s13 = smov (!%p187_p3, %s1772_s13), 1 }
   0xe   : > { %s1941_s14 = sshll.u32 %s2571_s13, 8  ;;  %s2065_s18 = smul.u32 656, %s2571_s13 }
   0xf   : > { %s2277_s17 = scalar_lea.vmem %s2567_s1, %s1941_s14  ;;  %s199_s24 = scalar_lea.vmem %s2568_s2, %s2571_s13 }
  0x10   : > { %v2076_v1 = vld [vmem:[%s2277_s17] sm:$0xff]   ;;  %v2078_v3 = vld [vmem:[%s2277_s17 + $0x8] sm:$0xff]   ;;  %v2080_v5 = vld [vmem:[%s2277_s17 + $0x10] sm:$0xff]   ;;  %s2314_s21 = scalar_lea.vmem %s2566_s0, %s2065_s18  ;;  %s2066_s25 = smul.u32 164, %s2571_s13 }
  0x11   : > { %v2077_v2 = vld [vmem:[%s2277_s17 + $0x80] sm:$0xff]   ;;  %966 = vmatpush1.bf16.msra.mxu1 %v2076_v1  ;;  %v2079_v4 = vld [vmem:[%s2277_s17 + $0x88] sm:$0xff]   ;;  %v2081_v6 = vld [vmem:[%s2277_s17 + $0x90] sm:$0xff]  }
  0x12   : > { %1166 = vmatpush1.bf16.msra.mxu0 %v2077_v2  ;;  %967 = vmatprep.subr.bf16.mxu1 %v2240_v0  ;;  %v2082_v7 = vld [vmem:[%s2277_s17 + $0x18] sm:$0xff]   ;;  %v2084_v9 = vld [vmem:[%s2277_s17 + $0x20] sm:$0xff]   ;;  %v2086_v11 = vld [vmem:[%s2277_s17 + $0x28] sm:$0xff]   ;;  %s2441_s28 = scalar_lea.vmem %s2569_s3, %s2066_s25 }
  0x13   : > { %1167 = vmatprep.subr.bf16.mxu0 %v2240_v0  ;;  %v2083_v8 = vld [vmem:[%s2277_s17 + $0x98] sm:$0xff]   ;;  %v2085_v10 = vld [vmem:[%s2277_s17 + $0xa0] sm:$0xff]   ;;  %v2087_v12 = vld [vmem:[%s2277_s17 + $0xa8] sm:$0xff]  }
  0x14   : > { %v2088_v13 = vld [vmem:[%s2277_s17 + $0x30] sm:$0xff]   ;;  %v2090_v15 = vld [vmem:[%s2277_s17 + $0x38] sm:$0xff]   ;;  %v2092_v17 = vld [vmem:[%s2277_s17 + $0x40] sm:$0xff]  }
  0x15   : > { %968 = vmatpush1.bf16.msra.mxu1 %v2078_v3  ;;  %v2089_v14 = vld [vmem:[%s2277_s17 + $0xb0] sm:$0xff]   ;;  %v2091_v16 = vld [vmem:[%s2277_s17 + $0xb8] sm:$0xff]   ;;  %v2093_v18 = vld [vmem:[%s2277_s17 + $0xc0] sm:$0xff]  }
  0x16   : > { %1168 = vmatpush1.bf16.msra.mxu0 %v2079_v4  ;;  %969 = vmatprep.subr.bf16.mxu1 %v2240_v0  ;;  %v2110_v19 = vld [vmem:[%s2314_s21 + $0x4] ss:$16 sps:$4 sm:$0xff]   ;;  %v2094_v20 = vld [vmem:[%s2277_s17 + $0x48] sm:$0xff]   ;;  %v2098_v25 = vld [vmem:[%s2277_s17 + $0x58] sm:$0xff]  }
  0x17   : > { %1169 = vmatprep.subr.bf16.mxu0 %v2240_v0  ;;  %v2113_v21 = vld [vmem:[%s2314_s21 + $0xc] ss:$16 sps:$4 sm:$0xff]   ;;  %997 = vmatprep.mubr.bf16.mxu1 %v2110_v19  ;;  %v2096_v23 = vld [vmem:[%s2277_s17 + $0x50] sm:$0xff]   ;;  %v2100_v27 = vld [vmem:[%s2277_s17 + $0x60] sm:$0xff]  }
  0x18   : > { %v2095_v22 = vld [vmem:[%s2277_s17 + $0xc8] sm:$0xff]   ;;  %1197 = vmatprep.mubr.bf16.mxu0 %v2113_v21  ;;  %v2097_v24 = vld [vmem:[%s2277_s17 + $0xd0] sm:$0xff]   ;;  %v2099_v26 = vld [vmem:[%s2277_s17 + $0xd8] sm:$0xff]  }
  0x19   : > { %970 = vmatpush1.bf16.msra.mxu1 %v2080_v5  ;;  %v2101_v28 = vld [vmem:[%s2277_s17 + $0xe0] sm:$0xff]   ;;  %v2102_v29 = vld [vmem:[%s2277_s17 + $0x68] sm:$0xff]   ;;  %v2104_v31 = vld [vmem:[%s2277_s17 + $0x70] sm:$0xff]  }
  0x1a   : > { %1170 = vmatpush1.bf16.msra.mxu0 %v2081_v6  ;;  %971 = vmatprep.subr.bf16.mxu1 %v2240_v0  ;;  %v2103_v30 = vld [vmem:[%s2277_s17 + $0xe8] sm:$0xff]   ;;  %v2105_v32 = vld [vmem:[%s2277_s17 + $0xf0] sm:$0xff]   ;;  %v2106_v33 = vld [vmem:[%s2277_s17 + $0x78] sm:$0xff]  }
  0x1b   : > { %1171 = vmatprep.subr.bf16.mxu0 %v2240_v0  ;;  %v2107_v34 = vld [vmem:[%s2277_s17 + $0xf8] sm:$0xff]   ;;  %v2108_v35 = vld [vmem:[%s2314_s21] ss:$16 sps:$4 sm:$0xff]   ;;  %v2114_v37 = vld [vmem:[%s2314_s21 + $0x24] ss:$16 sps:$4 sm:$0xff]  }
  0x1c   : > { %v2111_v36 = vld [vmem:[%s2314_s21 + $0x8] ss:$16 sps:$4 sm:$0xff]   ;;  %v2116_v38 = vld [vmem:[%s2314_s21 + $0x2c] ss:$16 sps:$4 sm:$0xff]   ;;  %v2118_v39 = vld [vmem:[%s2314_s21 + $0x20] ss:$16 sps:$4 sm:$0xff]  }
  0x1d   : > { %972 = vmatpush1.bf16.msra.mxu1 %v2082_v7  ;;  %v2119_v40 = vld [vmem:[%s2314_s21 + $0x28] ss:$16 sps:$4 sm:$0xff]   ;;  %v2120_v41 = vld [vmem:[%s2314_s21 + $0x44] ss:$16 sps:$4 sm:$0xff]   ;;  %v2122_v42 = vld [vmem:[%s2314_s21 + $0x4c] ss:$16 sps:$4 sm:$0xff]  }
  0x1e   : > { %1172 = vmatpush1.bf16.msra.mxu0 %v2083_v8  ;;  %973 = vmatprep.subr.bf16.mxu1 %v2240_v0  ;;  %v2124_v43 = vld [vmem:[%s2314_s21 + $0x40] ss:$16 sps:$4 sm:$0xff]   ;;  %v2125_v44 = vld [vmem:[%s2314_s21 + $0x48] ss:$16 sps:$4 sm:$0xff]   ;;  %v2126_v45 = vld [vmem:[%s2314_s21 + $0x64] ss:$16 sps:$4 sm:$0xff]  }
  0x1f   : > { %1173 = vmatprep.subr.bf16.mxu0 %v2240_v0  ;;  %v2128_v46 = vld [vmem:[%s2314_s21 + $0x6c] ss:$16 sps:$4 sm:$0xff]   ;;  %v2130_v47 = vld [vmem:[%s2314_s21 + $0x60] ss:$16 sps:$4 sm:$0xff]   ;;  %v2131_v48 = vld [vmem:[%s2314_s21 + $0x68] ss:$16 sps:$4 sm:$0xff]  }
  0x20   : > { %v2132_v49 = vld [vmem:[%s2314_s21 + $0x84] ss:$16 sps:$4 sm:$0xff]   ;;  %v2134_v50 = vld [vmem:[%s2314_s21 + $0x8c] ss:$16 sps:$4 sm:$0xff]   ;;  %v2136_v51 = vld [vmem:[%s2314_s21 + $0x80] ss:$16 sps:$4 sm:$0xff]  }
  0x21   : > { %974 = vmatpush1.bf16.msra.mxu1 %v2084_v9  ;;  %v2137_v52 = vld [vmem:[%s2314_s21 + $0x88] ss:$16 sps:$4 sm:$0xff]   ;;  %v2138_v53 = vld [vmem:[%s2314_s21 + $0xa4] ss:$16 sps:$4 sm:$0xff]   ;;  %v2140_v54 = vld [vmem:[%s2314_s21 + $0xac] ss:$16 sps:$4 sm:$0xff]  }
  0x22   : > { %1174 = vmatpush1.bf16.msra.mxu0 %v2085_v10  ;;  %975 = vmatprep.subr.bf16.mxu1 %v2240_v0  ;;  %v2142_v55 = vld [vmem:[%s2314_s21 + $0xa0] ss:$16 sps:$4 sm:$0xff]   ;;  %v2143_v56 = vld [vmem:[%s2314_s21 + $0xa8] ss:$16 sps:$4 sm:$0xff]   ;;  %v2144_v57 = vld [vmem:[%s2314_s21 + $0xc4] ss:$16 sps:$4 sm:$0xff]  }
  0x23   : > { %1175 = vmatprep.subr.bf16.mxu0 %v2240_v0  ;;  %v2146_v58 = vld [vmem:[%s2314_s21 + $0xcc] ss:$16 sps:$4 sm:$0xff]   ;;  %v2148_v59 = vld [vmem:[%s2314_s21 + $0xc0] ss:$16 sps:$4 sm:$0xff]   ;;  %v2149_v60 = vld [vmem:[%s2314_s21 + $0xc8] ss:$16 sps:$4 sm:$0xff]  }
  0x24   : > { %v2150_v61 = vld [vmem:[%s2314_s21 + $0xe4] ss:$16 sps:$4 sm:$0xff]   ;;  %v2152_v62 = vld [vmem:[%s2314_s21 + $0xec] ss:$16 sps:$4 sm:$0xff]   ;;  %v2154_v63 = vld [vmem:[%s2314_s21 + $0xe0] ss:$16 sps:$4 sm:$0xff]  }
  0x25   : > { %976 = vmatpush1.bf16.msra.mxu1 %v2086_v11  ;;  %v2156_v1 = vld [vmem:[%s2314_s21 + $0x104] ss:$16 sps:$4 sm:$0xff]   ;;  %v2158_v2 = vld [vmem:[%s2314_s21 + $0x10c] ss:$16 sps:$4 sm:$0xff]   ;;  %v2160_v3 = vld [vmem:[%s2314_s21 + $0x100] ss:$16 sps:$4 sm:$0xff]  }
  0x26   : > { %1176 = vmatpush1.bf16.msra.mxu0 %v2087_v12  ;;  %977 = vmatprep.subr.bf16.mxu1 %v2240_v0  ;;  %v2161_v4 = vld [vmem:[%s2314_s21 + $0x108] ss:$16 sps:$4 sm:$0xff]   ;;  %v2162_v5 = vld [vmem:[%s2314_s21 + $0x124] ss:$16 sps:$4 sm:$0xff]   ;;  %v2164_v6 = vld [vmem:[%s2314_s21 + $0x12c] ss:$16 sps:$4 sm:$0xff]  }
  0x27   : > { %1177 = vmatprep.subr.bf16.mxu0 %v2240_v0  ;;  %v2166_v7 = vld [vmem:[%s2314_s21 + $0x120] ss:$16 sps:$4 sm:$0xff]   ;;  %v2167_v8 = vld [vmem:[%s2314_s21 + $0x128] ss:$16 sps:$4 sm:$0xff]   ;;  %v2168_v9 = vld [vmem:[%s2314_s21 + $0x144] ss:$16 sps:$4 sm:$0xff]  }
  0x28   : > { %v2170_v10 = vld [vmem:[%s2314_s21 + $0x14c] ss:$16 sps:$4 sm:$0xff]   ;;  %v2172_v11 = vld [vmem:[%s2314_s21 + $0x140] ss:$16 sps:$4 sm:$0xff]   ;;  %v2173_v12 = vld [vmem:[%s2314_s21 + $0x148] ss:$16 sps:$4 sm:$0xff]  }
  0x29   : > { %978 = vmatpush1.bf16.msra.mxu1 %v2088_v13  ;;  %v2174_v13 = vld [vmem:[%s2314_s21 + $0x164] ss:$16 sps:$4 sm:$0xff]   ;;  %v2184_v19 = vld [vmem:[%s2314_s21 + $0x180] ss:$16 sps:$4 sm:$0xff]  }
  0x2a   : > { %1178 = vmatpush1.bf16.msra.mxu0 %v2089_v14  ;;  %979 = vmatprep.subr.bf16.mxu1 %v2240_v0  ;;  %v2176_v14 = vld [vmem:[%s2314_s21 + $0x16c] ss:$16 sps:$4 sm:$0xff]   ;;  %v2186_v21 = vld [vmem:[%s2314_s21 + $0x1a4] ss:$16 sps:$4 sm:$0xff]  }
  0x2b   : > { %1179 = vmatprep.subr.bf16.mxu0 %v2240_v0 }
  0x2d   : > { %980 = vmatpush1.bf16.msra.mxu1 %v2090_v15  ;;  %v2178_v15 = vld [vmem:[%s2314_s21 + $0x160] ss:$16 sps:$4 sm:$0xff]  }
  0x2e   : > { %1180 = vmatpush1.bf16.msra.mxu0 %v2091_v16  ;;  %981 = vmatprep.subr.bf16.mxu1 %v2240_v0  ;;  %v2179_v16 = vld [vmem:[%s2314_s21 + $0x168] ss:$16 sps:$4 sm:$0xff]  }
  0x2f   : > { %1181 = vmatprep.subr.bf16.mxu0 %v2240_v0 }
  0x31   : > { %982 = vmatpush1.bf16.msra.mxu1 %v2092_v17  ;;  %v2180_v17 = vld [vmem:[%s2314_s21 + $0x184] ss:$16 sps:$4 sm:$0xff]  }
  0x32   : > { %1182 = vmatpush1.bf16.msra.mxu0 %v2093_v18  ;;  %983 = vmatprep.subr.bf16.mxu1 %v2240_v0  ;;  %v2182_v18 = vld [vmem:[%s2314_s21 + $0x18c] ss:$16 sps:$4 sm:$0xff]  }
  0x33   : > { %1183 = vmatprep.subr.bf16.mxu0 %v2240_v0 }
  0x35   : > { %984 = vmatpush1.bf16.msra.mxu1 %v2094_v20  ;;  %v2185_v20 = vld [vmem:[%s2314_s21 + $0x188] ss:$16 sps:$4 sm:$0xff]  }
  0x36   : > { %1184 = vmatpush1.bf16.msra.mxu0 %v2095_v22  ;;  %985 = vmatprep.subr.bf16.mxu1 %v2240_v0  ;;  %v2188_v22 = vld [vmem:[%s2314_s21 + $0x1ac] ss:$16 sps:$4 sm:$0xff]  }
  0x37   : > { %1185 = vmatprep.subr.bf16.mxu0 %v2240_v0 }
  0x39   : > { %986 = vmatpush1.bf16.msra.mxu1 %v2096_v23  ;;  %v2190_v23 = vld [vmem:[%s2314_s21 + $0x1a0] ss:$16 sps:$4 sm:$0xff]  }
  0x3a   : > { %1186 = vmatpush1.bf16.msra.mxu0 %v2097_v24  ;;  %987 = vmatprep.subr.bf16.mxu1 %v2240_v0  ;;  %v2191_v24 = vld [vmem:[%s2314_s21 + $0x1a8] ss:$16 sps:$4 sm:$0xff]  }
  0x3b   : > { %1187 = vmatprep.subr.bf16.mxu0 %v2240_v0 }
  0x3d   : > { %988 = vmatpush1.bf16.msra.mxu1 %v2098_v25  ;;  %v2192_v25 = vld [vmem:[%s2314_s21 + $0x1c4] ss:$16 sps:$4 sm:$0xff]  }
  0x3e   : > { %1188 = vmatpush1.bf16.msra.mxu0 %v2099_v26  ;;  %989 = vmatprep.subr.bf16.mxu1 %v2240_v0  ;;  %v2194_v26 = vld [vmem:[%s2314_s21 + $0x1cc] ss:$16 sps:$4 sm:$0xff]  }
  0x3f   : > { %1189 = vmatprep.subr.bf16.mxu0 %v2240_v0 }
  0x41   : > { %990 = vmatpush1.bf16.msra.mxu1 %v2100_v27  ;;  %v2196_v27 = vld [vmem:[%s2314_s21 + $0x1c0] ss:$16 sps:$4 sm:$0xff]  }
  0x42   : > { %1190 = vmatpush1.bf16.msra.mxu0 %v2101_v28  ;;  %991 = vmatprep.subr.bf16.mxu1 %v2240_v0  ;;  %v2197_v28 = vld [vmem:[%s2314_s21 + $0x1c8] ss:$16 sps:$4 sm:$0xff]  }
  0x43   : > { %1191 = vmatprep.subr.bf16.mxu0 %v2240_v0 }
  0x45   : > { %992 = vmatpush1.bf16.msra.mxu1 %v2102_v29  ;;  %v2198_v29 = vld [vmem:[%s2314_s21 + $0x1e4] ss:$16 sps:$4 sm:$0xff]  }
  0x46   : > { %1192 = vmatpush1.bf16.msra.mxu0 %v2103_v30  ;;  %993 = vmatprep.subr.bf16.mxu1 %v2240_v0  ;;  %v2200_v30 = vld [vmem:[%s2314_s21 + $0x1ec] ss:$16 sps:$4 sm:$0xff]  }
  0x47   : > { %1193 = vmatprep.subr.bf16.mxu0 %v2240_v0 }
  0x49   : > { %994 = vmatpush1.bf16.msra.mxu1 %v2104_v31  ;;  %v2202_v31 = vld [vmem:[%s2314_s21 + $0x1e0] ss:$16 sps:$4 sm:$0xff]  }
  0x4a   : > { %1194 = vmatpush1.bf16.msra.mxu0 %v2105_v32  ;;  %995 = vmatprep.subr.bf16.mxu1 %v2240_v0  ;;  %v2203_v32 = vld [vmem:[%s2314_s21 + $0x1e8] ss:$16 sps:$4 sm:$0xff]  }
  0x4b   : > { %1195 = vmatprep.subr.bf16.mxu0 %v2240_v0  ;;  %v2155_v0 = vld [vmem:[%s2314_s21 + $0xe8] ss:$16 sps:$4 sm:$0xff]  }
  0x4d   : > { %996 = vmatpush1.bf16.msra.mxu1 %v2106_v33  ;;  %v2204_v33 = vld [vmem:[%s2314_s21 + $0x204] ss:$16 sps:$4 sm:$0xff]  }
  0x4e   : > { %1196 = vmatpush1.bf16.msra.mxu0 %v2107_v34  ;;  %v2206_v34 = vld [vmem:[%s2314_s21 + $0x20c] ss:$16 sps:$4 sm:$0xff]  }
  0x50   : > { %998 = vmatmul.mubr.bf16.vlgmr.msra.gmra.mrb[0].mxu1 %v2108_v35  ;;  %v2208_v35 = vld [vmem:[%s2314_s21 + $0x200] ss:$16 sps:$4 sm:$0xff]  }
  0x51   : > { %1198 = vmatmul.mubr.bf16.vlgmr.msra.gmra.mrb[0].mxu0 %v2111_v36  ;;  %1005 = vmatprep.mubr.bf16.mxu1 %v2114_v37  ;;  %v2209_v36 = vld [vmem:[%s2314_s21 + $0x208] ss:$16 sps:$4 sm:$0xff]   ;;  %v2210_v37 = vld [vmem:[%s2314_s21 + $0x224] ss:$16 sps:$4 sm:$0xff]  }
  0x52   : > { %1205 = vmatprep.mubr.bf16.mxu0 %v2116_v38  ;;  %v2212_v38 = vld [vmem:[%s2314_s21 + $0x22c] ss:$16 sps:$4 sm:$0xff]  }
  0x58   : > { %1006 = vmatmul.mubr.bf16.gmra.mrb[4].mxu1 %v2118_v39  ;;  %v2214_v39 = vld [vmem:[%s2314_s21 + $0x220] ss:$16 sps:$4 sm:$0xff]  }
  0x59   : > { %1206 = vmatmul.mubr.bf16.gmra.mrb[4].mxu0 %v2119_v40  ;;  %1013 = vmatprep.mubr.bf16.mxu1 %v2120_v41  ;;  %v2215_v40 = vld [vmem:[%s2314_s21 + $0x228] ss:$16 sps:$4 sm:$0xff]   ;;  %v2216_v41 = vld [vmem:[%s2314_s21 + $0x244] ss:$16 sps:$4 sm:$0xff]  }
  0x5a   : > { %1213 = vmatprep.mubr.bf16.mxu0 %v2122_v42  ;;  %v2218_v42 = vld [vmem:[%s2314_s21 + $0x24c] ss:$16 sps:$4 sm:$0xff]  }
  0x60   : > { %1014 = vmatmul.mubr.bf16.gmra.mrb[8].mxu1 %v2124_v43  ;;  %v2220_v43 = vld [vmem:[%s2314_s21 + $0x240] ss:$16 sps:$4 sm:$0xff]  }
  0x61   : > { %1214 = vmatmul.mubr.bf16.gmra.mrb[8].mxu0 %v2125_v44  ;;  %1021 = vmatprep.mubr.bf16.mxu1 %v2126_v45  ;;  %v2221_v44 = vld [vmem:[%s2314_s21 + $0x248] ss:$16 sps:$4 sm:$0xff]   ;;  %v2222_v45 = vld [vmem:[%s2314_s21 + $0x264] ss:$16 sps:$4 sm:$0xff]  }
  0x62   : > { %1221 = vmatprep.mubr.bf16.mxu0 %v2128_v46  ;;  %v2224_v46 = vld [vmem:[%s2314_s21 + $0x26c] ss:$16 sps:$4 sm:$0xff]  }
  0x68   : > { %1022 = vmatmul.mubr.bf16.gmra.mrb[12].mxu1 %v2130_v47  ;;  %v286_v47 = vld [vmem:[%s2314_s21 + $0x280] sm:$0x33] }
  0x69   : > { %1222 = vmatmul.mubr.bf16.gmra.mrb[12].mxu0 %v2131_v48  ;;  %1029 = vmatprep.mubr.bf16.mxu1 %v2132_v49  ;;  %v287_v48 = vld [vmem:[%s2314_s21 + $0x288] sm:$0x33]  ;;  %v2226_v49 = vld [vmem:[%s2314_s21 + $0x260] ss:$16 sps:$4 sm:$0xff]  }
  0x6a   : > { %1229 = vmatprep.mubr.bf16.mxu0 %v2134_v50  ;;  %v2227_v50 = vld [vmem:[%s2314_s21 + $0x268] ss:$16 sps:$4 sm:$0xff]  }
  0x70   : > { %1030 = vmatmul.mubr.bf16.gmra.mrb[16].mxu1 %v2136_v51  ;;  %v1863_v51 = vcombine.high %v286_v47, %v286_v47 }
  0x71   : > { %1230 = vmatmul.mubr.bf16.gmra.mrb[16].mxu0 %v2137_v52  ;;  %1037 = vmatprep.mubr.bf16.mxu1 %v2138_v53  ;;  %v1865_v52 = vcombine.high %v287_v48, %v287_v48  ;;  %v1862_v53 = vcombine.low %v286_v47, %v286_v47 }
  0x72   : > { %1237 = vmatprep.mubr.bf16.mxu0 %v2140_v54  ;;  %v1864_v54 = vcombine.low %v287_v48, %v287_v48 }
  0x78   : > { %1038 = vmatmul.mubr.bf16.gmra.mrb[20].mxu1 %v2142_v55  ;;  %v2433_v55 = vld [vmem:[%s199_s24] ss:$0 sm:$0xff] }
  0x79   : > { %1238 = vmatmul.mubr.bf16.gmra.mrb[20].mxu0 %v2143_v56  ;;  %1045 = vmatprep.mubr.bf16.mxu1 %v2144_v57 }
  0x7a   : > { %1245 = vmatprep.mubr.bf16.mxu0 %v2146_v58 }
  0x80   : > { %1046 = vmatmul.mubr.bf16.gmra.mrb[24].mxu1 %v2148_v59 }
  0x81   : > { %1246 = vmatmul.mubr.bf16.gmra.mrb[24].mxu0 %v2149_v60  ;;  %1053 = vmatprep.mubr.bf16.mxu1 %v2150_v61 }
  0x82   : > { %1253 = vmatprep.mubr.bf16.mxu0 %v2152_v62 }
  0x88   : > { %1054 = vmatmul.mubr.bf16.gmra.mrb[28].mxu1 %v2154_v63 }
  0x89   : > { %1254 = vmatmul.mubr.bf16.gmra.mrb[28].mxu0 %v2155_v0  ;;  %1061 = vmatprep.mubr.bf16.mxu1 %v2156_v1 }
  0x8a   : > { %1261 = vmatprep.mubr.bf16.mxu0 %v2158_v2 }
  0x90   : > { %1062 = vmatmul.mubr.bf16.gmra.mrb[32].mxu1 %v2160_v3 }
  0x91   : > { %1262 = vmatmul.mubr.bf16.gmra.mrb[32].mxu0 %v2161_v4  ;;  %1069 = vmatprep.mubr.bf16.mxu1 %v2162_v5 }
  0x92   : > { %1269 = vmatprep.mubr.bf16.mxu0 %v2164_v6 }
  0x98   : > { %1070 = vmatmul.mubr.bf16.gmra.mrb[36].mxu1 %v2166_v7 }
  0x99   : > { %1270 = vmatmul.mubr.bf16.gmra.mrb[36].mxu0 %v2167_v8  ;;  %1077 = vmatprep.mubr.bf16.mxu1 %v2168_v9 }
  0x9a   : > { %1277 = vmatprep.mubr.bf16.mxu0 %v2170_v10 }
  0xa0   : > { %1078 = vmatmul.mubr.bf16.gmra.mrb[40].mxu1 %v2172_v11 }
  0xa1   : > { %1278 = vmatmul.mubr.bf16.gmra.mrb[40].mxu0 %v2173_v12  ;;  %1085 = vmatprep.mubr.bf16.mxu1 %v2174_v13 }
  0xa2   : > { %1285 = vmatprep.mubr.bf16.mxu0 %v2176_v14 }
  0xa8   : > { %1086 = vmatmul.mubr.bf16.gmra.mrb[44].mxu1 %v2178_v15 }
  0xa9   : > { %1286 = vmatmul.mubr.bf16.gmra.mrb[44].mxu0 %v2179_v16  ;;  %1093 = vmatprep.mubr.bf16.mxu1 %v2180_v17 }
  0xaa   : > { %1293 = vmatprep.mubr.bf16.mxu0 %v2182_v18 }
  0xb0   : > { %1094 = vmatmul.mubr.bf16.gmra.mrb[48].mxu1 %v2184_v19 }
  0xb1   : > { %1294 = vmatmul.mubr.bf16.gmra.mrb[48].mxu0 %v2185_v20  ;;  %1101 = vmatprep.mubr.bf16.mxu1 %v2186_v21 }
  0xb2   : > { %1301 = vmatprep.mubr.bf16.mxu0 %v2188_v22 }
  0xb8   : > { %1102 = vmatmul.mubr.bf16.gmra.mrb[52].mxu1 %v2190_v23 }
  0xb9   : > { %1302 = vmatmul.mubr.bf16.gmra.mrb[52].mxu0 %v2191_v24  ;;  %1109 = vmatprep.mubr.bf16.mxu1 %v2192_v25 }
  0xba   : > { %1309 = vmatprep.mubr.bf16.mxu0 %v2194_v26 }
  0xc0   : > { %1110 = vmatmul.mubr.bf16.gmra.mrb[56].mxu1 %v2196_v27 }
  0xc1   : > { %1310 = vmatmul.mubr.bf16.gmra.mrb[56].mxu0 %v2197_v28  ;;  %1117 = vmatprep.mubr.bf16.mxu1 %v2198_v29 }
  0xc2   : > { %1317 = vmatprep.mubr.bf16.mxu0 %v2200_v30 }
  0xc8   : > { %1118 = vmatmul.mubr.bf16.gmra.mrb[60].mxu1 %v2202_v31 }
  0xc9   : > { %1318 = vmatmul.mubr.bf16.gmra.mrb[60].mxu0 %v2203_v32  ;;  %1125 = vmatprep.mubr.bf16.mxu1 %v2204_v33 }
  0xca   : > { %1325 = vmatprep.mubr.bf16.mxu0 %v2206_v34 }
  0xd0   : > { %1126 = vmatmul.mubr.bf16.gmra.mrb[64].mxu1 %v2208_v35 }
  0xd1   : > { %1326 = vmatmul.mubr.bf16.gmra.mrb[64].mxu0 %v2209_v36  ;;  %1133 = vmatprep.mubr.bf16.mxu1 %v2210_v37 }
  0xd2   : > { %1333 = vmatprep.mubr.bf16.mxu0 %v2212_v38 }
  0xd8   : > { %1134 = vmatmul.mubr.bf16.gmra.mrb[68].mxu1 %v2214_v39 }
  0xd9   : > { %1334 = vmatmul.mubr.bf16.gmra.mrb[68].mxu0 %v2215_v40  ;;  %1141 = vmatprep.mubr.bf16.mxu1 %v2216_v41 }
  0xda   : > { %1341 = vmatprep.mubr.bf16.mxu0 %v2218_v42 }
  0xe0   : > { %1142 = vmatmul.mubr.bf16.gmra.mrb[72].mxu1 %v2220_v43 }
  0xe1   : > { %1342 = vmatmul.mubr.bf16.gmra.mrb[72].mxu0 %v2221_v44  ;;  %1149 = vmatprep.mubr.bf16.mxu1 %v2222_v45 }
  0xe2   : > { %1349 = vmatprep.mubr.bf16.mxu0 %v2224_v46 }
  0xe8   : > { %1150 = vmatmul.mubr.bf16.gmra.mrb[76].mxu1 %v2226_v49 }
  0xe9   : > { %1350 = vmatmul.mubr.bf16.gmra.mrb[76].mxu0 %v2227_v50  ;;  %1157 = vmatprep.mubr.bf16.mxu1 %v1863_v51 }
  0xea   : > { %1357 = vmatprep.mubr.bf16.mxu0 %v1865_v52 }
  0xf0   : > { %1158 = vmatmul.mubr.bf16.gmra.mrb[80].mxu1 %v1862_v53 }
  0xf1   : > { %1358 = vmatmul.mubr.bf16.gmra.mrb[80].mxu0 %v1864_v54 }
 0x123   : > { %v999_v56 = vpop.f32.mrb[0].mxu1 }
 0x124   : > { %v1000_v57 = vadd.f32 %v2433_v55, %v999_v56  ;;  %v1199_v58 = vpop.f32.mrb[0].mxu0  ;;  %v1001_v59 = vpop.f32.mrb[1].mxu1 }
 0x125   : > { %v1201_v60 = vpop.f32.mrb[1].mxu0  ;;  %v1002_v61 = vpop.f32.mrb[2].mxu1 }
 0x126   : > { %v1200_v62 = vadd.f32 %v1199_v58, %v1000_v57  ;;  %v1003_v63 = vadd.f32 %v2433_v55, %v1002_v61  ;;  %v1202_v0 = vpop.f32.mrb[2].mxu0  ;;  %v1004_v1 = vpop.f32.mrb[3].mxu1 }
 0x127   : > { %v1204_v2 = vpop.f32.mrb[3].mxu0 }
 0x128   : > { %vm1365_vm0 = vcmp.ge.f32.partialorder %v1200_v62, 0.0  ;;  %v1406_v3 = vmul.f32 0.01, %v1200_v62  ;;  %v1203_v4 = vadd.f32 %v1202_v0, %v1003_v63 }
 0x12a   : > { %v1447_v5 = vsel %vm1365_vm0, %v1200_v62, %v1406_v3  ;;  %vm1366_vm2 = vcmp.ge.f32.partialorder %v1203_v4, 0.0  ;;  %v1407_v6 = vmul.f32 0.01, %v1203_v4 }
 0x12b   : > { %v1942_v7 = vpack.c.bf16 %v1447_v5, %v1447_v5  ;;  %v1007_v8 = vpop.f32.mrb[4].mxu1 }
 0x12c   : > { %v1448_v9 = vsel %vm1366_vm2, %v1203_v4, %v1407_v6  ;;  %v1008_v10 = vadd.f32 %v2433_v55, %v1007_v8  ;;  %v1207_v11 = vpop.f32.mrb[4].mxu0  ;;  %v1009_v12 = vpop.f32.mrb[5].mxu1 }
 0x12d   : > { %1654 = vst.msk [vmem:[%s2441_s28] sm:$0xf] %vm1653_vm1, %v1942_v7  ;;  %v1943_v13 = vpack.c.bf16 %v1448_v9, %v1448_v9  ;;  %v1209_v14 = vpop.f32.mrb[5].mxu0  ;;  %v1010_v15 = vpop.f32.mrb[6].mxu1 }
 0x12e   : > { %v1208_v16 = vadd.f32 %v1207_v11, %v1008_v10  ;;  %v1011_v17 = vadd.f32 %v2433_v55, %v1010_v15  ;;  %v1210_v18 = vpop.f32.mrb[6].mxu0  ;;  %v1012_v19 = vpop.f32.mrb[7].mxu1 }
 0x12f   : > { %1655 = vst.msk [vmem:[%s2441_s28 + $0x4] sm:$0xf] %vm1653_vm1, %v1943_v13  ;;  %v1212_v20 = vpop.f32.mrb[7].mxu0 }
 0x130   : > { %vm1367_vm3 = vcmp.ge.f32.partialorder %v1208_v16, 0.0  ;;  %v1408_v21 = vmul.f32 0.01, %v1208_v16  ;;  %v1211_v22 = vadd.f32 %v1210_v18, %v1011_v17 }
 0x132   : > { %v1449_v23 = vsel %vm1367_vm3, %v1208_v16, %v1408_v21  ;;  %vm1368_vm4 = vcmp.ge.f32.partialorder %v1211_v22, 0.0  ;;  %v1409_v24 = vmul.f32 0.01, %v1211_v22 }
 0x133   : > { %v1944_v25 = vpack.c.bf16 %v1449_v23, %v1449_v23  ;;  %v1015_v26 = vpop.f32.mrb[8].mxu1 }
 0x134   : > { %v1450_v27 = vsel %vm1368_vm4, %v1211_v22, %v1409_v24  ;;  %v1016_v28 = vadd.f32 %v2433_v55, %v1015_v26  ;;  %v1215_v29 = vpop.f32.mrb[8].mxu0  ;;  %v1017_v30 = vpop.f32.mrb[9].mxu1 }
 0x135   : > { %1656 = vst.msk [vmem:[%s2441_s28 + $0x8] sm:$0xf] %vm1653_vm1, %v1944_v25  ;;  %v1945_v31 = vpack.c.bf16 %v1450_v27, %v1450_v27  ;;  %v1217_v32 = vpop.f32.mrb[9].mxu0  ;;  %v1018_v33 = vpop.f32.mrb[10].mxu1 }
 0x136   : > { %v1216_v34 = vadd.f32 %v1215_v29, %v1016_v28  ;;  %v1019_v35 = vadd.f32 %v2433_v55, %v1018_v33  ;;  %v1218_v36 = vpop.f32.mrb[10].mxu0  ;;  %v1020_v37 = vpop.f32.mrb[11].mxu1 }
 0x137   : > { %1657 = vst.msk [vmem:[%s2441_s28 + $0xc] sm:$0xf] %vm1653_vm1, %v1945_v31  ;;  %v1220_v38 = vpop.f32.mrb[11].mxu0 }
 0x138   : > { %vm1369_vm5 = vcmp.ge.f32.partialorder %v1216_v34, 0.0  ;;  %v1410_v39 = vmul.f32 0.01, %v1216_v34  ;;  %v1219_v40 = vadd.f32 %v1218_v36, %v1019_v35 }
 0x13a   : > { %v1451_v41 = vsel %vm1369_vm5, %v1216_v34, %v1410_v39  ;;  %vm1370_vm6 = vcmp.ge.f32.partialorder %v1219_v40, 0.0  ;;  %v1411_v42 = vmul.f32 0.01, %v1219_v40 }
 0x13b   : > { %v1946_v43 = vpack.c.bf16 %v1451_v41, %v1451_v41  ;;  %v1023_v44 = vpop.f32.mrb[12].mxu1 }
 0x13c   : > { %v1452_v45 = vsel %vm1370_vm6, %v1219_v40, %v1411_v42  ;;  %v1024_v46 = vadd.f32 %v2433_v55, %v1023_v44  ;;  %v1223_v47 = vpop.f32.mrb[12].mxu0  ;;  %v1025_v48 = vpop.f32.mrb[13].mxu1 }
 0x13d   : > { %1658 = vst.msk [vmem:[%s2441_s28 + $0x10] sm:$0xf] %vm1653_vm1, %v1946_v43  ;;  %v1947_v49 = vpack.c.bf16 %v1452_v45, %v1452_v45  ;;  %v1225_v50 = vpop.f32.mrb[13].mxu0  ;;  %v1026_v51 = vpop.f32.mrb[14].mxu1 }
 0x13e   : > { %v1224_v52 = vadd.f32 %v1223_v47, %v1024_v46  ;;  %v1027_v53 = vadd.f32 %v2433_v55, %v1026_v51  ;;  %v1226_v54 = vpop.f32.mrb[14].mxu0  ;;  %v1028_v56 = vpop.f32.mrb[15].mxu1 }
 0x13f   : > { %1659 = vst.msk [vmem:[%s2441_s28 + $0x14] sm:$0xf] %vm1653_vm1, %v1947_v49  ;;  %v1228_v57 = vpop.f32.mrb[15].mxu0 }
 0x140   : > { %vm1371_vm7 = vcmp.ge.f32.partialorder %v1224_v52, 0.0  ;;  %v1412_v58 = vmul.f32 0.01, %v1224_v52  ;;  %v1227_v59 = vadd.f32 %v1226_v54, %v1027_v53 }
 0x142   : > { %v1453_v60 = vsel %vm1371_vm7, %v1224_v52, %v1412_v58  ;;  %vm1372_vm8 = vcmp.ge.f32.partialorder %v1227_v59, 0.0  ;;  %v1413_v61 = vmul.f32 0.01, %v1227_v59 }
 0x143   : > { %v1948_v62 = vpack.c.bf16 %v1453_v60, %v1453_v60  ;;  %v1031_v63 = vpop.f32.mrb[16].mxu1 }
 0x144   : > { %v1454_v0 = vsel %vm1372_vm8, %v1227_v59, %v1413_v61  ;;  %v1032_v1 = vadd.f32 %v2433_v55, %v1031_v63  ;;  %v1231_v2 = vpop.f32.mrb[16].mxu0  ;;  %v1033_v3 = vpop.f32.mrb[17].mxu1 }
 0x145   : > { %1660 = vst.msk [vmem:[%s2441_s28 + $0x18] sm:$0xf] %vm1653_vm1, %v1948_v62  ;;  %v1949_v4 = vpack.c.bf16 %v1454_v0, %v1454_v0  ;;  %v1233_v5 = vpop.f32.mrb[17].mxu0  ;;  %v1034_v6 = vpop.f32.mrb[18].mxu1 }
 0x146   : > { %v1232_v7 = vadd.f32 %v1231_v2, %v1032_v1  ;;  %v1035_v8 = vadd.f32 %v2433_v55, %v1034_v6  ;;  %v1234_v9 = vpop.f32.mrb[18].mxu0  ;;  %v1036_v10 = vpop.f32.mrb[19].mxu1 }
 0x147   : > { %1661 = vst.msk [vmem:[%s2441_s28 + $0x1c] sm:$0xf] %vm1653_vm1, %v1949_v4  ;;  %v1236_v11 = vpop.f32.mrb[19].mxu0 }
 0x148   : > { %vm1373_vm9 = vcmp.ge.f32.partialorder %v1232_v7, 0.0  ;;  %v1414_v12 = vmul.f32 0.01, %v1232_v7  ;;  %v1235_v13 = vadd.f32 %v1234_v9, %v1035_v8 }
 0x14a   : > { %v1455_v14 = vsel %vm1373_vm9, %v1232_v7, %v1414_v12  ;;  %vm1374_vm10 = vcmp.ge.f32.partialorder %v1235_v13, 0.0  ;;  %v1415_v15 = vmul.f32 0.01, %v1235_v13 }
 0x14b   : > { %v1950_v16 = vpack.c.bf16 %v1455_v14, %v1455_v14  ;;  %v1039_v17 = vpop.f32.mrb[20].mxu1 }
 0x14c   : > { %v1456_v18 = vsel %vm1374_vm10, %v1235_v13, %v1415_v15  ;;  %v1040_v19 = vadd.f32 %v2433_v55, %v1039_v17  ;;  %v1239_v20 = vpop.f32.mrb[20].mxu0  ;;  %v1041_v21 = vpop.f32.mrb[21].mxu1 }
 0x14d   : > { %1662 = vst.msk [vmem:[%s2441_s28 + $0x20] sm:$0xf] %vm1653_vm1, %v1950_v16  ;;  %v1951_v22 = vpack.c.bf16 %v1456_v18, %v1456_v18  ;;  %v1241_v23 = vpop.f32.mrb[21].mxu0  ;;  %v1042_v24 = vpop.f32.mrb[22].mxu1 }
 0x14e   : > { %v1240_v25 = vadd.f32 %v1239_v20, %v1040_v19  ;;  %v1043_v26 = vadd.f32 %v2433_v55, %v1042_v24  ;;  %v1242_v27 = vpop.f32.mrb[22].mxu0  ;;  %v1044_v28 = vpop.f32.mrb[23].mxu1 }
 0x14f   : > { %1663 = vst.msk [vmem:[%s2441_s28 + $0x24] sm:$0xf] %vm1653_vm1, %v1951_v22  ;;  %v1244_v29 = vpop.f32.mrb[23].mxu0 }
 0x150   : > { %vm1375_vm11 = vcmp.ge.f32.partialorder %v1240_v25, 0.0  ;;  %v1416_v30 = vmul.f32 0.01, %v1240_v25  ;;  %v1243_v31 = vadd.f32 %v1242_v27, %v1043_v26 }
 0x152   : > { %v1457_v32 = vsel %vm1375_vm11, %v1240_v25, %v1416_v30  ;;  %vm1376_vm12 = vcmp.ge.f32.partialorder %v1243_v31, 0.0  ;;  %v1417_v33 = vmul.f32 0.01, %v1243_v31 }
 0x153   : > { %v1952_v34 = vpack.c.bf16 %v1457_v32, %v1457_v32  ;;  %v1047_v35 = vpop.f32.mrb[24].mxu1 }
 0x154   : > { %v1458_v36 = vsel %vm1376_vm12, %v1243_v31, %v1417_v33  ;;  %v1048_v37 = vadd.f32 %v2433_v55, %v1047_v35  ;;  %v1247_v38 = vpop.f32.mrb[24].mxu0  ;;  %v1049_v39 = vpop.f32.mrb[25].mxu1 }
 0x155   : > { %1664 = vst.msk [vmem:[%s2441_s28 + $0x28] sm:$0xf] %vm1653_vm1, %v1952_v34  ;;  %v1953_v40 = vpack.c.bf16 %v1458_v36, %v1458_v36  ;;  %v1249_v41 = vpop.f32.mrb[25].mxu0  ;;  %v1050_v42 = vpop.f32.mrb[26].mxu1 }
 0x156   : > { %v1248_v43 = vadd.f32 %v1247_v38, %v1048_v37  ;;  %v1051_v44 = vadd.f32 %v2433_v55, %v1050_v42  ;;  %v1250_v45 = vpop.f32.mrb[26].mxu0  ;;  %v1052_v46 = vpop.f32.mrb[27].mxu1 }
 0x157   : > { %1665 = vst.msk [vmem:[%s2441_s28 + $0x2c] sm:$0xf] %vm1653_vm1, %v1953_v40  ;;  %v1252_v47 = vpop.f32.mrb[27].mxu0 }
 0x158   : > { %vm1377_vm13 = vcmp.ge.f32.partialorder %v1248_v43, 0.0  ;;  %v1418_v48 = vmul.f32 0.01, %v1248_v43  ;;  %v1251_v49 = vadd.f32 %v1250_v45, %v1051_v44 }
 0x15a   : > { %v1459_v50 = vsel %vm1377_vm13, %v1248_v43, %v1418_v48  ;;  %vm1378_vm14 = vcmp.ge.f32.partialorder %v1251_v49, 0.0  ;;  %v1419_v51 = vmul.f32 0.01, %v1251_v49 }
 0x15b   : > { %v1954_v52 = vpack.c.bf16 %v1459_v50, %v1459_v50  ;;  %v1055_v53 = vpop.f32.mrb[28].mxu1 }
 0x15c   : > { %v1460_v54 = vsel %vm1378_vm14, %v1251_v49, %v1419_v51  ;;  %v1056_v56 = vadd.f32 %v2433_v55, %v1055_v53  ;;  %v1255_v57 = vpop.f32.mrb[28].mxu0  ;;  %v1057_v58 = vpop.f32.mrb[29].mxu1 }
 0x15d   : > { %1666 = vst.msk [vmem:[%s2441_s28 + $0x30] sm:$0xf] %vm1653_vm1, %v1954_v52  ;;  %v1955_v59 = vpack.c.bf16 %v1460_v54, %v1460_v54  ;;  %v1257_v60 = vpop.f32.mrb[29].mxu0  ;;  %v1058_v61 = vpop.f32.mrb[30].mxu1 }
 0x15e   : > { %v1256_v62 = vadd.f32 %v1255_v57, %v1056_v56  ;;  %v1059_v63 = vadd.f32 %v2433_v55, %v1058_v61  ;;  %v1258_v0 = vpop.f32.mrb[30].mxu0  ;;  %v1060_v1 = vpop.f32.mrb[31].mxu1 }
 0x15f   : > { %1667 = vst.msk [vmem:[%s2441_s28 + $0x34] sm:$0xf] %vm1653_vm1, %v1955_v59  ;;  %v1260_v2 = vpop.f32.mrb[31].mxu0 }
 0x160   : > { %vm1379_vm15 = vcmp.ge.f32.partialorder %v1256_v62, 0.0  ;;  %v1420_v3 = vmul.f32 0.01, %v1256_v62  ;;  %v1259_v4 = vadd.f32 %v1258_v0, %v1059_v63 }
 0x162   : > { %v1461_v5 = vsel %vm1379_vm15, %v1256_v62, %v1420_v3  ;;  %vm1380_vm0 = vcmp.ge.f32.partialorder %v1259_v4, 0.0  ;;  %v1421_v6 = vmul.f32 0.01, %v1259_v4 }
 0x163   : > { %v1956_v7 = vpack.c.bf16 %v1461_v5, %v1461_v5  ;;  %v1063_v8 = vpop.f32.mrb[32].mxu1 }
 0x164   : > { %v1462_v9 = vsel %vm1380_vm0, %v1259_v4, %v1421_v6  ;;  %v1064_v10 = vadd.f32 %v2433_v55, %v1063_v8  ;;  %v1263_v11 = vpop.f32.mrb[32].mxu0  ;;  %v1065_v12 = vpop.f32.mrb[33].mxu1 }
 0x165   : > { %1668 = vst.msk [vmem:[%s2441_s28 + $0x38] sm:$0xf] %vm1653_vm1, %v1956_v7  ;;  %v1957_v13 = vpack.c.bf16 %v1462_v9, %v1462_v9  ;;  %v1265_v14 = vpop.f32.mrb[33].mxu0  ;;  %v1066_v15 = vpop.f32.mrb[34].mxu1 }
 0x166   : > { %v1264_v16 = vadd.f32 %v1263_v11, %v1064_v10  ;;  %v1067_v17 = vadd.f32 %v2433_v55, %v1066_v15  ;;  %v1266_v18 = vpop.f32.mrb[34].mxu0  ;;  %v1068_v19 = vpop.f32.mrb[35].mxu1 }
 0x167   : > { %1669 = vst.msk [vmem:[%s2441_s28 + $0x3c] sm:$0xf] %vm1653_vm1, %v1957_v13  ;;  %v1268_v20 = vpop.f32.mrb[35].mxu0 }
 0x168   : > { %vm1381_vm2 = vcmp.ge.f32.partialorder %v1264_v16, 0.0  ;;  %v1422_v21 = vmul.f32 0.01, %v1264_v16  ;;  %v1267_v22 = vadd.f32 %v1266_v18, %v1067_v17 }
 0x16a   : > { %v1463_v23 = vsel %vm1381_vm2, %v1264_v16, %v1422_v21  ;;  %vm1382_vm3 = vcmp.ge.f32.partialorder %v1267_v22, 0.0  ;;  %v1423_v24 = vmul.f32 0.01, %v1267_v22 }
 0x16b   : > { %v1958_v25 = vpack.c.bf16 %v1463_v23, %v1463_v23  ;;  %v1071_v26 = vpop.f32.mrb[36].mxu1 }
 0x16c   : > { %v1464_v27 = vsel %vm1382_vm3, %v1267_v22, %v1423_v24  ;;  %v1072_v28 = vadd.f32 %v2433_v55, %v1071_v26  ;;  %v1271_v29 = vpop.f32.mrb[36].mxu0  ;;  %v1073_v30 = vpop.f32.mrb[37].mxu1 }
 0x16d   : > { %1670 = vst.msk [vmem:[%s2441_s28 + $0x40] sm:$0xf] %vm1653_vm1, %v1958_v25  ;;  %v1959_v31 = vpack.c.bf16 %v1464_v27, %v1464_v27  ;;  %v1273_v32 = vpop.f32.mrb[37].mxu0  ;;  %v1074_v33 = vpop.f32.mrb[38].mxu1 }
 0x16e   : > { %v1272_v34 = vadd.f32 %v1271_v29, %v1072_v28  ;;  %v1075_v35 = vadd.f32 %v2433_v55, %v1074_v33  ;;  %v1274_v36 = vpop.f32.mrb[38].mxu0  ;;  %v1076_v37 = vpop.f32.mrb[39].mxu1 }
 0x16f   : > { %1671 = vst.msk [vmem:[%s2441_s28 + $0x44] sm:$0xf] %vm1653_vm1, %v1959_v31  ;;  %v1276_v38 = vpop.f32.mrb[39].mxu0 }
 0x170   : > { %vm1383_vm4 = vcmp.ge.f32.partialorder %v1272_v34, 0.0  ;;  %v1424_v39 = vmul.f32 0.01, %v1272_v34  ;;  %v1275_v40 = vadd.f32 %v1274_v36, %v1075_v35 }
 0x172   : > { %v1465_v41 = vsel %vm1383_vm4, %v1272_v34, %v1424_v39  ;;  %vm1384_vm5 = vcmp.ge.f32.partialorder %v1275_v40, 0.0  ;;  %v1425_v42 = vmul.f32 0.01, %v1275_v40 }
 0x173   : > { %v1960_v43 = vpack.c.bf16 %v1465_v41, %v1465_v41  ;;  %v1079_v44 = vpop.f32.mrb[40].mxu1 }
 0x174   : > { %v1466_v45 = vsel %vm1384_vm5, %v1275_v40, %v1425_v42  ;;  %v1080_v46 = vadd.f32 %v2433_v55, %v1079_v44  ;;  %v1279_v47 = vpop.f32.mrb[40].mxu0  ;;  %v1081_v48 = vpop.f32.mrb[41].mxu1 }
 0x175   : > { %1672 = vst.msk [vmem:[%s2441_s28 + $0x48] sm:$0xf] %vm1653_vm1, %v1960_v43  ;;  %v1961_v49 = vpack.c.bf16 %v1466_v45, %v1466_v45  ;;  %v1281_v50 = vpop.f32.mrb[41].mxu0  ;;  %v1082_v51 = vpop.f32.mrb[42].mxu1 }
 0x176   : > { %v1280_v52 = vadd.f32 %v1279_v47, %v1080_v46  ;;  %v1083_v53 = vadd.f32 %v2433_v55, %v1082_v51  ;;  %v1282_v54 = vpop.f32.mrb[42].mxu0  ;;  %v1084_v56 = vpop.f32.mrb[43].mxu1 }
 0x177   : > { %1673 = vst.msk [vmem:[%s2441_s28 + $0x4c] sm:$0xf] %vm1653_vm1, %v1961_v49  ;;  %v1284_v57 = vpop.f32.mrb[43].mxu0 }
 0x178   : > { %vm1385_vm6 = vcmp.ge.f32.partialorder %v1280_v52, 0.0  ;;  %v1426_v58 = vmul.f32 0.01, %v1280_v52  ;;  %v1283_v59 = vadd.f32 %v1282_v54, %v1083_v53 }
 0x17a   : > { %v1467_v60 = vsel %vm1385_vm6, %v1280_v52, %v1426_v58  ;;  %vm1386_vm7 = vcmp.ge.f32.partialorder %v1283_v59, 0.0  ;;  %v1427_v61 = vmul.f32 0.01, %v1283_v59 }
 0x17b   : > { %v1962_v62 = vpack.c.bf16 %v1467_v60, %v1467_v60  ;;  %v1087_v63 = vpop.f32.mrb[44].mxu1 }
 0x17c   : > { %v1468_v0 = vsel %vm1386_vm7, %v1283_v59, %v1427_v61  ;;  %v1088_v1 = vadd.f32 %v2433_v55, %v1087_v63  ;;  %v1287_v2 = vpop.f32.mrb[44].mxu0  ;;  %v1089_v3 = vpop.f32.mrb[45].mxu1 }
 0x17d   : > { %1674 = vst.msk [vmem:[%s2441_s28 + $0x50] sm:$0xf] %vm1653_vm1, %v1962_v62  ;;  %v1963_v4 = vpack.c.bf16 %v1468_v0, %v1468_v0  ;;  %v1289_v5 = vpop.f32.mrb[45].mxu0  ;;  %v1090_v6 = vpop.f32.mrb[46].mxu1 }
 0x17e   : > { %v1288_v7 = vadd.f32 %v1287_v2, %v1088_v1  ;;  %v1091_v8 = vadd.f32 %v2433_v55, %v1090_v6  ;;  %v1290_v9 = vpop.f32.mrb[46].mxu0  ;;  %v1092_v10 = vpop.f32.mrb[47].mxu1 }
 0x17f   : > { %1675 = vst.msk [vmem:[%s2441_s28 + $0x54] sm:$0xf] %vm1653_vm1, %v1963_v4  ;;  %v1292_v11 = vpop.f32.mrb[47].mxu0 }
 0x180   : > { %vm1387_vm8 = vcmp.ge.f32.partialorder %v1288_v7, 0.0  ;;  %v1428_v12 = vmul.f32 0.01, %v1288_v7  ;;  %v1291_v13 = vadd.f32 %v1290_v9, %v1091_v8 }
 0x182   : > { %v1469_v14 = vsel %vm1387_vm8, %v1288_v7, %v1428_v12  ;;  %vm1388_vm9 = vcmp.ge.f32.partialorder %v1291_v13, 0.0  ;;  %v1429_v15 = vmul.f32 0.01, %v1291_v13 }
 0x183   : > { %v1964_v16 = vpack.c.bf16 %v1469_v14, %v1469_v14  ;;  %v1095_v17 = vpop.f32.mrb[48].mxu1 }
 0x184   : > { %v1470_v18 = vsel %vm1388_vm9, %v1291_v13, %v1429_v15  ;;  %v1096_v19 = vadd.f32 %v2433_v55, %v1095_v17  ;;  %v1295_v20 = vpop.f32.mrb[48].mxu0  ;;  %v1097_v21 = vpop.f32.mrb[49].mxu1 }
 0x185   : > { %1676 = vst.msk [vmem:[%s2441_s28 + $0x58] sm:$0xf] %vm1653_vm1, %v1964_v16  ;;  %v1965_v22 = vpack.c.bf16 %v1470_v18, %v1470_v18  ;;  %v1297_v23 = vpop.f32.mrb[49].mxu0  ;;  %v1098_v24 = vpop.f32.mrb[50].mxu1 }
 0x186   : > { %v1296_v25 = vadd.f32 %v1295_v20, %v1096_v19  ;;  %v1099_v26 = vadd.f32 %v2433_v55, %v1098_v24  ;;  %v1298_v27 = vpop.f32.mrb[50].mxu0  ;;  %v1100_v28 = vpop.f32.mrb[51].mxu1 }
 0x187   : > { %1677 = vst.msk [vmem:[%s2441_s28 + $0x5c] sm:$0xf] %vm1653_vm1, %v1965_v22  ;;  %v1300_v29 = vpop.f32.mrb[51].mxu0 }
 0x188   : > { %vm1389_vm10 = vcmp.ge.f32.partialorder %v1296_v25, 0.0  ;;  %v1430_v30 = vmul.f32 0.01, %v1296_v25  ;;  %v1299_v31 = vadd.f32 %v1298_v27, %v1099_v26 }
 0x18a   : > { %v1471_v32 = vsel %vm1389_vm10, %v1296_v25, %v1430_v30  ;;  %vm1390_vm11 = vcmp.ge.f32.partialorder %v1299_v31, 0.0  ;;  %v1431_v33 = vmul.f32 0.01, %v1299_v31 }
 0x18b   : > { %v1966_v34 = vpack.c.bf16 %v1471_v32, %v1471_v32  ;;  %v1103_v35 = vpop.f32.mrb[52].mxu1 }
 0x18c   : > { %v1472_v36 = vsel %vm1390_vm11, %v1299_v31, %v1431_v33  ;;  %v1104_v37 = vadd.f32 %v2433_v55, %v1103_v35  ;;  %v1303_v38 = vpop.f32.mrb[52].mxu0  ;;  %v1105_v39 = vpop.f32.mrb[53].mxu1 }
 0x18d   : > { %1678 = vst.msk [vmem:[%s2441_s28 + $0x60] sm:$0xf] %vm1653_vm1, %v1966_v34  ;;  %v1967_v40 = vpack.c.bf16 %v1472_v36, %v1472_v36  ;;  %v1305_v41 = vpop.f32.mrb[53].mxu0  ;;  %v1106_v42 = vpop.f32.mrb[54].mxu1 }
 0x18e   : > { %v1304_v43 = vadd.f32 %v1303_v38, %v1104_v37  ;;  %v1107_v44 = vadd.f32 %v2433_v55, %v1106_v42  ;;  %v1306_v45 = vpop.f32.mrb[54].mxu0  ;;  %v1108_v46 = vpop.f32.mrb[55].mxu1 }
 0x18f   : > { %1679 = vst.msk [vmem:[%s2441_s28 + $0x64] sm:$0xf] %vm1653_vm1, %v1967_v40  ;;  %v1308_v47 = vpop.f32.mrb[55].mxu0 }
 0x190   : > { %vm1391_vm12 = vcmp.ge.f32.partialorder %v1304_v43, 0.0  ;;  %v1432_v48 = vmul.f32 0.01, %v1304_v43  ;;  %v1307_v49 = vadd.f32 %v1306_v45, %v1107_v44 }
 0x192   : > { %v1473_v50 = vsel %vm1391_vm12, %v1304_v43, %v1432_v48  ;;  %vm1392_vm13 = vcmp.ge.f32.partialorder %v1307_v49, 0.0  ;;  %v1433_v51 = vmul.f32 0.01, %v1307_v49  ;;  %vm1694_vm12 = vcmask 517120  }
 0x193   : > { %v1968_v52 = vpack.c.bf16 %v1473_v50, %v1473_v50  ;;  %v1111_v53 = vpop.f32.mrb[56].mxu1 }
 0x194   : > { %v1474_v54 = vsel %vm1392_vm13, %v1307_v49, %v1433_v51  ;;  %v1112_v56 = vadd.f32 %v2433_v55, %v1111_v53  ;;  %v1311_v57 = vpop.f32.mrb[56].mxu0  ;;  %v1113_v58 = vpop.f32.mrb[57].mxu1 }
 0x195   : > { %1680 = vst.msk [vmem:[%s2441_s28 + $0x68] sm:$0xf] %vm1653_vm1, %v1968_v52  ;;  %v1969_v59 = vpack.c.bf16 %v1474_v54, %v1474_v54  ;;  %v1313_v60 = vpop.f32.mrb[57].mxu0  ;;  %v1114_v61 = vpop.f32.mrb[58].mxu1 }
 0x196   : > { %v1312_v62 = vadd.f32 %v1311_v57, %v1112_v56  ;;  %v1115_v63 = vadd.f32 %v2433_v55, %v1114_v61  ;;  %v1314_v0 = vpop.f32.mrb[58].mxu0  ;;  %v1116_v1 = vpop.f32.mrb[59].mxu1 }
 0x197   : > { %1681 = vst.msk [vmem:[%s2441_s28 + $0x6c] sm:$0xf] %vm1653_vm1, %v1969_v59  ;;  %v1316_v2 = vpop.f32.mrb[59].mxu0 }
 0x198   : > { %vm1393_vm14 = vcmp.ge.f32.partialorder %v1312_v62, 0.0  ;;  %v1434_v3 = vmul.f32 0.01, %v1312_v62  ;;  %v1315_v4 = vadd.f32 %v1314_v0, %v1115_v63 }
 0x19a   : > { %v1475_v5 = vsel %vm1393_vm14, %v1312_v62, %v1434_v3  ;;  %vm1394_vm15 = vcmp.ge.f32.partialorder %v1315_v4, 0.0  ;;  %v1435_v6 = vmul.f32 0.01, %v1315_v4 }
 0x19b   : > { %v1970_v7 = vpack.c.bf16 %v1475_v5, %v1475_v5  ;;  %v1119_v8 = vpop.f32.mrb[60].mxu1 }
 0x19c   : > { %v1476_v9 = vsel %vm1394_vm15, %v1315_v4, %v1435_v6  ;;  %v1120_v10 = vadd.f32 %v2433_v55, %v1119_v8  ;;  %v1319_v11 = vpop.f32.mrb[60].mxu0  ;;  %v1121_v12 = vpop.f32.mrb[61].mxu1 }
 0x19d   : > { %1682 = vst.msk [vmem:[%s2441_s28 + $0x70] sm:$0xf] %vm1653_vm1, %v1970_v7  ;;  %v1971_v13 = vpack.c.bf16 %v1476_v9, %v1476_v9  ;;  %v1321_v14 = vpop.f32.mrb[61].mxu0  ;;  %v1122_v15 = vpop.f32.mrb[62].mxu1 }
 0x19e   : > { %v1320_v16 = vadd.f32 %v1319_v11, %v1120_v10  ;;  %v1123_v17 = vadd.f32 %v2433_v55, %v1122_v15  ;;  %v1322_v18 = vpop.f32.mrb[62].mxu0  ;;  %v1124_v19 = vpop.f32.mrb[63].mxu1 }
 0x19f   : > { %1683 = vst.msk [vmem:[%s2441_s28 + $0x74] sm:$0xf] %vm1653_vm1, %v1971_v13  ;;  %v1324_v20 = vpop.f32.mrb[63].mxu0 }
 0x1a0   : > { %vm1395_vm0 = vcmp.ge.f32.partialorder %v1320_v16, 0.0  ;;  %v1436_v21 = vmul.f32 0.01, %v1320_v16  ;;  %v1323_v22 = vadd.f32 %v1322_v18, %v1123_v17 }
 0x1a2   : > { %v1477_v23 = vsel %vm1395_vm0, %v1320_v16, %v1436_v21  ;;  %vm1396_vm2 = vcmp.ge.f32.partialorder %v1323_v22, 0.0  ;;  %v1437_v24 = vmul.f32 0.01, %v1323_v22 }
 0x1a3   : > { %v1972_v25 = vpack.c.bf16 %v1477_v23, %v1477_v23  ;;  %v1127_v26 = vpop.f32.mrb[64].mxu1 }
 0x1a4   : > { %v1478_v27 = vsel %vm1396_vm2, %v1323_v22, %v1437_v24  ;;  %v1128_v28 = vadd.f32 %v2433_v55, %v1127_v26  ;;  %v1327_v29 = vpop.f32.mrb[64].mxu0  ;;  %v1129_v30 = vpop.f32.mrb[65].mxu1 }
 0x1a5   : > { %1684 = vst.msk [vmem:[%s2441_s28 + $0x78] sm:$0xf] %vm1653_vm1, %v1972_v25  ;;  %v1973_v31 = vpack.c.bf16 %v1478_v27, %v1478_v27  ;;  %v1329_v32 = vpop.f32.mrb[65].mxu0  ;;  %v1130_v33 = vpop.f32.mrb[66].mxu1 }
 0x1a6   : > { %v1328_v34 = vadd.f32 %v1327_v29, %v1128_v28  ;;  %v1131_v35 = vadd.f32 %v2433_v55, %v1130_v33  ;;  %v1330_v36 = vpop.f32.mrb[66].mxu0  ;;  %v1132_v37 = vpop.f32.mrb[67].mxu1 }
 0x1a7   : > { %1685 = vst.msk [vmem:[%s2441_s28 + $0x7c] sm:$0xf] %vm1653_vm1, %v1973_v31  ;;  %v1332_v38 = vpop.f32.mrb[67].mxu0 }
 0x1a8   : > { %vm1397_vm3 = vcmp.ge.f32.partialorder %v1328_v34, 0.0  ;;  %v1438_v39 = vmul.f32 0.01, %v1328_v34  ;;  %v1331_v40 = vadd.f32 %v1330_v36, %v1131_v35 }
 0x1aa   : > { %v1479_v41 = vsel %vm1397_vm3, %v1328_v34, %v1438_v39  ;;  %vm1398_vm4 = vcmp.ge.f32.partialorder %v1331_v40, 0.0  ;;  %v1439_v42 = vmul.f32 0.01, %v1331_v40 }
 0x1ab   : > { %v1974_v43 = vpack.c.bf16 %v1479_v41, %v1479_v41  ;;  %v1135_v44 = vpop.f32.mrb[68].mxu1 }
 0x1ac   : > { %v1480_v45 = vsel %vm1398_vm4, %v1331_v40, %v1439_v42  ;;  %v1136_v46 = vadd.f32 %v2433_v55, %v1135_v44  ;;  %v1335_v47 = vpop.f32.mrb[68].mxu0  ;;  %v1137_v48 = vpop.f32.mrb[69].mxu1 }
 0x1ad   : > { %1686 = vst.msk [vmem:[%s2441_s28 + $0x80] sm:$0xf] %vm1653_vm1, %v1974_v43  ;;  %v1975_v49 = vpack.c.bf16 %v1480_v45, %v1480_v45  ;;  %v1337_v50 = vpop.f32.mrb[69].mxu0  ;;  %v1138_v51 = vpop.f32.mrb[70].mxu1 }
 0x1ae   : > { %v1336_v52 = vadd.f32 %v1335_v47, %v1136_v46  ;;  %v1139_v53 = vadd.f32 %v2433_v55, %v1138_v51  ;;  %v1338_v54 = vpop.f32.mrb[70].mxu0  ;;  %v1140_v56 = vpop.f32.mrb[71].mxu1 }
 0x1af   : > { %1687 = vst.msk [vmem:[%s2441_s28 + $0x84] sm:$0xf] %vm1653_vm1, %v1975_v49  ;;  %v1340_v57 = vpop.f32.mrb[71].mxu0 }
 0x1b0   : > { %vm1399_vm5 = vcmp.ge.f32.partialorder %v1336_v52, 0.0  ;;  %v1440_v58 = vmul.f32 0.01, %v1336_v52  ;;  %v1339_v59 = vadd.f32 %v1338_v54, %v1139_v53 }
 0x1b2   : > { %v1481_v60 = vsel %vm1399_vm5, %v1336_v52, %v1440_v58  ;;  %vm1400_vm6 = vcmp.ge.f32.partialorder %v1339_v59, 0.0  ;;  %v1441_v61 = vmul.f32 0.01, %v1339_v59 }
 0x1b3   : > { %v1976_v62 = vpack.c.bf16 %v1481_v60, %v1481_v60  ;;  %v1143_v63 = vpop.f32.mrb[72].mxu1 }
 0x1b4   : > { %v1482_v0 = vsel %vm1400_vm6, %v1339_v59, %v1441_v61  ;;  %v1144_v1 = vadd.f32 %v2433_v55, %v1143_v63  ;;  %v1343_v2 = vpop.f32.mrb[72].mxu0  ;;  %v1145_v3 = vpop.f32.mrb[73].mxu1 }
 0x1b5   : > { %1688 = vst.msk [vmem:[%s2441_s28 + $0x88] sm:$0xf] %vm1653_vm1, %v1976_v62  ;;  %v1977_v4 = vpack.c.bf16 %v1482_v0, %v1482_v0  ;;  %v1345_v5 = vpop.f32.mrb[73].mxu0  ;;  %v1146_v6 = vpop.f32.mrb[74].mxu1 }
 0x1b6   : > { %v1344_v7 = vadd.f32 %v1343_v2, %v1144_v1  ;;  %v1147_v8 = vadd.f32 %v2433_v55, %v1146_v6  ;;  %v1346_v9 = vpop.f32.mrb[74].mxu0  ;;  %v1148_v10 = vpop.f32.mrb[75].mxu1 }
 0x1b7   : > { %1689 = vst.msk [vmem:[%s2441_s28 + $0x8c] sm:$0xf] %vm1653_vm1, %v1977_v4  ;;  %v1348_v11 = vpop.f32.mrb[75].mxu0 }
 0x1b8   : > { %vm1401_vm7 = vcmp.ge.f32.partialorder %v1344_v7, 0.0  ;;  %v1442_v12 = vmul.f32 0.01, %v1344_v7  ;;  %v1347_v13 = vadd.f32 %v1346_v9, %v1147_v8 }
 0x1ba   : > { %v1483_v14 = vsel %vm1401_vm7, %v1344_v7, %v1442_v12  ;;  %vm1402_vm8 = vcmp.ge.f32.partialorder %v1347_v13, 0.0  ;;  %v1443_v15 = vmul.f32 0.01, %v1347_v13 }
 0x1bb   : > { %v1978_v16 = vpack.c.bf16 %v1483_v14, %v1483_v14  ;;  %v1151_v17 = vpop.f32.mrb[76].mxu1 }
 0x1bc   : > { %v1484_v18 = vsel %vm1402_vm8, %v1347_v13, %v1443_v15  ;;  %v1152_v19 = vadd.f32 %v2433_v55, %v1151_v17  ;;  %v1351_v20 = vpop.f32.mrb[76].mxu0  ;;  %v1153_v21 = vpop.f32.mrb[77].mxu1 }
 0x1bd   : > { %1690 = vst.msk [vmem:[%s2441_s28 + $0x90] sm:$0xf] %vm1653_vm1, %v1978_v16  ;;  %v1979_v22 = vpack.c.bf16 %v1484_v18, %v1484_v18  ;;  %v1353_v23 = vpop.f32.mrb[77].mxu0  ;;  %v1154_v24 = vpop.f32.mrb[78].mxu1 }
 0x1be   : > { %v1352_v25 = vadd.f32 %v1351_v20, %v1152_v19  ;;  %v1155_v26 = vadd.f32 %v2433_v55, %v1154_v24  ;;  %v1354_v27 = vpop.f32.mrb[78].mxu0  ;;  %v1156_v28 = vpop.f32.mrb[79].mxu1 }
 0x1bf   : > { %1691 = vst.msk [vmem:[%s2441_s28 + $0x94] sm:$0xf] %vm1653_vm1, %v1979_v22  ;;  %v1356_v29 = vpop.f32.mrb[79].mxu0 }
 0x1c0   : > { %vm1403_vm9 = vcmp.ge.f32.partialorder %v1352_v25, 0.0  ;;  %v1444_v30 = vmul.f32 0.01, %v1352_v25  ;;  %v1355_v31 = vadd.f32 %v1354_v27, %v1155_v26 }
 0x1c2   : > { %v1485_v32 = vsel %vm1403_vm9, %v1352_v25, %v1444_v30  ;;  %vm1404_vm10 = vcmp.ge.f32.partialorder %v1355_v31, 0.0  ;;  %v1445_v33 = vmul.f32 0.01, %v1355_v31 }
 0x1c3   : > { %v1980_v34 = vpack.c.bf16 %v1485_v32, %v1485_v32  ;;  %v1159_v35 = vpop.f32.mrb[80].mxu1 }
 0x1c4   : > { %v1486_v36 = vsel %vm1404_vm10, %v1355_v31, %v1445_v33  ;;  %v1160_v37 = vadd.f32 %v2433_v55, %v1159_v35  ;;  %v1359_v38 = vpop.f32.mrb[80].mxu0  ;;  %v1161_v39 = vpop.f32.mrb[81].mxu1 }
 0x1c5   : > { %1692 = vst.msk [vmem:[%s2441_s28 + $0x98] sm:$0xf] %vm1653_vm1, %v1980_v34  ;;  %v1981_v40 = vpack.c.bf16 %v1486_v36, %v1486_v36  ;;  %v1361_v41 = vpop.f32.mrb[81].mxu0  ;;  %v1162_v42 = vpop.f32.mrb[82].mxu1 }
 0x1c6   : > { %v1360_v43 = vadd.f32 %v1359_v38, %v1160_v37  ;;  %v1362_v44 = vpop.f32.mrb[82].mxu0  ;;  %v1163_v45 = vpop.f32.mrb[83].mxu1 }
 0x1c7   : > { %1693 = vst.msk [vmem:[%s2441_s28 + $0x9c] sm:$0xf] %vm1653_vm1, %v1981_v40  ;;  %v1363_v46 = vpop.f32.mrb[83].mxu0 }
 0x1c8   : > { %vm1405_vm11 = vcmp.ge.f32.partialorder %v1360_v43, 0.0  ;;  %v1446_v47 = vmul.f32 0.01, %v1360_v43 }
 0x1ca   : > { %v1487_v48 = vsel %vm1405_vm11, %v1360_v43, %v1446_v47 }
 0x1cb   : > { %v1982_v49 = vpack.c.bf16 %v1487_v48, %v1487_v48 }
 0x1cd   : > { %1695 = vst.msk [vmem:[%s2441_s28 + $0xa0] sm:$0x3] %vm1694_vm12, %v1982_v49 }
 0x1ce PF: > { %s13_s12 = sadd.s32 1, %s2238_s12  }
 0x1cf   : > { %p10_p4 = scmp.ge.s32.totalorder %s13_s12, 4  }
 0x1d1   :  { %12 = sbr.rel (!%p10_p4) target bundleno = 1 (0x1), region = 68 }

// kernel: squeeze.2
= control target key start
LH: loop header
LB: loop body
LE: loop exit
PB: predicated region body
PF: predicated region fallthrough
CT: control target
= control target key end

     0   :  { %2 = vsyncpa [#allocation1], 0  ;;  %s171_s0 = inlined_call_operand.vmem [shape: f32[1,4,512], index: 0, kind: input, shape index: {}]   ;;  %s172_s1 = inlined_call_operand.hbm [shape: f32[2,2,512], index: 1, kind: output, shape index: {}]  }
   0x1   :  { %v108_v0 = vld [vmem:[%s171_s0 + $0xc] sm:$0xf]  ;;  %v109_v1 = vld [vmem:[%s171_s0 + $0x8] sm:$0xf]  ;;  %v110_v2 = vld [vmem:[%s171_s0 + $0x4] sm:$0xf] }
   0x2   :  { %9 = vst [vmem:[#allocation3 + $0x18] sm:$0xf] %v108_v0  ;;  %14 = vst [vmem:[#allocation3 + $0x10] sm:$0xf] %v109_v1  ;;  %v19_v3 = vld [vmem:[%s171_s0] sm:$0xf] }
   0x3   :  { %18 = vst [vmem:[#allocation3 + $0x8] sm:$0xf] %v110_v2  ;;  %20 = vst [vmem:[#allocation3] sm:$0xf] %v19_v3  ;;  %s136_s0 = smov [#allocation0]  }
   0x4   :  { %s94_s14 = sshll.u32 %s136_s0, 4  ;;  %s95_s14 = int_to_ptr.vmem [resolvable:$true] %s94_s14 }
   0x5   :  { %s112_s15 = scalar_lea.vmem %s95_s14, 256  ;;  %p117_p1 = scmp.lt.s32.totalorder %s95_s14, %s95_s14 }
   0x6   :  { %p113_p0 = scmp.ne.s32.totalorder %s95_s14, %s112_s15  ;;  %p118_p2 = scmp.lt.s32.totalorder %s112_s15, %s112_s15 }
   0x8   :  { %p119_p3 = por %p118_p2, %p117_p1 }
   0x9   :  { %v32_v4 = vld [vmem:[#allocation3 + $0x10] sm:$0xf]   ;;  %v38_v5 = vld [vmem:[#allocation3 + $0x18] sm:$0xf]  }
   0xa   :  { %v21_v6 = vld [vmem:[#allocation3] sm:$0xf]   ;;  %v26_v7 = vld [vmem:[#allocation3 + $0x8] sm:$0xf]   ;;  %34 = vst [vmem:[#allocation2 + $0x10] sm:$0x3] %v32_v4   ;;  %p120_p4 = pnand %p119_p3, %p113_p0 }
   0xb   :  { %36 = vst [vmem:[#allocation2 + $0x2e] sm:$0xc] %v32_v4   ;;  %40 = vst [vmem:[#allocation2 + $0x18] sm:$0x3] %v38_v5  }
   0xc   :  { %42 = vst [vmem:[#allocation2 + $0x36] sm:$0xc] %v38_v5   ;;  %22 = vst [vmem:[#allocation2] sm:$0x3] %v21_v6  }
   0xd   :  { %24 = vst [vmem:[#allocation2 + $0x1e] sm:$0xc] %v21_v6   ;;  %28 = vst [vmem:[#allocation2 + $0x8] sm:$0x3] %v26_v7  }
   0xe   :  { %30 = vst [vmem:[#allocation2 + $0x26] sm:$0xc] %v26_v7  }
  0x11   :  { %v55_v8 = vld [vmem:[#allocation2 + $0x10] sm:$0x3] }
  0x12   :  { %v61_v9 = vld [vmem:[#allocation2 + $0x18] sm:$0x3]  ;;  %v79_v10 = vld [vmem:[#allocation2 + $0x30] sm:$0x3]  ;;  %59 = vst [vmem:[#allocation0 + $0x4] sm:$0x3] %v55_v8 }
  0x13   :  { %v46_v11 = vld [vmem:[#allocation2] sm:$0x3]  ;;  %65 = vst [vmem:[#allocation0 + $0x6] sm:$0x3] %v61_v9  ;;  %83 = vst [vmem:[#allocation0 + $0xc] sm:$0x3] %v79_v10 }
  0x14   :  { %v50_v12 = vld [vmem:[#allocation2 + $0x8] sm:$0x3]  ;;  %v67_v13 = vld [vmem:[#allocation2 + $0x20] sm:$0x3]  ;;  %48 = vst [vmem:[#allocation0] sm:$0x3] %v46_v11 }
  0x15   :  { %53 = vst [vmem:[#allocation0 + $0x2] sm:$0x3] %v50_v12  ;;  %71 = vst [vmem:[#allocation0 + $0x8] sm:$0x3] %v67_v13  ;;  %v73_v14 = vld [vmem:[#allocation2 + $0x28] sm:$0x3] }
  0x16   :  { %v85_v15 = vld [vmem:[#allocation2 + $0x38] sm:$0x3]  ;;  %77 = vst [vmem:[#allocation0 + $0xa] sm:$0x3] %v73_v14 }
  0x17   :  { %89 = vst [vmem:[#allocation0 + $0xe] sm:$0x3] %v85_v15 }
  0x18   :  { %123 = shalt.err (!%p120_p4)
}
  0x19   :  { %s124_s18 = scalar_lea.hbm %s172_s1, 256 }
  0x1a   :  { %p125_p5 = scmp.ne.s32.totalorder %s172_s1, %s124_s18  ;;  %p128_p6 = scmp.lt.u32.totalorder %s124_s18, %s172_s1 }
  0x1c   :  { %p130_p7 = pnand %p128_p6, %p125_p5 }
  0x1e   :  { %133 = shalt.err (!%p130_p7)
}
  0x1f   :  { %97 = dma.vmem_to_hbm [thread:$0]  %s95_s14, 256, %s172_s1, [#allocation1]  }
  0x20   :  { %134 = dma.done.wait [#allocation1], 256  }
  0x21   :  { %135 = vsyncadd [#allocation1], 4294967040 }
  0x22   :  { %99 = vsyncpa [#allocation1], 1 }

// kernel: rnd_forward.6
= control target key start
LH: loop header
LB: loop body
LE: loop exit
PB: predicated region body
PF: predicated region fallthrough
CT: control target
= control target key end

     0   :  { %s2244_s12 = smov 0   ;;  %s2572_s0 = inlined_call_operand.vmem [shape: bf16[2,196,576], index: 0, kind: input, shape index: {}]   ;;  %s2573_s1 = inlined_call_operand.vmem [shape: bf16[2,576,64], index: 1, kind: input, shape index: {}]   ;;  %s2574_s2 = inlined_call_operand.vmem [shape: f32[2,1,64], index: 2, kind: input, shape index: {}]   ;;  %s2575_s3 = inlined_call_operand.vmem [shape: bf16[2,196,64], index: 3, kind: output, shape index: {}]  }
   0x1 LB: > { %s1620_s13 = sadd.s32 4294967295, %s2220_s12   ;;  %p1624_p0 = scmp.ge.s32.totalorder %s2220_s12, 1  ;;  %s2220_s12 = sphi %s2244_s12, %s13_s12  }
   0x2   : > { %p155_p1 = scmp.lt.s32.totalorder %s2220_s12, 3 }
   0x4   : > { %p156_p2 = pnand %p1624_p0, %p155_p1 }
   0x5   : > { %p187_p3 = scmp.lt.s32.totalorder (!%p156_p2), %s1620_s13, 1  ;;  %v2222_v24 = vmov (!%p156_p2), 0.0   ;;  %vm2223_vm0 = vmmov (!%p156_p2), 0   ;;  %vm893_vm1 = vcmask (!%p156_p2), 523264   ;;  %vm1517_vm3 = vcmask (!%p156_p2), 519168  }
   0x6   : > { %159 = sbr.rel (%p156_p2) target bundleno = 422 (0x1a6), region = 32 }
   0xd   : > { %s2577_s13 = smov (!%p187_p3, %s1620_s13), 1 }
   0xe   : > { %s2077_s14 = smul.u32 288, %s2577_s13  ;;  %s199_s24 = scalar_lea.vmem %s2574_s2, %s2577_s13 }
   0xf   : > { %s2076_s18 = smul.u32 500, %s2577_s13 }
  0x10   : > { %s2258_s17 = scalar_lea.vmem %s2573_s1, %s2077_s14  ;;  %s2078_s25 = smul.u32 100, %s2577_s13 }
  0x11   : > { %v2089_v0 = vld [vmem:[%s2258_s17 + $0x40] sm:$0xff]   ;;  %v2091_v2 = vld [vmem:[%s2258_s17 + $0x48] sm:$0xff]   ;;  %v2093_v4 = vld [vmem:[%s2258_s17 + $0x50] sm:$0xff]   ;;  %s2273_s21 = scalar_lea.vmem %s2572_s0, %s2076_s18 }
  0x12   : > { %v2090_v1 = vld [vmem:[%s2258_s17] sm:$0xff]   ;;  %1795 = vmatprep.subr.bf16.mxu0 %v2089_v0  ;;  %2060 = vmatprep.subr.bf16.mxu1 %v2089_v0  ;;  %v2092_v3 = vld [vmem:[%s2258_s17 + $0x8] sm:$0xff]   ;;  %v2094_v5 = vld [vmem:[%s2258_s17 + $0x10] sm:$0xff]   ;;  %s2485_s28 = scalar_lea.vmem %s2575_s3, %s2078_s25 }
  0x13   : > { %1796 = vmatpush3.bf16.msra.mxu0 %v2090_v1  ;;  %2068 = vmatpush3.bf16.msra.mxu1 %v2090_v1  ;;  %v2095_v6 = vld [vmem:[%s2258_s17 + $0x58] sm:$0xff]   ;;  %v2097_v8 = vld [vmem:[%s2258_s17 + $0x60] sm:$0xff]   ;;  %v2099_v10 = vld [vmem:[%s2258_s17 + $0x68] sm:$0xff]  }
  0x14   : > { %1797 = vmatprep.subr.bf16.mxu0 %v2091_v2  ;;  %2061 = vmatprep.subr.bf16.mxu1 %v2091_v2  ;;  %v2096_v7 = vld [vmem:[%s2258_s17 + $0x18] sm:$0xff]   ;;  %v2098_v9 = vld [vmem:[%s2258_s17 + $0x20] sm:$0xff]   ;;  %v2100_v13 = vld [vmem:[%s2258_s17 + $0x28] sm:$0xff]  }
  0x15   : > { %v2107_v11 = vld [vmem:[%s2273_s21 + $0x4] ss:$20 sps:$4 sm:$0xff]   ;;  %v2110_v12 = vld [vmem:[%s2273_s21 + $0x11c] ss:$20 sps:$4 sm:$0xff]   ;;  %v2105_v19 = vld [vmem:[%s2273_s21] ss:$20 sps:$4 sm:$0xff]  }
  0x16   : > { %v2101_v14 = vld [vmem:[%s2258_s17 + $0x70] sm:$0xff]   ;;  %965 = vmatprep.mubr.bf16.mxu0 %v2107_v11  ;;  %1021 = vmatprep.mubr.bf16.mxu1 %v2110_v12  ;;  %v2103_v16 = vld [vmem:[%s2258_s17 + $0x78] sm:$0xff]   ;;  %v2112_v18 = vld [vmem:[%s2258_s17 + $0xc0] sm:$0xff]  }
  0x17   : > { %1798 = vmatpush3.bf16.msra.mxu0 %v2092_v3  ;;  %2069 = vmatpush3.bf16.msra.mxu1 %v2092_v3  ;;  %v2102_v15 = vld [vmem:[%s2258_s17 + $0x30] sm:$0xff]   ;;  %v2104_v17 = vld [vmem:[%s2258_s17 + $0x38] sm:$0xff]   ;;  %v2111_v21 = vld [vmem:[%s2258_s17 + $0x100] sm:$0xff]  }
  0x18   : > { %1799 = vmatprep.subr.bf16.mxu0 %v2093_v4  ;;  %2062 = vmatprep.subr.bf16.mxu1 %v2093_v4  ;;  %v2108_v20 = vld [vmem:[%s2273_s21 + $0x118] ss:$20 sps:$4 sm:$0xff]   ;;  %v2113_v22 = vld [vmem:[%s2258_s17 + $0x80] sm:$0xff]   ;;  %v2118_v29 = vld [vmem:[%s2273_s21 + $0x28] ss:$20 sps:$4 sm:$0xff]  }
  0x19   : > { %v2114_v23 = vld [vmem:[%s2273_s21 + $0x2c] ss:$20 sps:$4 sm:$0xff]   ;;  %v2116_v25 = vld [vmem:[%s2273_s21 + $0x144] ss:$20 sps:$4 sm:$0xff]   ;;  %v2126_v31 = vld [vmem:[%s2258_s17 + $0xd0] sm:$0xff]  }
  0x1a   : > { %v2120_v26 = vld [vmem:[%s2258_s17 + $0xc8] sm:$0xff]   ;;  %v2119_v30 = vld [vmem:[%s2273_s21 + $0x140] ss:$20 sps:$4 sm:$0xff]   ;;  %v2131_v36 = vld [vmem:[%s2258_s17 + $0xd8] sm:$0xff]  }
  0x1b   : > { %1800 = vmatpush3.bf16.msra.mxu0 %v2094_v5  ;;  %2070 = vmatpush3.bf16.msra.mxu1 %v2094_v5  ;;  %v2121_v27 = vld [vmem:[%s2258_s17 + $0x88] sm:$0xff]   ;;  %v2130_v34 = vld [vmem:[%s2258_s17 + $0x90] sm:$0xff]   ;;  %v2132_v38 = vld [vmem:[%s2258_s17 + $0x98] sm:$0xff]  }
  0x1c   : > { %1801 = vmatprep.subr.bf16.mxu0 %v2095_v6  ;;  %2063 = vmatprep.subr.bf16.mxu1 %v2095_v6  ;;  %v2127_v28 = vld [vmem:[%s2258_s17 + $0x108] sm:$0xff]   ;;  %v2141_v35 = vld [vmem:[%s2258_s17 + $0x110] sm:$0xff]   ;;  %v2139_v40 = vld [vmem:[%s2258_s17 + $0xe0] sm:$0xff]  }
  0x1d   : > { %v2122_v32 = vld [vmem:[%s2273_s21 + $0x54] ss:$20 sps:$4 sm:$0xff]   ;;  %v2124_v33 = vld [vmem:[%s2273_s21 + $0x16c] ss:$20 sps:$4 sm:$0xff]   ;;  %v2128_v37 = vld [vmem:[%s2273_s21 + $0x50] ss:$20 sps:$4 sm:$0xff]  }
  0x1e   : > { %v2129_v39 = vld [vmem:[%s2273_s21 + $0x168] ss:$20 sps:$4 sm:$0xff]   ;;  %v2140_v43 = vld [vmem:[%s2258_s17 + $0xa0] sm:$0xff]   ;;  %v2137_v47 = vld [vmem:[%s2273_s21 + $0x78] ss:$20 sps:$4 sm:$0xff]  }
  0x1f   : > { %1802 = vmatpush3.bf16.msra.mxu0 %v2096_v7  ;;  %2071 = vmatpush3.bf16.msra.mxu1 %v2096_v7  ;;  %v2133_v41 = vld [vmem:[%s2273_s21 + $0x7c] ss:$20 sps:$4 sm:$0xff]   ;;  %v2135_v42 = vld [vmem:[%s2273_s21 + $0x194] ss:$20 sps:$4 sm:$0xff]   ;;  %v2142_v50 = vld [vmem:[%s2273_s21 + $0xa4] ss:$20 sps:$4 sm:$0xff]  }
  0x20   : > { %1803 = vmatprep.subr.bf16.mxu0 %v2097_v8  ;;  %2064 = vmatprep.subr.bf16.mxu1 %v2097_v8  ;;  %v2157_v44 = vld [vmem:[%s2258_s17 + $0x118] sm:$0xff]   ;;  %v2148_v45 = vld [vmem:[%s2258_s17 + $0xe8] sm:$0xff]   ;;  %v2153_v48 = vld [vmem:[%s2258_s17 + $0xf0] sm:$0xff]  }
  0x21   : > { %v2149_v46 = vld [vmem:[%s2258_s17 + $0xa8] sm:$0xff]   ;;  %v2138_v49 = vld [vmem:[%s2273_s21 + $0x190] ss:$20 sps:$4 sm:$0xff]   ;;  %v2158_v53 = vld [vmem:[%s2258_s17 + $0xf8] sm:$0xff]  }
  0x22   : > { %v2144_v51 = vld [vmem:[%s2273_s21 + $0x1bc] ss:$20 sps:$4 sm:$0xff]   ;;  %v278_v54 = vld [vmem:[%s2273_s21 + $0x1e0] sm:$0x33]  ;;  %v2147_v57 = vld [vmem:[%s2273_s21 + $0x1b8] ss:$20 sps:$4 sm:$0xff]  }
  0x23   : > { %1804 = vmatpush3.bf16.msra.mxu0 %v2098_v9  ;;  %2072 = vmatpush3.bf16.msra.mxu1 %v2098_v9  ;;  %v2156_v52 = vld [vmem:[%s2258_s17 + $0xb0] sm:$0xff]   ;;  %v2159_v55 = vld [vmem:[%s2258_s17 + $0xb8] sm:$0xff]   ;;  %v2150_v58 = vld [vmem:[%s2273_s21 + $0xcc] ss:$20 sps:$4 sm:$0xff]   ;;  %v1690_v59 = vcombine.high %v278_v54, %v278_v54  ;;  %v1689_v61 = vcombine.low %v278_v54, %v278_v54 }
  0x24   : > { %1805 = vmatprep.subr.bf16.mxu0 %v2099_v10  ;;  %2065 = vmatprep.subr.bf16.mxu1 %v2099_v10  ;;  %v2146_v56 = vld [vmem:[%s2273_s21 + $0xa0] ss:$20 sps:$4 sm:$0xff]   ;;  %v2154_v60 = vld [vmem:[%s2273_s21 + $0xc8] ss:$20 sps:$4 sm:$0xff]   ;;  %v2165_v1 = vld [vmem:[%s2273_s21 + $0xf0] ss:$20 sps:$4 sm:$0xff]  }
  0x25   : > { %v2160_v62 = vld [vmem:[%s2273_s21 + $0xf4] ss:$20 sps:$4 sm:$0xff]   ;;  %v2164_v63 = vld [vmem:[%s2273_s21 + $0xc] ss:$20 sps:$4 sm:$0xff]   ;;  %v2168_v3 = vld [vmem:[%s2273_s21 + $0x30] ss:$20 sps:$4 sm:$0xff]  }
  0x26   : > { %v2162_v0 = vld [vmem:[%s2273_s21 + $0x8] ss:$20 sps:$4 sm:$0xff]   ;;  %v2169_v4 = vld [vmem:[%s2273_s21 + $0x10] ss:$20 sps:$4 sm:$0xff]   ;;  %v2172_v6 = vld [vmem:[%s2273_s21 + $0x58] ss:$20 sps:$4 sm:$0xff]  }
  0x27   : > { %1806 = vmatpush3.bf16.msra.mxu0 %v2100_v13  ;;  %2073 = vmatpush3.bf16.msra.mxu1 %v2100_v13  ;;  %v2166_v2 = vld [vmem:[%s2273_s21 + $0x34] ss:$20 sps:$4 sm:$0xff]   ;;  %v2170_v5 = vld [vmem:[%s2273_s21 + $0x5c] ss:$20 sps:$4 sm:$0xff]   ;;  %v2173_v7 = vld [vmem:[%s2273_s21 + $0x38] ss:$20 sps:$4 sm:$0xff]  }
  0x28   : > { %1807 = vmatprep.subr.bf16.mxu0 %v2101_v14  ;;  %2066 = vmatprep.subr.bf16.mxu1 %v2101_v14  ;;  %v2174_v8 = vld [vmem:[%s2273_s21 + $0x84] ss:$20 sps:$4 sm:$0xff]   ;;  %v2176_v9 = vld [vmem:[%s2273_s21 + $0x80] ss:$20 sps:$4 sm:$0xff]   ;;  %v2180_v12 = vld [vmem:[%s2273_s21 + $0xa8] ss:$20 sps:$4 sm:$0xff]  }
  0x29   : > { %v2177_v10 = vld [vmem:[%s2273_s21 + $0x60] ss:$20 sps:$4 sm:$0xff]   ;;  %v2181_v13 = vld [vmem:[%s2273_s21 + $0x88] ss:$20 sps:$4 sm:$0xff]  }
  0x2a   : > { %v2178_v11 = vld [vmem:[%s2273_s21 + $0xac] ss:$20 sps:$4 sm:$0xff]   ;;  %v2182_v14 = vld [vmem:[%s2273_s21 + $0xd4] ss:$20 sps:$4 sm:$0xff]  }
  0x2b   : > { %1808 = vmatpush3.bf16.msra.mxu0 %v2102_v15  ;;  %2074 = vmatpush3.bf16.msra.mxu1 %v2102_v15  ;;  %v2184_v15 = vld [vmem:[%s2273_s21 + $0xd0] ss:$20 sps:$4 sm:$0xff]  }
  0x2c   : > { %1809 = vmatprep.subr.bf16.mxu0 %v2103_v16  ;;  %2067 = vmatprep.subr.bf16.mxu1 %v2103_v16  ;;  %v2185_v16 = vld [vmem:[%s2273_s21 + $0xb0] ss:$20 sps:$4 sm:$0xff]  }
  0x2f   : > { %1810 = vmatpush3.bf16.msra.mxu0 %v2104_v17  ;;  %2075 = vmatpush3.bf16.msra.mxu1 %v2104_v17  ;;  %v2186_v17 = vld [vmem:[%s2273_s21 + $0xfc] ss:$20 sps:$4 sm:$0xff]  }
  0x30   : > { %2000 = vmatprep.subr.bf16.mxu0 %v2222_v24  ;;  %1889 = vmatprep.subr.bf16.mxu1 %v2112_v18  ;;  %v2188_v18 = vld [vmem:[%s2273_s21 + $0xf8] ss:$20 sps:$4 sm:$0xff]  }
  0x32   : > { %966 = vmatmul.mubr.bf16.vlgmr.msra.gmra.mrb[0].mxu0 %v2105_v19  ;;  %1022 = vmatmul.mubr.bf16.vlgmr.msra.gmra.mrb[0].mxu1 %v2108_v20  ;;  %v2189_v19 = vld [vmem:[%s2273_s21 + $0xd8] ss:$20 sps:$4 sm:$0xff]  }
  0x33   : > { %2001 = vmatpush3.bf16.msra.mxu0 %v2111_v21  ;;  %1890 = vmatpush3.bf16.msra.mxu1 %v2113_v22  ;;  %v2190_v20 = vld [vmem:[%s2273_s21 + $0x124] ss:$20 sps:$4 sm:$0xff]   ;;  %v2192_v21 = vld [vmem:[%s2273_s21 + $0x120] ss:$20 sps:$4 sm:$0xff]  }
  0x34   : > { %973 = vmatprep.mubr.bf16.mxu0 %v2114_v23  ;;  %1029 = vmatprep.mubr.bf16.mxu1 %v2116_v25  ;;  %v2193_v22 = vld [vmem:[%s2273_s21 + $0x100] ss:$20 sps:$4 sm:$0xff]   ;;  %v2196_v25 = vld [vmem:[%s2273_s21 + $0x148] ss:$20 sps:$4 sm:$0xff]  }
  0x35   : > { %1891 = vmatprep.subr.bf16.mxu1 %v2120_v26  ;;  %2002 = vmatprep.subr.bf16.mxu0 %v2222_v24  ;;  %v2194_v23 = vld [vmem:[%s2273_s21 + $0x14c] ss:$20 sps:$4 sm:$0xff]   ;;  %v2197_v26 = vld [vmem:[%s2273_s21 + $0x128] ss:$20 sps:$4 sm:$0xff]  }
  0x37   : > { %1892 = vmatpush3.bf16.msra.mxu1 %v2121_v27  ;;  %2003 = vmatpush3.bf16.msra.mxu0 %v2127_v28  ;;  %v2198_v27 = vld [vmem:[%s2273_s21 + $0x174] ss:$20 sps:$4 sm:$0xff]   ;;  %v2200_v28 = vld [vmem:[%s2273_s21 + $0x170] ss:$20 sps:$4 sm:$0xff]  }
  0x38   : > { %1893 = vmatprep.subr.bf16.mxu1 %v2126_v31  ;;  %2004 = vmatprep.subr.bf16.mxu0 %v2222_v24  ;;  %v2204_v31 = vld [vmem:[%s2273_s21 + $0x198] ss:$20 sps:$4 sm:$0xff]  }
  0x3a   : > { %974 = vmatmul.mubr.bf16.gmra.mrb[4].mxu0 %v2118_v29  ;;  %1030 = vmatmul.mubr.bf16.gmra.mrb[4].mxu1 %v2119_v30  ;;  %v2201_v29 = vld [vmem:[%s2273_s21 + $0x150] ss:$20 sps:$4 sm:$0xff]  }
  0x3b   : > { %981 = vmatprep.mubr.bf16.mxu0 %v2122_v32  ;;  %1037 = vmatprep.mubr.bf16.mxu1 %v2124_v33  ;;  %v2202_v30 = vld [vmem:[%s2273_s21 + $0x19c] ss:$20 sps:$4 sm:$0xff]   ;;  %v2205_v32 = vld [vmem:[%s2273_s21 + $0x178] ss:$20 sps:$4 sm:$0xff]  }
  0x3c   : > { %1894 = vmatpush3.bf16.msra.mxu1 %v2130_v34  ;;  %2005 = vmatpush3.bf16.msra.mxu0 %v2141_v35  ;;  %v2206_v33 = vld [vmem:[%s2273_s21 + $0x1c4] ss:$20 sps:$4 sm:$0xff]   ;;  %v279_v34 = vld [vmem:[%s2273_s21 + $0x1e8] sm:$0x33]  ;;  %v2208_v35 = vld [vmem:[%s2273_s21 + $0x1c0] ss:$20 sps:$4 sm:$0xff]  }
  0x3d   : > { %1895 = vmatprep.subr.bf16.mxu1 %v2131_v36  ;;  %2006 = vmatprep.subr.bf16.mxu0 %v2222_v24  ;;  %v2209_v36 = vld [vmem:[%s2273_s21 + $0x1a0] ss:$20 sps:$4 sm:$0xff]  }
  0x40   : > { %1896 = vmatpush3.bf16.msra.mxu1 %v2132_v38  ;;  %2007 = vmatpush3.bf16.msra.mxu0 %v2157_v44  ;;  %v1691_v38 = vcombine.low %v279_v34, %v279_v34 }
  0x41   : > { %1897 = vmatprep.subr.bf16.mxu1 %v2139_v40  ;;  %v2213_v40 = vld [vmem:[%s2273_s21 + $0x1f0] ss:$0 sps:$4 sm:$0x33]  }
  0x42   : > { %982 = vmatmul.mubr.bf16.gmra.mrb[8].mxu0 %v2128_v37  ;;  %1038 = vmatmul.mubr.bf16.gmra.mrb[8].mxu1 %v2129_v39  ;;  %v1692_v37 = vcombine.high %v279_v34, %v279_v34  ;;  %v2212_v39 = vld [vmem:[%s2273_s21 + $0x1c8] ss:$20 sps:$4 sm:$0xff]  }
  0x43   : > { %989 = vmatprep.mubr.bf16.mxu0 %v2133_v41  ;;  %1045 = vmatprep.mubr.bf16.mxu1 %v2135_v42 }
  0x44   : > { %1898 = vmatpush3.bf16.msra.mxu1 %v2140_v43 }
  0x45   : > { %1899 = vmatprep.subr.bf16.mxu1 %v2148_v45 }
  0x48   : > { %1900 = vmatpush3.bf16.msra.mxu1 %v2149_v46 }
  0x49   : > { %1901 = vmatprep.subr.bf16.mxu1 %v2153_v48 }
  0x4a   : > { %990 = vmatmul.mubr.bf16.gmra.mrb[12].mxu0 %v2137_v47  ;;  %1046 = vmatmul.mubr.bf16.gmra.mrb[12].mxu1 %v2138_v49 }
  0x4b   : > { %997 = vmatprep.mubr.bf16.mxu0 %v2142_v50  ;;  %1053 = vmatprep.mubr.bf16.mxu1 %v2144_v51 }
  0x4c   : > { %1902 = vmatpush3.bf16.msra.mxu1 %v2156_v52 }
  0x4d   : > { %1903 = vmatprep.subr.bf16.mxu1 %v2158_v53 }
  0x50   : > { %1904 = vmatpush3.bf16.msra.mxu1 %v2159_v55 }
  0x52   : > { %998 = vmatmul.mubr.bf16.gmra.mrb[16].mxu0 %v2146_v56  ;;  %1054 = vmatmul.mubr.bf16.gmra.mrb[16].mxu1 %v2147_v57 }
  0x53   : > { %1005 = vmatprep.mubr.bf16.mxu0 %v2150_v58  ;;  %1061 = vmatprep.mubr.bf16.mxu1 %v1690_v59 }
  0x5a   : > { %1006 = vmatmul.mubr.bf16.gmra.mrb[20].mxu0 %v2154_v60  ;;  %1062 = vmatmul.mubr.bf16.gmra.mrb[20].mxu1 %v1689_v61  ;;  %v2422_v60 = vld [vmem:[%s199_s24] ss:$0 sm:$0xff] }
  0x5b   : > { %1013 = vmatprep.mubr.bf16.mxu0 %v2160_v62  ;;  %1101 = vmatprep.mubr.bf16.mxu1 %v2164_v63 }
  0x62   : > { %1014 = vmatmul.mubr.bf16.gmra.mrb[24].mxu0 %v2165_v1  ;;  %1102 = vmatmul.mubr.bf16.vlgmr.msra.gmra.mrb[24].mxu1 %v2162_v0 }
  0x63   : > { %1109 = vmatprep.mubr.bf16.mxu1 %v2166_v2  ;;  %2008 = vmatprep.mubr.msk.bf16.mxu0 %vm2223_vm0, %v2222_v24 }
  0x6a   : > { %1110 = vmatmul.mubr.bf16.gmra.mrb[28].mxu1 %v2168_v3  ;;  %2009 = vmatmul.mubr.msk.bf16.vlgmr.msra.gmra.mrb[28].mxu0 %vm893_vm1, %v2169_v4 }
  0x6b   : > { %1117 = vmatprep.mubr.bf16.mxu1 %v2170_v5  ;;  %2012 = vmatprep.mubr.msk.bf16.mxu0 %vm2223_vm0, %v2222_v24 }
  0x72   : > { %1118 = vmatmul.mubr.bf16.gmra.mrb[32].mxu1 %v2172_v6  ;;  %2013 = vmatmul.mubr.msk.bf16.gmra.mrb[32].mxu0 %vm893_vm1, %v2173_v7 }
  0x73   : > { %1125 = vmatprep.mubr.bf16.mxu1 %v2174_v8  ;;  %2016 = vmatprep.mubr.msk.bf16.mxu0 %vm2223_vm0, %v2222_v24 }
  0x7a   : > { %1126 = vmatmul.mubr.bf16.gmra.mrb[36].mxu1 %v2176_v9  ;;  %2017 = vmatmul.mubr.msk.bf16.gmra.mrb[36].mxu0 %vm893_vm1, %v2177_v10 }
  0x7b   : > { %1133 = vmatprep.mubr.bf16.mxu1 %v2178_v11  ;;  %2020 = vmatprep.mubr.msk.bf16.mxu0 %vm2223_vm0, %v2222_v24 }
  0x82   : > { %1134 = vmatmul.mubr.bf16.gmra.mrb[40].mxu1 %v2180_v12  ;;  %2021 = vmatmul.mubr.msk.bf16.gmra.mrb[40].mxu0 %vm893_vm1, %v2181_v13 }
  0x83   : > { %1141 = vmatprep.mubr.bf16.mxu1 %v2182_v14  ;;  %2024 = vmatprep.mubr.msk.bf16.mxu0 %vm2223_vm0, %v2222_v24 }
  0x8a   : > { %1142 = vmatmul.mubr.bf16.gmra.mrb[44].mxu1 %v2184_v15  ;;  %2025 = vmatmul.mubr.msk.bf16.gmra.mrb[44].mxu0 %vm893_vm1, %v2185_v16 }
  0x8b   : > { %1149 = vmatprep.mubr.bf16.mxu1 %v2186_v17  ;;  %2028 = vmatprep.mubr.msk.bf16.mxu0 %vm2223_vm0, %v2222_v24 }
  0x92   : > { %1150 = vmatmul.mubr.bf16.gmra.mrb[48].mxu1 %v2188_v18  ;;  %2029 = vmatmul.mubr.msk.bf16.gmra.mrb[48].mxu0 %vm893_vm1, %v2189_v19 }
  0x93   : > { %1157 = vmatprep.mubr.bf16.mxu1 %v2190_v20  ;;  %2032 = vmatprep.mubr.msk.bf16.mxu0 %vm2223_vm0, %v2222_v24 }
  0x9a   : > { %1158 = vmatmul.mubr.bf16.gmra.mrb[52].mxu1 %v2192_v21  ;;  %2033 = vmatmul.mubr.msk.bf16.gmra.mrb[52].mxu0 %vm893_vm1, %v2193_v22 }
  0x9b   : > { %1165 = vmatprep.mubr.bf16.mxu1 %v2194_v23  ;;  %2036 = vmatprep.mubr.msk.bf16.mxu0 %vm2223_vm0, %v2222_v24 }
  0xa2   : > { %1166 = vmatmul.mubr.bf16.gmra.mrb[56].mxu1 %v2196_v25  ;;  %2037 = vmatmul.mubr.msk.bf16.gmra.mrb[56].mxu0 %vm893_vm1, %v2197_v26 }
  0xa3   : > { %1173 = vmatprep.mubr.bf16.mxu1 %v2198_v27  ;;  %2040 = vmatprep.mubr.msk.bf16.mxu0 %vm2223_vm0, %v2222_v24 }
  0xaa   : > { %1174 = vmatmul.mubr.bf16.gmra.mrb[60].mxu1 %v2200_v28  ;;  %2041 = vmatmul.mubr.msk.bf16.gmra.mrb[60].mxu0 %vm893_vm1, %v2201_v29 }
  0xab   : > { %1181 = vmatprep.mubr.bf16.mxu1 %v2202_v30  ;;  %2044 = vmatprep.mubr.msk.bf16.mxu0 %vm2223_vm0, %v2222_v24 }
  0xb2   : > { %1182 = vmatmul.mubr.bf16.gmra.mrb[64].mxu1 %v2204_v31  ;;  %2045 = vmatmul.mubr.msk.bf16.gmra.mrb[64].mxu0 %vm893_vm1, %v2205_v32 }
  0xb3   : > { %1189 = vmatprep.mubr.bf16.mxu1 %v2206_v33  ;;  %2048 = vmatprep.mubr.msk.bf16.mxu0 %vm2223_vm0, %v2222_v24 }
  0xba   : > { %1190 = vmatmul.mubr.bf16.gmra.mrb[68].mxu1 %v2208_v35  ;;  %2049 = vmatmul.mubr.msk.bf16.gmra.mrb[68].mxu0 %vm893_vm1, %v2209_v36 }
  0xbb   : > { %1197 = vmatprep.mubr.bf16.mxu1 %v1692_v37  ;;  %2052 = vmatprep.mubr.msk.bf16.mxu0 %vm2223_vm0, %v2222_v24 }
  0xc2   : > { %1198 = vmatmul.mubr.bf16.gmra.mrb[72].mxu1 %v1691_v38  ;;  %2053 = vmatmul.mubr.msk.bf16.gmra.mrb[72].mxu0 %vm893_vm1, %v2212_v39 }
  0xc3   : > { %2056 = vmatprep.mubr.msk.bf16.mxu0 %vm2223_vm0, %v2222_v24 }
  0xca   : > { %2057 = vmatmul.mubr.msk.bf16.gmra.mrb[76].mxu0 %vm893_vm1, %v2213_v40 }
 0x105   : > { %v1811_v41 = vpop.f32.mrb[0].mxu0  ;;  %v1853_v42 = vpop.f32.mrb[0].mxu1 }
 0x106   : > { %v1812_v43 = vpop.f32.mrb[1].mxu0  ;;  %v1854_v44 = vpop.f32.mrb[1].mxu1 }
 0x107   : > { %v2408_v45 = vadd.f32 %v1812_v43, %v1811_v41  ;;  %v1814_v46 = vpop.f32.mrb[2].mxu0  ;;  %v2410_v47 = vadd.f32 %v1854_v44, %v1853_v42  ;;  %v1856_v48 = vpop.f32.mrb[2].mxu1 }
 0x108   : > { %v1815_v49 = vpop.f32.mrb[3].mxu0  ;;  %v1857_v50 = vpop.f32.mrb[3].mxu1 }
 0x109   : > { %v2412_v51 = vadd.f32 %v1815_v49, %v1814_v46  ;;  %v2414_v52 = vadd.f32 %v1857_v50, %v1856_v48 }
 0x10d   : > { %v1817_v24 = vpop.f32.mrb[4].mxu0  ;;  %v1859_v53 = vpop.f32.mrb[4].mxu1 }
 0x10e   : > { %v1818_v54 = vpop.f32.mrb[5].mxu0  ;;  %v1860_v55 = vpop.f32.mrb[5].mxu1 }
 0x10f   : > { %v2420_v56 = vadd.f32 %v1818_v54, %v1817_v24  ;;  %v1820_v57 = vpop.f32.mrb[6].mxu0  ;;  %v1861_v58 = vadd.f32 %v1860_v55, %v1859_v53  ;;  %v1862_v59 = vpop.f32.mrb[6].mxu1 }
 0x110   : > { %v1821_v61 = vpop.f32.mrb[7].mxu0  ;;  %v1863_v62 = vpop.f32.mrb[7].mxu1 }
 0x111   : > { %v2425_v63 = vadd.f32 %v1861_v58, %v2422_v60  ;;  %v2427_v0 = vadd.f32 %v1821_v61, %v1820_v57  ;;  %v1864_v1 = vadd.f32 %v1863_v62, %v1862_v59 }
 0x113   : > { %v2430_v2 = vadd.f32 %v1864_v1, %v2422_v60 }
 0x115   : > { %v1823_v3 = vpop.f32.mrb[8].mxu0  ;;  %v1865_v4 = vpop.f32.mrb[8].mxu1 }
 0x116   : > { %v1824_v5 = vpop.f32.mrb[9].mxu0  ;;  %v1866_v6 = vpop.f32.mrb[9].mxu1 }
 0x117   : > { %v2432_v7 = vadd.f32 %v1824_v5, %v1823_v3  ;;  %v1826_v8 = vpop.f32.mrb[10].mxu0  ;;  %v1867_v9 = vadd.f32 %v1866_v6, %v1865_v4  ;;  %v1868_v10 = vpop.f32.mrb[10].mxu1  ;;  %v968_v6 = vadd.f32 %v2408_v45, %v2422_v60 }
 0x118   : > { %v1827_v11 = vpop.f32.mrb[11].mxu0  ;;  %v1869_v12 = vpop.f32.mrb[11].mxu1 }
 0x119   : > { %v2435_v13 = vadd.f32 %v1867_v9, %v2422_v60  ;;  %v2437_v14 = vadd.f32 %v1827_v11, %v1826_v8  ;;  %v1870_v15 = vadd.f32 %v1869_v12, %v1868_v10 }
 0x11b   : > { %v2440_v16 = vadd.f32 %v1870_v15, %v2422_v60 }
 0x11d   : > { %v1829_v17 = vpop.f32.mrb[12].mxu0  ;;  %v1871_v18 = vpop.f32.mrb[12].mxu1 }
 0x11e   : > { %v1830_v19 = vpop.f32.mrb[13].mxu0  ;;  %v1872_v20 = vpop.f32.mrb[13].mxu1 }
 0x11f   : > { %v2442_v21 = vadd.f32 %v1830_v19, %v1829_v17  ;;  %v1832_v22 = vpop.f32.mrb[14].mxu0  ;;  %v1873_v23 = vadd.f32 %v1872_v20, %v1871_v18  ;;  %v1874_v25 = vpop.f32.mrb[14].mxu1  ;;  %v971_v17 = vadd.f32 %v2412_v51, %v2422_v60 }
 0x120   : > { %v1833_v26 = vpop.f32.mrb[15].mxu0  ;;  %v1875_v27 = vpop.f32.mrb[15].mxu1 }
 0x121   : > { %v2445_v28 = vadd.f32 %v1873_v23, %v2422_v60  ;;  %v2447_v29 = vadd.f32 %v1833_v26, %v1832_v22  ;;  %v1876_v30 = vadd.f32 %v1875_v27, %v1874_v25 }
 0x123   : > { %v2450_v31 = vadd.f32 %v1876_v30, %v2422_v60  ;;  %v976_v30 = vadd.f32 %v2420_v56, %v2422_v60 }
 0x125   : > { %v1835_v32 = vpop.f32.mrb[16].mxu0  ;;  %v1877_v33 = vpop.f32.mrb[16].mxu1 }
 0x126   : > { %v1836_v34 = vpop.f32.mrb[17].mxu0  ;;  %v1878_v35 = vpop.f32.mrb[17].mxu1 }
 0x127   : > { %v2452_v36 = vadd.f32 %v1836_v34, %v1835_v32  ;;  %v1838_v37 = vpop.f32.mrb[18].mxu0  ;;  %v1879_v38 = vadd.f32 %v1878_v35, %v1877_v33  ;;  %v1880_v39 = vpop.f32.mrb[18].mxu1 }
 0x128   : > { %v1839_v40 = vpop.f32.mrb[19].mxu0  ;;  %v1881_v41 = vpop.f32.mrb[19].mxu1 }
 0x129   : > { %v2455_v42 = vadd.f32 %v1879_v38, %v2422_v60  ;;  %v2457_v43 = vadd.f32 %v1839_v40, %v1838_v37  ;;  %v1882_v44 = vadd.f32 %v1881_v41, %v1880_v39  ;;  %v979_v39 = vadd.f32 %v2427_v0, %v2422_v60 }
 0x12b   : > { %v2460_v46 = vadd.f32 %v1882_v44, %v2422_v60 }
 0x12d   : > { %v1841_v48 = vpop.f32.mrb[20].mxu0  ;;  %v1883_v49 = vpop.f32.mrb[20].mxu1 }
 0x12e   : > { %v1842_v50 = vpop.f32.mrb[21].mxu0  ;;  %v1884_v24 = vpop.f32.mrb[21].mxu1 }
 0x12f   : > { %v2462_v53 = vadd.f32 %v1842_v50, %v1841_v48  ;;  %v1844_v54 = vpop.f32.mrb[22].mxu0  ;;  %v1885_v55 = vadd.f32 %v1884_v24, %v1883_v49  ;;  %v1886_v57 = vpop.f32.mrb[22].mxu1 }
 0x130   : > { %v1845_v58 = vpop.f32.mrb[23].mxu0  ;;  %v1887_v59 = vpop.f32.mrb[23].mxu1 }
 0x131   : > { %v2465_v61 = vadd.f32 %v1885_v55, %v2422_v60  ;;  %v2467_v62 = vadd.f32 %v1845_v58, %v1844_v54  ;;  %v984_v59 = vadd.f32 %v2432_v7, %v2422_v60 }
 0x135   : > { %v1847_v1 = vpop.f32.mrb[24].mxu0  ;;  %v1905_v3 = vpop.f32.mrb[24].mxu1 }
 0x136   : > { %v1848_v4 = vpop.f32.mrb[25].mxu0  ;;  %v1906_v5 = vpop.f32.mrb[25].mxu1 }
 0x137   : > { %v2471_v8 = vadd.f32 %v1848_v4, %v1847_v1  ;;  %v1907_v9 = vadd.f32 %v1906_v5, %v1905_v3  ;;  %v1850_v10 = vpop.f32.mrb[26].mxu0  ;;  %v1908_v11 = vpop.f32.mrb[26].mxu1 }
 0x138   : > { %v1851_v12 = vpop.f32.mrb[27].mxu0  ;;  %v1909_v15 = vpop.f32.mrb[27].mxu1 }
 0x139   : > { %v2475_v18 = vadd.f32 %v1851_v12, %v1850_v10  ;;  %v1910_v19 = vadd.f32 %v1909_v15, %v1908_v11  ;;  %v1104_v20 = vadd.f32 %v1907_v9, %v968_v6  ;;  %v987_v11 = vadd.f32 %v2437_v14, %v2422_v60 }
 0x13a   : > { %v992_v14 = vadd.f32 %v2442_v21, %v2422_v60 }
 0x13b   : > { %v1107_v22 = vadd.f32 %v1910_v19, %v971_v17 }
 0x13d   : > { %v1911_v23 = vpop.f32.mrb[28].mxu1  ;;  %v1239_v25 = vpop.f32.mrb[28].mxu0 }
 0x13e   : > { %v1240_v26 = vadd.f32 %v1239_v25, %v1104_v20  ;;  %v1912_v45 = vpop.f32.mrb[29].mxu1  ;;  %v2010_v27 = vpop.f32.mrb[29].mxu0 }
 0x13f   : > { %v1913_v32 = vadd.f32 %v1912_v45, %v1911_v23  ;;  %v1914_v33 = vpop.f32.mrb[30].mxu1  ;;  %v1242_v34 = vpop.f32.mrb[30].mxu0 }
 0x140   : > { %vm1341_vm2 = vcmp.ge.f32.partialorder %v1240_v26, 0.0  ;;  %v1366_v35 = vmul.f32 0.01, %v1240_v26  ;;  %v1243_v51 = vadd.f32 %v1242_v34, %v1107_v22  ;;  %v1915_v37 = vpop.f32.mrb[31].mxu1  ;;  %v2011_v38 = vpop.f32.mrb[31].mxu0 }
 0x141   : > { %v1916_v40 = vadd.f32 %v1915_v37, %v1914_v33  ;;  %v1112_v41 = vadd.f32 %v1913_v32, %v976_v30 }
 0x142   : > { %v1391_v56 = vsel %vm1341_vm2, %v1240_v26, %v1366_v35  ;;  %vm1342_vm4 = vcmp.ge.f32.partialorder %v1243_v51, 0.0  ;;  %v1367_v44 = vmul.f32 0.01, %v1243_v51 }
 0x143   : > { %v1770_v48 = vpack.c.bf16 %v1391_v56, %v1391_v56  ;;  %v1115_v49 = vadd.f32 %v1916_v40, %v979_v39  ;;  %v995_v39 = vadd.f32 %v2447_v29, %v2422_v60  ;;  %v1000_v29 = vadd.f32 %v2452_v36, %v2422_v60 }
 0x144   : > { %v1392_v50 = vsel %vm1342_vm4, %v1243_v51, %v1367_v44 }
 0x145   : > { %1518 = vst.msk [vmem:[%s2485_s28] sm:$0xf] %vm1517_vm3, %v1770_v48  ;;  %v1771_v24 = vpack.c.bf16 %v1392_v50, %v1392_v50  ;;  %v1917_v0 = vpop.f32.mrb[32].mxu1  ;;  %v1247_v54 = vpop.f32.mrb[32].mxu0 }
 0x146   : > { %v1248_v55 = vadd.f32 %v1247_v54, %v1112_v41  ;;  %v1918_v57 = vpop.f32.mrb[33].mxu1  ;;  %v2014_v58 = vpop.f32.mrb[33].mxu0 }
 0x147   : > { %1519 = vst.msk [vmem:[%s2485_s28 + $0x4] sm:$0xf] %vm1517_vm3, %v1771_v24  ;;  %v1919_v1 = vadd.f32 %v1918_v57, %v1917_v0  ;;  %v1920_v3 = vpop.f32.mrb[34].mxu1  ;;  %v1250_v4 = vpop.f32.mrb[34].mxu0 }
 0x148   : > { %vm1343_vm5 = vcmp.ge.f32.partialorder %v1248_v55, 0.0  ;;  %v1368_v5 = vmul.f32 0.01, %v1248_v55  ;;  %v1251_v6 = vadd.f32 %v1250_v4, %v1115_v49  ;;  %v1921_v9 = vpop.f32.mrb[35].mxu1  ;;  %v2015_v10 = vpop.f32.mrb[35].mxu0 }
 0x149   : > { %v1922_v12 = vadd.f32 %v1921_v9, %v1920_v3  ;;  %v1120_v15 = vadd.f32 %v1919_v1, %v984_v59  ;;  %v1003_v9 = vadd.f32 %v2457_v43, %v2422_v60  ;;  %v1008_v43 = vadd.f32 %v2462_v53, %v2422_v60 }
 0x14a   : > { %v1393_v17 = vsel %vm1343_vm5, %v1248_v55, %v1368_v5  ;;  %vm1344_vm6 = vcmp.ge.f32.partialorder %v1251_v6, 0.0  ;;  %v1369_v7 = vmul.f32 0.01, %v1251_v6 }
 0x14b   : > { %v1772_v19 = vpack.c.bf16 %v1393_v17, %v1393_v17  ;;  %v1123_v20 = vadd.f32 %v1922_v12, %v987_v11 }
 0x14c   : > { %v1394_v22 = vsel %vm1344_vm6, %v1251_v6, %v1369_v7 }
 0x14d   : > { %1520 = vst.msk [vmem:[%s2485_s28 + $0x8] sm:$0xf] %vm1517_vm3, %v1772_v19  ;;  %v1773_v23 = vpack.c.bf16 %v1394_v22, %v1394_v22  ;;  %v1923_v25 = vpop.f32.mrb[36].mxu1  ;;  %v1255_v26 = vpop.f32.mrb[36].mxu0 }
 0x14e   : > { %v1256_v45 = vadd.f32 %v1255_v26, %v1120_v15  ;;  %v1924_v27 = vpop.f32.mrb[37].mxu1  ;;  %v2018_v30 = vpop.f32.mrb[37].mxu0 }
 0x14f   : > { %1521 = vst.msk [vmem:[%s2485_s28 + $0xc] sm:$0xf] %vm1517_vm3, %v1773_v23  ;;  %v1925_v32 = vadd.f32 %v1924_v27, %v1923_v25  ;;  %v1926_v33 = vpop.f32.mrb[38].mxu1  ;;  %v1258_v34 = vpop.f32.mrb[38].mxu0 }
 0x150   : > { %vm1345_vm7 = vcmp.ge.f32.partialorder %v1256_v45, 0.0  ;;  %v1370_v35 = vmul.f32 0.01, %v1256_v45  ;;  %v1259_v51 = vadd.f32 %v1258_v34, %v1123_v20  ;;  %v1927_v37 = vpop.f32.mrb[39].mxu1  ;;  %v2019_v38 = vpop.f32.mrb[39].mxu0 }
 0x151   : > { %v1928_v40 = vadd.f32 %v1927_v37, %v1926_v33  ;;  %v1128_v41 = vadd.f32 %v1925_v32, %v992_v14 }
 0x152   : > { %v1395_v56 = vsel %vm1345_vm7, %v1256_v45, %v1370_v35  ;;  %vm1346_vm8 = vcmp.ge.f32.partialorder %v1259_v51, 0.0  ;;  %v1371_v21 = vmul.f32 0.01, %v1259_v51  ;;  %v1011_v35 = vadd.f32 %v2467_v62, %v2422_v60 }
 0x153   : > { %v1774_v44 = vpack.c.bf16 %v1395_v56, %v1395_v56  ;;  %v1131_v48 = vadd.f32 %v1928_v40, %v995_v39  ;;  %v1016_v62 = vadd.f32 %v2471_v8, %v2422_v60 }
 0x154   : > { %v1396_v49 = vsel %vm1346_vm8, %v1259_v51, %v1371_v21 }
 0x155   : > { %1522 = vst.msk [vmem:[%s2485_s28 + $0x10] sm:$0xf] %vm1517_vm3, %v1774_v44  ;;  %v1775_v50 = vpack.c.bf16 %v1396_v49, %v1396_v49  ;;  %v1929_v24 = vpop.f32.mrb[40].mxu1  ;;  %v1263_v0 = vpop.f32.mrb[40].mxu0 }
 0x156   : > { %v1264_v54 = vadd.f32 %v1263_v0, %v1128_v41  ;;  %v1930_v55 = vpop.f32.mrb[41].mxu1  ;;  %v2022_v57 = vpop.f32.mrb[41].mxu0 }
 0x157   : > { %1523 = vst.msk [vmem:[%s2485_s28 + $0x14] sm:$0xf] %vm1517_vm3, %v1775_v50  ;;  %v1931_v58 = vadd.f32 %v1930_v55, %v1929_v24  ;;  %v1932_v59 = vpop.f32.mrb[42].mxu1  ;;  %v1266_v1 = vpop.f32.mrb[42].mxu0 }
 0x158   : > { %vm1347_vm9 = vcmp.ge.f32.partialorder %v1264_v54, 0.0  ;;  %v1372_v3 = vmul.f32 0.01, %v1264_v54  ;;  %v1267_v4 = vadd.f32 %v1266_v1, %v1131_v48  ;;  %v1933_v5 = vpop.f32.mrb[43].mxu1  ;;  %v2023_v6 = vpop.f32.mrb[43].mxu0 }
 0x159   : > { %v1934_v10 = vadd.f32 %v1933_v5, %v1932_v59  ;;  %v1136_v11 = vadd.f32 %v1931_v58, %v1000_v29  ;;  %v1019_v59 = vadd.f32 %v2475_v18, %v2422_v60  ;;  %v1024_v18 = vadd.f32 %v2410_v47, %v2422_v60 }
 0x15a   : > { %v1397_v12 = vsel %vm1347_vm9, %v1264_v54, %v1372_v3  ;;  %vm1348_vm10 = vcmp.ge.f32.partialorder %v1267_v4, 0.0  ;;  %v1373_v36 = vmul.f32 0.01, %v1267_v4 }
 0x15b   : > { %v1776_v15 = vpack.c.bf16 %v1397_v12, %v1397_v12  ;;  %v1139_v17 = vadd.f32 %v1934_v10, %v1003_v9 }
 0x15c   : > { %v1398_v7 = vsel %vm1348_vm10, %v1267_v4, %v1373_v36 }
 0x15d   : > { %1524 = vst.msk [vmem:[%s2485_s28 + $0x18] sm:$0xf] %vm1517_vm3, %v1776_v15  ;;  %v1777_v19 = vpack.c.bf16 %v1398_v7, %v1398_v7  ;;  %v1935_v20 = vpop.f32.mrb[44].mxu1  ;;  %v1271_v22 = vpop.f32.mrb[44].mxu0 }
 0x15e   : > { %v1272_v23 = vadd.f32 %v1271_v22, %v1136_v11  ;;  %v1936_v25 = vpop.f32.mrb[45].mxu1  ;;  %v2026_v26 = vpop.f32.mrb[45].mxu0 }
 0x15f   : > { %1525 = vst.msk [vmem:[%s2485_s28 + $0x1c] sm:$0xf] %vm1517_vm3, %v1777_v19  ;;  %v1937_v45 = vadd.f32 %v1936_v25, %v1935_v20  ;;  %v1938_v27 = vpop.f32.mrb[46].mxu1  ;;  %v1274_v30 = vpop.f32.mrb[46].mxu0 }
 0x160   : > { %vm1349_vm11 = vcmp.ge.f32.partialorder %v1272_v23, 0.0  ;;  %v1374_v14 = vmul.f32 0.01, %v1272_v23  ;;  %v1275_v32 = vadd.f32 %v1274_v30, %v1139_v17  ;;  %v1939_v33 = vpop.f32.mrb[47].mxu1  ;;  %v2027_v34 = vpop.f32.mrb[47].mxu0 }
 0x161   : > { %v1940_v51 = vadd.f32 %v1939_v33, %v1938_v27  ;;  %v1144_v37 = vadd.f32 %v1937_v45, %v1008_v43  ;;  %v1027_v43 = vadd.f32 %v2414_v52, %v2422_v60 }
 0x162   : > { %v1399_v38 = vsel %vm1349_vm11, %v1272_v23, %v1374_v14  ;;  %vm1350_vm12 = vcmp.ge.f32.partialorder %v1275_v32, 0.0  ;;  %v1375_v53 = vmul.f32 0.01, %v1275_v32 }
 0x163   : > { %v1778_v39 = vpack.c.bf16 %v1399_v38, %v1399_v38  ;;  %v1147_v40 = vadd.f32 %v1940_v51, %v1011_v35 }
 0x164   : > { %v1400_v41 = vsel %vm1350_vm12, %v1275_v32, %v1375_v53 }
 0x165   : > { %1526 = vst.msk [vmem:[%s2485_s28 + $0x20] sm:$0xf] %vm1517_vm3, %v1778_v39  ;;  %v1779_v56 = vpack.c.bf16 %v1400_v41, %v1400_v41  ;;  %v1941_v21 = vpop.f32.mrb[48].mxu1  ;;  %v1279_v44 = vpop.f32.mrb[48].mxu0 }
 0x166   : > { %v1280_v48 = vadd.f32 %v1279_v44, %v1144_v37  ;;  %v1942_v49 = vpop.f32.mrb[49].mxu1  ;;  %v2030_v50 = vpop.f32.mrb[49].mxu0 }
 0x167   : > { %1527 = vst.msk [vmem:[%s2485_s28 + $0x24] sm:$0xf] %vm1517_vm3, %v1779_v56  ;;  %v1943_v24 = vadd.f32 %v1942_v49, %v1941_v21  ;;  %v1944_v0 = vpop.f32.mrb[50].mxu1  ;;  %v1282_v54 = vpop.f32.mrb[50].mxu0 }
 0x168   : > { %vm1351_vm13 = vcmp.ge.f32.partialorder %v1280_v48, 0.0  ;;  %v1376_v55 = vmul.f32 0.01, %v1280_v48  ;;  %v1283_v57 = vadd.f32 %v1282_v54, %v1147_v40  ;;  %v1945_v29 = vpop.f32.mrb[51].mxu1  ;;  %v2031_v58 = vpop.f32.mrb[51].mxu0 }
 0x169   : > { %v1946_v1 = vadd.f32 %v1945_v29, %v1944_v0  ;;  %v1152_v3 = vadd.f32 %v1943_v24, %v1016_v62 }
 0x16a   : > { %v1401_v4 = vsel %vm1351_vm13, %v1280_v48, %v1376_v55  ;;  %vm1352_vm14 = vcmp.ge.f32.partialorder %v1283_v57, 0.0  ;;  %v1377_v8 = vmul.f32 0.01, %v1283_v57  ;;  %vm1542_vm13 = vcmask 517120  }
 0x16b   : > { %v1780_v5 = vpack.c.bf16 %v1401_v4, %v1401_v4  ;;  %v1155_v6 = vadd.f32 %v1946_v1, %v1019_v59 }
 0x16c   : > { %v1402_v9 = vsel %vm1352_vm14, %v1283_v57, %v1377_v8 }
 0x16d   : > { %1528 = vst.msk [vmem:[%s2485_s28 + $0x28] sm:$0xf] %vm1517_vm3, %v1780_v5  ;;  %v1781_v10 = vpack.c.bf16 %v1402_v9, %v1402_v9  ;;  %v1947_v11 = vpop.f32.mrb[52].mxu1  ;;  %v1287_v12 = vpop.f32.mrb[52].mxu0 }
 0x16e   : > { %v1288_v36 = vadd.f32 %v1287_v12, %v1152_v3  ;;  %v1948_v15 = vpop.f32.mrb[53].mxu1  ;;  %v2034_v17 = vpop.f32.mrb[53].mxu0 }
 0x16f   : > { %1529 = vst.msk [vmem:[%s2485_s28 + $0x2c] sm:$0xf] %vm1517_vm3, %v1781_v10  ;;  %v1949_v7 = vadd.f32 %v1948_v15, %v1947_v11  ;;  %v1950_v19 = vpop.f32.mrb[54].mxu1  ;;  %v1290_v20 = vpop.f32.mrb[54].mxu0 }
 0x170   : > { %vm1353_vm15 = vcmp.ge.f32.partialorder %v1288_v36, 0.0  ;;  %v1378_v22 = vmul.f32 0.01, %v1288_v36  ;;  %v1291_v23 = vadd.f32 %v1290_v20, %v1155_v6  ;;  %v1951_v25 = vpop.f32.mrb[55].mxu1  ;;  %v2035_v26 = vpop.f32.mrb[55].mxu0 }
 0x171   : > { %v1952_v45 = vadd.f32 %v1951_v25, %v1950_v19  ;;  %v1160_v27 = vadd.f32 %v1949_v7, %v1024_v18 }
 0x172   : > { %v1403_v30 = vsel %vm1353_vm15, %v1288_v36, %v1378_v22  ;;  %vm1354_vm0 = vcmp.ge.f32.partialorder %v1291_v23, 0.0  ;;  %v1379_v47 = vmul.f32 0.01, %v1291_v23 }
 0x173   : > { %v1782_v14 = vpack.c.bf16 %v1403_v30, %v1403_v30  ;;  %v1163_v32 = vadd.f32 %v1952_v45, %v1027_v43 }
 0x174   : > { %v1404_v33 = vsel %vm1354_vm0, %v1291_v23, %v1379_v47 }
 0x175   : > { %1530 = vst.msk [vmem:[%s2485_s28 + $0x30] sm:$0xf] %vm1517_vm3, %v1782_v14  ;;  %v1783_v34 = vpack.c.bf16 %v1404_v33, %v1404_v33  ;;  %v1953_v35 = vpop.f32.mrb[56].mxu1  ;;  %v1295_v51 = vpop.f32.mrb[56].mxu0 }
 0x176   : > { %v1296_v37 = vadd.f32 %v1295_v51, %v1160_v27  ;;  %v1954_v38 = vpop.f32.mrb[57].mxu1  ;;  %v2038_v53 = vpop.f32.mrb[57].mxu0 }
 0x177   : > { %1531 = vst.msk [vmem:[%s2485_s28 + $0x34] sm:$0xf] %vm1517_vm3, %v1783_v34  ;;  %v1955_v52 = vadd.f32 %v1954_v38, %v1953_v35  ;;  %v1956_v60 = vpop.f32.mrb[58].mxu1  ;;  %v1298_v39 = vpop.f32.mrb[58].mxu0 }
 0x178   : > { %vm1355_vm1 = vcmp.ge.f32.partialorder %v1296_v37, 0.0  ;;  %v1380_v40 = vmul.f32 0.01, %v1296_v37  ;;  %v1299_v41 = vadd.f32 %v1298_v39, %v1163_v32  ;;  %v1957_v56 = vpop.f32.mrb[59].mxu1  ;;  %v2039_v21 = vpop.f32.mrb[59].mxu0 }
 0x179   : > { %v1958_v44 = vadd.f32 %v1957_v56, %v1956_v60  ;;  %v1168_v48 = vadd.f32 %v1955_v52, %v2425_v63 }
 0x17a   : > { %v1405_v49 = vsel %vm1355_vm1, %v1296_v37, %v1380_v40  ;;  %vm1356_vm2 = vcmp.ge.f32.partialorder %v1299_v41, 0.0  ;;  %v1381_v50 = vmul.f32 0.01, %v1299_v41 }
 0x17b   : > { %v1784_v62 = vpack.c.bf16 %v1405_v49, %v1405_v49  ;;  %v1171_v24 = vadd.f32 %v1958_v44, %v2430_v2 }
 0x17c   : > { %v1406_v0 = vsel %vm1356_vm2, %v1299_v41, %v1381_v50 }
 0x17d   : > { %1532 = vst.msk [vmem:[%s2485_s28 + $0x38] sm:$0xf] %vm1517_vm3, %v1784_v62  ;;  %v1785_v54 = vpack.c.bf16 %v1406_v0, %v1406_v0  ;;  %v1959_v55 = vpop.f32.mrb[60].mxu1  ;;  %v1303_v57 = vpop.f32.mrb[60].mxu0 }
 0x17e   : > { %v1304_v29 = vadd.f32 %v1303_v57, %v1168_v48  ;;  %v1960_v58 = vpop.f32.mrb[61].mxu1  ;;  %v2042_v59 = vpop.f32.mrb[61].mxu0 }
 0x17f   : > { %1533 = vst.msk [vmem:[%s2485_s28 + $0x3c] sm:$0xf] %vm1517_vm3, %v1785_v54  ;;  %v1961_v1 = vadd.f32 %v1960_v58, %v1959_v55  ;;  %v1962_v63 = vpop.f32.mrb[62].mxu1  ;;  %v1306_v3 = vpop.f32.mrb[62].mxu0 }
 0x180   : > { %vm1357_vm4 = vcmp.ge.f32.partialorder %v1304_v29, 0.0  ;;  %v1382_v4 = vmul.f32 0.01, %v1304_v29  ;;  %v1307_v8 = vadd.f32 %v1306_v3, %v1171_v24  ;;  %v1963_v5 = vpop.f32.mrb[63].mxu1  ;;  %v2043_v2 = vpop.f32.mrb[63].mxu0 }
 0x181   : > { %v1964_v6 = vadd.f32 %v1963_v5, %v1962_v63  ;;  %v1176_v9 = vadd.f32 %v1961_v1, %v2435_v13 }
 0x182   : > { %v1407_v10 = vsel %vm1357_vm4, %v1304_v29, %v1382_v4  ;;  %vm1358_vm5 = vcmp.ge.f32.partialorder %v1307_v8, 0.0  ;;  %v1383_v11 = vmul.f32 0.01, %v1307_v8 }
 0x183   : > { %v1786_v12 = vpack.c.bf16 %v1407_v10, %v1407_v10  ;;  %v1179_v36 = vadd.f32 %v1964_v6, %v2440_v16 }
 0x184   : > { %v1408_v15 = vsel %vm1358_vm5, %v1307_v8, %v1383_v11 }
 0x185   : > { %1534 = vst.msk [vmem:[%s2485_s28 + $0x40] sm:$0xf] %vm1517_vm3, %v1786_v12  ;;  %v1787_v17 = vpack.c.bf16 %v1408_v15, %v1408_v15  ;;  %v1965_v18 = vpop.f32.mrb[64].mxu1  ;;  %v1311_v7 = vpop.f32.mrb[64].mxu0 }
 0x186   : > { %v1312_v19 = vadd.f32 %v1311_v7, %v1176_v9  ;;  %v1966_v20 = vpop.f32.mrb[65].mxu1  ;;  %v2046_v22 = vpop.f32.mrb[65].mxu0 }
 0x187   : > { %1535 = vst.msk [vmem:[%s2485_s28 + $0x44] sm:$0xf] %vm1517_vm3, %v1787_v17  ;;  %v1967_v23 = vadd.f32 %v1966_v20, %v1965_v18  ;;  %v1968_v13 = vpop.f32.mrb[66].mxu1  ;;  %v1314_v25 = vpop.f32.mrb[66].mxu0 }
 0x188   : > { %vm1359_vm6 = vcmp.ge.f32.partialorder %v1312_v19, 0.0  ;;  %v1384_v26 = vmul.f32 0.01, %v1312_v19  ;;  %v1315_v43 = vadd.f32 %v1314_v25, %v1179_v36  ;;  %v1969_v45 = vpop.f32.mrb[67].mxu1  ;;  %v2047_v16 = vpop.f32.mrb[67].mxu0 }
 0x189   : > { %v1970_v27 = vadd.f32 %v1969_v45, %v1968_v13  ;;  %v1184_v30 = vadd.f32 %v1967_v23, %v2445_v28 }
 0x18a   : > { %v1409_v47 = vsel %vm1359_vm6, %v1312_v19, %v1384_v26  ;;  %vm1360_vm7 = vcmp.ge.f32.partialorder %v1315_v43, 0.0  ;;  %v1385_v14 = vmul.f32 0.01, %v1315_v43 }
 0x18b   : > { %v1788_v32 = vpack.c.bf16 %v1409_v47, %v1409_v47  ;;  %v1187_v33 = vadd.f32 %v1970_v27, %v2450_v31 }
 0x18c   : > { %v1410_v34 = vsel %vm1360_vm7, %v1315_v43, %v1385_v14 }
 0x18d   : > { %1536 = vst.msk [vmem:[%s2485_s28 + $0x48] sm:$0xf] %vm1517_vm3, %v1788_v32  ;;  %v1789_v35 = vpack.c.bf16 %v1410_v34, %v1410_v34  ;;  %v1971_v51 = vpop.f32.mrb[68].mxu1  ;;  %v1319_v37 = vpop.f32.mrb[68].mxu0 }
 0x18e   : > { %v1320_v38 = vadd.f32 %v1319_v37, %v1184_v30  ;;  %v1972_v53 = vpop.f32.mrb[69].mxu1  ;;  %v2050_v52 = vpop.f32.mrb[69].mxu0 }
 0x18f   : > { %1537 = vst.msk [vmem:[%s2485_s28 + $0x4c] sm:$0xf] %vm1517_vm3, %v1789_v35  ;;  %v1973_v60 = vadd.f32 %v1972_v53, %v1971_v51  ;;  %v1974_v28 = vpop.f32.mrb[70].mxu1  ;;  %v1322_v39 = vpop.f32.mrb[70].mxu0 }
 0x190   : > { %vm1361_vm8 = vcmp.ge.f32.partialorder %v1320_v38, 0.0  ;;  %v1386_v40 = vmul.f32 0.01, %v1320_v38  ;;  %v1323_v41 = vadd.f32 %v1322_v39, %v1187_v33  ;;  %v1975_v56 = vpop.f32.mrb[71].mxu1  ;;  %v2051_v31 = vpop.f32.mrb[71].mxu0 }
 0x191   : > { %v1976_v21 = vadd.f32 %v1975_v56, %v1974_v28  ;;  %v1192_v44 = vadd.f32 %v1973_v60, %v2455_v42 }
 0x192   : > { %v1411_v48 = vsel %vm1361_vm8, %v1320_v38, %v1386_v40  ;;  %vm1362_vm9 = vcmp.ge.f32.partialorder %v1323_v41, 0.0  ;;  %v1387_v49 = vmul.f32 0.01, %v1323_v41 }
 0x193   : > { %v1790_v50 = vpack.c.bf16 %v1411_v48, %v1411_v48  ;;  %v1195_v62 = vadd.f32 %v1976_v21, %v2460_v46 }
 0x194   : > { %v1412_v24 = vsel %vm1362_vm9, %v1323_v41, %v1387_v49 }
 0x195   : > { %1538 = vst.msk [vmem:[%s2485_s28 + $0x50] sm:$0xf] %vm1517_vm3, %v1790_v50  ;;  %v1791_v0 = vpack.c.bf16 %v1412_v24, %v1412_v24  ;;  %v1977_v54 = vpop.f32.mrb[72].mxu1  ;;  %v1327_v55 = vpop.f32.mrb[72].mxu0 }
 0x196   : > { %v1328_v57 = vadd.f32 %v1327_v55, %v1192_v44  ;;  %v1978_v29 = vpop.f32.mrb[73].mxu1  ;;  %v2054_v58 = vpop.f32.mrb[73].mxu0 }
 0x197   : > { %1539 = vst.msk [vmem:[%s2485_s28 + $0x54] sm:$0xf] %vm1517_vm3, %v1791_v0  ;;  %v1979_v59 = vadd.f32 %v1978_v29, %v1977_v54  ;;  %v1330_v42 = vpop.f32.mrb[74].mxu0  ;;  %v1980_v1 = vpop.f32.mrb[74].mxu1 }
 0x198   : > { %vm1363_vm10 = vcmp.ge.f32.partialorder %v1328_v57, 0.0  ;;  %v1388_v63 = vmul.f32 0.01, %v1328_v57  ;;  %v1331_v3 = vadd.f32 %v1330_v42, %v1195_v62  ;;  %v2055_v46 = vpop.f32.mrb[75].mxu0  ;;  %v1981_v4 = vpop.f32.mrb[75].mxu1 }
 0x199   : > { %v1200_v8 = vadd.f32 %v1979_v59, %v2465_v61 }
 0x19a   : > { %v1413_v5 = vsel %vm1363_vm10, %v1328_v57, %v1388_v63  ;;  %vm1364_vm11 = vcmp.ge.f32.partialorder %v1331_v3, 0.0  ;;  %v1389_v2 = vmul.f32 0.01, %v1331_v3 }
 0x19b   : > { %v1792_v6 = vpack.c.bf16 %v1413_v5, %v1413_v5 }
 0x19c   : > { %v1414_v9 = vsel %vm1364_vm11, %v1331_v3, %v1389_v2 }
 0x19d   : > { %1540 = vst.msk [vmem:[%s2485_s28 + $0x58] sm:$0xf] %vm1517_vm3, %v1792_v6  ;;  %v1793_v10 = vpack.c.bf16 %v1414_v9, %v1414_v9  ;;  %v1335_v11 = vpop.f32.mrb[76].mxu0 }
 0x19e   : > { %v1336_v12 = vadd.f32 %v1335_v11, %v1200_v8  ;;  %v2058_v36 = vpop.f32.mrb[77].mxu0 }
 0x19f   : > { %1541 = vst.msk [vmem:[%s2485_s28 + $0x5c] sm:$0xf] %vm1517_vm3, %v1793_v10  ;;  %v1338_v15 = vpop.f32.mrb[78].mxu0 }
 0x1a0   : > { %vm1365_vm12 = vcmp.ge.f32.partialorder %v1336_v12, 0.0  ;;  %v1390_v17 = vmul.f32 0.01, %v1336_v12  ;;  %v2059_v18 = vpop.f32.mrb[79].mxu0 }
 0x1a2   : > { %v1415_v7 = vsel %vm1365_vm12, %v1336_v12, %v1390_v17 }
 0x1a3   : > { %v1794_v61 = vpack.c.bf16 %v1415_v7, %v1415_v7 }
 0x1a5   : > { %1543 = vst.msk [vmem:[%s2485_s28 + $0x60] sm:$0x3] %vm1542_vm13, %v1794_v61 }
 0x1a6 PF: > { %s13_s12 = sadd.s32 1, %s2220_s12  }
 0x1a7   : > { %p10_p4 = scmp.ge.s32.totalorder %s13_s12, 4  }
 0x1a9   :  { %12 = sbr.rel (!%p10_p4) target bundleno = 1 (0x1), region = 68 }

// kernel: rnd_forward.7
= control target key start
LH: loop header
LB: loop body
LE: loop exit
PB: predicated region body
PF: predicated region fallthrough
CT: control target
= control target key end

     0   :  { %s11101_s24 = smov 0   ;;  %s12864_s0 = inlined_call_operand.vmem [shape: bf16[2,4,3136], index: 0, kind: input, shape index: {}]   ;;  %s12865_s1 = inlined_call_operand.vmem [shape: bf16[2,3136,512], index: 1, kind: input, shape index: {}]   ;;  %s12866_s2 = inlined_call_operand.vmem [shape: f32[2,1,512], index: 2, kind: input, shape index: {}]   ;;  %s12867_s3 = inlined_call_operand.vmem [shape: bf16[512,512], index: 3, kind: input, shape index: {}]   ;;  %s12868_s4 = inlined_call_operand.vmem [shape: f32[1,512], index: 4, kind: input, shape index: {}]   ;;  %s12869_s5 = inlined_call_operand.vmem [shape: bf16[512,512], index: 5, kind: input, shape index: {}]   ;;  %s12870_s6 = inlined_call_operand.vmem [shape: f32[1,512], index: 6, kind: input, shape index: {}]   ;;  %s12871_s7 = inlined_call_operand.vmem [shape: f32[2,4,512], index: 7, kind: output, shape index: {}]  }
   0x1 LB: > { %s11107_s25 = sadd.s32 4294967295, %s11057_s24   ;;  %p8295_p0 = scmp.ge.s32.totalorder %s11057_s24, 1  ;;  %s11057_s24 = sphi %s11101_s24, %s17_s24  }
   0x2   : > { %p256_p1 = scmp.lt.s32.totalorder %s11057_s24, 3 }
   0x4   : > { %p257_p2 = pnand %p8295_p0, %p256_p1 }
   0x5   : > { %p297_p3 = scmp.lt.s32.totalorder (!%p257_p2), %s11107_s25, 1  ;;  %v1110_v36 = vlaneseq (!%p257_p2)  ;;  %v11059_v37 = vmov (!%p257_p2), 1983009808   ;;  %vm5190_vm0 = vcmask (!%p257_p2), 523264   ;;  %p9088_p4 = scmp.ne.s32.totalorder (!%p257_p2), %s11107_s25, 0 }
   0x6   : > { %260 = sbr.rel (%p257_p2) target bundleno = 1653 (0x675), region = 48  ;;  %v1139_v38 = vunpack.c.l.s4 (!%p257_p2), %v11059_v37 }
   0x7   : > { %v11167_v42 = vshrl.u32 (!%p257_p2), %v1110_v36, 7 }
   0x8   : > { %v1140_v43 = vunpack.c.0.s8 (!%p257_p2), %v1139_v38 }
   0xa   : > { %v11180_v49 = vsub.s32 (!%p257_p2), %v1140_v43, %v11167_v42 }
   0xd   : > { %s11113_s26 = scalar_select %p297_p3, %s11107_s25, 1 }
   0xf   : > { %s9474_s27 = smul.u32 6272, %s11113_s26  ;;  %s9348_s28 = sshll.u32 %s11113_s26, 4 }
  0x10   : > { %s11120_s8 = scalar_lea.vmem %s12871_s7, %s9348_s28  ;;  %s9473_s12 = smul.u32 50, %s11113_s26 }
  0x11   : > { %s11125_s11 = scalar_lea.vmem %s12865_s1, %s9474_s27  ;;  %s8298_s16 = sshll.u32 %s11113_s26, 2 }
  0x12   : > { %v9485_v0 = vld [vmem:[%s11125_s11 + $0x4] ss:$16 sps:$4 sm:$0xff]   ;;  %v9487_v1 = vld [vmem:[%s11125_s11 + $0xc] ss:$16 sps:$4 sm:$0xff]   ;;  %v9489_v2 = vld [vmem:[%s11125_s11] ss:$16 sps:$4 sm:$0xff]   ;;  %s11177_s15 = scalar_lea.vmem %s12864_s0, %s9473_s12  ;;  %s310_s19 = scalar_lea.vmem %s12866_s2, %s8298_s16 }
  0x13   : > { %5194 = vmatprep.subr.bf16.mxu0 %v9485_v0  ;;  %v9490_v3 = vld [vmem:[%s11125_s11 + $0x8] ss:$16 sps:$4 sm:$0xff]   ;;  %5727 = vmatprep.subr.bf16.mxu1 %v9487_v1  ;;  %v9491_v4 = vld [vmem:[%s11125_s11 + $0x24] ss:$16 sps:$4 sm:$0xff]   ;;  %v9493_v5 = vld [vmem:[%s11125_s11 + $0x2c] ss:$16 sps:$4 sm:$0xff]  }
  0x14   : > { %5195 = vmatpush1.bf16.msra.mxu0 %v9489_v2  ;;  %5728 = vmatpush1.bf16.msra.mxu1 %v9490_v3  ;;  %v9495_v6 = vld [vmem:[%s11125_s11 + $0x20] ss:$16 sps:$4 sm:$0xff]   ;;  %v9496_v7 = vld [vmem:[%s11125_s11 + $0x28] ss:$16 sps:$4 sm:$0xff]   ;;  %v9497_v8 = vld [vmem:[%s11125_s11 + $0x44] ss:$16 sps:$4 sm:$0xff]  }
  0x15   : > { %5196 = vmatprep.subr.bf16.mxu0 %v9491_v4  ;;  %5729 = vmatprep.subr.bf16.mxu1 %v9493_v5  ;;  %v9499_v9 = vld [vmem:[%s11125_s11 + $0x4c] ss:$16 sps:$4 sm:$0xff]   ;;  %v9501_v10 = vld [vmem:[%s11125_s11 + $0x40] ss:$16 sps:$4 sm:$0xff]   ;;  %v9502_v11 = vld [vmem:[%s11125_s11 + $0x48] ss:$16 sps:$4 sm:$0xff]  }
  0x16   : > { %v9503_v12 = vld [vmem:[%s11125_s11 + $0x64] ss:$16 sps:$4 sm:$0xff]   ;;  %v9505_v13 = vld [vmem:[%s11125_s11 + $0x6c] ss:$16 sps:$4 sm:$0xff]   ;;  %v9507_v14 = vld [vmem:[%s11125_s11 + $0x60] ss:$16 sps:$4 sm:$0xff]  }
  0x17   : > { %v9508_v15 = vld [vmem:[%s11125_s11 + $0x68] ss:$16 sps:$4 sm:$0xff]   ;;  %v9509_v16 = vld [vmem:[%s11125_s11 + $0x84] ss:$16 sps:$4 sm:$0xff]   ;;  %v9511_v17 = vld [vmem:[%s11125_s11 + $0x8c] ss:$16 sps:$4 sm:$0xff]  }
  0x18   : > { %5197 = vmatpush1.bf16.msra.mxu0 %v9495_v6  ;;  %5730 = vmatpush1.bf16.msra.mxu1 %v9496_v7  ;;  %v9513_v18 = vld [vmem:[%s11125_s11 + $0x80] ss:$16 sps:$4 sm:$0xff]   ;;  %v9514_v19 = vld [vmem:[%s11125_s11 + $0x88] ss:$16 sps:$4 sm:$0xff]   ;;  %v9515_v20 = vld [vmem:[%s11125_s11 + $0xa4] ss:$16 sps:$4 sm:$0xff]  }
  0x19   : > { %5198 = vmatprep.subr.bf16.mxu0 %v9497_v8  ;;  %5731 = vmatprep.subr.bf16.mxu1 %v9499_v9  ;;  %v9517_v21 = vld [vmem:[%s11125_s11 + $0xac] ss:$16 sps:$4 sm:$0xff]   ;;  %v9519_v22 = vld [vmem:[%s11125_s11 + $0xa0] ss:$16 sps:$4 sm:$0xff]   ;;  %v9520_v23 = vld [vmem:[%s11125_s11 + $0xa8] ss:$16 sps:$4 sm:$0xff]  }
  0x1a   : > { %v9521_v24 = vld [vmem:[%s11125_s11 + $0xc4] ss:$16 sps:$4 sm:$0xff]   ;;  %v9523_v25 = vld [vmem:[%s11125_s11 + $0xcc] ss:$16 sps:$4 sm:$0xff]   ;;  %v9525_v26 = vld [vmem:[%s11125_s11 + $0xc0] ss:$16 sps:$4 sm:$0xff]  }
  0x1b   : > { %v9526_v27 = vld [vmem:[%s11125_s11 + $0xc8] ss:$16 sps:$4 sm:$0xff]   ;;  %v9527_v28 = vld [vmem:[%s11125_s11 + $0xe4] ss:$16 sps:$4 sm:$0xff]   ;;  %v9529_v29 = vld [vmem:[%s11125_s11 + $0xec] ss:$16 sps:$4 sm:$0xff]  }
  0x1c   : > { %5199 = vmatpush1.bf16.msra.mxu0 %v9501_v10  ;;  %5732 = vmatpush1.bf16.msra.mxu1 %v9502_v11  ;;  %v9531_v30 = vld [vmem:[%s11125_s11 + $0xe0] ss:$16 sps:$4 sm:$0xff]   ;;  %v9532_v31 = vld [vmem:[%s11125_s11 + $0xe8] ss:$16 sps:$4 sm:$0xff]   ;;  %v9533_v32 = vld [vmem:[%s11125_s11 + $0x104] ss:$16 sps:$4 sm:$0xff]  }
  0x1d   : > { %5200 = vmatprep.subr.bf16.mxu0 %v9503_v12  ;;  %5733 = vmatprep.subr.bf16.mxu1 %v9505_v13  ;;  %v9535_v33 = vld [vmem:[%s11125_s11 + $0x10c] ss:$16 sps:$4 sm:$0xff]   ;;  %v9537_v34 = vld [vmem:[%s11125_s11 + $0x100] ss:$16 sps:$4 sm:$0xff]   ;;  %v9538_v35 = vld [vmem:[%s11125_s11 + $0x108] ss:$16 sps:$4 sm:$0xff]  }
  0x1e   : > { %v9539_v39 = vld [vmem:[%s11125_s11 + $0x124] ss:$16 sps:$4 sm:$0xff]   ;;  %v9541_v40 = vld [vmem:[%s11125_s11 + $0x12c] ss:$16 sps:$4 sm:$0xff]   ;;  %v9543_v41 = vld [vmem:[%s11125_s11 + $0x120] ss:$16 sps:$4 sm:$0xff]  }
  0x1f   : > { %v9544_v44 = vld [vmem:[%s11125_s11 + $0x128] ss:$16 sps:$4 sm:$0xff]   ;;  %v9545_v45 = vld [vmem:[%s11125_s11 + $0x144] ss:$16 sps:$4 sm:$0xff]   ;;  %v9547_v46 = vld [vmem:[%s11125_s11 + $0x14c] ss:$16 sps:$4 sm:$0xff]  }
  0x20   : > { %5201 = vmatpush1.bf16.msra.mxu0 %v9507_v14  ;;  %5734 = vmatpush1.bf16.msra.mxu1 %v9508_v15  ;;  %v9549_v47 = vld [vmem:[%s11125_s11 + $0x140] ss:$16 sps:$4 sm:$0xff]   ;;  %v9550_v48 = vld [vmem:[%s11125_s11 + $0x148] ss:$16 sps:$4 sm:$0xff]   ;;  %v9551_v50 = vld [vmem:[%s11125_s11 + $0x164] ss:$16 sps:$4 sm:$0xff]  }
  0x21   : > { %5202 = vmatprep.subr.bf16.mxu0 %v9509_v16  ;;  %5735 = vmatprep.subr.bf16.mxu1 %v9511_v17  ;;  %v9553_v51 = vld [vmem:[%s11125_s11 + $0x16c] ss:$16 sps:$4 sm:$0xff]   ;;  %v317_v52 = vld [vmem:[%s11177_s15] sm:$0xff]  ;;  %v9556_v55 = vld [vmem:[%s11125_s11 + $0x168] ss:$16 sps:$4 sm:$0xff]  }
  0x22   : > { %v9555_v53 = vld [vmem:[%s11125_s11 + $0x160] ss:$16 sps:$4 sm:$0xff]   ;;  %v1144_v54 = vrot.slane %v317_v52, %v11180_v49  ;;  %v9557_v56 = vld [vmem:[%s11125_s11 + $0x184] ss:$16 sps:$4 sm:$0xff]   ;;  %v9559_v57 = vld [vmem:[%s11125_s11 + $0x18c] ss:$16 sps:$4 sm:$0xff]   ;;  %v1137_v7 = vcombine.high %v317_v52, %v317_v52 }
  0x23   : > { %v9561_v59 = vld [vmem:[%s11125_s11 + $0x180] ss:$16 sps:$4 sm:$0xff]   ;;  %v9562_v60 = vld [vmem:[%s11125_s11 + $0x188] ss:$16 sps:$4 sm:$0xff]   ;;  %v9563_v61 = vld [vmem:[%s11125_s11 + $0x1a4] ss:$16 sps:$4 sm:$0xff]  }
  0x24   : > { %5203 = vmatpush1.bf16.msra.mxu0 %v9513_v18  ;;  %5736 = vmatpush1.bf16.msra.mxu1 %v9514_v19  ;;  %v1152_v58 = vcombine.high %v1144_v54, %v1144_v54  ;;  %v9565_v62 = vld [vmem:[%s11125_s11 + $0x1ac] ss:$16 sps:$4 sm:$0xff]   ;;  %v9567_v63 = vld [vmem:[%s11125_s11 + $0x1a0] ss:$16 sps:$4 sm:$0xff]   ;;  %v9568_v0 = vld [vmem:[%s11125_s11 + $0x1a8] ss:$16 sps:$4 sm:$0xff]   ;;  %v11207_v12 = vrot.slane %v1137_v7, %v11180_v49 }
  0x25   : > { %5204 = vmatprep.subr.bf16.mxu0 %v9515_v20  ;;  %5737 = vmatprep.subr.bf16.mxu1 %v9517_v21  ;;  %v9569_v1 = vld [vmem:[%s11125_s11 + $0x1c4] ss:$16 sps:$4 sm:$0xff]   ;;  %v9571_v2 = vld [vmem:[%s11125_s11 + $0x1cc] ss:$16 sps:$4 sm:$0xff]   ;;  %v9573_v3 = vld [vmem:[%s11125_s11 + $0x1c0] ss:$16 sps:$4 sm:$0xff]  }
  0x26   : > { %5226 = vmatprep.mubr.bf16.mxu0 %v1152_v58  ;;  %5759 = vmatprep.mubr.bf16.mxu1 %v1152_v58  ;;  %v9574_v4 = vld [vmem:[%s11125_s11 + $0x1c8] ss:$16 sps:$4 sm:$0xff]   ;;  %v9575_v5 = vld [vmem:[%s11125_s11 + $0x1e4] ss:$16 sps:$4 sm:$0xff]   ;;  %v9577_v6 = vld [vmem:[%s11125_s11 + $0x1ec] ss:$16 sps:$4 sm:$0xff]   ;;  %v1153_v17 = vcombine.high %v11207_v12, %v11207_v12 }
  0x27   : > { %v9579_v8 = vld [vmem:[%s11125_s11 + $0x1e0] ss:$16 sps:$4 sm:$0xff]   ;;  %v9580_v9 = vld [vmem:[%s11125_s11 + $0x1e8] ss:$16 sps:$4 sm:$0xff]   ;;  %v9584_v10 = vld [vmem:[%s11125_s11 + $0x204] ss:$16 sps:$4 sm:$0xff]  }
  0x28   : > { %5205 = vmatpush1.bf16.msra.mxu0 %v9519_v22  ;;  %5738 = vmatpush1.bf16.msra.mxu1 %v9520_v23  ;;  %v9587_v11 = vld [vmem:[%s11125_s11 + $0x20c] ss:$16 sps:$4 sm:$0xff]   ;;  %v9582_v13 = vld [vmem:[%s11125_s11 + $0x200] ss:$16 sps:$4 sm:$0xff]   ;;  %v9585_v14 = vld [vmem:[%s11125_s11 + $0x208] ss:$16 sps:$4 sm:$0xff]  }
  0x29   : > { %5206 = vmatprep.subr.bf16.mxu0 %v9521_v24  ;;  %5739 = vmatprep.subr.bf16.mxu1 %v9523_v25  ;;  %v9590_v15 = vld [vmem:[%s11125_s11 + $0x224] ss:$16 sps:$4 sm:$0xff]   ;;  %v9593_v16 = vld [vmem:[%s11125_s11 + $0x22c] ss:$16 sps:$4 sm:$0xff]   ;;  %v9588_v18 = vld [vmem:[%s11125_s11 + $0x220] ss:$16 sps:$4 sm:$0xff]  }
  0x2a   : > { %v9591_v19 = vld [vmem:[%s11125_s11 + $0x228] ss:$16 sps:$4 sm:$0xff]   ;;  %v9596_v20 = vld [vmem:[%s11125_s11 + $0x244] ss:$16 sps:$4 sm:$0xff]   ;;  %v9599_v21 = vld [vmem:[%s11125_s11 + $0x24c] ss:$16 sps:$4 sm:$0xff]  }
  0x2b   : > { %v9594_v22 = vld [vmem:[%s11125_s11 + $0x240] ss:$16 sps:$4 sm:$0xff]   ;;  %v9597_v23 = vld [vmem:[%s11125_s11 + $0x248] ss:$16 sps:$4 sm:$0xff]   ;;  %v9602_v24 = vld [vmem:[%s11125_s11 + $0x264] ss:$16 sps:$4 sm:$0xff]  }
  0x2c   : > { %5207 = vmatpush1.bf16.msra.mxu0 %v9525_v26  ;;  %5740 = vmatpush1.bf16.msra.mxu1 %v9526_v27  ;;  %v9605_v25 = vld [vmem:[%s11125_s11 + $0x26c] ss:$16 sps:$4 sm:$0xff]   ;;  %v9600_v26 = vld [vmem:[%s11125_s11 + $0x260] ss:$16 sps:$4 sm:$0xff]   ;;  %v9603_v27 = vld [vmem:[%s11125_s11 + $0x268] ss:$16 sps:$4 sm:$0xff]  }
  0x2d   : > { %5208 = vmatprep.subr.bf16.mxu0 %v9527_v28  ;;  %5741 = vmatprep.subr.bf16.mxu1 %v9529_v29  ;;  %v9608_v28 = vld [vmem:[%s11125_s11 + $0x284] ss:$16 sps:$4 sm:$0xff]   ;;  %v9611_v29 = vld [vmem:[%s11125_s11 + $0x28c] ss:$16 sps:$4 sm:$0xff]   ;;  %v9618_v38 = vld [vmem:[%s11125_s11 + $0x2c0] ss:$16 sps:$4 sm:$0xff]  }
  0x2e   : > { %v9620_v36 = vld [vmem:[%s11125_s11 + $0x2c4] ss:$16 sps:$4 sm:$0xff]   ;;  %v9623_v37 = vld [vmem:[%s11125_s11 + $0x2cc] ss:$16 sps:$4 sm:$0xff]   ;;  %v9624_v43 = vld [vmem:[%s11125_s11 + $0x2e0] ss:$16 sps:$4 sm:$0xff]  }
  0x2f   : > { %v9636_v52 = vld [vmem:[%s11125_s11 + $0x320] ss:$16 sps:$4 sm:$0xff]   ;;  %v9650_v58 = vld [vmem:[%s11125_s11 + $0x364] ss:$16 sps:$4 sm:$0xff]   ;;  %v9671_v7 = vld [vmem:[%s11125_s11 + $0x3cc] ss:$16 sps:$4 sm:$0xff]  }
  0x30   : > { %5209 = vmatpush1.bf16.msra.mxu0 %v9531_v30  ;;  %5742 = vmatpush1.bf16.msra.mxu1 %v9532_v31  ;;  %v9606_v30 = vld [vmem:[%s11125_s11 + $0x280] ss:$16 sps:$4 sm:$0xff]   ;;  %v9609_v31 = vld [vmem:[%s11125_s11 + $0x288] ss:$16 sps:$4 sm:$0xff]  }
  0x31   : > { %5210 = vmatprep.subr.bf16.mxu0 %v9533_v32  ;;  %5743 = vmatprep.subr.bf16.mxu1 %v9535_v33  ;;  %v9614_v32 = vld [vmem:[%s11125_s11 + $0x2a4] ss:$16 sps:$4 sm:$0xff]   ;;  %v9617_v33 = vld [vmem:[%s11125_s11 + $0x2ac] ss:$16 sps:$4 sm:$0xff]  }
  0x34   : > { %5211 = vmatpush1.bf16.msra.mxu0 %v9537_v34  ;;  %5744 = vmatpush1.bf16.msra.mxu1 %v9538_v35  ;;  %v9612_v34 = vld [vmem:[%s11125_s11 + $0x2a0] ss:$16 sps:$4 sm:$0xff]   ;;  %v9615_v35 = vld [vmem:[%s11125_s11 + $0x2a8] ss:$16 sps:$4 sm:$0xff]  }
  0x35   : > { %5212 = vmatprep.subr.bf16.mxu0 %v9539_v39  ;;  %5745 = vmatprep.subr.bf16.mxu1 %v9541_v40  ;;  %v9621_v39 = vld [vmem:[%s11125_s11 + $0x2c8] ss:$16 sps:$4 sm:$0xff]   ;;  %v9626_v40 = vld [vmem:[%s11125_s11 + $0x2e4] ss:$16 sps:$4 sm:$0xff]  }
  0x38   : > { %5213 = vmatpush1.bf16.msra.mxu0 %v9543_v41  ;;  %5746 = vmatpush1.bf16.msra.mxu1 %v9544_v44  ;;  %v9629_v41 = vld [vmem:[%s11125_s11 + $0x2ec] ss:$16 sps:$4 sm:$0xff]   ;;  %v9627_v44 = vld [vmem:[%s11125_s11 + $0x2e8] ss:$16 sps:$4 sm:$0xff]  }
  0x39   : > { %5214 = vmatprep.subr.bf16.mxu0 %v9545_v45  ;;  %5747 = vmatprep.subr.bf16.mxu1 %v9547_v46  ;;  %v9632_v45 = vld [vmem:[%s11125_s11 + $0x304] ss:$16 sps:$4 sm:$0xff]   ;;  %v9635_v46 = vld [vmem:[%s11125_s11 + $0x30c] ss:$16 sps:$4 sm:$0xff]  }
  0x3c   : > { %5215 = vmatpush1.bf16.msra.mxu0 %v9549_v47  ;;  %5748 = vmatpush1.bf16.msra.mxu1 %v9550_v48  ;;  %v9630_v47 = vld [vmem:[%s11125_s11 + $0x300] ss:$16 sps:$4 sm:$0xff]   ;;  %v9633_v48 = vld [vmem:[%s11125_s11 + $0x308] ss:$16 sps:$4 sm:$0xff]  }
  0x3d   : > { %5216 = vmatprep.subr.bf16.mxu0 %v9551_v50  ;;  %5749 = vmatprep.subr.bf16.mxu1 %v9553_v51  ;;  %v9638_v50 = vld [vmem:[%s11125_s11 + $0x324] ss:$16 sps:$4 sm:$0xff]   ;;  %v9641_v51 = vld [vmem:[%s11125_s11 + $0x32c] ss:$16 sps:$4 sm:$0xff]  }
  0x40   : > { %5217 = vmatpush1.bf16.msra.mxu0 %v9555_v53  ;;  %5750 = vmatpush1.bf16.msra.mxu1 %v9556_v55  ;;  %v9639_v53 = vld [vmem:[%s11125_s11 + $0x328] ss:$16 sps:$4 sm:$0xff]   ;;  %v9647_v55 = vld [vmem:[%s11125_s11 + $0x34c] ss:$16 sps:$4 sm:$0xff]  }
  0x41   : > { %5218 = vmatprep.subr.bf16.mxu0 %v9557_v56  ;;  %5751 = vmatprep.subr.bf16.mxu1 %v9559_v57  ;;  %v9642_v56 = vld [vmem:[%s11125_s11 + $0x340] ss:$16 sps:$4 sm:$0xff]   ;;  %v9645_v57 = vld [vmem:[%s11125_s11 + $0x348] ss:$16 sps:$4 sm:$0xff]  }
  0x44   : > { %5219 = vmatpush1.bf16.msra.mxu0 %v9561_v59  ;;  %5752 = vmatpush1.bf16.msra.mxu1 %v9562_v60  ;;  %v9653_v59 = vld [vmem:[%s11125_s11 + $0x36c] ss:$16 sps:$4 sm:$0xff]   ;;  %v9648_v60 = vld [vmem:[%s11125_s11 + $0x360] ss:$16 sps:$4 sm:$0xff]  }
  0x45   : > { %5220 = vmatprep.subr.bf16.mxu0 %v9563_v61  ;;  %5753 = vmatprep.subr.bf16.mxu1 %v9565_v62  ;;  %v9651_v61 = vld [vmem:[%s11125_s11 + $0x368] ss:$16 sps:$4 sm:$0xff]   ;;  %v9656_v62 = vld [vmem:[%s11125_s11 + $0x384] ss:$16 sps:$4 sm:$0xff]  }
  0x48   : > { %5221 = vmatpush1.bf16.msra.mxu0 %v9567_v63  ;;  %5754 = vmatpush1.bf16.msra.mxu1 %v9568_v0  ;;  %v9659_v63 = vld [vmem:[%s11125_s11 + $0x38c] ss:$16 sps:$4 sm:$0xff]   ;;  %v9654_v0 = vld [vmem:[%s11125_s11 + $0x380] ss:$16 sps:$4 sm:$0xff]  }
  0x49   : > { %5222 = vmatprep.subr.bf16.mxu0 %v9569_v1  ;;  %5755 = vmatprep.subr.bf16.mxu1 %v9571_v2  ;;  %v9657_v1 = vld [vmem:[%s11125_s11 + $0x388] ss:$16 sps:$4 sm:$0xff]   ;;  %v9662_v2 = vld [vmem:[%s11125_s11 + $0x3a4] ss:$16 sps:$4 sm:$0xff]  }
  0x4c   : > { %5223 = vmatpush1.bf16.msra.mxu0 %v9573_v3  ;;  %5756 = vmatpush1.bf16.msra.mxu1 %v9574_v4  ;;  %v9665_v3 = vld [vmem:[%s11125_s11 + $0x3ac] ss:$16 sps:$4 sm:$0xff]   ;;  %v9660_v4 = vld [vmem:[%s11125_s11 + $0x3a0] ss:$16 sps:$4 sm:$0xff]  }
  0x4d   : > { %5224 = vmatprep.subr.bf16.mxu0 %v9575_v5  ;;  %5757 = vmatprep.subr.bf16.mxu1 %v9577_v6  ;;  %v9663_v5 = vld [vmem:[%s11125_s11 + $0x3a8] ss:$16 sps:$4 sm:$0xff]   ;;  %v9668_v6 = vld [vmem:[%s11125_s11 + $0x3c4] ss:$16 sps:$4 sm:$0xff]  }
  0x50   : > { %5225 = vmatpush1.bf16.msra.mxu0 %v9579_v8  ;;  %5758 = vmatpush1.bf16.msra.mxu1 %v9580_v9  ;;  %v9666_v8 = vld [vmem:[%s11125_s11 + $0x3c0] ss:$16 sps:$4 sm:$0xff]   ;;  %v9669_v9 = vld [vmem:[%s11125_s11 + $0x3c8] ss:$16 sps:$4 sm:$0xff]  }
  0x51   : > { %5235 = vmatprep.subr.bf16.mxu0 %v9584_v10  ;;  %5768 = vmatprep.subr.bf16.mxu1 %v9587_v11  ;;  %v9674_v10 = vld [vmem:[%s11125_s11 + $0x3e4] ss:$16 sps:$4 sm:$0xff]   ;;  %v9677_v11 = vld [vmem:[%s11125_s11 + $0x3ec] ss:$16 sps:$4 sm:$0xff]  }
  0x53   : > { %5227 = vmatmul.mubr.bf16.vlgmr.msra.gmra.mrb[0].mxu0 %v1144_v54  ;;  %5760 = vmatmul.mubr.bf16.vlgmr.msra.gmra.mrb[0].mxu1 %v1144_v54  ;;  %v9644_v54 = vld [vmem:[%s11125_s11 + $0x344] ss:$16 sps:$4 sm:$0xff]  }
  0x54   : > { %5236 = vmatpush1.bf16.msra.mxu0 %v9582_v13  ;;  %5769 = vmatpush1.bf16.msra.mxu1 %v9585_v14  ;;  %v9672_v13 = vld [vmem:[%s11125_s11 + $0x3e0] ss:$16 sps:$4 sm:$0xff]   ;;  %v9675_v14 = vld [vmem:[%s11125_s11 + $0x3e8] ss:$16 sps:$4 sm:$0xff]  }
  0x55   : > { %5237 = vmatprep.subr.bf16.mxu0 %v9590_v15  ;;  %5770 = vmatprep.subr.bf16.mxu1 %v9593_v16  ;;  %v9680_v15 = vld [vmem:[%s11125_s11 + $0x404] ss:$16 sps:$4 sm:$0xff]   ;;  %v9683_v16 = vld [vmem:[%s11125_s11 + $0x40c] ss:$16 sps:$4 sm:$0xff]  }
  0x56   : > { %5267 = vmatprep.mubr.bf16.mxu0 %v1153_v17  ;;  %5800 = vmatprep.mubr.bf16.mxu1 %v1153_v17  ;;  %v9678_v17 = vld [vmem:[%s11125_s11 + $0x400] ss:$16 sps:$4 sm:$0xff]  }
  0x58   : > { %5238 = vmatpush1.bf16.msra.mxu0 %v9588_v18  ;;  %5771 = vmatpush1.bf16.msra.mxu1 %v9591_v19  ;;  %v9681_v18 = vld [vmem:[%s11125_s11 + $0x408] ss:$16 sps:$4 sm:$0xff]  }
  0x59   : > { %5239 = vmatprep.subr.bf16.mxu0 %v9596_v20  ;;  %5772 = vmatprep.subr.bf16.mxu1 %v9599_v21  ;;  %v11278_v19 = vld [vmem:[%s11177_s15 + $0x8] sm:$0xff]  ;;  %v9686_v20 = vld [vmem:[%s11125_s11 + $0x424] ss:$16 sps:$4 sm:$0xff]  }
  0x5a   : > { %v9689_v21 = vld [vmem:[%s11125_s11 + $0x42c] ss:$16 sps:$4 sm:$0xff]  }
  0x5c   : > { %5240 = vmatpush1.bf16.msra.mxu0 %v9594_v22  ;;  %5773 = vmatpush1.bf16.msra.mxu1 %v9597_v23  ;;  %v11284_v22 = vrot.slane %v11278_v19, %v11180_v49 }
  0x5d   : > { %5241 = vmatprep.subr.bf16.mxu0 %v9602_v24  ;;  %5774 = vmatprep.subr.bf16.mxu1 %v9605_v25  ;;  %v9684_v24 = vld [vmem:[%s11125_s11 + $0x420] ss:$16 sps:$4 sm:$0xff]   ;;  %v9687_v25 = vld [vmem:[%s11125_s11 + $0x428] ss:$16 sps:$4 sm:$0xff]  }
  0x5e   : > { %v1169_v23 = vcombine.high %v11284_v22, %v11284_v22 }
  0x60   : > { %5242 = vmatpush1.bf16.msra.mxu0 %v9600_v26  ;;  %5775 = vmatpush1.bf16.msra.mxu1 %v9603_v27  ;;  %v9692_v26 = vld [vmem:[%s11125_s11 + $0x444] ss:$16 sps:$4 sm:$0xff]   ;;  %v9695_v27 = vld [vmem:[%s11125_s11 + $0x44c] ss:$16 sps:$4 sm:$0xff]  }
  0x61   : > { %5243 = vmatprep.subr.bf16.mxu0 %v9608_v28  ;;  %5776 = vmatprep.subr.bf16.mxu1 %v9611_v29  ;;  %v9693_v28 = vld [vmem:[%s11125_s11 + $0x448] ss:$16 sps:$4 sm:$0xff]   ;;  %v9698_v29 = vld [vmem:[%s11125_s11 + $0x464] ss:$16 sps:$4 sm:$0xff]  }
  0x64   : > { %5244 = vmatpush1.bf16.msra.mxu0 %v9606_v30  ;;  %5777 = vmatpush1.bf16.msra.mxu1 %v9609_v31  ;;  %v9701_v30 = vld [vmem:[%s11125_s11 + $0x46c] ss:$16 sps:$4 sm:$0xff]   ;;  %v9696_v31 = vld [vmem:[%s11125_s11 + $0x460] ss:$16 sps:$4 sm:$0xff]  }
  0x65   : > { %5245 = vmatprep.subr.bf16.mxu0 %v9614_v32  ;;  %5778 = vmatprep.subr.bf16.mxu1 %v9617_v33  ;;  %v9699_v32 = vld [vmem:[%s11125_s11 + $0x468] ss:$16 sps:$4 sm:$0xff]   ;;  %v9704_v33 = vld [vmem:[%s11125_s11 + $0x484] ss:$16 sps:$4 sm:$0xff]  }
  0x68   : > { %5246 = vmatpush1.bf16.msra.mxu0 %v9612_v34  ;;  %5779 = vmatpush1.bf16.msra.mxu1 %v9615_v35  ;;  %v9707_v34 = vld [vmem:[%s11125_s11 + $0x48c] ss:$16 sps:$4 sm:$0xff]   ;;  %v9702_v35 = vld [vmem:[%s11125_s11 + $0x480] ss:$16 sps:$4 sm:$0xff]  }
  0x69   : > { %5247 = vmatprep.subr.bf16.mxu0 %v9620_v36  ;;  %5780 = vmatprep.subr.bf16.mxu1 %v9623_v37  ;;  %v9705_v36 = vld [vmem:[%s11125_s11 + $0x488] ss:$16 sps:$4 sm:$0xff]   ;;  %v9710_v37 = vld [vmem:[%s11125_s11 + $0x4a4] ss:$16 sps:$4 sm:$0xff]  }
  0x6c   : > { %5248 = vmatpush1.bf16.msra.mxu0 %v9618_v38  ;;  %5781 = vmatpush1.bf16.msra.mxu1 %v9621_v39  ;;  %v9713_v38 = vld [vmem:[%s11125_s11 + $0x4ac] ss:$16 sps:$4 sm:$0xff]   ;;  %v9708_v39 = vld [vmem:[%s11125_s11 + $0x4a0] ss:$16 sps:$4 sm:$0xff]  }
  0x6d   : > { %5249 = vmatprep.subr.bf16.mxu0 %v9626_v40  ;;  %5782 = vmatprep.subr.bf16.mxu1 %v9629_v41  ;;  %v9711_v40 = vld [vmem:[%s11125_s11 + $0x4a8] ss:$16 sps:$4 sm:$0xff]   ;;  %v9716_v41 = vld [vmem:[%s11125_s11 + $0x4c4] ss:$16 sps:$4 sm:$0xff]  }
  0x70   : > { %5250 = vmatpush1.bf16.msra.mxu0 %v9624_v43  ;;  %5783 = vmatpush1.bf16.msra.mxu1 %v9627_v44  ;;  %v9719_v43 = vld [vmem:[%s11125_s11 + $0x4cc] ss:$16 sps:$4 sm:$0xff]   ;;  %v9714_v44 = vld [vmem:[%s11125_s11 + $0x4c0] ss:$16 sps:$4 sm:$0xff]  }
  0x71   : > { %5251 = vmatprep.subr.bf16.mxu0 %v9632_v45  ;;  %5784 = vmatprep.subr.bf16.mxu1 %v9635_v46  ;;  %v9717_v45 = vld [vmem:[%s11125_s11 + $0x4c8] ss:$16 sps:$4 sm:$0xff]   ;;  %v9722_v46 = vld [vmem:[%s11125_s11 + $0x4e4] ss:$16 sps:$4 sm:$0xff]  }
  0x74   : > { %5252 = vmatpush1.bf16.msra.mxu0 %v9630_v47  ;;  %5785 = vmatpush1.bf16.msra.mxu1 %v9633_v48  ;;  %v9725_v47 = vld [vmem:[%s11125_s11 + $0x4ec] ss:$16 sps:$4 sm:$0xff]   ;;  %v9720_v48 = vld [vmem:[%s11125_s11 + $0x4e0] ss:$16 sps:$4 sm:$0xff]  }
  0x75   : > { %5253 = vmatprep.subr.bf16.mxu0 %v9638_v50  ;;  %5786 = vmatprep.subr.bf16.mxu1 %v9641_v51  ;;  %v9723_v50 = vld [vmem:[%s11125_s11 + $0x4e8] ss:$16 sps:$4 sm:$0xff]   ;;  %v9728_v51 = vld [vmem:[%s11125_s11 + $0x504] ss:$16 sps:$4 sm:$0xff]  }
  0x78   : > { %5254 = vmatpush1.bf16.msra.mxu0 %v9636_v52  ;;  %5787 = vmatpush1.bf16.msra.mxu1 %v9639_v53  ;;  %v9731_v52 = vld [vmem:[%s11125_s11 + $0x50c] ss:$16 sps:$4 sm:$0xff]   ;;  %v9726_v53 = vld [vmem:[%s11125_s11 + $0x500] ss:$16 sps:$4 sm:$0xff]  }
  0x79   : > { %5255 = vmatprep.subr.bf16.mxu0 %v9644_v54  ;;  %5788 = vmatprep.subr.bf16.mxu1 %v9647_v55  ;;  %v9729_v54 = vld [vmem:[%s11125_s11 + $0x508] ss:$16 sps:$4 sm:$0xff]   ;;  %v9734_v55 = vld [vmem:[%s11125_s11 + $0x524] ss:$16 sps:$4 sm:$0xff]  }
  0x7c   : > { %5256 = vmatpush1.bf16.msra.mxu0 %v9642_v56  ;;  %5789 = vmatpush1.bf16.msra.mxu1 %v9645_v57  ;;  %v9737_v56 = vld [vmem:[%s11125_s11 + $0x52c] ss:$16 sps:$4 sm:$0xff]   ;;  %v9732_v57 = vld [vmem:[%s11125_s11 + $0x520] ss:$16 sps:$4 sm:$0xff]  }
  0x7d   : > { %5257 = vmatprep.subr.bf16.mxu0 %v9650_v58  ;;  %5790 = vmatprep.subr.bf16.mxu1 %v9653_v59  ;;  %v9735_v58 = vld [vmem:[%s11125_s11 + $0x528] ss:$16 sps:$4 sm:$0xff]   ;;  %v9740_v59 = vld [vmem:[%s11125_s11 + $0x544] ss:$16 sps:$4 sm:$0xff]  }
  0x80   : > { %5258 = vmatpush1.bf16.msra.mxu0 %v9648_v60  ;;  %5791 = vmatpush1.bf16.msra.mxu1 %v9651_v61  ;;  %v9743_v60 = vld [vmem:[%s11125_s11 + $0x54c] ss:$16 sps:$4 sm:$0xff]   ;;  %v9738_v61 = vld [vmem:[%s11125_s11 + $0x540] ss:$16 sps:$4 sm:$0xff]  }
  0x81   : > { %5259 = vmatprep.subr.bf16.mxu0 %v9656_v62  ;;  %5792 = vmatprep.subr.bf16.mxu1 %v9659_v63  ;;  %v9741_v62 = vld [vmem:[%s11125_s11 + $0x548] ss:$16 sps:$4 sm:$0xff]   ;;  %v9746_v63 = vld [vmem:[%s11125_s11 + $0x564] ss:$16 sps:$4 sm:$0xff]  }
  0x84   : > { %5260 = vmatpush1.bf16.msra.mxu0 %v9654_v0  ;;  %5793 = vmatpush1.bf16.msra.mxu1 %v9657_v1  ;;  %v9749_v0 = vld [vmem:[%s11125_s11 + $0x56c] ss:$16 sps:$4 sm:$0xff]   ;;  %v9744_v1 = vld [vmem:[%s11125_s11 + $0x560] ss:$16 sps:$4 sm:$0xff]  }
  0x85   : > { %5261 = vmatprep.subr.bf16.mxu0 %v9662_v2  ;;  %5794 = vmatprep.subr.bf16.mxu1 %v9665_v3  ;;  %v9747_v2 = vld [vmem:[%s11125_s11 + $0x568] ss:$16 sps:$4 sm:$0xff]   ;;  %v9752_v3 = vld [vmem:[%s11125_s11 + $0x584] ss:$16 sps:$4 sm:$0xff]  }
  0x88   : > { %5262 = vmatpush1.bf16.msra.mxu0 %v9660_v4  ;;  %5795 = vmatpush1.bf16.msra.mxu1 %v9663_v5  ;;  %v9755_v4 = vld [vmem:[%s11125_s11 + $0x58c] ss:$16 sps:$4 sm:$0xff]   ;;  %v9750_v5 = vld [vmem:[%s11125_s11 + $0x580] ss:$16 sps:$4 sm:$0xff]  }
  0x89   : > { %5263 = vmatprep.subr.bf16.mxu0 %v9668_v6  ;;  %5796 = vmatprep.subr.bf16.mxu1 %v9671_v7  ;;  %v9753_v6 = vld [vmem:[%s11125_s11 + $0x588] ss:$16 sps:$4 sm:$0xff]   ;;  %v9758_v7 = vld [vmem:[%s11125_s11 + $0x5a4] ss:$16 sps:$4 sm:$0xff]  }
  0x8c   : > { %5264 = vmatpush1.bf16.msra.mxu0 %v9666_v8  ;;  %5797 = vmatpush1.bf16.msra.mxu1 %v9669_v9  ;;  %v9761_v8 = vld [vmem:[%s11125_s11 + $0x5ac] ss:$16 sps:$4 sm:$0xff]   ;;  %v9756_v9 = vld [vmem:[%s11125_s11 + $0x5a0] ss:$16 sps:$4 sm:$0xff]  }
  0x8d   : > { %5265 = vmatprep.subr.bf16.mxu0 %v9674_v10  ;;  %5798 = vmatprep.subr.bf16.mxu1 %v9677_v11  ;;  %v9759_v10 = vld [vmem:[%s11125_s11 + $0x5a8] ss:$16 sps:$4 sm:$0xff]   ;;  %v9764_v11 = vld [vmem:[%s11125_s11 + $0x5c4] ss:$16 sps:$4 sm:$0xff]  }
  0x90   : > { %5266 = vmatpush1.bf16.msra.mxu0 %v9672_v13  ;;  %5799 = vmatpush1.bf16.msra.mxu1 %v9675_v14  ;;  %v9767_v13 = vld [vmem:[%s11125_s11 + $0x5cc] ss:$16 sps:$4 sm:$0xff]   ;;  %v9762_v14 = vld [vmem:[%s11125_s11 + $0x5c0] ss:$16 sps:$4 sm:$0xff]  }
  0x91   : > { %5276 = vmatprep.subr.bf16.mxu0 %v9680_v15  ;;  %5809 = vmatprep.subr.bf16.mxu1 %v9683_v16  ;;  %v9765_v15 = vld [vmem:[%s11125_s11 + $0x5c8] ss:$16 sps:$4 sm:$0xff]   ;;  %v9770_v16 = vld [vmem:[%s11125_s11 + $0x5e4] ss:$16 sps:$4 sm:$0xff]  }
  0x93   : > { %5268 = vmatmul.mubr.bf16.vlgmr.msra.gmra.mrb[0].mxu0 %v11207_v12  ;;  %5801 = vmatmul.mubr.bf16.vlgmr.msra.gmra.mrb[0].mxu1 %v11207_v12  ;;  %v9690_v12 = vld [vmem:[%s11125_s11 + $0x440] ss:$16 sps:$4 sm:$0xff]  }
  0x94   : > { %5277 = vmatpush1.bf16.msra.mxu0 %v9678_v17  ;;  %5810 = vmatpush1.bf16.msra.mxu1 %v9681_v18  ;;  %v9773_v17 = vld [vmem:[%s11125_s11 + $0x5ec] ss:$16 sps:$4 sm:$0xff]   ;;  %v1154_v18 = vcombine.high %v11278_v19, %v11278_v19  ;;  %v9777_v19 = vld [vmem:[%s11125_s11 + $0x608] ss:$16 sps:$4 sm:$0xff]  }
  0x95   : > { %5278 = vmatprep.subr.bf16.mxu0 %v9686_v20  ;;  %5811 = vmatprep.subr.bf16.mxu1 %v9689_v21  ;;  %v9768_v20 = vld [vmem:[%s11125_s11 + $0x5e0] ss:$16 sps:$4 sm:$0xff]   ;;  %v9771_v21 = vld [vmem:[%s11125_s11 + $0x5e8] ss:$16 sps:$4 sm:$0xff]  }
  0x96   : > { %5308 = vmatprep.mubr.bf16.mxu0 %v1169_v23  ;;  %5841 = vmatprep.mubr.bf16.mxu1 %v1169_v23  ;;  %v9776_v23 = vld [vmem:[%s11125_s11 + $0x604] ss:$16 sps:$4 sm:$0xff]  }
  0x98   : > { %5279 = vmatpush1.bf16.msra.mxu0 %v9684_v24  ;;  %5812 = vmatpush1.bf16.msra.mxu1 %v9687_v25  ;;  %v9779_v24 = vld [vmem:[%s11125_s11 + $0x60c] ss:$16 sps:$4 sm:$0xff]   ;;  %v11353_v25 = vrot.slane %v1154_v18, %v11180_v49 }
  0x99   : > { %5280 = vmatprep.subr.bf16.mxu0 %v9692_v26  ;;  %5813 = vmatprep.subr.bf16.mxu1 %v9695_v27  ;;  %v9774_v26 = vld [vmem:[%s11125_s11 + $0x600] ss:$16 sps:$4 sm:$0xff]   ;;  %v9782_v27 = vld [vmem:[%s11125_s11 + $0x624] ss:$16 sps:$4 sm:$0xff]   ;;  %v9863_v18 = vld [vmem:[%s11125_s11 + $0x7cc] ss:$16 sps:$4 sm:$0xff]  }
  0x9c   : > { %5281 = vmatpush1.bf16.msra.mxu0 %v9690_v12  ;;  %5814 = vmatpush1.bf16.msra.mxu1 %v9693_v28  ;;  %v9785_v12 = vld [vmem:[%s11125_s11 + $0x62c] ss:$16 sps:$4 sm:$0xff]   ;;  %v1170_v28 = vcombine.high %v11353_v25, %v11353_v25 }
  0x9d   : > { %5282 = vmatprep.subr.bf16.mxu0 %v9698_v29  ;;  %5815 = vmatprep.subr.bf16.mxu1 %v9701_v30  ;;  %v9780_v29 = vld [vmem:[%s11125_s11 + $0x620] ss:$16 sps:$4 sm:$0xff]   ;;  %v9783_v30 = vld [vmem:[%s11125_s11 + $0x628] ss:$16 sps:$4 sm:$0xff]  }
  0xa0   : > { %5283 = vmatpush1.bf16.msra.mxu0 %v9696_v31  ;;  %5816 = vmatpush1.bf16.msra.mxu1 %v9699_v32  ;;  %v9788_v31 = vld [vmem:[%s11125_s11 + $0x644] ss:$16 sps:$4 sm:$0xff]   ;;  %v9791_v32 = vld [vmem:[%s11125_s11 + $0x64c] ss:$16 sps:$4 sm:$0xff]  }
  0xa1   : > { %5284 = vmatprep.subr.bf16.mxu0 %v9704_v33  ;;  %5817 = vmatprep.subr.bf16.mxu1 %v9707_v34  ;;  %v9786_v33 = vld [vmem:[%s11125_s11 + $0x640] ss:$16 sps:$4 sm:$0xff]   ;;  %v9794_v34 = vld [vmem:[%s11125_s11 + $0x664] ss:$16 sps:$4 sm:$0xff]  }
  0xa4   : > { %5285 = vmatpush1.bf16.msra.mxu0 %v9702_v35  ;;  %5818 = vmatpush1.bf16.msra.mxu1 %v9705_v36  ;;  %v9797_v35 = vld [vmem:[%s11125_s11 + $0x66c] ss:$16 sps:$4 sm:$0xff]   ;;  %v9792_v36 = vld [vmem:[%s11125_s11 + $0x660] ss:$16 sps:$4 sm:$0xff]  }
  0xa5   : > { %5286 = vmatprep.subr.bf16.mxu0 %v9710_v37  ;;  %5819 = vmatprep.subr.bf16.mxu1 %v9713_v38  ;;  %v9795_v37 = vld [vmem:[%s11125_s11 + $0x668] ss:$16 sps:$4 sm:$0xff]   ;;  %v9800_v38 = vld [vmem:[%s11125_s11 + $0x684] ss:$16 sps:$4 sm:$0xff]  }
  0xa8   : > { %5287 = vmatpush1.bf16.msra.mxu0 %v9708_v39  ;;  %5820 = vmatpush1.bf16.msra.mxu1 %v9711_v40  ;;  %v9803_v39 = vld [vmem:[%s11125_s11 + $0x68c] ss:$16 sps:$4 sm:$0xff]   ;;  %v9798_v40 = vld [vmem:[%s11125_s11 + $0x680] ss:$16 sps:$4 sm:$0xff]  }
  0xa9   : > { %5288 = vmatprep.subr.bf16.mxu0 %v9716_v41  ;;  %5821 = vmatprep.subr.bf16.mxu1 %v9719_v43  ;;  %v9801_v41 = vld [vmem:[%s11125_s11 + $0x688] ss:$16 sps:$4 sm:$0xff]   ;;  %v9806_v43 = vld [vmem:[%s11125_s11 + $0x6a4] ss:$16 sps:$4 sm:$0xff]  }
  0xac   : > { %5289 = vmatpush1.bf16.msra.mxu0 %v9714_v44  ;;  %5822 = vmatpush1.bf16.msra.mxu1 %v9717_v45  ;;  %v9809_v44 = vld [vmem:[%s11125_s11 + $0x6ac] ss:$16 sps:$4 sm:$0xff]   ;;  %v9804_v45 = vld [vmem:[%s11125_s11 + $0x6a0] ss:$16 sps:$4 sm:$0xff]  }
  0xad   : > { %5290 = vmatprep.subr.bf16.mxu0 %v9722_v46  ;;  %5823 = vmatprep.subr.bf16.mxu1 %v9725_v47  ;;  %v9807_v46 = vld [vmem:[%s11125_s11 + $0x6a8] ss:$16 sps:$4 sm:$0xff]   ;;  %v9812_v47 = vld [vmem:[%s11125_s11 + $0x6c4] ss:$16 sps:$4 sm:$0xff]  }
  0xb0   : > { %5291 = vmatpush1.bf16.msra.mxu0 %v9720_v48  ;;  %5824 = vmatpush1.bf16.msra.mxu1 %v9723_v50  ;;  %v9815_v48 = vld [vmem:[%s11125_s11 + $0x6cc] ss:$16 sps:$4 sm:$0xff]   ;;  %v9810_v50 = vld [vmem:[%s11125_s11 + $0x6c0] ss:$16 sps:$4 sm:$0xff]  }
  0xb1   : > { %5292 = vmatprep.subr.bf16.mxu0 %v9728_v51  ;;  %5825 = vmatprep.subr.bf16.mxu1 %v9731_v52  ;;  %v9813_v51 = vld [vmem:[%s11125_s11 + $0x6c8] ss:$16 sps:$4 sm:$0xff]   ;;  %v9818_v52 = vld [vmem:[%s11125_s11 + $0x6e4] ss:$16 sps:$4 sm:$0xff]  }
  0xb4   : > { %5293 = vmatpush1.bf16.msra.mxu0 %v9726_v53  ;;  %5826 = vmatpush1.bf16.msra.mxu1 %v9729_v54  ;;  %v9821_v53 = vld [vmem:[%s11125_s11 + $0x6ec] ss:$16 sps:$4 sm:$0xff]   ;;  %v9816_v54 = vld [vmem:[%s11125_s11 + $0x6e0] ss:$16 sps:$4 sm:$0xff]  }
  0xb5   : > { %5294 = vmatprep.subr.bf16.mxu0 %v9734_v55  ;;  %5827 = vmatprep.subr.bf16.mxu1 %v9737_v56  ;;  %v9819_v55 = vld [vmem:[%s11125_s11 + $0x6e8] ss:$16 sps:$4 sm:$0xff]   ;;  %v9824_v56 = vld [vmem:[%s11125_s11 + $0x704] ss:$16 sps:$4 sm:$0xff]  }
  0xb8   : > { %5295 = vmatpush1.bf16.msra.mxu0 %v9732_v57  ;;  %5828 = vmatpush1.bf16.msra.mxu1 %v9735_v58  ;;  %v9827_v57 = vld [vmem:[%s11125_s11 + $0x70c] ss:$16 sps:$4 sm:$0xff]   ;;  %v9822_v58 = vld [vmem:[%s11125_s11 + $0x700] ss:$16 sps:$4 sm:$0xff]  }
  0xb9   : > { %5296 = vmatprep.subr.bf16.mxu0 %v9740_v59  ;;  %5829 = vmatprep.subr.bf16.mxu1 %v9743_v60  ;;  %v9825_v59 = vld [vmem:[%s11125_s11 + $0x708] ss:$16 sps:$4 sm:$0xff]   ;;  %v9830_v60 = vld [vmem:[%s11125_s11 + $0x724] ss:$16 sps:$4 sm:$0xff]  }
  0xbc   : > { %5297 = vmatpush1.bf16.msra.mxu0 %v9738_v61  ;;  %5830 = vmatpush1.bf16.msra.mxu1 %v9741_v62  ;;  %v9833_v61 = vld [vmem:[%s11125_s11 + $0x72c] ss:$16 sps:$4 sm:$0xff]   ;;  %v9828_v62 = vld [vmem:[%s11125_s11 + $0x720] ss:$16 sps:$4 sm:$0xff]  }
  0xbd   : > { %5298 = vmatprep.subr.bf16.mxu0 %v9746_v63  ;;  %5831 = vmatprep.subr.bf16.mxu1 %v9749_v0  ;;  %v9831_v63 = vld [vmem:[%s11125_s11 + $0x728] ss:$16 sps:$4 sm:$0xff]   ;;  %v9836_v0 = vld [vmem:[%s11125_s11 + $0x744] ss:$16 sps:$4 sm:$0xff]  }
  0xc0   : > { %5299 = vmatpush1.bf16.msra.mxu0 %v9744_v1  ;;  %5832 = vmatpush1.bf16.msra.mxu1 %v9747_v2  ;;  %v9839_v1 = vld [vmem:[%s11125_s11 + $0x74c] ss:$16 sps:$4 sm:$0xff]   ;;  %v9834_v2 = vld [vmem:[%s11125_s11 + $0x740] ss:$16 sps:$4 sm:$0xff]  }
  0xc1   : > { %5300 = vmatprep.subr.bf16.mxu0 %v9752_v3  ;;  %5833 = vmatprep.subr.bf16.mxu1 %v9755_v4  ;;  %v9837_v3 = vld [vmem:[%s11125_s11 + $0x748] ss:$16 sps:$4 sm:$0xff]   ;;  %v9842_v4 = vld [vmem:[%s11125_s11 + $0x764] ss:$16 sps:$4 sm:$0xff]  }
  0xc4   : > { %5301 = vmatpush1.bf16.msra.mxu0 %v9750_v5  ;;  %5834 = vmatpush1.bf16.msra.mxu1 %v9753_v6  ;;  %v9845_v5 = vld [vmem:[%s11125_s11 + $0x76c] ss:$16 sps:$4 sm:$0xff]   ;;  %v9840_v6 = vld [vmem:[%s11125_s11 + $0x760] ss:$16 sps:$4 sm:$0xff]  }
  0xc5   : > { %5302 = vmatprep.subr.bf16.mxu0 %v9758_v7  ;;  %5835 = vmatprep.subr.bf16.mxu1 %v9761_v8  ;;  %v9843_v7 = vld [vmem:[%s11125_s11 + $0x768] ss:$16 sps:$4 sm:$0xff]   ;;  %v9848_v8 = vld [vmem:[%s11125_s11 + $0x784] ss:$16 sps:$4 sm:$0xff]  }
  0xc8   : > { %5303 = vmatpush1.bf16.msra.mxu0 %v9756_v9  ;;  %5836 = vmatpush1.bf16.msra.mxu1 %v9759_v10  ;;  %v9851_v9 = vld [vmem:[%s11125_s11 + $0x78c] ss:$16 sps:$4 sm:$0xff]   ;;  %v9846_v10 = vld [vmem:[%s11125_s11 + $0x780] ss:$16 sps:$4 sm:$0xff]  }
  0xc9   : > { %5304 = vmatprep.subr.bf16.mxu0 %v9764_v11  ;;  %5837 = vmatprep.subr.bf16.mxu1 %v9767_v13  ;;  %v9849_v11 = vld [vmem:[%s11125_s11 + $0x788] ss:$16 sps:$4 sm:$0xff]   ;;  %v9854_v13 = vld [vmem:[%s11125_s11 + $0x7a4] ss:$16 sps:$4 sm:$0xff]  }
  0xcc   : > { %5305 = vmatpush1.bf16.msra.mxu0 %v9762_v14  ;;  %5838 = vmatpush1.bf16.msra.mxu1 %v9765_v15  ;;  %v9857_v14 = vld [vmem:[%s11125_s11 + $0x7ac] ss:$16 sps:$4 sm:$0xff]   ;;  %v9852_v15 = vld [vmem:[%s11125_s11 + $0x7a0] ss:$16 sps:$4 sm:$0xff]  }
  0xcd   : > { %5306 = vmatprep.subr.bf16.mxu0 %v9770_v16  ;;  %5839 = vmatprep.subr.bf16.mxu1 %v9773_v17  ;;  %v9855_v16 = vld [vmem:[%s11125_s11 + $0x7a8] ss:$16 sps:$4 sm:$0xff]   ;;  %v9860_v17 = vld [vmem:[%s11125_s11 + $0x7c4] ss:$16 sps:$4 sm:$0xff]  }
  0xd0   : > { %5307 = vmatpush1.bf16.msra.mxu0 %v9768_v20  ;;  %5840 = vmatpush1.bf16.msra.mxu1 %v9771_v21  ;;  %v9858_v20 = vld [vmem:[%s11125_s11 + $0x7c0] ss:$16 sps:$4 sm:$0xff]   ;;  %v9861_v21 = vld [vmem:[%s11125_s11 + $0x7c8] ss:$16 sps:$4 sm:$0xff]  }
  0xd1   : > { %5317 = vmatprep.subr.bf16.mxu0 %v9776_v23  ;;  %5850 = vmatprep.subr.bf16.mxu1 %v9779_v24  ;;  %v9866_v23 = vld [vmem:[%s11125_s11 + $0x7e4] ss:$16 sps:$4 sm:$0xff]   ;;  %v9869_v24 = vld [vmem:[%s11125_s11 + $0x7ec] ss:$16 sps:$4 sm:$0xff]  }
  0xd3   : > { %5309 = vmatmul.mubr.bf16.vlgmr.msra.gmra.mrb[0].mxu0 %v11284_v22  ;;  %5842 = vmatmul.mubr.bf16.vlgmr.msra.gmra.mrb[0].mxu1 %v11284_v22  ;;  %v9789_v22 = vld [vmem:[%s11125_s11 + $0x648] ss:$16 sps:$4 sm:$0xff]  }
  0xd4   : > { %5318 = vmatpush1.bf16.msra.mxu0 %v9774_v26  ;;  %5851 = vmatpush1.bf16.msra.mxu1 %v9777_v19  ;;  %v9864_v26 = vld [vmem:[%s11125_s11 + $0x7e0] ss:$16 sps:$4 sm:$0xff]  }
  0xd5   : > { %5319 = vmatprep.subr.bf16.mxu0 %v9782_v27  ;;  %5852 = vmatprep.subr.bf16.mxu1 %v9785_v12  ;;  %v11421_v19 = vld [vmem:[%s11177_s15 + $0x10] sm:$0xff]  ;;  %v9867_v27 = vld [vmem:[%s11125_s11 + $0x7e8] ss:$16 sps:$4 sm:$0xff]  }
  0xd6   : > { %5349 = vmatprep.mubr.bf16.mxu0 %v1170_v28  ;;  %5882 = vmatprep.mubr.bf16.mxu1 %v1170_v28  ;;  %v9873_v12 = vld [vmem:[%s11125_s11 + $0x804] ss:$16 sps:$4 sm:$0xff]   ;;  %v9876_v28 = vld [vmem:[%s11125_s11 + $0x80c] ss:$16 sps:$4 sm:$0xff]  }
  0xd8   : > { %5320 = vmatpush1.bf16.msra.mxu0 %v9780_v29  ;;  %5853 = vmatpush1.bf16.msra.mxu1 %v9783_v30  ;;  %v11428_v29 = vrot.slane %v11421_v19, %v11180_v49  ;;  %v9871_v30 = vld [vmem:[%s11125_s11 + $0x800] ss:$16 sps:$4 sm:$0xff]  }
  0xd9   : > { %5321 = vmatprep.subr.bf16.mxu0 %v9788_v31  ;;  %5854 = vmatprep.subr.bf16.mxu1 %v9791_v32  ;;  %v9874_v31 = vld [vmem:[%s11125_s11 + $0x808] ss:$16 sps:$4 sm:$0xff]   ;;  %v9879_v32 = vld [vmem:[%s11125_s11 + $0x824] ss:$16 sps:$4 sm:$0xff]  }
  0xdc   : > { %5322 = vmatpush1.bf16.msra.mxu0 %v9786_v33  ;;  %5855 = vmatpush1.bf16.msra.mxu1 %v9789_v22  ;;  %v9882_v33 = vld [vmem:[%s11125_s11 + $0x82c] ss:$16 sps:$4 sm:$0xff]   ;;  %v1186_v22 = vcombine.high %v11428_v29, %v11428_v29 }
  0xdd   : > { %5323 = vmatprep.subr.bf16.mxu0 %v9794_v34  ;;  %5856 = vmatprep.subr.bf16.mxu1 %v9797_v35  ;;  %v9877_v34 = vld [vmem:[%s11125_s11 + $0x820] ss:$16 sps:$4 sm:$0xff]   ;;  %v9880_v35 = vld [vmem:[%s11125_s11 + $0x828] ss:$16 sps:$4 sm:$0xff]  }
  0xe0   : > { %5324 = vmatpush1.bf16.msra.mxu0 %v9792_v36  ;;  %5857 = vmatpush1.bf16.msra.mxu1 %v9795_v37  ;;  %v9885_v36 = vld [vmem:[%s11125_s11 + $0x844] ss:$16 sps:$4 sm:$0xff]   ;;  %v9888_v37 = vld [vmem:[%s11125_s11 + $0x84c] ss:$16 sps:$4 sm:$0xff]  }
  0xe1   : > { %5325 = vmatprep.subr.bf16.mxu0 %v9800_v38  ;;  %5858 = vmatprep.subr.bf16.mxu1 %v9803_v39  ;;  %v9883_v38 = vld [vmem:[%s11125_s11 + $0x840] ss:$16 sps:$4 sm:$0xff]   ;;  %v9891_v39 = vld [vmem:[%s11125_s11 + $0x864] ss:$16 sps:$4 sm:$0xff]  }
  0xe4   : > { %5326 = vmatpush1.bf16.msra.mxu0 %v9798_v40  ;;  %5859 = vmatpush1.bf16.msra.mxu1 %v9801_v41  ;;  %v9894_v40 = vld [vmem:[%s11125_s11 + $0x86c] ss:$16 sps:$4 sm:$0xff]   ;;  %v9889_v41 = vld [vmem:[%s11125_s11 + $0x860] ss:$16 sps:$4 sm:$0xff]  }
  0xe5   : > { %5327 = vmatprep.subr.bf16.mxu0 %v9806_v43  ;;  %5860 = vmatprep.subr.bf16.mxu1 %v9809_v44  ;;  %v9892_v43 = vld [vmem:[%s11125_s11 + $0x868] ss:$16 sps:$4 sm:$0xff]   ;;  %v9897_v44 = vld [vmem:[%s11125_s11 + $0x884] ss:$16 sps:$4 sm:$0xff]  }
  0xe8   : > { %5328 = vmatpush1.bf16.msra.mxu0 %v9804_v45  ;;  %5861 = vmatpush1.bf16.msra.mxu1 %v9807_v46  ;;  %v9900_v45 = vld [vmem:[%s11125_s11 + $0x88c] ss:$16 sps:$4 sm:$0xff]   ;;  %v9895_v46 = vld [vmem:[%s11125_s11 + $0x880] ss:$16 sps:$4 sm:$0xff]  }
  0xe9   : > { %5329 = vmatprep.subr.bf16.mxu0 %v9812_v47  ;;  %5862 = vmatprep.subr.bf16.mxu1 %v9815_v48  ;;  %v9898_v47 = vld [vmem:[%s11125_s11 + $0x888] ss:$16 sps:$4 sm:$0xff]   ;;  %v9903_v48 = vld [vmem:[%s11125_s11 + $0x8a4] ss:$16 sps:$4 sm:$0xff]  }
  0xec   : > { %5330 = vmatpush1.bf16.msra.mxu0 %v9810_v50  ;;  %5863 = vmatpush1.bf16.msra.mxu1 %v9813_v51  ;;  %v9906_v50 = vld [vmem:[%s11125_s11 + $0x8ac] ss:$16 sps:$4 sm:$0xff]   ;;  %v9901_v51 = vld [vmem:[%s11125_s11 + $0x8a0] ss:$16 sps:$4 sm:$0xff]  }
  0xed   : > { %5331 = vmatprep.subr.bf16.mxu0 %v9818_v52  ;;  %5864 = vmatprep.subr.bf16.mxu1 %v9821_v53  ;;  %v9904_v52 = vld [vmem:[%s11125_s11 + $0x8a8] ss:$16 sps:$4 sm:$0xff]   ;;  %v9909_v53 = vld [vmem:[%s11125_s11 + $0x8c4] ss:$16 sps:$4 sm:$0xff]  }
  0xf0   : > { %5332 = vmatpush1.bf16.msra.mxu0 %v9816_v54  ;;  %5865 = vmatpush1.bf16.msra.mxu1 %v9819_v55  ;;  %v9912_v54 = vld [vmem:[%s11125_s11 + $0x8cc] ss:$16 sps:$4 sm:$0xff]   ;;  %v9907_v55 = vld [vmem:[%s11125_s11 + $0x8c0] ss:$16 sps:$4 sm:$0xff]  }
  0xf1   : > { %5333 = vmatprep.subr.bf16.mxu0 %v9824_v56  ;;  %5866 = vmatprep.subr.bf16.mxu1 %v9827_v57  ;;  %v9910_v56 = vld [vmem:[%s11125_s11 + $0x8c8] ss:$16 sps:$4 sm:$0xff]   ;;  %v9915_v57 = vld [vmem:[%s11125_s11 + $0x8e4] ss:$16 sps:$4 sm:$0xff]  }
  0xf4   : > { %5334 = vmatpush1.bf16.msra.mxu0 %v9822_v58  ;;  %5867 = vmatpush1.bf16.msra.mxu1 %v9825_v59  ;;  %v9918_v58 = vld [vmem:[%s11125_s11 + $0x8ec] ss:$16 sps:$4 sm:$0xff]   ;;  %v9913_v59 = vld [vmem:[%s11125_s11 + $0x8e0] ss:$16 sps:$4 sm:$0xff]  }
  0xf5   : > { %5335 = vmatprep.subr.bf16.mxu0 %v9830_v60  ;;  %5868 = vmatprep.subr.bf16.mxu1 %v9833_v61  ;;  %v9916_v60 = vld [vmem:[%s11125_s11 + $0x8e8] ss:$16 sps:$4 sm:$0xff]   ;;  %v9921_v61 = vld [vmem:[%s11125_s11 + $0x904] ss:$16 sps:$4 sm:$0xff]  }
  0xf8   : > { %5336 = vmatpush1.bf16.msra.mxu0 %v9828_v62  ;;  %5869 = vmatpush1.bf16.msra.mxu1 %v9831_v63  ;;  %v9924_v62 = vld [vmem:[%s11125_s11 + $0x90c] ss:$16 sps:$4 sm:$0xff]   ;;  %v9919_v63 = vld [vmem:[%s11125_s11 + $0x900] ss:$16 sps:$4 sm:$0xff]  }
  0xf9   : > { %5337 = vmatprep.subr.bf16.mxu0 %v9836_v0  ;;  %5870 = vmatprep.subr.bf16.mxu1 %v9839_v1  ;;  %v9922_v0 = vld [vmem:[%s11125_s11 + $0x908] ss:$16 sps:$4 sm:$0xff]   ;;  %v9927_v1 = vld [vmem:[%s11125_s11 + $0x924] ss:$16 sps:$4 sm:$0xff]  }
  0xfc   : > { %5338 = vmatpush1.bf16.msra.mxu0 %v9834_v2  ;;  %5871 = vmatpush1.bf16.msra.mxu1 %v9837_v3  ;;  %v9930_v2 = vld [vmem:[%s11125_s11 + $0x92c] ss:$16 sps:$4 sm:$0xff]   ;;  %v9925_v3 = vld [vmem:[%s11125_s11 + $0x920] ss:$16 sps:$4 sm:$0xff]  }
  0xfd   : > { %5339 = vmatprep.subr.bf16.mxu0 %v9842_v4  ;;  %5872 = vmatprep.subr.bf16.mxu1 %v9845_v5  ;;  %v9928_v4 = vld [vmem:[%s11125_s11 + $0x928] ss:$16 sps:$4 sm:$0xff]   ;;  %v9933_v5 = vld [vmem:[%s11125_s11 + $0x944] ss:$16 sps:$4 sm:$0xff]  }
 0x100   : > { %5340 = vmatpush1.bf16.msra.mxu0 %v9840_v6  ;;  %5873 = vmatpush1.bf16.msra.mxu1 %v9843_v7  ;;  %v9936_v6 = vld [vmem:[%s11125_s11 + $0x94c] ss:$16 sps:$4 sm:$0xff]   ;;  %v9931_v7 = vld [vmem:[%s11125_s11 + $0x940] ss:$16 sps:$4 sm:$0xff]  }
 0x101   : > { %5341 = vmatprep.subr.bf16.mxu0 %v9848_v8  ;;  %5874 = vmatprep.subr.bf16.mxu1 %v9851_v9  ;;  %v9934_v8 = vld [vmem:[%s11125_s11 + $0x948] ss:$16 sps:$4 sm:$0xff]   ;;  %v9939_v9 = vld [vmem:[%s11125_s11 + $0x964] ss:$16 sps:$4 sm:$0xff]  }
 0x104   : > { %5342 = vmatpush1.bf16.msra.mxu0 %v9846_v10  ;;  %5875 = vmatpush1.bf16.msra.mxu1 %v9849_v11  ;;  %v9942_v10 = vld [vmem:[%s11125_s11 + $0x96c] ss:$16 sps:$4 sm:$0xff]   ;;  %v9937_v11 = vld [vmem:[%s11125_s11 + $0x960] ss:$16 sps:$4 sm:$0xff]  }
 0x105   : > { %5343 = vmatprep.subr.bf16.mxu0 %v9854_v13  ;;  %5876 = vmatprep.subr.bf16.mxu1 %v9857_v14  ;;  %v9940_v13 = vld [vmem:[%s11125_s11 + $0x968] ss:$16 sps:$4 sm:$0xff]   ;;  %v9945_v14 = vld [vmem:[%s11125_s11 + $0x984] ss:$16 sps:$4 sm:$0xff]  }
 0x108   : > { %5344 = vmatpush1.bf16.msra.mxu0 %v9852_v15  ;;  %5877 = vmatpush1.bf16.msra.mxu1 %v9855_v16  ;;  %v9948_v15 = vld [vmem:[%s11125_s11 + $0x98c] ss:$16 sps:$4 sm:$0xff]   ;;  %v9943_v16 = vld [vmem:[%s11125_s11 + $0x980] ss:$16 sps:$4 sm:$0xff]  }
 0x109   : > { %5345 = vmatprep.subr.bf16.mxu0 %v9860_v17  ;;  %5878 = vmatprep.subr.bf16.mxu1 %v9863_v18  ;;  %v9946_v17 = vld [vmem:[%s11125_s11 + $0x988] ss:$16 sps:$4 sm:$0xff]   ;;  %v9951_v18 = vld [vmem:[%s11125_s11 + $0x9a4] ss:$16 sps:$4 sm:$0xff]  }
 0x10c   : > { %5346 = vmatpush1.bf16.msra.mxu0 %v9858_v20  ;;  %5879 = vmatpush1.bf16.msra.mxu1 %v9861_v21  ;;  %v9954_v20 = vld [vmem:[%s11125_s11 + $0x9ac] ss:$16 sps:$4 sm:$0xff]   ;;  %v9949_v21 = vld [vmem:[%s11125_s11 + $0x9a0] ss:$16 sps:$4 sm:$0xff]  }
 0x10d   : > { %5347 = vmatprep.subr.bf16.mxu0 %v9866_v23  ;;  %5880 = vmatprep.subr.bf16.mxu1 %v9869_v24  ;;  %v9952_v23 = vld [vmem:[%s11125_s11 + $0x9a8] ss:$16 sps:$4 sm:$0xff]   ;;  %v9957_v24 = vld [vmem:[%s11125_s11 + $0x9c4] ss:$16 sps:$4 sm:$0xff]  }
 0x110   : > { %5348 = vmatpush1.bf16.msra.mxu0 %v9864_v26  ;;  %5881 = vmatpush1.bf16.msra.mxu1 %v9867_v27  ;;  %v9960_v26 = vld [vmem:[%s11125_s11 + $0x9cc] ss:$16 sps:$4 sm:$0xff]   ;;  %v9955_v27 = vld [vmem:[%s11125_s11 + $0x9c0] ss:$16 sps:$4 sm:$0xff]  }
 0x111   : > { %5358 = vmatprep.subr.bf16.mxu0 %v9873_v12  ;;  %5891 = vmatprep.subr.bf16.mxu1 %v9876_v28  ;;  %v9958_v12 = vld [vmem:[%s11125_s11 + $0x9c8] ss:$16 sps:$4 sm:$0xff]   ;;  %v9963_v28 = vld [vmem:[%s11125_s11 + $0x9e4] ss:$16 sps:$4 sm:$0xff]  }
 0x113   : > { %5350 = vmatmul.mubr.bf16.vlgmr.msra.gmra.mrb[0].mxu0 %v11353_v25  ;;  %5883 = vmatmul.mubr.bf16.vlgmr.msra.gmra.mrb[0].mxu1 %v11353_v25  ;;  %v9886_v25 = vld [vmem:[%s11125_s11 + $0x848] ss:$16 sps:$4 sm:$0xff]  }
 0x114   : > { %5359 = vmatpush1.bf16.msra.mxu0 %v9871_v30  ;;  %5892 = vmatpush1.bf16.msra.mxu1 %v9874_v31  ;;  %v9966_v30 = vld [vmem:[%s11125_s11 + $0x9ec] ss:$16 sps:$4 sm:$0xff]   ;;  %v1171_v31 = vcombine.high %v11421_v19, %v11421_v19  ;;  %v9970_v19 = vld [vmem:[%s11125_s11 + $0xa08] ss:$16 sps:$4 sm:$0xff]  }
 0x115   : > { %5360 = vmatprep.subr.bf16.mxu0 %v9879_v32  ;;  %5893 = vmatprep.subr.bf16.mxu1 %v9882_v33  ;;  %v9961_v32 = vld [vmem:[%s11125_s11 + $0x9e0] ss:$16 sps:$4 sm:$0xff]   ;;  %v9964_v33 = vld [vmem:[%s11125_s11 + $0x9e8] ss:$16 sps:$4 sm:$0xff]  }
 0x116   : > { %5390 = vmatprep.mubr.bf16.mxu0 %v1186_v22  ;;  %5923 = vmatprep.mubr.bf16.mxu1 %v1186_v22  ;;  %v9969_v22 = vld [vmem:[%s11125_s11 + $0xa04] ss:$16 sps:$4 sm:$0xff]  }
 0x118   : > { %5361 = vmatpush1.bf16.msra.mxu0 %v9877_v34  ;;  %5894 = vmatpush1.bf16.msra.mxu1 %v9880_v35  ;;  %v9972_v34 = vld [vmem:[%s11125_s11 + $0xa0c] ss:$16 sps:$4 sm:$0xff]   ;;  %v11501_v35 = vrot.slane %v1171_v31, %v11180_v49 }
 0x119   : > { %5362 = vmatprep.subr.bf16.mxu0 %v9885_v36  ;;  %5895 = vmatprep.subr.bf16.mxu1 %v9888_v37  ;;  %v9967_v36 = vld [vmem:[%s11125_s11 + $0xa00] ss:$16 sps:$4 sm:$0xff]   ;;  %v9975_v37 = vld [vmem:[%s11125_s11 + $0xa24] ss:$16 sps:$4 sm:$0xff]   ;;  %v10056_v31 = vld [vmem:[%s11125_s11 + $0xbcc] ss:$16 sps:$4 sm:$0xff]  }
 0x11c   : > { %5363 = vmatpush1.bf16.msra.mxu0 %v9883_v38  ;;  %5896 = vmatpush1.bf16.msra.mxu1 %v9886_v25  ;;  %v9978_v38 = vld [vmem:[%s11125_s11 + $0xa2c] ss:$16 sps:$4 sm:$0xff]   ;;  %v1187_v25 = vcombine.high %v11501_v35, %v11501_v35 }
 0x11d   : > { %5364 = vmatprep.subr.bf16.mxu0 %v9891_v39  ;;  %5897 = vmatprep.subr.bf16.mxu1 %v9894_v40  ;;  %v9973_v39 = vld [vmem:[%s11125_s11 + $0xa20] ss:$16 sps:$4 sm:$0xff]   ;;  %v9976_v40 = vld [vmem:[%s11125_s11 + $0xa28] ss:$16 sps:$4 sm:$0xff]  }
 0x120   : > { %5365 = vmatpush1.bf16.msra.mxu0 %v9889_v41  ;;  %5898 = vmatpush1.bf16.msra.mxu1 %v9892_v43  ;;  %v9981_v41 = vld [vmem:[%s11125_s11 + $0xa44] ss:$16 sps:$4 sm:$0xff]   ;;  %v9984_v43 = vld [vmem:[%s11125_s11 + $0xa4c] ss:$16 sps:$4 sm:$0xff]  }
 0x121   : > { %5366 = vmatprep.subr.bf16.mxu0 %v9897_v44  ;;  %5899 = vmatprep.subr.bf16.mxu1 %v9900_v45  ;;  %v9979_v44 = vld [vmem:[%s11125_s11 + $0xa40] ss:$16 sps:$4 sm:$0xff]   ;;  %v9987_v45 = vld [vmem:[%s11125_s11 + $0xa64] ss:$16 sps:$4 sm:$0xff]  }
 0x124   : > { %5367 = vmatpush1.bf16.msra.mxu0 %v9895_v46  ;;  %5900 = vmatpush1.bf16.msra.mxu1 %v9898_v47  ;;  %v9990_v46 = vld [vmem:[%s11125_s11 + $0xa6c] ss:$16 sps:$4 sm:$0xff]   ;;  %v9985_v47 = vld [vmem:[%s11125_s11 + $0xa60] ss:$16 sps:$4 sm:$0xff]  }
 0x125   : > { %5368 = vmatprep.subr.bf16.mxu0 %v9903_v48  ;;  %5901 = vmatprep.subr.bf16.mxu1 %v9906_v50  ;;  %v9988_v48 = vld [vmem:[%s11125_s11 + $0xa68] ss:$16 sps:$4 sm:$0xff]   ;;  %v9993_v50 = vld [vmem:[%s11125_s11 + $0xa84] ss:$16 sps:$4 sm:$0xff]  }
 0x128   : > { %5369 = vmatpush1.bf16.msra.mxu0 %v9901_v51  ;;  %5902 = vmatpush1.bf16.msra.mxu1 %v9904_v52  ;;  %v9996_v51 = vld [vmem:[%s11125_s11 + $0xa8c] ss:$16 sps:$4 sm:$0xff]   ;;  %v9991_v52 = vld [vmem:[%s11125_s11 + $0xa80] ss:$16 sps:$4 sm:$0xff]  }
 0x129   : > { %5370 = vmatprep.subr.bf16.mxu0 %v9909_v53  ;;  %5903 = vmatprep.subr.bf16.mxu1 %v9912_v54  ;;  %v9994_v53 = vld [vmem:[%s11125_s11 + $0xa88] ss:$16 sps:$4 sm:$0xff]   ;;  %v9999_v54 = vld [vmem:[%s11125_s11 + $0xaa4] ss:$16 sps:$4 sm:$0xff]  }
 0x12c   : > { %5371 = vmatpush1.bf16.msra.mxu0 %v9907_v55  ;;  %5904 = vmatpush1.bf16.msra.mxu1 %v9910_v56  ;;  %v10002_v55 = vld [vmem:[%s11125_s11 + $0xaac] ss:$16 sps:$4 sm:$0xff]   ;;  %v9997_v56 = vld [vmem:[%s11125_s11 + $0xaa0] ss:$16 sps:$4 sm:$0xff]  }
 0x12d   : > { %5372 = vmatprep.subr.bf16.mxu0 %v9915_v57  ;;  %5905 = vmatprep.subr.bf16.mxu1 %v9918_v58  ;;  %v10000_v57 = vld [vmem:[%s11125_s11 + $0xaa8] ss:$16 sps:$4 sm:$0xff]   ;;  %v10005_v58 = vld [vmem:[%s11125_s11 + $0xac4] ss:$16 sps:$4 sm:$0xff]  }
 0x130   : > { %5373 = vmatpush1.bf16.msra.mxu0 %v9913_v59  ;;  %5906 = vmatpush1.bf16.msra.mxu1 %v9916_v60  ;;  %v10008_v59 = vld [vmem:[%s11125_s11 + $0xacc] ss:$16 sps:$4 sm:$0xff]   ;;  %v10003_v60 = vld [vmem:[%s11125_s11 + $0xac0] ss:$16 sps:$4 sm:$0xff]  }
 0x131   : > { %5374 = vmatprep.subr.bf16.mxu0 %v9921_v61  ;;  %5907 = vmatprep.subr.bf16.mxu1 %v9924_v62  ;;  %v10006_v61 = vld [vmem:[%s11125_s11 + $0xac8] ss:$16 sps:$4 sm:$0xff]   ;;  %v10011_v62 = vld [vmem:[%s11125_s11 + $0xae4] ss:$16 sps:$4 sm:$0xff]  }
 0x134   : > { %5375 = vmatpush1.bf16.msra.mxu0 %v9919_v63  ;;  %5908 = vmatpush1.bf16.msra.mxu1 %v9922_v0  ;;  %v10014_v63 = vld [vmem:[%s11125_s11 + $0xaec] ss:$16 sps:$4 sm:$0xff]   ;;  %v10009_v0 = vld [vmem:[%s11125_s11 + $0xae0] ss:$16 sps:$4 sm:$0xff]  }
 0x135   : > { %5376 = vmatprep.subr.bf16.mxu0 %v9927_v1  ;;  %5909 = vmatprep.subr.bf16.mxu1 %v9930_v2  ;;  %v10012_v1 = vld [vmem:[%s11125_s11 + $0xae8] ss:$16 sps:$4 sm:$0xff]   ;;  %v10017_v2 = vld [vmem:[%s11125_s11 + $0xb04] ss:$16 sps:$4 sm:$0xff]  }
 0x138   : > { %5377 = vmatpush1.bf16.msra.mxu0 %v9925_v3  ;;  %5910 = vmatpush1.bf16.msra.mxu1 %v9928_v4  ;;  %v10020_v3 = vld [vmem:[%s11125_s11 + $0xb0c] ss:$16 sps:$4 sm:$0xff]   ;;  %v10015_v4 = vld [vmem:[%s11125_s11 + $0xb00] ss:$16 sps:$4 sm:$0xff]  }
 0x139   : > { %5378 = vmatprep.subr.bf16.mxu0 %v9933_v5  ;;  %5911 = vmatprep.subr.bf16.mxu1 %v9936_v6  ;;  %v10018_v5 = vld [vmem:[%s11125_s11 + $0xb08] ss:$16 sps:$4 sm:$0xff]   ;;  %v10023_v6 = vld [vmem:[%s11125_s11 + $0xb24] ss:$16 sps:$4 sm:$0xff]  }
 0x13c   : > { %5379 = vmatpush1.bf16.msra.mxu0 %v9931_v7  ;;  %5912 = vmatpush1.bf16.msra.mxu1 %v9934_v8  ;;  %v10026_v7 = vld [vmem:[%s11125_s11 + $0xb2c] ss:$16 sps:$4 sm:$0xff]   ;;  %v10021_v8 = vld [vmem:[%s11125_s11 + $0xb20] ss:$16 sps:$4 sm:$0xff]  }
 0x13d   : > { %5380 = vmatprep.subr.bf16.mxu0 %v9939_v9  ;;  %5913 = vmatprep.subr.bf16.mxu1 %v9942_v10  ;;  %v10024_v9 = vld [vmem:[%s11125_s11 + $0xb28] ss:$16 sps:$4 sm:$0xff]   ;;  %v10029_v10 = vld [vmem:[%s11125_s11 + $0xb44] ss:$16 sps:$4 sm:$0xff]  }
 0x140   : > { %5381 = vmatpush1.bf16.msra.mxu0 %v9937_v11  ;;  %5914 = vmatpush1.bf16.msra.mxu1 %v9940_v13  ;;  %v10032_v11 = vld [vmem:[%s11125_s11 + $0xb4c] ss:$16 sps:$4 sm:$0xff]   ;;  %v10027_v13 = vld [vmem:[%s11125_s11 + $0xb40] ss:$16 sps:$4 sm:$0xff]  }
 0x141   : > { %5382 = vmatprep.subr.bf16.mxu0 %v9945_v14  ;;  %5915 = vmatprep.subr.bf16.mxu1 %v9948_v15  ;;  %v10030_v14 = vld [vmem:[%s11125_s11 + $0xb48] ss:$16 sps:$4 sm:$0xff]   ;;  %v10035_v15 = vld [vmem:[%s11125_s11 + $0xb64] ss:$16 sps:$4 sm:$0xff]  }
 0x144   : > { %5383 = vmatpush1.bf16.msra.mxu0 %v9943_v16  ;;  %5916 = vmatpush1.bf16.msra.mxu1 %v9946_v17  ;;  %v10038_v16 = vld [vmem:[%s11125_s11 + $0xb6c] ss:$16 sps:$4 sm:$0xff]   ;;  %v10033_v17 = vld [vmem:[%s11125_s11 + $0xb60] ss:$16 sps:$4 sm:$0xff]  }
 0x145   : > { %5384 = vmatprep.subr.bf16.mxu0 %v9951_v18  ;;  %5917 = vmatprep.subr.bf16.mxu1 %v9954_v20  ;;  %v10036_v18 = vld [vmem:[%s11125_s11 + $0xb68] ss:$16 sps:$4 sm:$0xff]   ;;  %v10041_v20 = vld [vmem:[%s11125_s11 + $0xb84] ss:$16 sps:$4 sm:$0xff]  }
 0x148   : > { %5385 = vmatpush1.bf16.msra.mxu0 %v9949_v21  ;;  %5918 = vmatpush1.bf16.msra.mxu1 %v9952_v23  ;;  %v10044_v21 = vld [vmem:[%s11125_s11 + $0xb8c] ss:$16 sps:$4 sm:$0xff]   ;;  %v10039_v23 = vld [vmem:[%s11125_s11 + $0xb80] ss:$16 sps:$4 sm:$0xff]  }
 0x149   : > { %5386 = vmatprep.subr.bf16.mxu0 %v9957_v24  ;;  %5919 = vmatprep.subr.bf16.mxu1 %v9960_v26  ;;  %v10042_v24 = vld [vmem:[%s11125_s11 + $0xb88] ss:$16 sps:$4 sm:$0xff]   ;;  %v10047_v26 = vld [vmem:[%s11125_s11 + $0xba4] ss:$16 sps:$4 sm:$0xff]  }
 0x14c   : > { %5387 = vmatpush1.bf16.msra.mxu0 %v9955_v27  ;;  %5920 = vmatpush1.bf16.msra.mxu1 %v9958_v12  ;;  %v10050_v27 = vld [vmem:[%s11125_s11 + $0xbac] ss:$16 sps:$4 sm:$0xff]   ;;  %v10045_v12 = vld [vmem:[%s11125_s11 + $0xba0] ss:$16 sps:$4 sm:$0xff]  }
 0x14d   : > { %5388 = vmatprep.subr.bf16.mxu0 %v9963_v28  ;;  %5921 = vmatprep.subr.bf16.mxu1 %v9966_v30  ;;  %v10048_v28 = vld [vmem:[%s11125_s11 + $0xba8] ss:$16 sps:$4 sm:$0xff]   ;;  %v10053_v30 = vld [vmem:[%s11125_s11 + $0xbc4] ss:$16 sps:$4 sm:$0xff]  }
 0x150   : > { %5389 = vmatpush1.bf16.msra.mxu0 %v9961_v32  ;;  %5922 = vmatpush1.bf16.msra.mxu1 %v9964_v33  ;;  %v10051_v32 = vld [vmem:[%s11125_s11 + $0xbc0] ss:$16 sps:$4 sm:$0xff]   ;;  %v10054_v33 = vld [vmem:[%s11125_s11 + $0xbc8] ss:$16 sps:$4 sm:$0xff]  }
 0x151   : > { %5399 = vmatprep.subr.bf16.mxu0 %v9969_v22  ;;  %5932 = vmatprep.subr.bf16.mxu1 %v9972_v34  ;;  %v10059_v22 = vld [vmem:[%s11125_s11 + $0xbe4] ss:$16 sps:$4 sm:$0xff]   ;;  %v10062_v34 = vld [vmem:[%s11125_s11 + $0xbec] ss:$16 sps:$4 sm:$0xff]  }
 0x153   : > { %5391 = vmatmul.mubr.bf16.vlgmr.msra.gmra.mrb[0].mxu0 %v11428_v29  ;;  %5924 = vmatmul.mubr.bf16.vlgmr.msra.gmra.mrb[0].mxu1 %v11428_v29  ;;  %v9982_v29 = vld [vmem:[%s11125_s11 + $0xa48] ss:$16 sps:$4 sm:$0xff]  }
 0x154   : > { %5400 = vmatpush1.bf16.msra.mxu0 %v9967_v36  ;;  %5933 = vmatpush1.bf16.msra.mxu1 %v9970_v19  ;;  %v11568_v36 = vld [vmem:[%s11177_s15 + $0x18] sm:$0xff]  ;;  %v10057_v19 = vld [vmem:[%s11125_s11 + $0xbe0] ss:$16 sps:$4 sm:$0xff]  }
 0x155   : > { %5401 = vmatprep.subr.bf16.mxu0 %v9975_v37  ;;  %5934 = vmatprep.subr.bf16.mxu1 %v9978_v38  ;;  %v10060_v37 = vld [vmem:[%s11125_s11 + $0xbe8] ss:$16 sps:$4 sm:$0xff]   ;;  %v10066_v38 = vld [vmem:[%s11125_s11 + $0xc04] ss:$16 sps:$4 sm:$0xff]  }
 0x156   : > { %5431 = vmatprep.mubr.bf16.mxu0 %v1187_v25  ;;  %5964 = vmatprep.mubr.bf16.mxu1 %v1187_v25  ;;  %v10069_v25 = vld [vmem:[%s11125_s11 + $0xc0c] ss:$16 sps:$4 sm:$0xff]  }
 0x158   : > { %5402 = vmatpush1.bf16.msra.mxu0 %v9973_v39  ;;  %5935 = vmatpush1.bf16.msra.mxu1 %v9976_v40  ;;  %v11576_v39 = vrot.slane %v11568_v36, %v11180_v49  ;;  %v10064_v40 = vld [vmem:[%s11125_s11 + $0xc00] ss:$16 sps:$4 sm:$0xff]  }
 0x159   : > { %5403 = vmatprep.subr.bf16.mxu0 %v9981_v41  ;;  %5936 = vmatprep.subr.bf16.mxu1 %v9984_v43  ;;  %v10067_v41 = vld [vmem:[%s11125_s11 + $0xc08] ss:$16 sps:$4 sm:$0xff]   ;;  %v10072_v43 = vld [vmem:[%s11125_s11 + $0xc24] ss:$16 sps:$4 sm:$0xff]  }
 0x15c   : > { %5404 = vmatpush1.bf16.msra.mxu0 %v9979_v44  ;;  %5937 = vmatpush1.bf16.msra.mxu1 %v9982_v29  ;;  %v10075_v44 = vld [vmem:[%s11125_s11 + $0xc2c] ss:$16 sps:$4 sm:$0xff]   ;;  %v1203_v29 = vcombine.high %v11576_v39, %v11576_v39 }
 0x15d   : > { %5405 = vmatprep.subr.bf16.mxu0 %v9987_v45  ;;  %5938 = vmatprep.subr.bf16.mxu1 %v9990_v46  ;;  %v10070_v45 = vld [vmem:[%s11125_s11 + $0xc20] ss:$16 sps:$4 sm:$0xff]   ;;  %v10073_v46 = vld [vmem:[%s11125_s11 + $0xc28] ss:$16 sps:$4 sm:$0xff]  }
 0x160   : > { %5406 = vmatpush1.bf16.msra.mxu0 %v9985_v47  ;;  %5939 = vmatpush1.bf16.msra.mxu1 %v9988_v48  ;;  %v10078_v47 = vld [vmem:[%s11125_s11 + $0xc44] ss:$16 sps:$4 sm:$0xff]   ;;  %v10081_v48 = vld [vmem:[%s11125_s11 + $0xc4c] ss:$16 sps:$4 sm:$0xff]  }
 0x161   : > { %5407 = vmatprep.subr.bf16.mxu0 %v9993_v50  ;;  %5940 = vmatprep.subr.bf16.mxu1 %v9996_v51  ;;  %v10076_v50 = vld [vmem:[%s11125_s11 + $0xc40] ss:$16 sps:$4 sm:$0xff]   ;;  %v10084_v51 = vld [vmem:[%s11125_s11 + $0xc64] ss:$16 sps:$4 sm:$0xff]  }
 0x164   : > { %5408 = vmatpush1.bf16.msra.mxu0 %v9991_v52  ;;  %5941 = vmatpush1.bf16.msra.mxu1 %v9994_v53  ;;  %v10087_v52 = vld [vmem:[%s11125_s11 + $0xc6c] ss:$16 sps:$4 sm:$0xff]   ;;  %v10082_v53 = vld [vmem:[%s11125_s11 + $0xc60] ss:$16 sps:$4 sm:$0xff]  }
 0x165   : > { %5409 = vmatprep.subr.bf16.mxu0 %v9999_v54  ;;  %5942 = vmatprep.subr.bf16.mxu1 %v10002_v55  ;;  %v10085_v54 = vld [vmem:[%s11125_s11 + $0xc68] ss:$16 sps:$4 sm:$0xff]   ;;  %v10090_v55 = vld [vmem:[%s11125_s11 + $0xc84] ss:$16 sps:$4 sm:$0xff]  }
 0x168   : > { %5410 = vmatpush1.bf16.msra.mxu0 %v9997_v56  ;;  %5943 = vmatpush1.bf16.msra.mxu1 %v10000_v57  ;;  %v10093_v56 = vld [vmem:[%s11125_s11 + $0xc8c] ss:$16 sps:$4 sm:$0xff]   ;;  %v10088_v57 = vld [vmem:[%s11125_s11 + $0xc80] ss:$16 sps:$4 sm:$0xff]  }
 0x169   : > { %5411 = vmatprep.subr.bf16.mxu0 %v10005_v58  ;;  %5944 = vmatprep.subr.bf16.mxu1 %v10008_v59  ;;  %v10091_v58 = vld [vmem:[%s11125_s11 + $0xc88] ss:$16 sps:$4 sm:$0xff]   ;;  %v10096_v59 = vld [vmem:[%s11125_s11 + $0xca4] ss:$16 sps:$4 sm:$0xff]  }
 0x16c   : > { %5412 = vmatpush1.bf16.msra.mxu0 %v10003_v60  ;;  %5945 = vmatpush1.bf16.msra.mxu1 %v10006_v61  ;;  %v10099_v60 = vld [vmem:[%s11125_s11 + $0xcac] ss:$16 sps:$4 sm:$0xff]   ;;  %v10094_v61 = vld [vmem:[%s11125_s11 + $0xca0] ss:$16 sps:$4 sm:$0xff]  }
 0x16d   : > { %5413 = vmatprep.subr.bf16.mxu0 %v10011_v62  ;;  %5946 = vmatprep.subr.bf16.mxu1 %v10014_v63  ;;  %v10097_v62 = vld [vmem:[%s11125_s11 + $0xca8] ss:$16 sps:$4 sm:$0xff]   ;;  %v10102_v63 = vld [vmem:[%s11125_s11 + $0xcc4] ss:$16 sps:$4 sm:$0xff]  }
 0x170   : > { %5414 = vmatpush1.bf16.msra.mxu0 %v10009_v0  ;;  %5947 = vmatpush1.bf16.msra.mxu1 %v10012_v1  ;;  %v10105_v0 = vld [vmem:[%s11125_s11 + $0xccc] ss:$16 sps:$4 sm:$0xff]   ;;  %v10100_v1 = vld [vmem:[%s11125_s11 + $0xcc0] ss:$16 sps:$4 sm:$0xff]  }
 0x171   : > { %5415 = vmatprep.subr.bf16.mxu0 %v10017_v2  ;;  %5948 = vmatprep.subr.bf16.mxu1 %v10020_v3  ;;  %v10103_v2 = vld [vmem:[%s11125_s11 + $0xcc8] ss:$16 sps:$4 sm:$0xff]   ;;  %v10108_v3 = vld [vmem:[%s11125_s11 + $0xce4] ss:$16 sps:$4 sm:$0xff]  }
 0x174   : > { %5416 = vmatpush1.bf16.msra.mxu0 %v10015_v4  ;;  %5949 = vmatpush1.bf16.msra.mxu1 %v10018_v5  ;;  %v10111_v4 = vld [vmem:[%s11125_s11 + $0xcec] ss:$16 sps:$4 sm:$0xff]   ;;  %v10106_v5 = vld [vmem:[%s11125_s11 + $0xce0] ss:$16 sps:$4 sm:$0xff]  }
 0x175   : > { %5417 = vmatprep.subr.bf16.mxu0 %v10023_v6  ;;  %5950 = vmatprep.subr.bf16.mxu1 %v10026_v7  ;;  %v10109_v6 = vld [vmem:[%s11125_s11 + $0xce8] ss:$16 sps:$4 sm:$0xff]   ;;  %v10114_v7 = vld [vmem:[%s11125_s11 + $0xd04] ss:$16 sps:$4 sm:$0xff]  }
 0x178   : > { %5418 = vmatpush1.bf16.msra.mxu0 %v10021_v8  ;;  %5951 = vmatpush1.bf16.msra.mxu1 %v10024_v9  ;;  %v10117_v8 = vld [vmem:[%s11125_s11 + $0xd0c] ss:$16 sps:$4 sm:$0xff]   ;;  %v10112_v9 = vld [vmem:[%s11125_s11 + $0xd00] ss:$16 sps:$4 sm:$0xff]  }
 0x179   : > { %5419 = vmatprep.subr.bf16.mxu0 %v10029_v10  ;;  %5952 = vmatprep.subr.bf16.mxu1 %v10032_v11  ;;  %v10115_v10 = vld [vmem:[%s11125_s11 + $0xd08] ss:$16 sps:$4 sm:$0xff]   ;;  %v10120_v11 = vld [vmem:[%s11125_s11 + $0xd24] ss:$16 sps:$4 sm:$0xff]  }
 0x17c   : > { %5420 = vmatpush1.bf16.msra.mxu0 %v10027_v13  ;;  %5953 = vmatpush1.bf16.msra.mxu1 %v10030_v14  ;;  %v10123_v13 = vld [vmem:[%s11125_s11 + $0xd2c] ss:$16 sps:$4 sm:$0xff]   ;;  %v10118_v14 = vld [vmem:[%s11125_s11 + $0xd20] ss:$16 sps:$4 sm:$0xff]  }
 0x17d   : > { %5421 = vmatprep.subr.bf16.mxu0 %v10035_v15  ;;  %5954 = vmatprep.subr.bf16.mxu1 %v10038_v16  ;;  %v10121_v15 = vld [vmem:[%s11125_s11 + $0xd28] ss:$16 sps:$4 sm:$0xff]   ;;  %v10126_v16 = vld [vmem:[%s11125_s11 + $0xd44] ss:$16 sps:$4 sm:$0xff]  }
 0x180   : > { %5422 = vmatpush1.bf16.msra.mxu0 %v10033_v17  ;;  %5955 = vmatpush1.bf16.msra.mxu1 %v10036_v18  ;;  %v10129_v17 = vld [vmem:[%s11125_s11 + $0xd4c] ss:$16 sps:$4 sm:$0xff]   ;;  %v10124_v18 = vld [vmem:[%s11125_s11 + $0xd40] ss:$16 sps:$4 sm:$0xff]  }
 0x181   : > { %5423 = vmatprep.subr.bf16.mxu0 %v10041_v20  ;;  %5956 = vmatprep.subr.bf16.mxu1 %v10044_v21  ;;  %v10127_v20 = vld [vmem:[%s11125_s11 + $0xd48] ss:$16 sps:$4 sm:$0xff]   ;;  %v10132_v21 = vld [vmem:[%s11125_s11 + $0xd64] ss:$16 sps:$4 sm:$0xff]  }
 0x184   : > { %5424 = vmatpush1.bf16.msra.mxu0 %v10039_v23  ;;  %5957 = vmatpush1.bf16.msra.mxu1 %v10042_v24  ;;  %v10135_v23 = vld [vmem:[%s11125_s11 + $0xd6c] ss:$16 sps:$4 sm:$0xff]   ;;  %v10130_v24 = vld [vmem:[%s11125_s11 + $0xd60] ss:$16 sps:$4 sm:$0xff]  }
 0x185   : > { %5425 = vmatprep.subr.bf16.mxu0 %v10047_v26  ;;  %5958 = vmatprep.subr.bf16.mxu1 %v10050_v27  ;;  %v10133_v26 = vld [vmem:[%s11125_s11 + $0xd68] ss:$16 sps:$4 sm:$0xff]   ;;  %v10138_v27 = vld [vmem:[%s11125_s11 + $0xd84] ss:$16 sps:$4 sm:$0xff]  }
 0x188   : > { %5426 = vmatpush1.bf16.msra.mxu0 %v10045_v12  ;;  %5959 = vmatpush1.bf16.msra.mxu1 %v10048_v28  ;;  %v10141_v12 = vld [vmem:[%s11125_s11 + $0xd8c] ss:$16 sps:$4 sm:$0xff]   ;;  %v10136_v28 = vld [vmem:[%s11125_s11 + $0xd80] ss:$16 sps:$4 sm:$0xff]  }
 0x189   : > { %5427 = vmatprep.subr.bf16.mxu0 %v10053_v30  ;;  %5960 = vmatprep.subr.bf16.mxu1 %v10056_v31  ;;  %v10139_v30 = vld [vmem:[%s11125_s11 + $0xd88] ss:$16 sps:$4 sm:$0xff]   ;;  %v10144_v31 = vld [vmem:[%s11125_s11 + $0xda4] ss:$16 sps:$4 sm:$0xff]  }
 0x18c   : > { %5428 = vmatpush1.bf16.msra.mxu0 %v10051_v32  ;;  %5961 = vmatpush1.bf16.msra.mxu1 %v10054_v33  ;;  %v10147_v32 = vld [vmem:[%s11125_s11 + $0xdac] ss:$16 sps:$4 sm:$0xff]   ;;  %v10142_v33 = vld [vmem:[%s11125_s11 + $0xda0] ss:$16 sps:$4 sm:$0xff]  }
 0x18d   : > { %5429 = vmatprep.subr.bf16.mxu0 %v10059_v22  ;;  %5962 = vmatprep.subr.bf16.mxu1 %v10062_v34  ;;  %v10145_v22 = vld [vmem:[%s11125_s11 + $0xda8] ss:$16 sps:$4 sm:$0xff]   ;;  %v10150_v34 = vld [vmem:[%s11125_s11 + $0xdc4] ss:$16 sps:$4 sm:$0xff]  }
 0x190   : > { %5430 = vmatpush1.bf16.msra.mxu0 %v10057_v19  ;;  %5963 = vmatpush1.bf16.msra.mxu1 %v10060_v37  ;;  %v10153_v19 = vld [vmem:[%s11125_s11 + $0xdcc] ss:$16 sps:$4 sm:$0xff]   ;;  %v10148_v37 = vld [vmem:[%s11125_s11 + $0xdc0] ss:$16 sps:$4 sm:$0xff]  }
 0x191   : > { %5440 = vmatprep.subr.bf16.mxu0 %v10066_v38  ;;  %5973 = vmatprep.subr.bf16.mxu1 %v10069_v25  ;;  %v10151_v38 = vld [vmem:[%s11125_s11 + $0xdc8] ss:$16 sps:$4 sm:$0xff]   ;;  %v10156_v25 = vld [vmem:[%s11125_s11 + $0xde4] ss:$16 sps:$4 sm:$0xff]  }
 0x193   : > { %5432 = vmatmul.mubr.bf16.vlgmr.msra.gmra.mrb[0].mxu0 %v11501_v35  ;;  %5965 = vmatmul.mubr.bf16.vlgmr.msra.gmra.mrb[0].mxu1 %v11501_v35  ;;  %v10079_v35 = vld [vmem:[%s11125_s11 + $0xc48] ss:$16 sps:$4 sm:$0xff]  }
 0x194   : > { %5441 = vmatpush1.bf16.msra.mxu0 %v10064_v40  ;;  %5974 = vmatpush1.bf16.msra.mxu1 %v10067_v41  ;;  %v10159_v40 = vld [vmem:[%s11125_s11 + $0xdec] ss:$16 sps:$4 sm:$0xff]   ;;  %v1188_v41 = vcombine.high %v11568_v36, %v11568_v36  ;;  %v10163_v36 = vld [vmem:[%s11125_s11 + $0xe08] ss:$16 sps:$4 sm:$0xff]  }
 0x195   : > { %5442 = vmatprep.subr.bf16.mxu0 %v10072_v43  ;;  %5975 = vmatprep.subr.bf16.mxu1 %v10075_v44  ;;  %v10154_v43 = vld [vmem:[%s11125_s11 + $0xde0] ss:$16 sps:$4 sm:$0xff]   ;;  %v10157_v44 = vld [vmem:[%s11125_s11 + $0xde8] ss:$16 sps:$4 sm:$0xff]  }
 0x196   : > { %5472 = vmatprep.mubr.bf16.mxu0 %v1203_v29  ;;  %6005 = vmatprep.mubr.bf16.mxu1 %v1203_v29  ;;  %v10162_v29 = vld [vmem:[%s11125_s11 + $0xe04] ss:$16 sps:$4 sm:$0xff]  }
 0x198   : > { %5443 = vmatpush1.bf16.msra.mxu0 %v10070_v45  ;;  %5976 = vmatpush1.bf16.msra.mxu1 %v10073_v46  ;;  %v10165_v45 = vld [vmem:[%s11125_s11 + $0xe0c] ss:$16 sps:$4 sm:$0xff]   ;;  %v11649_v46 = vrot.slane %v1188_v41, %v11180_v49 }
 0x199   : > { %5444 = vmatprep.subr.bf16.mxu0 %v10078_v47  ;;  %5977 = vmatprep.subr.bf16.mxu1 %v10081_v48  ;;  %v10160_v47 = vld [vmem:[%s11125_s11 + $0xe00] ss:$16 sps:$4 sm:$0xff]   ;;  %v10168_v48 = vld [vmem:[%s11125_s11 + $0xe24] ss:$16 sps:$4 sm:$0xff]   ;;  %v10249_v41 = vld [vmem:[%s11125_s11 + $0xfcc] ss:$16 sps:$4 sm:$0xff]  }
 0x19c   : > { %5445 = vmatpush1.bf16.msra.mxu0 %v10076_v50  ;;  %5978 = vmatpush1.bf16.msra.mxu1 %v10079_v35  ;;  %v10171_v50 = vld [vmem:[%s11125_s11 + $0xe2c] ss:$16 sps:$4 sm:$0xff]   ;;  %v1204_v35 = vcombine.high %v11649_v46, %v11649_v46 }
 0x19d   : > { %5446 = vmatprep.subr.bf16.mxu0 %v10084_v51  ;;  %5979 = vmatprep.subr.bf16.mxu1 %v10087_v52  ;;  %v10166_v51 = vld [vmem:[%s11125_s11 + $0xe20] ss:$16 sps:$4 sm:$0xff]   ;;  %v10169_v52 = vld [vmem:[%s11125_s11 + $0xe28] ss:$16 sps:$4 sm:$0xff]  }
 0x1a0   : > { %5447 = vmatpush1.bf16.msra.mxu0 %v10082_v53  ;;  %5980 = vmatpush1.bf16.msra.mxu1 %v10085_v54  ;;  %v10174_v53 = vld [vmem:[%s11125_s11 + $0xe44] ss:$16 sps:$4 sm:$0xff]   ;;  %v10177_v54 = vld [vmem:[%s11125_s11 + $0xe4c] ss:$16 sps:$4 sm:$0xff]  }
 0x1a1   : > { %5448 = vmatprep.subr.bf16.mxu0 %v10090_v55  ;;  %5981 = vmatprep.subr.bf16.mxu1 %v10093_v56  ;;  %v10172_v55 = vld [vmem:[%s11125_s11 + $0xe40] ss:$16 sps:$4 sm:$0xff]   ;;  %v10180_v56 = vld [vmem:[%s11125_s11 + $0xe64] ss:$16 sps:$4 sm:$0xff]  }
 0x1a4   : > { %5449 = vmatpush1.bf16.msra.mxu0 %v10088_v57  ;;  %5982 = vmatpush1.bf16.msra.mxu1 %v10091_v58  ;;  %v10183_v57 = vld [vmem:[%s11125_s11 + $0xe6c] ss:$16 sps:$4 sm:$0xff]   ;;  %v10178_v58 = vld [vmem:[%s11125_s11 + $0xe60] ss:$16 sps:$4 sm:$0xff]  }
 0x1a5   : > { %5450 = vmatprep.subr.bf16.mxu0 %v10096_v59  ;;  %5983 = vmatprep.subr.bf16.mxu1 %v10099_v60  ;;  %v10181_v59 = vld [vmem:[%s11125_s11 + $0xe68] ss:$16 sps:$4 sm:$0xff]   ;;  %v10186_v60 = vld [vmem:[%s11125_s11 + $0xe84] ss:$16 sps:$4 sm:$0xff]  }
 0x1a8   : > { %5451 = vmatpush1.bf16.msra.mxu0 %v10094_v61  ;;  %5984 = vmatpush1.bf16.msra.mxu1 %v10097_v62  ;;  %v10189_v61 = vld [vmem:[%s11125_s11 + $0xe8c] ss:$16 sps:$4 sm:$0xff]   ;;  %v10184_v62 = vld [vmem:[%s11125_s11 + $0xe80] ss:$16 sps:$4 sm:$0xff]  }
 0x1a9   : > { %5452 = vmatprep.subr.bf16.mxu0 %v10102_v63  ;;  %5985 = vmatprep.subr.bf16.mxu1 %v10105_v0  ;;  %v10187_v63 = vld [vmem:[%s11125_s11 + $0xe88] ss:$16 sps:$4 sm:$0xff]   ;;  %v10192_v0 = vld [vmem:[%s11125_s11 + $0xea4] ss:$16 sps:$4 sm:$0xff]  }
 0x1ac   : > { %5453 = vmatpush1.bf16.msra.mxu0 %v10100_v1  ;;  %5986 = vmatpush1.bf16.msra.mxu1 %v10103_v2  ;;  %v10195_v1 = vld [vmem:[%s11125_s11 + $0xeac] ss:$16 sps:$4 sm:$0xff]   ;;  %v10190_v2 = vld [vmem:[%s11125_s11 + $0xea0] ss:$16 sps:$4 sm:$0xff]  }
 0x1ad   : > { %5454 = vmatprep.subr.bf16.mxu0 %v10108_v3  ;;  %5987 = vmatprep.subr.bf16.mxu1 %v10111_v4  ;;  %v10193_v3 = vld [vmem:[%s11125_s11 + $0xea8] ss:$16 sps:$4 sm:$0xff]   ;;  %v10198_v4 = vld [vmem:[%s11125_s11 + $0xec4] ss:$16 sps:$4 sm:$0xff]  }
 0x1b0   : > { %5455 = vmatpush1.bf16.msra.mxu0 %v10106_v5  ;;  %5988 = vmatpush1.bf16.msra.mxu1 %v10109_v6  ;;  %v10201_v5 = vld [vmem:[%s11125_s11 + $0xecc] ss:$16 sps:$4 sm:$0xff]   ;;  %v10196_v6 = vld [vmem:[%s11125_s11 + $0xec0] ss:$16 sps:$4 sm:$0xff]  }
 0x1b1   : > { %5456 = vmatprep.subr.bf16.mxu0 %v10114_v7  ;;  %5989 = vmatprep.subr.bf16.mxu1 %v10117_v8  ;;  %v10199_v7 = vld [vmem:[%s11125_s11 + $0xec8] ss:$16 sps:$4 sm:$0xff]   ;;  %v10204_v8 = vld [vmem:[%s11125_s11 + $0xee4] ss:$16 sps:$4 sm:$0xff]  }
 0x1b4   : > { %5457 = vmatpush1.bf16.msra.mxu0 %v10112_v9  ;;  %5990 = vmatpush1.bf16.msra.mxu1 %v10115_v10  ;;  %v10207_v9 = vld [vmem:[%s11125_s11 + $0xeec] ss:$16 sps:$4 sm:$0xff]   ;;  %v10202_v10 = vld [vmem:[%s11125_s11 + $0xee0] ss:$16 sps:$4 sm:$0xff]  }
 0x1b5   : > { %5458 = vmatprep.subr.bf16.mxu0 %v10120_v11  ;;  %5991 = vmatprep.subr.bf16.mxu1 %v10123_v13  ;;  %v10205_v11 = vld [vmem:[%s11125_s11 + $0xee8] ss:$16 sps:$4 sm:$0xff]   ;;  %v10210_v13 = vld [vmem:[%s11125_s11 + $0xf04] ss:$16 sps:$4 sm:$0xff]  }
 0x1b8   : > { %5459 = vmatpush1.bf16.msra.mxu0 %v10118_v14  ;;  %5992 = vmatpush1.bf16.msra.mxu1 %v10121_v15  ;;  %v10213_v14 = vld [vmem:[%s11125_s11 + $0xf0c] ss:$16 sps:$4 sm:$0xff]   ;;  %v10208_v15 = vld [vmem:[%s11125_s11 + $0xf00] ss:$16 sps:$4 sm:$0xff]  }
 0x1b9   : > { %5460 = vmatprep.subr.bf16.mxu0 %v10126_v16  ;;  %5993 = vmatprep.subr.bf16.mxu1 %v10129_v17  ;;  %v10211_v16 = vld [vmem:[%s11125_s11 + $0xf08] ss:$16 sps:$4 sm:$0xff]   ;;  %v10216_v17 = vld [vmem:[%s11125_s11 + $0xf24] ss:$16 sps:$4 sm:$0xff]  }
 0x1bc   : > { %5461 = vmatpush1.bf16.msra.mxu0 %v10124_v18  ;;  %5994 = vmatpush1.bf16.msra.mxu1 %v10127_v20  ;;  %v10219_v18 = vld [vmem:[%s11125_s11 + $0xf2c] ss:$16 sps:$4 sm:$0xff]   ;;  %v10214_v20 = vld [vmem:[%s11125_s11 + $0xf20] ss:$16 sps:$4 sm:$0xff]  }
 0x1bd   : > { %5462 = vmatprep.subr.bf16.mxu0 %v10132_v21  ;;  %5995 = vmatprep.subr.bf16.mxu1 %v10135_v23  ;;  %v10217_v21 = vld [vmem:[%s11125_s11 + $0xf28] ss:$16 sps:$4 sm:$0xff]   ;;  %v10222_v23 = vld [vmem:[%s11125_s11 + $0xf44] ss:$16 sps:$4 sm:$0xff]  }
 0x1c0   : > { %5463 = vmatpush1.bf16.msra.mxu0 %v10130_v24  ;;  %5996 = vmatpush1.bf16.msra.mxu1 %v10133_v26  ;;  %v10225_v24 = vld [vmem:[%s11125_s11 + $0xf4c] ss:$16 sps:$4 sm:$0xff]   ;;  %v10220_v26 = vld [vmem:[%s11125_s11 + $0xf40] ss:$16 sps:$4 sm:$0xff]  }
 0x1c1   : > { %5464 = vmatprep.subr.bf16.mxu0 %v10138_v27  ;;  %5997 = vmatprep.subr.bf16.mxu1 %v10141_v12  ;;  %v10223_v27 = vld [vmem:[%s11125_s11 + $0xf48] ss:$16 sps:$4 sm:$0xff]   ;;  %v10228_v12 = vld [vmem:[%s11125_s11 + $0xf64] ss:$16 sps:$4 sm:$0xff]  }
 0x1c4   : > { %5465 = vmatpush1.bf16.msra.mxu0 %v10136_v28  ;;  %5998 = vmatpush1.bf16.msra.mxu1 %v10139_v30  ;;  %v10231_v28 = vld [vmem:[%s11125_s11 + $0xf6c] ss:$16 sps:$4 sm:$0xff]   ;;  %v10226_v30 = vld [vmem:[%s11125_s11 + $0xf60] ss:$16 sps:$4 sm:$0xff]  }
 0x1c5   : > { %5466 = vmatprep.subr.bf16.mxu0 %v10144_v31  ;;  %5999 = vmatprep.subr.bf16.mxu1 %v10147_v32  ;;  %v10229_v31 = vld [vmem:[%s11125_s11 + $0xf68] ss:$16 sps:$4 sm:$0xff]   ;;  %v10234_v32 = vld [vmem:[%s11125_s11 + $0xf84] ss:$16 sps:$4 sm:$0xff]  }
 0x1c8   : > { %5467 = vmatpush1.bf16.msra.mxu0 %v10142_v33  ;;  %6000 = vmatpush1.bf16.msra.mxu1 %v10145_v22  ;;  %v10237_v33 = vld [vmem:[%s11125_s11 + $0xf8c] ss:$16 sps:$4 sm:$0xff]   ;;  %v10232_v22 = vld [vmem:[%s11125_s11 + $0xf80] ss:$16 sps:$4 sm:$0xff]  }
 0x1c9   : > { %5468 = vmatprep.subr.bf16.mxu0 %v10150_v34  ;;  %6001 = vmatprep.subr.bf16.mxu1 %v10153_v19  ;;  %v10235_v34 = vld [vmem:[%s11125_s11 + $0xf88] ss:$16 sps:$4 sm:$0xff]   ;;  %v10240_v19 = vld [vmem:[%s11125_s11 + $0xfa4] ss:$16 sps:$4 sm:$0xff]  }
 0x1cc   : > { %5469 = vmatpush1.bf16.msra.mxu0 %v10148_v37  ;;  %6002 = vmatpush1.bf16.msra.mxu1 %v10151_v38  ;;  %v10243_v37 = vld [vmem:[%s11125_s11 + $0xfac] ss:$16 sps:$4 sm:$0xff]   ;;  %v10238_v38 = vld [vmem:[%s11125_s11 + $0xfa0] ss:$16 sps:$4 sm:$0xff]  }
 0x1cd   : > { %5470 = vmatprep.subr.bf16.mxu0 %v10156_v25  ;;  %6003 = vmatprep.subr.bf16.mxu1 %v10159_v40  ;;  %v10241_v25 = vld [vmem:[%s11125_s11 + $0xfa8] ss:$16 sps:$4 sm:$0xff]   ;;  %v10246_v40 = vld [vmem:[%s11125_s11 + $0xfc4] ss:$16 sps:$4 sm:$0xff]  }
 0x1d0   : > { %5471 = vmatpush1.bf16.msra.mxu0 %v10154_v43  ;;  %6004 = vmatpush1.bf16.msra.mxu1 %v10157_v44  ;;  %v10244_v43 = vld [vmem:[%s11125_s11 + $0xfc0] ss:$16 sps:$4 sm:$0xff]   ;;  %v10247_v44 = vld [vmem:[%s11125_s11 + $0xfc8] ss:$16 sps:$4 sm:$0xff]  }
 0x1d1   : > { %5481 = vmatprep.subr.bf16.mxu0 %v10162_v29  ;;  %6014 = vmatprep.subr.bf16.mxu1 %v10165_v45  ;;  %v10252_v29 = vld [vmem:[%s11125_s11 + $0xfe4] ss:$16 sps:$4 sm:$0xff]   ;;  %v10255_v45 = vld [vmem:[%s11125_s11 + $0xfec] ss:$16 sps:$4 sm:$0xff]  }
 0x1d3   : > { %5473 = vmatmul.mubr.bf16.vlgmr.msra.gmra.mrb[0].mxu0 %v11576_v39  ;;  %6006 = vmatmul.mubr.bf16.vlgmr.msra.gmra.mrb[0].mxu1 %v11576_v39  ;;  %v10175_v39 = vld [vmem:[%s11125_s11 + $0xe48] ss:$16 sps:$4 sm:$0xff]  }
 0x1d4   : > { %5482 = vmatpush1.bf16.msra.mxu0 %v10160_v47  ;;  %6015 = vmatpush1.bf16.msra.mxu1 %v10163_v36  ;;  %v11716_v47 = vld [vmem:[%s11177_s15 + $0x20] sm:$0xff] }
 0x1d5   : > { %5483 = vmatprep.subr.bf16.mxu0 %v10168_v48  ;;  %6016 = vmatprep.subr.bf16.mxu1 %v10171_v50  ;;  %v10250_v36 = vld [vmem:[%s11125_s11 + $0xfe0] ss:$16 sps:$4 sm:$0xff]   ;;  %v10253_v48 = vld [vmem:[%s11125_s11 + $0xfe8] ss:$16 sps:$4 sm:$0xff]   ;;  %v10259_v50 = vld [vmem:[%s11125_s11 + $0x1004] ss:$16 sps:$4 sm:$0xff]  }
 0x1d6   : > { %5513 = vmatprep.mubr.bf16.mxu0 %v1204_v35  ;;  %6046 = vmatprep.mubr.bf16.mxu1 %v1204_v35  ;;  %v10262_v35 = vld [vmem:[%s11125_s11 + $0x100c] ss:$16 sps:$4 sm:$0xff]  }
 0x1d8   : > { %5484 = vmatpush1.bf16.msra.mxu0 %v10166_v51  ;;  %6017 = vmatpush1.bf16.msra.mxu1 %v10169_v52  ;;  %v11724_v51 = vrot.slane %v11716_v47, %v11180_v49  ;;  %v10257_v52 = vld [vmem:[%s11125_s11 + $0x1000] ss:$16 sps:$4 sm:$0xff]  }
 0x1d9   : > { %5485 = vmatprep.subr.bf16.mxu0 %v10174_v53  ;;  %6018 = vmatprep.subr.bf16.mxu1 %v10177_v54  ;;  %v10260_v53 = vld [vmem:[%s11125_s11 + $0x1008] ss:$16 sps:$4 sm:$0xff]   ;;  %v10265_v54 = vld [vmem:[%s11125_s11 + $0x1024] ss:$16 sps:$4 sm:$0xff]  }
 0x1dc   : > { %5486 = vmatpush1.bf16.msra.mxu0 %v10172_v55  ;;  %6019 = vmatpush1.bf16.msra.mxu1 %v10175_v39  ;;  %v10268_v55 = vld [vmem:[%s11125_s11 + $0x102c] ss:$16 sps:$4 sm:$0xff]   ;;  %v1220_v39 = vcombine.high %v11724_v51, %v11724_v51 }
 0x1dd   : > { %5487 = vmatprep.subr.bf16.mxu0 %v10180_v56  ;;  %6020 = vmatprep.subr.bf16.mxu1 %v10183_v57  ;;  %v10263_v56 = vld [vmem:[%s11125_s11 + $0x1020] ss:$16 sps:$4 sm:$0xff]   ;;  %v10266_v57 = vld [vmem:[%s11125_s11 + $0x1028] ss:$16 sps:$4 sm:$0xff]  }
 0x1e0   : > { %5488 = vmatpush1.bf16.msra.mxu0 %v10178_v58  ;;  %6021 = vmatpush1.bf16.msra.mxu1 %v10181_v59  ;;  %v10271_v58 = vld [vmem:[%s11125_s11 + $0x1044] ss:$16 sps:$4 sm:$0xff]   ;;  %v10274_v59 = vld [vmem:[%s11125_s11 + $0x104c] ss:$16 sps:$4 sm:$0xff]  }
 0x1e1   : > { %5489 = vmatprep.subr.bf16.mxu0 %v10186_v60  ;;  %6022 = vmatprep.subr.bf16.mxu1 %v10189_v61  ;;  %v10269_v60 = vld [vmem:[%s11125_s11 + $0x1040] ss:$16 sps:$4 sm:$0xff]   ;;  %v10277_v61 = vld [vmem:[%s11125_s11 + $0x1064] ss:$16 sps:$4 sm:$0xff]  }
 0x1e4   : > { %5490 = vmatpush1.bf16.msra.mxu0 %v10184_v62  ;;  %6023 = vmatpush1.bf16.msra.mxu1 %v10187_v63  ;;  %v10280_v62 = vld [vmem:[%s11125_s11 + $0x106c] ss:$16 sps:$4 sm:$0xff]   ;;  %v10275_v63 = vld [vmem:[%s11125_s11 + $0x1060] ss:$16 sps:$4 sm:$0xff]  }
 0x1e5   : > { %5491 = vmatprep.subr.bf16.mxu0 %v10192_v0  ;;  %6024 = vmatprep.subr.bf16.mxu1 %v10195_v1  ;;  %v10278_v0 = vld [vmem:[%s11125_s11 + $0x1068] ss:$16 sps:$4 sm:$0xff]   ;;  %v10283_v1 = vld [vmem:[%s11125_s11 + $0x1084] ss:$16 sps:$4 sm:$0xff]  }
 0x1e8   : > { %5492 = vmatpush1.bf16.msra.mxu0 %v10190_v2  ;;  %6025 = vmatpush1.bf16.msra.mxu1 %v10193_v3  ;;  %v10286_v2 = vld [vmem:[%s11125_s11 + $0x108c] ss:$16 sps:$4 sm:$0xff]   ;;  %v10281_v3 = vld [vmem:[%s11125_s11 + $0x1080] ss:$16 sps:$4 sm:$0xff]  }
 0x1e9   : > { %5493 = vmatprep.subr.bf16.mxu0 %v10198_v4  ;;  %6026 = vmatprep.subr.bf16.mxu1 %v10201_v5  ;;  %v10284_v4 = vld [vmem:[%s11125_s11 + $0x1088] ss:$16 sps:$4 sm:$0xff]   ;;  %v10289_v5 = vld [vmem:[%s11125_s11 + $0x10a4] ss:$16 sps:$4 sm:$0xff]  }
 0x1ec   : > { %5494 = vmatpush1.bf16.msra.mxu0 %v10196_v6  ;;  %6027 = vmatpush1.bf16.msra.mxu1 %v10199_v7  ;;  %v10292_v6 = vld [vmem:[%s11125_s11 + $0x10ac] ss:$16 sps:$4 sm:$0xff]   ;;  %v10287_v7 = vld [vmem:[%s11125_s11 + $0x10a0] ss:$16 sps:$4 sm:$0xff]  }
 0x1ed   : > { %5495 = vmatprep.subr.bf16.mxu0 %v10204_v8  ;;  %6028 = vmatprep.subr.bf16.mxu1 %v10207_v9  ;;  %v10290_v8 = vld [vmem:[%s11125_s11 + $0x10a8] ss:$16 sps:$4 sm:$0xff]   ;;  %v10295_v9 = vld [vmem:[%s11125_s11 + $0x10c4] ss:$16 sps:$4 sm:$0xff]  }
 0x1f0   : > { %5496 = vmatpush1.bf16.msra.mxu0 %v10202_v10  ;;  %6029 = vmatpush1.bf16.msra.mxu1 %v10205_v11  ;;  %v10298_v10 = vld [vmem:[%s11125_s11 + $0x10cc] ss:$16 sps:$4 sm:$0xff]   ;;  %v10293_v11 = vld [vmem:[%s11125_s11 + $0x10c0] ss:$16 sps:$4 sm:$0xff]  }
 0x1f1   : > { %5497 = vmatprep.subr.bf16.mxu0 %v10210_v13  ;;  %6030 = vmatprep.subr.bf16.mxu1 %v10213_v14  ;;  %v10296_v13 = vld [vmem:[%s11125_s11 + $0x10c8] ss:$16 sps:$4 sm:$0xff]   ;;  %v10301_v14 = vld [vmem:[%s11125_s11 + $0x10e4] ss:$16 sps:$4 sm:$0xff]  }
 0x1f4   : > { %5498 = vmatpush1.bf16.msra.mxu0 %v10208_v15  ;;  %6031 = vmatpush1.bf16.msra.mxu1 %v10211_v16  ;;  %v10304_v15 = vld [vmem:[%s11125_s11 + $0x10ec] ss:$16 sps:$4 sm:$0xff]   ;;  %v10299_v16 = vld [vmem:[%s11125_s11 + $0x10e0] ss:$16 sps:$4 sm:$0xff]  }
 0x1f5   : > { %5499 = vmatprep.subr.bf16.mxu0 %v10216_v17  ;;  %6032 = vmatprep.subr.bf16.mxu1 %v10219_v18  ;;  %v10302_v17 = vld [vmem:[%s11125_s11 + $0x10e8] ss:$16 sps:$4 sm:$0xff]   ;;  %v10307_v18 = vld [vmem:[%s11125_s11 + $0x1104] ss:$16 sps:$4 sm:$0xff]  }
 0x1f8   : > { %5500 = vmatpush1.bf16.msra.mxu0 %v10214_v20  ;;  %6033 = vmatpush1.bf16.msra.mxu1 %v10217_v21  ;;  %v10310_v20 = vld [vmem:[%s11125_s11 + $0x110c] ss:$16 sps:$4 sm:$0xff]   ;;  %v10305_v21 = vld [vmem:[%s11125_s11 + $0x1100] ss:$16 sps:$4 sm:$0xff]  }
 0x1f9   : > { %5501 = vmatprep.subr.bf16.mxu0 %v10222_v23  ;;  %6034 = vmatprep.subr.bf16.mxu1 %v10225_v24  ;;  %v10308_v23 = vld [vmem:[%s11125_s11 + $0x1108] ss:$16 sps:$4 sm:$0xff]   ;;  %v10313_v24 = vld [vmem:[%s11125_s11 + $0x1124] ss:$16 sps:$4 sm:$0xff]  }
 0x1fc   : > { %5502 = vmatpush1.bf16.msra.mxu0 %v10220_v26  ;;  %6035 = vmatpush1.bf16.msra.mxu1 %v10223_v27  ;;  %v10316_v26 = vld [vmem:[%s11125_s11 + $0x112c] ss:$16 sps:$4 sm:$0xff]   ;;  %v10311_v27 = vld [vmem:[%s11125_s11 + $0x1120] ss:$16 sps:$4 sm:$0xff]  }
 0x1fd   : > { %5503 = vmatprep.subr.bf16.mxu0 %v10228_v12  ;;  %6036 = vmatprep.subr.bf16.mxu1 %v10231_v28  ;;  %v10314_v12 = vld [vmem:[%s11125_s11 + $0x1128] ss:$16 sps:$4 sm:$0xff]   ;;  %v10319_v28 = vld [vmem:[%s11125_s11 + $0x1144] ss:$16 sps:$4 sm:$0xff]  }
 0x200   : > { %5504 = vmatpush1.bf16.msra.mxu0 %v10226_v30  ;;  %6037 = vmatpush1.bf16.msra.mxu1 %v10229_v31  ;;  %v10322_v30 = vld [vmem:[%s11125_s11 + $0x114c] ss:$16 sps:$4 sm:$0xff]   ;;  %v10317_v31 = vld [vmem:[%s11125_s11 + $0x1140] ss:$16 sps:$4 sm:$0xff]  }
 0x201   : > { %5505 = vmatprep.subr.bf16.mxu0 %v10234_v32  ;;  %6038 = vmatprep.subr.bf16.mxu1 %v10237_v33  ;;  %v10320_v32 = vld [vmem:[%s11125_s11 + $0x1148] ss:$16 sps:$4 sm:$0xff]   ;;  %v10325_v33 = vld [vmem:[%s11125_s11 + $0x1164] ss:$16 sps:$4 sm:$0xff]  }
 0x204   : > { %5506 = vmatpush1.bf16.msra.mxu0 %v10232_v22  ;;  %6039 = vmatpush1.bf16.msra.mxu1 %v10235_v34  ;;  %v10328_v22 = vld [vmem:[%s11125_s11 + $0x116c] ss:$16 sps:$4 sm:$0xff]   ;;  %v10323_v34 = vld [vmem:[%s11125_s11 + $0x1160] ss:$16 sps:$4 sm:$0xff]  }
 0x205   : > { %5507 = vmatprep.subr.bf16.mxu0 %v10240_v19  ;;  %6040 = vmatprep.subr.bf16.mxu1 %v10243_v37  ;;  %v10326_v19 = vld [vmem:[%s11125_s11 + $0x1168] ss:$16 sps:$4 sm:$0xff]   ;;  %v10331_v37 = vld [vmem:[%s11125_s11 + $0x1184] ss:$16 sps:$4 sm:$0xff]  }
 0x208   : > { %5508 = vmatpush1.bf16.msra.mxu0 %v10238_v38  ;;  %6041 = vmatpush1.bf16.msra.mxu1 %v10241_v25  ;;  %v10334_v38 = vld [vmem:[%s11125_s11 + $0x118c] ss:$16 sps:$4 sm:$0xff]   ;;  %v10329_v25 = vld [vmem:[%s11125_s11 + $0x1180] ss:$16 sps:$4 sm:$0xff]  }
 0x209   : > { %5509 = vmatprep.subr.bf16.mxu0 %v10246_v40  ;;  %6042 = vmatprep.subr.bf16.mxu1 %v10249_v41  ;;  %v10332_v40 = vld [vmem:[%s11125_s11 + $0x1188] ss:$16 sps:$4 sm:$0xff]   ;;  %v10337_v41 = vld [vmem:[%s11125_s11 + $0x11a4] ss:$16 sps:$4 sm:$0xff]  }
 0x20c   : > { %5510 = vmatpush1.bf16.msra.mxu0 %v10244_v43  ;;  %6043 = vmatpush1.bf16.msra.mxu1 %v10247_v44  ;;  %v10340_v43 = vld [vmem:[%s11125_s11 + $0x11ac] ss:$16 sps:$4 sm:$0xff]   ;;  %v10335_v44 = vld [vmem:[%s11125_s11 + $0x11a0] ss:$16 sps:$4 sm:$0xff]  }
 0x20d   : > { %5511 = vmatprep.subr.bf16.mxu0 %v10252_v29  ;;  %6044 = vmatprep.subr.bf16.mxu1 %v10255_v45  ;;  %v10338_v29 = vld [vmem:[%s11125_s11 + $0x11a8] ss:$16 sps:$4 sm:$0xff]   ;;  %v10343_v45 = vld [vmem:[%s11125_s11 + $0x11c4] ss:$16 sps:$4 sm:$0xff]  }
 0x210   : > { %5512 = vmatpush1.bf16.msra.mxu0 %v10250_v36  ;;  %6045 = vmatpush1.bf16.msra.mxu1 %v10253_v48  ;;  %v10346_v36 = vld [vmem:[%s11125_s11 + $0x11cc] ss:$16 sps:$4 sm:$0xff]   ;;  %v10341_v48 = vld [vmem:[%s11125_s11 + $0x11c0] ss:$16 sps:$4 sm:$0xff]  }
 0x211   : > { %5522 = vmatprep.subr.bf16.mxu0 %v10259_v50  ;;  %6055 = vmatprep.subr.bf16.mxu1 %v10262_v35  ;;  %v10344_v50 = vld [vmem:[%s11125_s11 + $0x11c8] ss:$16 sps:$4 sm:$0xff]   ;;  %v10349_v35 = vld [vmem:[%s11125_s11 + $0x11e4] ss:$16 sps:$4 sm:$0xff]  }
 0x213   : > { %5514 = vmatmul.mubr.bf16.vlgmr.msra.gmra.mrb[0].mxu0 %v11649_v46  ;;  %6047 = vmatmul.mubr.bf16.vlgmr.msra.gmra.mrb[0].mxu1 %v11649_v46  ;;  %v10272_v46 = vld [vmem:[%s11125_s11 + $0x1048] ss:$16 sps:$4 sm:$0xff]  }
 0x214   : > { %5523 = vmatpush1.bf16.msra.mxu0 %v10257_v52  ;;  %6056 = vmatpush1.bf16.msra.mxu1 %v10260_v53  ;;  %v10352_v52 = vld [vmem:[%s11125_s11 + $0x11ec] ss:$16 sps:$4 sm:$0xff]   ;;  %v1205_v53 = vcombine.high %v11716_v47, %v11716_v47  ;;  %v10356_v47 = vld [vmem:[%s11125_s11 + $0x1208] ss:$16 sps:$4 sm:$0xff]  }
 0x215   : > { %5524 = vmatprep.subr.bf16.mxu0 %v10265_v54  ;;  %6057 = vmatprep.subr.bf16.mxu1 %v10268_v55  ;;  %v10347_v54 = vld [vmem:[%s11125_s11 + $0x11e0] ss:$16 sps:$4 sm:$0xff]   ;;  %v10350_v55 = vld [vmem:[%s11125_s11 + $0x11e8] ss:$16 sps:$4 sm:$0xff]  }
 0x216   : > { %5554 = vmatprep.mubr.bf16.mxu0 %v1220_v39  ;;  %6087 = vmatprep.mubr.bf16.mxu1 %v1220_v39  ;;  %v10355_v39 = vld [vmem:[%s11125_s11 + $0x1204] ss:$16 sps:$4 sm:$0xff]  }
 0x218   : > { %5525 = vmatpush1.bf16.msra.mxu0 %v10263_v56  ;;  %6058 = vmatpush1.bf16.msra.mxu1 %v10266_v57  ;;  %v10358_v56 = vld [vmem:[%s11125_s11 + $0x120c] ss:$16 sps:$4 sm:$0xff]   ;;  %v11797_v57 = vrot.slane %v1205_v53, %v11180_v49 }
 0x219   : > { %5526 = vmatprep.subr.bf16.mxu0 %v10271_v58  ;;  %6059 = vmatprep.subr.bf16.mxu1 %v10274_v59  ;;  %v10353_v58 = vld [vmem:[%s11125_s11 + $0x1200] ss:$16 sps:$4 sm:$0xff]   ;;  %v10361_v59 = vld [vmem:[%s11125_s11 + $0x1224] ss:$16 sps:$4 sm:$0xff]   ;;  %v10442_v53 = vld [vmem:[%s11125_s11 + $0x13cc] ss:$16 sps:$4 sm:$0xff]  }
 0x21c   : > { %5527 = vmatpush1.bf16.msra.mxu0 %v10269_v60  ;;  %6060 = vmatpush1.bf16.msra.mxu1 %v10272_v46  ;;  %v10364_v60 = vld [vmem:[%s11125_s11 + $0x122c] ss:$16 sps:$4 sm:$0xff]   ;;  %v1221_v46 = vcombine.high %v11797_v57, %v11797_v57 }
 0x21d   : > { %5528 = vmatprep.subr.bf16.mxu0 %v10277_v61  ;;  %6061 = vmatprep.subr.bf16.mxu1 %v10280_v62  ;;  %v10359_v61 = vld [vmem:[%s11125_s11 + $0x1220] ss:$16 sps:$4 sm:$0xff]   ;;  %v10362_v62 = vld [vmem:[%s11125_s11 + $0x1228] ss:$16 sps:$4 sm:$0xff]  }
 0x220   : > { %5529 = vmatpush1.bf16.msra.mxu0 %v10275_v63  ;;  %6062 = vmatpush1.bf16.msra.mxu1 %v10278_v0  ;;  %v10367_v63 = vld [vmem:[%s11125_s11 + $0x1244] ss:$16 sps:$4 sm:$0xff]   ;;  %v10370_v0 = vld [vmem:[%s11125_s11 + $0x124c] ss:$16 sps:$4 sm:$0xff]  }
 0x221   : > { %5530 = vmatprep.subr.bf16.mxu0 %v10283_v1  ;;  %6063 = vmatprep.subr.bf16.mxu1 %v10286_v2  ;;  %v10365_v1 = vld [vmem:[%s11125_s11 + $0x1240] ss:$16 sps:$4 sm:$0xff]   ;;  %v10373_v2 = vld [vmem:[%s11125_s11 + $0x1264] ss:$16 sps:$4 sm:$0xff]  }
 0x224   : > { %5531 = vmatpush1.bf16.msra.mxu0 %v10281_v3  ;;  %6064 = vmatpush1.bf16.msra.mxu1 %v10284_v4  ;;  %v10376_v3 = vld [vmem:[%s11125_s11 + $0x126c] ss:$16 sps:$4 sm:$0xff]   ;;  %v10371_v4 = vld [vmem:[%s11125_s11 + $0x1260] ss:$16 sps:$4 sm:$0xff]  }
 0x225   : > { %5532 = vmatprep.subr.bf16.mxu0 %v10289_v5  ;;  %6065 = vmatprep.subr.bf16.mxu1 %v10292_v6  ;;  %v10374_v5 = vld [vmem:[%s11125_s11 + $0x1268] ss:$16 sps:$4 sm:$0xff]   ;;  %v10379_v6 = vld [vmem:[%s11125_s11 + $0x1284] ss:$16 sps:$4 sm:$0xff]  }
 0x228   : > { %5533 = vmatpush1.bf16.msra.mxu0 %v10287_v7  ;;  %6066 = vmatpush1.bf16.msra.mxu1 %v10290_v8  ;;  %v10382_v7 = vld [vmem:[%s11125_s11 + $0x128c] ss:$16 sps:$4 sm:$0xff]   ;;  %v10377_v8 = vld [vmem:[%s11125_s11 + $0x1280] ss:$16 sps:$4 sm:$0xff]  }
 0x229   : > { %5534 = vmatprep.subr.bf16.mxu0 %v10295_v9  ;;  %6067 = vmatprep.subr.bf16.mxu1 %v10298_v10  ;;  %v10380_v9 = vld [vmem:[%s11125_s11 + $0x1288] ss:$16 sps:$4 sm:$0xff]   ;;  %v10385_v10 = vld [vmem:[%s11125_s11 + $0x12a4] ss:$16 sps:$4 sm:$0xff]  }
 0x22c   : > { %5535 = vmatpush1.bf16.msra.mxu0 %v10293_v11  ;;  %6068 = vmatpush1.bf16.msra.mxu1 %v10296_v13  ;;  %v10388_v11 = vld [vmem:[%s11125_s11 + $0x12ac] ss:$16 sps:$4 sm:$0xff]   ;;  %v10383_v13 = vld [vmem:[%s11125_s11 + $0x12a0] ss:$16 sps:$4 sm:$0xff]  }
 0x22d   : > { %5536 = vmatprep.subr.bf16.mxu0 %v10301_v14  ;;  %6069 = vmatprep.subr.bf16.mxu1 %v10304_v15  ;;  %v10386_v14 = vld [vmem:[%s11125_s11 + $0x12a8] ss:$16 sps:$4 sm:$0xff]   ;;  %v10391_v15 = vld [vmem:[%s11125_s11 + $0x12c4] ss:$16 sps:$4 sm:$0xff]  }
 0x230   : > { %5537 = vmatpush1.bf16.msra.mxu0 %v10299_v16  ;;  %6070 = vmatpush1.bf16.msra.mxu1 %v10302_v17  ;;  %v10394_v16 = vld [vmem:[%s11125_s11 + $0x12cc] ss:$16 sps:$4 sm:$0xff]   ;;  %v10389_v17 = vld [vmem:[%s11125_s11 + $0x12c0] ss:$16 sps:$4 sm:$0xff]  }
 0x231   : > { %5538 = vmatprep.subr.bf16.mxu0 %v10307_v18  ;;  %6071 = vmatprep.subr.bf16.mxu1 %v10310_v20  ;;  %v10392_v18 = vld [vmem:[%s11125_s11 + $0x12c8] ss:$16 sps:$4 sm:$0xff]   ;;  %v10397_v20 = vld [vmem:[%s11125_s11 + $0x12e4] ss:$16 sps:$4 sm:$0xff]  }
 0x234   : > { %5539 = vmatpush1.bf16.msra.mxu0 %v10305_v21  ;;  %6072 = vmatpush1.bf16.msra.mxu1 %v10308_v23  ;;  %v10400_v21 = vld [vmem:[%s11125_s11 + $0x12ec] ss:$16 sps:$4 sm:$0xff]   ;;  %v10395_v23 = vld [vmem:[%s11125_s11 + $0x12e0] ss:$16 sps:$4 sm:$0xff]  }
 0x235   : > { %5540 = vmatprep.subr.bf16.mxu0 %v10313_v24  ;;  %6073 = vmatprep.subr.bf16.mxu1 %v10316_v26  ;;  %v10398_v24 = vld [vmem:[%s11125_s11 + $0x12e8] ss:$16 sps:$4 sm:$0xff]   ;;  %v10403_v26 = vld [vmem:[%s11125_s11 + $0x1304] ss:$16 sps:$4 sm:$0xff]  }
 0x238   : > { %5541 = vmatpush1.bf16.msra.mxu0 %v10311_v27  ;;  %6074 = vmatpush1.bf16.msra.mxu1 %v10314_v12  ;;  %v10406_v27 = vld [vmem:[%s11125_s11 + $0x130c] ss:$16 sps:$4 sm:$0xff]   ;;  %v10401_v12 = vld [vmem:[%s11125_s11 + $0x1300] ss:$16 sps:$4 sm:$0xff]  }
 0x239   : > { %5542 = vmatprep.subr.bf16.mxu0 %v10319_v28  ;;  %6075 = vmatprep.subr.bf16.mxu1 %v10322_v30  ;;  %v10404_v28 = vld [vmem:[%s11125_s11 + $0x1308] ss:$16 sps:$4 sm:$0xff]   ;;  %v10409_v30 = vld [vmem:[%s11125_s11 + $0x1324] ss:$16 sps:$4 sm:$0xff]  }
 0x23c   : > { %5543 = vmatpush1.bf16.msra.mxu0 %v10317_v31  ;;  %6076 = vmatpush1.bf16.msra.mxu1 %v10320_v32  ;;  %v10412_v31 = vld [vmem:[%s11125_s11 + $0x132c] ss:$16 sps:$4 sm:$0xff]   ;;  %v10407_v32 = vld [vmem:[%s11125_s11 + $0x1320] ss:$16 sps:$4 sm:$0xff]  }
 0x23d   : > { %5544 = vmatprep.subr.bf16.mxu0 %v10325_v33  ;;  %6077 = vmatprep.subr.bf16.mxu1 %v10328_v22  ;;  %v10410_v33 = vld [vmem:[%s11125_s11 + $0x1328] ss:$16 sps:$4 sm:$0xff]   ;;  %v10415_v22 = vld [vmem:[%s11125_s11 + $0x1344] ss:$16 sps:$4 sm:$0xff]  }
 0x240   : > { %5545 = vmatpush1.bf16.msra.mxu0 %v10323_v34  ;;  %6078 = vmatpush1.bf16.msra.mxu1 %v10326_v19  ;;  %v10418_v34 = vld [vmem:[%s11125_s11 + $0x134c] ss:$16 sps:$4 sm:$0xff]   ;;  %v10413_v19 = vld [vmem:[%s11125_s11 + $0x1340] ss:$16 sps:$4 sm:$0xff]  }
 0x241   : > { %5546 = vmatprep.subr.bf16.mxu0 %v10331_v37  ;;  %6079 = vmatprep.subr.bf16.mxu1 %v10334_v38  ;;  %v10416_v37 = vld [vmem:[%s11125_s11 + $0x1348] ss:$16 sps:$4 sm:$0xff]   ;;  %v10421_v38 = vld [vmem:[%s11125_s11 + $0x1364] ss:$16 sps:$4 sm:$0xff]  }
 0x244   : > { %5547 = vmatpush1.bf16.msra.mxu0 %v10329_v25  ;;  %6080 = vmatpush1.bf16.msra.mxu1 %v10332_v40  ;;  %v10424_v25 = vld [vmem:[%s11125_s11 + $0x136c] ss:$16 sps:$4 sm:$0xff]   ;;  %v10419_v40 = vld [vmem:[%s11125_s11 + $0x1360] ss:$16 sps:$4 sm:$0xff]  }
 0x245   : > { %5548 = vmatprep.subr.bf16.mxu0 %v10337_v41  ;;  %6081 = vmatprep.subr.bf16.mxu1 %v10340_v43  ;;  %v10422_v41 = vld [vmem:[%s11125_s11 + $0x1368] ss:$16 sps:$4 sm:$0xff]   ;;  %v10427_v43 = vld [vmem:[%s11125_s11 + $0x1384] ss:$16 sps:$4 sm:$0xff]  }
 0x248   : > { %5549 = vmatpush1.bf16.msra.mxu0 %v10335_v44  ;;  %6082 = vmatpush1.bf16.msra.mxu1 %v10338_v29  ;;  %v10430_v44 = vld [vmem:[%s11125_s11 + $0x138c] ss:$16 sps:$4 sm:$0xff]   ;;  %v10425_v29 = vld [vmem:[%s11125_s11 + $0x1380] ss:$16 sps:$4 sm:$0xff]  }
 0x249   : > { %5550 = vmatprep.subr.bf16.mxu0 %v10343_v45  ;;  %6083 = vmatprep.subr.bf16.mxu1 %v10346_v36  ;;  %v10428_v45 = vld [vmem:[%s11125_s11 + $0x1388] ss:$16 sps:$4 sm:$0xff]   ;;  %v10433_v36 = vld [vmem:[%s11125_s11 + $0x13a4] ss:$16 sps:$4 sm:$0xff]  }
 0x24c   : > { %5551 = vmatpush1.bf16.msra.mxu0 %v10341_v48  ;;  %6084 = vmatpush1.bf16.msra.mxu1 %v10344_v50  ;;  %v10436_v48 = vld [vmem:[%s11125_s11 + $0x13ac] ss:$16 sps:$4 sm:$0xff]   ;;  %v10431_v50 = vld [vmem:[%s11125_s11 + $0x13a0] ss:$16 sps:$4 sm:$0xff]  }
 0x24d   : > { %5552 = vmatprep.subr.bf16.mxu0 %v10349_v35  ;;  %6085 = vmatprep.subr.bf16.mxu1 %v10352_v52  ;;  %v10434_v35 = vld [vmem:[%s11125_s11 + $0x13a8] ss:$16 sps:$4 sm:$0xff]   ;;  %v10439_v52 = vld [vmem:[%s11125_s11 + $0x13c4] ss:$16 sps:$4 sm:$0xff]  }
 0x250   : > { %5553 = vmatpush1.bf16.msra.mxu0 %v10347_v54  ;;  %6086 = vmatpush1.bf16.msra.mxu1 %v10350_v55  ;;  %v10437_v54 = vld [vmem:[%s11125_s11 + $0x13c0] ss:$16 sps:$4 sm:$0xff]   ;;  %v10440_v55 = vld [vmem:[%s11125_s11 + $0x13c8] ss:$16 sps:$4 sm:$0xff]  }
 0x251   : > { %5563 = vmatprep.subr.bf16.mxu0 %v10355_v39  ;;  %6096 = vmatprep.subr.bf16.mxu1 %v10358_v56  ;;  %v10445_v39 = vld [vmem:[%s11125_s11 + $0x13e4] ss:$16 sps:$4 sm:$0xff]   ;;  %v10448_v56 = vld [vmem:[%s11125_s11 + $0x13ec] ss:$16 sps:$4 sm:$0xff]  }
 0x253   : > { %5555 = vmatmul.mubr.bf16.vlgmr.msra.gmra.mrb[0].mxu0 %v11724_v51  ;;  %6088 = vmatmul.mubr.bf16.vlgmr.msra.gmra.mrb[0].mxu1 %v11724_v51  ;;  %v10368_v51 = vld [vmem:[%s11125_s11 + $0x1248] ss:$16 sps:$4 sm:$0xff]  }
 0x254   : > { %5564 = vmatpush1.bf16.msra.mxu0 %v10353_v58  ;;  %6097 = vmatpush1.bf16.msra.mxu1 %v10356_v47  ;;  %v11864_v58 = vld [vmem:[%s11177_s15 + $0x28] sm:$0xff]  ;;  %v10443_v47 = vld [vmem:[%s11125_s11 + $0x13e0] ss:$16 sps:$4 sm:$0xff]  }
 0x255   : > { %5565 = vmatprep.subr.bf16.mxu0 %v10361_v59  ;;  %6098 = vmatprep.subr.bf16.mxu1 %v10364_v60  ;;  %v10446_v59 = vld [vmem:[%s11125_s11 + $0x13e8] ss:$16 sps:$4 sm:$0xff]   ;;  %v10452_v60 = vld [vmem:[%s11125_s11 + $0x1404] ss:$16 sps:$4 sm:$0xff]  }
 0x256   : > { %5595 = vmatprep.mubr.bf16.mxu0 %v1221_v46  ;;  %6128 = vmatprep.mubr.bf16.mxu1 %v1221_v46  ;;  %v10455_v46 = vld [vmem:[%s11125_s11 + $0x140c] ss:$16 sps:$4 sm:$0xff]  }
 0x258   : > { %5566 = vmatpush1.bf16.msra.mxu0 %v10359_v61  ;;  %6099 = vmatpush1.bf16.msra.mxu1 %v10362_v62  ;;  %v11872_v61 = vrot.slane %v11864_v58, %v11180_v49  ;;  %v10450_v62 = vld [vmem:[%s11125_s11 + $0x1400] ss:$16 sps:$4 sm:$0xff]  }
 0x259   : > { %5567 = vmatprep.subr.bf16.mxu0 %v10367_v63  ;;  %6100 = vmatprep.subr.bf16.mxu1 %v10370_v0  ;;  %v10453_v63 = vld [vmem:[%s11125_s11 + $0x1408] ss:$16 sps:$4 sm:$0xff]   ;;  %v10458_v0 = vld [vmem:[%s11125_s11 + $0x1424] ss:$16 sps:$4 sm:$0xff]  }
 0x25c   : > { %5568 = vmatpush1.bf16.msra.mxu0 %v10365_v1  ;;  %6101 = vmatpush1.bf16.msra.mxu1 %v10368_v51  ;;  %v10461_v1 = vld [vmem:[%s11125_s11 + $0x142c] ss:$16 sps:$4 sm:$0xff]   ;;  %v1237_v51 = vcombine.high %v11872_v61, %v11872_v61 }
 0x25d   : > { %5569 = vmatprep.subr.bf16.mxu0 %v10373_v2  ;;  %6102 = vmatprep.subr.bf16.mxu1 %v10376_v3  ;;  %v10456_v2 = vld [vmem:[%s11125_s11 + $0x1420] ss:$16 sps:$4 sm:$0xff]   ;;  %v10459_v3 = vld [vmem:[%s11125_s11 + $0x1428] ss:$16 sps:$4 sm:$0xff]  }
 0x260   : > { %5570 = vmatpush1.bf16.msra.mxu0 %v10371_v4  ;;  %6103 = vmatpush1.bf16.msra.mxu1 %v10374_v5  ;;  %v10464_v4 = vld [vmem:[%s11125_s11 + $0x1444] ss:$16 sps:$4 sm:$0xff]   ;;  %v10467_v5 = vld [vmem:[%s11125_s11 + $0x144c] ss:$16 sps:$4 sm:$0xff]  }
 0x261   : > { %5571 = vmatprep.subr.bf16.mxu0 %v10379_v6  ;;  %6104 = vmatprep.subr.bf16.mxu1 %v10382_v7  ;;  %v10462_v6 = vld [vmem:[%s11125_s11 + $0x1440] ss:$16 sps:$4 sm:$0xff]   ;;  %v10470_v7 = vld [vmem:[%s11125_s11 + $0x1464] ss:$16 sps:$4 sm:$0xff]  }
 0x264   : > { %5572 = vmatpush1.bf16.msra.mxu0 %v10377_v8  ;;  %6105 = vmatpush1.bf16.msra.mxu1 %v10380_v9  ;;  %v10473_v8 = vld [vmem:[%s11125_s11 + $0x146c] ss:$16 sps:$4 sm:$0xff]   ;;  %v10468_v9 = vld [vmem:[%s11125_s11 + $0x1460] ss:$16 sps:$4 sm:$0xff]  }
 0x265   : > { %5573 = vmatprep.subr.bf16.mxu0 %v10385_v10  ;;  %6106 = vmatprep.subr.bf16.mxu1 %v10388_v11  ;;  %v10471_v10 = vld [vmem:[%s11125_s11 + $0x1468] ss:$16 sps:$4 sm:$0xff]   ;;  %v10476_v11 = vld [vmem:[%s11125_s11 + $0x1484] ss:$16 sps:$4 sm:$0xff]  }
 0x268   : > { %5574 = vmatpush1.bf16.msra.mxu0 %v10383_v13  ;;  %6107 = vmatpush1.bf16.msra.mxu1 %v10386_v14  ;;  %v10479_v13 = vld [vmem:[%s11125_s11 + $0x148c] ss:$16 sps:$4 sm:$0xff]   ;;  %v10474_v14 = vld [vmem:[%s11125_s11 + $0x1480] ss:$16 sps:$4 sm:$0xff]  }
 0x269   : > { %5575 = vmatprep.subr.bf16.mxu0 %v10391_v15  ;;  %6108 = vmatprep.subr.bf16.mxu1 %v10394_v16  ;;  %v10477_v15 = vld [vmem:[%s11125_s11 + $0x1488] ss:$16 sps:$4 sm:$0xff]   ;;  %v10482_v16 = vld [vmem:[%s11125_s11 + $0x14a4] ss:$16 sps:$4 sm:$0xff]  }
 0x26c   : > { %5576 = vmatpush1.bf16.msra.mxu0 %v10389_v17  ;;  %6109 = vmatpush1.bf16.msra.mxu1 %v10392_v18  ;;  %v10485_v17 = vld [vmem:[%s11125_s11 + $0x14ac] ss:$16 sps:$4 sm:$0xff]   ;;  %v10480_v18 = vld [vmem:[%s11125_s11 + $0x14a0] ss:$16 sps:$4 sm:$0xff]  }
 0x26d   : > { %5577 = vmatprep.subr.bf16.mxu0 %v10397_v20  ;;  %6110 = vmatprep.subr.bf16.mxu1 %v10400_v21  ;;  %v10483_v20 = vld [vmem:[%s11125_s11 + $0x14a8] ss:$16 sps:$4 sm:$0xff]   ;;  %v10488_v21 = vld [vmem:[%s11125_s11 + $0x14c4] ss:$16 sps:$4 sm:$0xff]  }
 0x270   : > { %5578 = vmatpush1.bf16.msra.mxu0 %v10395_v23  ;;  %6111 = vmatpush1.bf16.msra.mxu1 %v10398_v24  ;;  %v10491_v23 = vld [vmem:[%s11125_s11 + $0x14cc] ss:$16 sps:$4 sm:$0xff]   ;;  %v10486_v24 = vld [vmem:[%s11125_s11 + $0x14c0] ss:$16 sps:$4 sm:$0xff]  }
 0x271   : > { %5579 = vmatprep.subr.bf16.mxu0 %v10403_v26  ;;  %6112 = vmatprep.subr.bf16.mxu1 %v10406_v27  ;;  %v10489_v26 = vld [vmem:[%s11125_s11 + $0x14c8] ss:$16 sps:$4 sm:$0xff]   ;;  %v10494_v27 = vld [vmem:[%s11125_s11 + $0x14e4] ss:$16 sps:$4 sm:$0xff]  }
 0x274   : > { %5580 = vmatpush1.bf16.msra.mxu0 %v10401_v12  ;;  %6113 = vmatpush1.bf16.msra.mxu1 %v10404_v28  ;;  %v10497_v12 = vld [vmem:[%s11125_s11 + $0x14ec] ss:$16 sps:$4 sm:$0xff]   ;;  %v10492_v28 = vld [vmem:[%s11125_s11 + $0x14e0] ss:$16 sps:$4 sm:$0xff]  }
 0x275   : > { %5581 = vmatprep.subr.bf16.mxu0 %v10409_v30  ;;  %6114 = vmatprep.subr.bf16.mxu1 %v10412_v31  ;;  %v10495_v30 = vld [vmem:[%s11125_s11 + $0x14e8] ss:$16 sps:$4 sm:$0xff]   ;;  %v10500_v31 = vld [vmem:[%s11125_s11 + $0x1504] ss:$16 sps:$4 sm:$0xff]  }
 0x278   : > { %5582 = vmatpush1.bf16.msra.mxu0 %v10407_v32  ;;  %6115 = vmatpush1.bf16.msra.mxu1 %v10410_v33  ;;  %v10503_v32 = vld [vmem:[%s11125_s11 + $0x150c] ss:$16 sps:$4 sm:$0xff]   ;;  %v10498_v33 = vld [vmem:[%s11125_s11 + $0x1500] ss:$16 sps:$4 sm:$0xff]  }
 0x279   : > { %5583 = vmatprep.subr.bf16.mxu0 %v10415_v22  ;;  %6116 = vmatprep.subr.bf16.mxu1 %v10418_v34  ;;  %v10501_v22 = vld [vmem:[%s11125_s11 + $0x1508] ss:$16 sps:$4 sm:$0xff]   ;;  %v10506_v34 = vld [vmem:[%s11125_s11 + $0x1524] ss:$16 sps:$4 sm:$0xff]  }
 0x27c   : > { %5584 = vmatpush1.bf16.msra.mxu0 %v10413_v19  ;;  %6117 = vmatpush1.bf16.msra.mxu1 %v10416_v37  ;;  %v10509_v19 = vld [vmem:[%s11125_s11 + $0x152c] ss:$16 sps:$4 sm:$0xff]   ;;  %v10504_v37 = vld [vmem:[%s11125_s11 + $0x1520] ss:$16 sps:$4 sm:$0xff]  }
 0x27d   : > { %5585 = vmatprep.subr.bf16.mxu0 %v10421_v38  ;;  %6118 = vmatprep.subr.bf16.mxu1 %v10424_v25  ;;  %v10507_v38 = vld [vmem:[%s11125_s11 + $0x1528] ss:$16 sps:$4 sm:$0xff]   ;;  %v10512_v25 = vld [vmem:[%s11125_s11 + $0x1544] ss:$16 sps:$4 sm:$0xff]  }
 0x280   : > { %5586 = vmatpush1.bf16.msra.mxu0 %v10419_v40  ;;  %6119 = vmatpush1.bf16.msra.mxu1 %v10422_v41  ;;  %v10515_v40 = vld [vmem:[%s11125_s11 + $0x154c] ss:$16 sps:$4 sm:$0xff]   ;;  %v10510_v41 = vld [vmem:[%s11125_s11 + $0x1540] ss:$16 sps:$4 sm:$0xff]  }
 0x281   : > { %5587 = vmatprep.subr.bf16.mxu0 %v10427_v43  ;;  %6120 = vmatprep.subr.bf16.mxu1 %v10430_v44  ;;  %v10513_v43 = vld [vmem:[%s11125_s11 + $0x1548] ss:$16 sps:$4 sm:$0xff]   ;;  %v10518_v44 = vld [vmem:[%s11125_s11 + $0x1564] ss:$16 sps:$4 sm:$0xff]  }
 0x284   : > { %5588 = vmatpush1.bf16.msra.mxu0 %v10425_v29  ;;  %6121 = vmatpush1.bf16.msra.mxu1 %v10428_v45  ;;  %v10521_v29 = vld [vmem:[%s11125_s11 + $0x156c] ss:$16 sps:$4 sm:$0xff]   ;;  %v10516_v45 = vld [vmem:[%s11125_s11 + $0x1560] ss:$16 sps:$4 sm:$0xff]  }
 0x285   : > { %5589 = vmatprep.subr.bf16.mxu0 %v10433_v36  ;;  %6122 = vmatprep.subr.bf16.mxu1 %v10436_v48  ;;  %v10519_v36 = vld [vmem:[%s11125_s11 + $0x1568] ss:$16 sps:$4 sm:$0xff]   ;;  %v10524_v48 = vld [vmem:[%s11125_s11 + $0x1584] ss:$16 sps:$4 sm:$0xff]  }
 0x288   : > { %5590 = vmatpush1.bf16.msra.mxu0 %v10431_v50  ;;  %6123 = vmatpush1.bf16.msra.mxu1 %v10434_v35  ;;  %v10527_v50 = vld [vmem:[%s11125_s11 + $0x158c] ss:$16 sps:$4 sm:$0xff]   ;;  %v10522_v35 = vld [vmem:[%s11125_s11 + $0x1580] ss:$16 sps:$4 sm:$0xff]  }
 0x289   : > { %5591 = vmatprep.subr.bf16.mxu0 %v10439_v52  ;;  %6124 = vmatprep.subr.bf16.mxu1 %v10442_v53  ;;  %v10525_v52 = vld [vmem:[%s11125_s11 + $0x1588] ss:$16 sps:$4 sm:$0xff]   ;;  %v10530_v53 = vld [vmem:[%s11125_s11 + $0x15a4] ss:$16 sps:$4 sm:$0xff]  }
 0x28c   : > { %5592 = vmatpush1.bf16.msra.mxu0 %v10437_v54  ;;  %6125 = vmatpush1.bf16.msra.mxu1 %v10440_v55  ;;  %v10533_v54 = vld [vmem:[%s11125_s11 + $0x15ac] ss:$16 sps:$4 sm:$0xff]   ;;  %v10528_v55 = vld [vmem:[%s11125_s11 + $0x15a0] ss:$16 sps:$4 sm:$0xff]  }
 0x28d   : > { %5593 = vmatprep.subr.bf16.mxu0 %v10445_v39  ;;  %6126 = vmatprep.subr.bf16.mxu1 %v10448_v56  ;;  %v10531_v39 = vld [vmem:[%s11125_s11 + $0x15a8] ss:$16 sps:$4 sm:$0xff]   ;;  %v10536_v56 = vld [vmem:[%s11125_s11 + $0x15c4] ss:$16 sps:$4 sm:$0xff]  }
 0x290   : > { %5594 = vmatpush1.bf16.msra.mxu0 %v10443_v47  ;;  %6127 = vmatpush1.bf16.msra.mxu1 %v10446_v59  ;;  %v10539_v47 = vld [vmem:[%s11125_s11 + $0x15cc] ss:$16 sps:$4 sm:$0xff]   ;;  %v10534_v59 = vld [vmem:[%s11125_s11 + $0x15c0] ss:$16 sps:$4 sm:$0xff]  }
 0x291   : > { %5604 = vmatprep.subr.bf16.mxu0 %v10452_v60  ;;  %6137 = vmatprep.subr.bf16.mxu1 %v10455_v46  ;;  %v10537_v60 = vld [vmem:[%s11125_s11 + $0x15c8] ss:$16 sps:$4 sm:$0xff]   ;;  %v10542_v46 = vld [vmem:[%s11125_s11 + $0x15e4] ss:$16 sps:$4 sm:$0xff]  }
 0x293   : > { %5596 = vmatmul.mubr.bf16.vlgmr.msra.gmra.mrb[0].mxu0 %v11797_v57  ;;  %6129 = vmatmul.mubr.bf16.vlgmr.msra.gmra.mrb[0].mxu1 %v11797_v57  ;;  %v10465_v57 = vld [vmem:[%s11125_s11 + $0x1448] ss:$16 sps:$4 sm:$0xff]  }
 0x294   : > { %5605 = vmatpush1.bf16.msra.mxu0 %v10450_v62  ;;  %6138 = vmatpush1.bf16.msra.mxu1 %v10453_v63  ;;  %v10545_v62 = vld [vmem:[%s11125_s11 + $0x15ec] ss:$16 sps:$4 sm:$0xff]   ;;  %v1222_v63 = vcombine.high %v11864_v58, %v11864_v58  ;;  %v10549_v58 = vld [vmem:[%s11125_s11 + $0x1608] ss:$16 sps:$4 sm:$0xff]  }
 0x295   : > { %5606 = vmatprep.subr.bf16.mxu0 %v10458_v0  ;;  %6139 = vmatprep.subr.bf16.mxu1 %v10461_v1  ;;  %v10540_v0 = vld [vmem:[%s11125_s11 + $0x15e0] ss:$16 sps:$4 sm:$0xff]   ;;  %v10543_v1 = vld [vmem:[%s11125_s11 + $0x15e8] ss:$16 sps:$4 sm:$0xff]  }
 0x296   : > { %5636 = vmatprep.mubr.bf16.mxu0 %v1237_v51  ;;  %6169 = vmatprep.mubr.bf16.mxu1 %v1237_v51  ;;  %v10548_v51 = vld [vmem:[%s11125_s11 + $0x1604] ss:$16 sps:$4 sm:$0xff]  }
 0x298   : > { %5607 = vmatpush1.bf16.msra.mxu0 %v10456_v2  ;;  %6140 = vmatpush1.bf16.msra.mxu1 %v10459_v3  ;;  %v10551_v2 = vld [vmem:[%s11125_s11 + $0x160c] ss:$16 sps:$4 sm:$0xff]   ;;  %v11945_v3 = vrot.slane %v1222_v63, %v11180_v49  ;;  %v10552_v49 = vld [vmem:[%s11125_s11 + $0x1620] ss:$16 sps:$4 sm:$0xff]  }
 0x299   : > { %5608 = vmatprep.subr.bf16.mxu0 %v10464_v4  ;;  %6141 = vmatprep.subr.bf16.mxu1 %v10467_v5  ;;  %v10546_v4 = vld [vmem:[%s11125_s11 + $0x1600] ss:$16 sps:$4 sm:$0xff]   ;;  %v10554_v5 = vld [vmem:[%s11125_s11 + $0x1624] ss:$16 sps:$4 sm:$0xff]  }
 0x29a   : > { %v10630_v63 = vld [vmem:[%s11125_s11 + $0x17c0] ss:$16 sps:$4 sm:$0xff]  }
 0x29c   : > { %5609 = vmatpush1.bf16.msra.mxu0 %v10462_v6  ;;  %6142 = vmatpush1.bf16.msra.mxu1 %v10465_v57  ;;  %v10557_v6 = vld [vmem:[%s11125_s11 + $0x162c] ss:$16 sps:$4 sm:$0xff]   ;;  %v1238_v57 = vcombine.high %v11945_v3, %v11945_v3 }
 0x29d   : > { %5610 = vmatprep.subr.bf16.mxu0 %v10470_v7  ;;  %6143 = vmatprep.subr.bf16.mxu1 %v10473_v8  ;;  %v10555_v7 = vld [vmem:[%s11125_s11 + $0x1628] ss:$16 sps:$4 sm:$0xff]   ;;  %v10560_v8 = vld [vmem:[%s11125_s11 + $0x1644] ss:$16 sps:$4 sm:$0xff]  }
 0x2a0   : > { %5611 = vmatpush1.bf16.msra.mxu0 %v10468_v9  ;;  %6144 = vmatpush1.bf16.msra.mxu1 %v10471_v10  ;;  %v10563_v9 = vld [vmem:[%s11125_s11 + $0x164c] ss:$16 sps:$4 sm:$0xff]   ;;  %v10558_v10 = vld [vmem:[%s11125_s11 + $0x1640] ss:$16 sps:$4 sm:$0xff]  }
 0x2a1   : > { %5612 = vmatprep.subr.bf16.mxu0 %v10476_v11  ;;  %6145 = vmatprep.subr.bf16.mxu1 %v10479_v13  ;;  %v10566_v11 = vld [vmem:[%s11125_s11 + $0x1664] ss:$16 sps:$4 sm:$0xff]   ;;  %v10569_v13 = vld [vmem:[%s11125_s11 + $0x166c] ss:$16 sps:$4 sm:$0xff]  }
 0x2a4   : > { %5613 = vmatpush1.bf16.msra.mxu0 %v10474_v14  ;;  %6146 = vmatpush1.bf16.msra.mxu1 %v10477_v15  ;;  %v10564_v14 = vld [vmem:[%s11125_s11 + $0x1660] ss:$16 sps:$4 sm:$0xff]   ;;  %v10567_v15 = vld [vmem:[%s11125_s11 + $0x1668] ss:$16 sps:$4 sm:$0xff]  }
 0x2a5   : > { %5614 = vmatprep.subr.bf16.mxu0 %v10482_v16  ;;  %6147 = vmatprep.subr.bf16.mxu1 %v10485_v17  ;;  %v10572_v16 = vld [vmem:[%s11125_s11 + $0x1684] ss:$16 sps:$4 sm:$0xff]   ;;  %v10575_v17 = vld [vmem:[%s11125_s11 + $0x168c] ss:$16 sps:$4 sm:$0xff]  }
 0x2a8   : > { %5615 = vmatpush1.bf16.msra.mxu0 %v10480_v18  ;;  %6148 = vmatpush1.bf16.msra.mxu1 %v10483_v20  ;;  %v10570_v18 = vld [vmem:[%s11125_s11 + $0x1680] ss:$16 sps:$4 sm:$0xff]   ;;  %v10573_v20 = vld [vmem:[%s11125_s11 + $0x1688] ss:$16 sps:$4 sm:$0xff]  }
 0x2a9   : > { %5616 = vmatprep.subr.bf16.mxu0 %v10488_v21  ;;  %6149 = vmatprep.subr.bf16.mxu1 %v10491_v23  ;;  %v10578_v21 = vld [vmem:[%s11125_s11 + $0x16a4] ss:$16 sps:$4 sm:$0xff]   ;;  %v10581_v23 = vld [vmem:[%s11125_s11 + $0x16ac] ss:$16 sps:$4 sm:$0xff]  }
 0x2ac   : > { %5617 = vmatpush1.bf16.msra.mxu0 %v10486_v24  ;;  %6150 = vmatpush1.bf16.msra.mxu1 %v10489_v26  ;;  %v10576_v24 = vld [vmem:[%s11125_s11 + $0x16a0] ss:$16 sps:$4 sm:$0xff]   ;;  %v10579_v26 = vld [vmem:[%s11125_s11 + $0x16a8] ss:$16 sps:$4 sm:$0xff]  }
 0x2ad   : > { %5618 = vmatprep.subr.bf16.mxu0 %v10494_v27  ;;  %6151 = vmatprep.subr.bf16.mxu1 %v10497_v12  ;;  %v10584_v27 = vld [vmem:[%s11125_s11 + $0x16c4] ss:$16 sps:$4 sm:$0xff]   ;;  %v10587_v12 = vld [vmem:[%s11125_s11 + $0x16cc] ss:$16 sps:$4 sm:$0xff]  }
 0x2b0   : > { %5619 = vmatpush1.bf16.msra.mxu0 %v10492_v28  ;;  %6152 = vmatpush1.bf16.msra.mxu1 %v10495_v30  ;;  %v10582_v28 = vld [vmem:[%s11125_s11 + $0x16c0] ss:$16 sps:$4 sm:$0xff]   ;;  %v10585_v30 = vld [vmem:[%s11125_s11 + $0x16c8] ss:$16 sps:$4 sm:$0xff]  }
 0x2b1   : > { %5620 = vmatprep.subr.bf16.mxu0 %v10500_v31  ;;  %6153 = vmatprep.subr.bf16.mxu1 %v10503_v32  ;;  %v10590_v31 = vld [vmem:[%s11125_s11 + $0x16e4] ss:$16 sps:$4 sm:$0xff]   ;;  %v10593_v32 = vld [vmem:[%s11125_s11 + $0x16ec] ss:$16 sps:$4 sm:$0xff]  }
 0x2b4   : > { %5621 = vmatpush1.bf16.msra.mxu0 %v10498_v33  ;;  %6154 = vmatpush1.bf16.msra.mxu1 %v10501_v22  ;;  %v10588_v33 = vld [vmem:[%s11125_s11 + $0x16e0] ss:$16 sps:$4 sm:$0xff]   ;;  %v10591_v22 = vld [vmem:[%s11125_s11 + $0x16e8] ss:$16 sps:$4 sm:$0xff]  }
 0x2b5   : > { %5622 = vmatprep.subr.bf16.mxu0 %v10506_v34  ;;  %6155 = vmatprep.subr.bf16.mxu1 %v10509_v19  ;;  %v10596_v34 = vld [vmem:[%s11125_s11 + $0x1704] ss:$16 sps:$4 sm:$0xff]   ;;  %v10599_v19 = vld [vmem:[%s11125_s11 + $0x170c] ss:$16 sps:$4 sm:$0xff]  }
 0x2b8   : > { %5623 = vmatpush1.bf16.msra.mxu0 %v10504_v37  ;;  %6156 = vmatpush1.bf16.msra.mxu1 %v10507_v38  ;;  %v10594_v37 = vld [vmem:[%s11125_s11 + $0x1700] ss:$16 sps:$4 sm:$0xff]   ;;  %v10597_v38 = vld [vmem:[%s11125_s11 + $0x1708] ss:$16 sps:$4 sm:$0xff]  }
 0x2b9   : > { %5624 = vmatprep.subr.bf16.mxu0 %v10512_v25  ;;  %6157 = vmatprep.subr.bf16.mxu1 %v10515_v40  ;;  %v10602_v25 = vld [vmem:[%s11125_s11 + $0x1724] ss:$16 sps:$4 sm:$0xff]   ;;  %v10605_v40 = vld [vmem:[%s11125_s11 + $0x172c] ss:$16 sps:$4 sm:$0xff]  }
 0x2bc   : > { %5625 = vmatpush1.bf16.msra.mxu0 %v10510_v41  ;;  %6158 = vmatpush1.bf16.msra.mxu1 %v10513_v43  ;;  %v10600_v41 = vld [vmem:[%s11125_s11 + $0x1720] ss:$16 sps:$4 sm:$0xff]   ;;  %v10603_v43 = vld [vmem:[%s11125_s11 + $0x1728] ss:$16 sps:$4 sm:$0xff]  }
 0x2bd   : > { %5626 = vmatprep.subr.bf16.mxu0 %v10518_v44  ;;  %6159 = vmatprep.subr.bf16.mxu1 %v10521_v29  ;;  %v10608_v44 = vld [vmem:[%s11125_s11 + $0x1744] ss:$16 sps:$4 sm:$0xff]   ;;  %v10611_v29 = vld [vmem:[%s11125_s11 + $0x174c] ss:$16 sps:$4 sm:$0xff]  }
 0x2c0   : > { %5627 = vmatpush1.bf16.msra.mxu0 %v10516_v45  ;;  %6160 = vmatpush1.bf16.msra.mxu1 %v10519_v36  ;;  %v10606_v45 = vld [vmem:[%s11125_s11 + $0x1740] ss:$16 sps:$4 sm:$0xff]   ;;  %v10609_v36 = vld [vmem:[%s11125_s11 + $0x1748] ss:$16 sps:$4 sm:$0xff]  }
 0x2c1   : > { %5628 = vmatprep.subr.bf16.mxu0 %v10524_v48  ;;  %6161 = vmatprep.subr.bf16.mxu1 %v10527_v50  ;;  %v10614_v48 = vld [vmem:[%s11125_s11 + $0x1764] ss:$16 sps:$4 sm:$0xff]   ;;  %v10617_v50 = vld [vmem:[%s11125_s11 + $0x176c] ss:$16 sps:$4 sm:$0xff]  }
 0x2c4   : > { %5629 = vmatpush1.bf16.msra.mxu0 %v10522_v35  ;;  %6162 = vmatpush1.bf16.msra.mxu1 %v10525_v52  ;;  %v10612_v35 = vld [vmem:[%s11125_s11 + $0x1760] ss:$16 sps:$4 sm:$0xff]   ;;  %v10615_v52 = vld [vmem:[%s11125_s11 + $0x1768] ss:$16 sps:$4 sm:$0xff]  }
 0x2c5   : > { %5630 = vmatprep.subr.bf16.mxu0 %v10530_v53  ;;  %6163 = vmatprep.subr.bf16.mxu1 %v10533_v54  ;;  %v10620_v53 = vld [vmem:[%s11125_s11 + $0x1784] ss:$16 sps:$4 sm:$0xff]   ;;  %v10623_v54 = vld [vmem:[%s11125_s11 + $0x178c] ss:$16 sps:$4 sm:$0xff]  }
 0x2c8   : > { %5631 = vmatpush1.bf16.msra.mxu0 %v10528_v55  ;;  %6164 = vmatpush1.bf16.msra.mxu1 %v10531_v39  ;;  %v10618_v55 = vld [vmem:[%s11125_s11 + $0x1780] ss:$16 sps:$4 sm:$0xff]   ;;  %v10621_v39 = vld [vmem:[%s11125_s11 + $0x1788] ss:$16 sps:$4 sm:$0xff]  }
 0x2c9   : > { %5632 = vmatprep.subr.bf16.mxu0 %v10536_v56  ;;  %6165 = vmatprep.subr.bf16.mxu1 %v10539_v47  ;;  %v10626_v56 = vld [vmem:[%s11125_s11 + $0x17a4] ss:$16 sps:$4 sm:$0xff]   ;;  %v10629_v47 = vld [vmem:[%s11125_s11 + $0x17ac] ss:$16 sps:$4 sm:$0xff]  }
 0x2cc   : > { %5633 = vmatpush1.bf16.msra.mxu0 %v10534_v59  ;;  %6166 = vmatpush1.bf16.msra.mxu1 %v10537_v60  ;;  %v10624_v59 = vld [vmem:[%s11125_s11 + $0x17a0] ss:$16 sps:$4 sm:$0xff]   ;;  %v10627_v60 = vld [vmem:[%s11125_s11 + $0x17a8] ss:$16 sps:$4 sm:$0xff]  }
 0x2cd   : > { %5634 = vmatprep.subr.bf16.mxu0 %v10542_v46  ;;  %6167 = vmatprep.subr.bf16.mxu1 %v10545_v62  ;;  %v10632_v46 = vld [vmem:[%s11125_s11 + $0x17c4] ss:$16 sps:$4 sm:$0xff]   ;;  %v10635_v62 = vld [vmem:[%s11125_s11 + $0x17cc] ss:$16 sps:$4 sm:$0xff]  }
 0x2d0   : > { %5635 = vmatpush1.bf16.msra.mxu0 %v10540_v0  ;;  %6168 = vmatpush1.bf16.msra.mxu1 %v10543_v1  ;;  %v10633_v0 = vld [vmem:[%s11125_s11 + $0x17c8] ss:$16 sps:$4 sm:$0xff]   ;;  %v10638_v1 = vld [vmem:[%s11125_s11 + $0x17e4] ss:$16 sps:$4 sm:$0xff]  }
 0x2d1   : > { %5645 = vmatprep.subr.bf16.mxu0 %v10548_v51  ;;  %6178 = vmatprep.subr.bf16.mxu1 %v10551_v2  ;;  %v10641_v51 = vld [vmem:[%s11125_s11 + $0x17ec] ss:$16 sps:$4 sm:$0xff]   ;;  %v10636_v2 = vld [vmem:[%s11125_s11 + $0x17e0] ss:$16 sps:$4 sm:$0xff]  }
 0x2d3   : > { %5637 = vmatmul.mubr.bf16.vlgmr.msra.gmra.mrb[0].mxu0 %v11872_v61  ;;  %6170 = vmatmul.mubr.bf16.vlgmr.msra.gmra.mrb[0].mxu1 %v11872_v61  ;;  %v10561_v61 = vld [vmem:[%s11125_s11 + $0x1648] ss:$16 sps:$4 sm:$0xff]  }
 0x2d4   : > { %5646 = vmatpush1.bf16.msra.mxu0 %v10546_v4  ;;  %6179 = vmatpush1.bf16.msra.mxu1 %v10549_v58  ;;  %v10639_v4 = vld [vmem:[%s11125_s11 + $0x17e8] ss:$16 sps:$4 sm:$0xff]   ;;  %v10645_v58 = vld [vmem:[%s11125_s11 + $0x1804] ss:$16 sps:$4 sm:$0xff]  }
 0x2d5   : > { %5647 = vmatprep.subr.bf16.mxu0 %v10554_v5  ;;  %6180 = vmatprep.subr.bf16.mxu1 %v10557_v6  ;;  %v10648_v5 = vld [vmem:[%s11125_s11 + $0x180c] ss:$16 sps:$4 sm:$0xff]   ;;  %v10643_v6 = vld [vmem:[%s11125_s11 + $0x1800] ss:$16 sps:$4 sm:$0xff]  }
 0x2d6   : > { %5677 = vmatprep.mubr.bf16.mxu0 %v1238_v57  ;;  %6210 = vmatprep.mubr.bf16.mxu1 %v1238_v57  ;;  %v10646_v57 = vld [vmem:[%s11125_s11 + $0x1808] ss:$16 sps:$4 sm:$0xff]  }
 0x2d8   : > { %5648 = vmatpush1.bf16.msra.mxu0 %v10552_v49  ;;  %6181 = vmatpush1.bf16.msra.mxu1 %v10555_v7  ;;  %v10651_v49 = vld [vmem:[%s11125_s11 + $0x1824] ss:$16 sps:$4 sm:$0xff]   ;;  %v10654_v7 = vld [vmem:[%s11125_s11 + $0x182c] ss:$16 sps:$4 sm:$0xff]  }
 0x2d9   : > { %5649 = vmatprep.subr.bf16.mxu0 %v10560_v8  ;;  %6182 = vmatprep.subr.bf16.mxu1 %v10563_v9  ;;  %v10649_v8 = vld [vmem:[%s11125_s11 + $0x1820] ss:$16 sps:$4 sm:$0xff]   ;;  %v10652_v9 = vld [vmem:[%s11125_s11 + $0x1828] ss:$16 sps:$4 sm:$0xff]  }
 0x2dc   : > { %5650 = vmatpush1.bf16.msra.mxu0 %v10558_v10  ;;  %6183 = vmatpush1.bf16.msra.mxu1 %v10561_v61  ;;  %v10657_v10 = vld [vmem:[%s11125_s11 + $0x1844] ss:$16 sps:$4 sm:$0xff]   ;;  %v10660_v61 = vld [vmem:[%s11125_s11 + $0x184c] ss:$16 sps:$4 sm:$0xff]  }
 0x2dd   : > { %5651 = vmatprep.subr.bf16.mxu0 %v10566_v11  ;;  %6184 = vmatprep.subr.bf16.mxu1 %v10569_v13  ;;  %v11060_v11 = vmov 0   ;;  %v10655_v13 = vld [vmem:[%s11125_s11 + $0x1840] ss:$16 sps:$4 sm:$0xff]  }
 0x2e0   : > { %5652 = vmatpush1.bf16.msra.mxu0 %v10564_v14  ;;  %6185 = vmatpush1.bf16.msra.mxu1 %v10567_v15  ;;  %v10663_v14 = vld [vmem:[%s11125_s11 + $0x1864] ss:$16 sps:$4 sm:$0xff]   ;;  %v10666_v15 = vld [vmem:[%s11125_s11 + $0x186c] ss:$16 sps:$4 sm:$0xff]  }
 0x2e1   : > { %5653 = vmatprep.subr.bf16.mxu0 %v10572_v16  ;;  %6186 = vmatprep.subr.bf16.mxu1 %v10575_v17  ;;  %v10661_v16 = vld [vmem:[%s11125_s11 + $0x1860] ss:$16 sps:$4 sm:$0xff]   ;;  %v10664_v17 = vld [vmem:[%s11125_s11 + $0x1868] ss:$16 sps:$4 sm:$0xff]  }
 0x2e4   : > { %5654 = vmatpush1.bf16.msra.mxu0 %v10570_v18  ;;  %6187 = vmatpush1.bf16.msra.mxu1 %v10573_v20  ;;  %v8301_v18 = vld.sshfl [vmem:[%s11177_s15 + $0x30] sm:$0x3 pattern:$0x76325410]  ;;  %v12037_v20 = vsub.s32 0, %v11167_v42 }
 0x2e5   : > { %5655 = vmatprep.subr.bf16.mxu0 %v10578_v21  ;;  %6188 = vmatprep.subr.bf16.mxu1 %v10581_v23  ;;  %v12040_v21 = vsub.s32 2, %v11167_v42  ;;  %v1108_v23 = vld [vmem:[%s310_s19] sm:$0xf] }
 0x2e8   : > { %5656 = vmatpush1.bf16.msra.mxu0 %v10576_v24  ;;  %6189 = vmatpush1.bf16.msra.mxu1 %v10579_v26  ;;  %v12043_v24 = vsub.s32 1, %v11167_v42  ;;  %v12046_v26 = vsub.s32 3, %v11167_v42 }
 0x2e9   : > { %5657 = vmatprep.subr.bf16.mxu0 %v10584_v27  ;;  %6190 = vmatprep.subr.bf16.mxu1 %v10587_v12  ;;  %v1113_v27 = vrot.slane %v1108_v23, %v12037_v20  ;;  %v1121_v12 = vrot.slane %v1108_v23, %v12040_v21 }
 0x2ec   : > { %5658 = vmatpush1.bf16.msra.mxu0 %v10582_v28  ;;  %6191 = vmatpush1.bf16.msra.mxu1 %v10585_v30  ;;  %v1117_v28 = vrot.slane %v1108_v23, %v12043_v24  ;;  %v1125_v30 = vrot.slane %v1108_v23, %v12046_v26 }
 0x2ed   : > { %5659 = vmatprep.subr.bf16.mxu0 %v10590_v31  ;;  %6192 = vmatprep.subr.bf16.mxu1 %v10593_v32 }
 0x2f0   : > { %5660 = vmatpush1.bf16.msra.mxu0 %v10588_v33  ;;  %6193 = vmatpush1.bf16.msra.mxu1 %v10591_v22 }
 0x2f1   : > { %5661 = vmatprep.subr.bf16.mxu0 %v10596_v34  ;;  %6194 = vmatprep.subr.bf16.mxu1 %v10599_v19 }
 0x2f4   : > { %5662 = vmatpush1.bf16.msra.mxu0 %v10594_v37  ;;  %6195 = vmatpush1.bf16.msra.mxu1 %v10597_v38 }
 0x2f5   : > { %5663 = vmatprep.subr.bf16.mxu0 %v10602_v25  ;;  %6196 = vmatprep.subr.bf16.mxu1 %v10605_v40 }
 0x2f8   : > { %5664 = vmatpush1.bf16.msra.mxu0 %v10600_v41  ;;  %6197 = vmatpush1.bf16.msra.mxu1 %v10603_v43 }
 0x2f9   : > { %5665 = vmatprep.subr.bf16.mxu0 %v10608_v44  ;;  %6198 = vmatprep.subr.bf16.mxu1 %v10611_v29 }
 0x2fc   : > { %5666 = vmatpush1.bf16.msra.mxu0 %v10606_v45  ;;  %6199 = vmatpush1.bf16.msra.mxu1 %v10609_v36 }
 0x2fd   : > { %5667 = vmatprep.subr.bf16.mxu0 %v10614_v48  ;;  %6200 = vmatprep.subr.bf16.mxu1 %v10617_v50 }
 0x300   : > { %5668 = vmatpush1.bf16.msra.mxu0 %v10612_v35  ;;  %6201 = vmatpush1.bf16.msra.mxu1 %v10615_v52 }
 0x301   : > { %5669 = vmatprep.subr.bf16.mxu0 %v10620_v53  ;;  %6202 = vmatprep.subr.bf16.mxu1 %v10623_v54 }
 0x304   : > { %5670 = vmatpush1.bf16.msra.mxu0 %v10618_v55  ;;  %6203 = vmatpush1.bf16.msra.mxu1 %v10621_v39 }
 0x305   : > { %5671 = vmatprep.subr.bf16.mxu0 %v10626_v56  ;;  %6204 = vmatprep.subr.bf16.mxu1 %v10629_v47 }
 0x308   : > { %5672 = vmatpush1.bf16.msra.mxu0 %v10624_v59  ;;  %6205 = vmatpush1.bf16.msra.mxu1 %v10627_v60 }
 0x309   : > { %5673 = vmatprep.subr.bf16.mxu0 %v10632_v46  ;;  %6206 = vmatprep.subr.bf16.mxu1 %v10635_v62 }
 0x30c   : > { %5674 = vmatpush1.bf16.msra.mxu0 %v10630_v63  ;;  %6207 = vmatpush1.bf16.msra.mxu1 %v10633_v0 }
 0x30d   : > { %5675 = vmatprep.subr.bf16.mxu0 %v10638_v1  ;;  %6208 = vmatprep.subr.bf16.mxu1 %v10641_v51 }
 0x310   : > { %5676 = vmatpush1.bf16.msra.mxu0 %v10636_v2  ;;  %6209 = vmatpush1.bf16.msra.mxu1 %v10639_v4 }
 0x311   : > { %5686 = vmatprep.subr.bf16.mxu0 %v10645_v58  ;;  %6219 = vmatprep.subr.bf16.mxu1 %v10648_v5 }
 0x313   : > { %5678 = vmatmul.mubr.bf16.vlgmr.msra.gmra.mrb[0].mxu0 %v11945_v3  ;;  %6211 = vmatmul.mubr.bf16.vlgmr.msra.gmra.mrb[0].mxu1 %v11945_v3  ;;  %v10658_v3 = vld [vmem:[%s11125_s11 + $0x1848] ss:$16 sps:$4 sm:$0xff]  }
 0x314   : > { %5687 = vmatpush1.bf16.msra.mxu0 %v10643_v6  ;;  %6220 = vmatpush1.bf16.msra.mxu1 %v10646_v57 }
 0x315   : > { %5688 = vmatprep.subr.bf16.mxu0 %v10651_v49  ;;  %6221 = vmatprep.subr.bf16.mxu1 %v10654_v7 }
 0x316   : > { %5718 = vmatprep.mubr.bf16.mxu0 %v11060_v11  ;;  %6251 = vmatprep.mubr.bf16.mxu1 %v11060_v11 }
 0x318   : > { %5689 = vmatpush1.bf16.msra.mxu0 %v10649_v8  ;;  %6222 = vmatpush1.bf16.msra.mxu1 %v10652_v9 }
 0x319   : > { %5690 = vmatprep.subr.bf16.mxu0 %v10657_v10  ;;  %6223 = vmatprep.subr.bf16.mxu1 %v10660_v61 }
 0x31c   : > { %5691 = vmatpush1.bf16.msra.mxu0 %v10655_v13  ;;  %6224 = vmatpush1.bf16.msra.mxu1 %v10658_v3 }
 0x31d   : > { %5692 = vmatprep.subr.bf16.mxu0 %v10663_v14  ;;  %6225 = vmatprep.subr.bf16.mxu1 %v10666_v15 }
 0x320   : > { %5693 = vmatpush1.bf16.msra.mxu0 %v10661_v16  ;;  %6226 = vmatpush1.bf16.msra.mxu1 %v10664_v17 }
 0x323   : > { %9086 = vmatmul.mubr.msk.bf16.vlgmr.msra.gmra.mrb[0].mxu0 %vm5190_vm0, %v8301_v18  ;;  %9087 = vmatmul.mubr.msk.bf16.vlgmr.msra.gmra.mrb[0].mxu1 %vm5190_vm0, %v8301_v18 }
 0x3f3   : > { %6263 = sbr.rel (%p9088_p4) target bundleno = 1021 (0x3fd), region = 52 }
 0x3f6   : > { %v5720_v31 = vpop.f32.mrb[0].mxu0  ;;  %v6253_v32 = vpop.f32.mrb[0].mxu1 }
 0x3f7   : > { %v12052_v33 = vadd.f32 %v5720_v31, %v1113_v27  ;;  %v12054_v22 = vadd.f32 %v6253_v32, %v1121_v12  ;;  %v5722_v34 = vpop.f32.mrb[1].mxu0  ;;  %v6255_v19 = vpop.f32.mrb[1].mxu1 }
 0x3f8   : > { %v9350_v37 = vadd.f32 %v5722_v34, %v1117_v28  ;;  %v12056_v38 = vadd.f32 %v6255_v19, %v1125_v30  ;;  %v5724_v42 = vpop.f32.mrb[2].mxu0  ;;  %v6257_v25 = vpop.f32.mrb[2].mxu1 }
 0x3f9   : > { %v5725_v40 = vpop.f32.mrb[3].mxu0  ;;  %v6258_v41 = vpop.f32.mrb[3].mxu1 }
 0x3fa   : > { %v6268_v43 = vcombine.low %v12052_v33, %v9350_v37  ;;  %v6269_v44 = vcombine.low %v12054_v22, %v12056_v38 }
 0x3fc   : > { %6272 = vst [vmem:[%s11120_s8] sm:$0xff] %v6268_v43  ;;  %6273 = vst [vmem:[%s11120_s8 + $0x8] sm:$0xff] %v6269_v44 }
 0x3fd PF: > { %p9089_p5 = scmp.ne.s32.totalorder %s11107_s25, 1 }
 0x3fe   : > { %v10667_v29 = vld [vmem:[%s12867_s3 + $0x4] ss:$16 sps:$4 sm:$0xff] (!%p9089_p5)   ;;  %v6279_v45 = vmax.f32 (!%p9089_p5), %v9350_v37, 0.0  ;;  %v10669_v36 = vld [vmem:[%s12867_s3 + $0xc] ss:$16 sps:$4 sm:$0xff] (!%p9089_p5)  }
 0x3ff   : > { %6277 = sbr.rel (%p9089_p5) target bundleno = 1653 (0x675), region = 56  ;;  %7076 = vmatprep.subr.bf16.mxu0 (!%p9089_p5), %v10667_v29  ;;  %v10671_v48 = vld [vmem:[%s12867_s3] ss:$16 sps:$4 sm:$0xff] (!%p9089_p5)   ;;  %v10672_v50 = vld [vmem:[%s12867_s3 + $0x8] ss:$16 sps:$4 sm:$0xff] (!%p9089_p5)   ;;  %7158 = vmatprep.subr.bf16.mxu1 (!%p9089_p5), %v10669_v36 }
 0x400   : > { %v6283_v35 = vpack.c.bf16 (!%p9089_p5), %v6279_v45, %v6279_v45  ;;  %v10673_v52 = vld [vmem:[%s12867_s3 + $0x24] ss:$16 sps:$4 sm:$0xff] (!%p9089_p5)   ;;  %7077 = vmatpush1.bf16.msra.mxu0 (!%p9089_p5), %v10671_v48  ;;  %7159 = vmatpush1.bf16.msra.mxu1 (!%p9089_p5), %v10672_v50  ;;  %v10675_v53 = vld [vmem:[%s12867_s3 + $0x2c] ss:$16 sps:$4 sm:$0xff] (!%p9089_p5)   ;;  %v10677_v54 = vld [vmem:[%s12867_s3 + $0x20] ss:$16 sps:$4 sm:$0xff] (!%p9089_p5)  }
 0x401   : > { %7078 = vmatprep.subr.bf16.mxu0 (!%p9089_p5), %v10673_v52  ;;  %v10678_v55 = vld [vmem:[%s12867_s3 + $0x28] ss:$16 sps:$4 sm:$0xff] (!%p9089_p5)   ;;  %7160 = vmatprep.subr.bf16.mxu1 (!%p9089_p5), %v10675_v53  ;;  %v10679_v39 = vld [vmem:[%s12867_s3 + $0x44] ss:$16 sps:$4 sm:$0xff] (!%p9089_p5)   ;;  %v10681_v56 = vld [vmem:[%s12867_s3 + $0x4c] ss:$16 sps:$4 sm:$0xff] (!%p9089_p5)  }
 0x402   : > { %7108 = vmatprep.mubr.bf16.mxu0 (!%p9089_p5), %v6283_v35  ;;  %7190 = vmatprep.mubr.bf16.mxu1 (!%p9089_p5), %v6283_v35  ;;  %v10683_v47 = vld [vmem:[%s12867_s3 + $0x40] ss:$16 sps:$4 sm:$0xff] (!%p9089_p5)   ;;  %v10684_v59 = vld [vmem:[%s12867_s3 + $0x48] ss:$16 sps:$4 sm:$0xff] (!%p9089_p5)   ;;  %v10685_v60 = vld [vmem:[%s12867_s3 + $0x64] ss:$16 sps:$4 sm:$0xff] (!%p9089_p5)  }
 0x403   : > { %v10687_v46 = vld [vmem:[%s12867_s3 + $0x6c] ss:$16 sps:$4 sm:$0xff] (!%p9089_p5)   ;;  %v10689_v62 = vld [vmem:[%s12867_s3 + $0x60] ss:$16 sps:$4 sm:$0xff] (!%p9089_p5)   ;;  %v10690_v63 = vld [vmem:[%s12867_s3 + $0x68] ss:$16 sps:$4 sm:$0xff] (!%p9089_p5)  }
 0x404   : > { %7079 = vmatpush1.bf16.msra.mxu0 (!%p9089_p5), %v10677_v54  ;;  %7161 = vmatpush1.bf16.msra.mxu1 (!%p9089_p5), %v10678_v55  ;;  %v10691_v0 = vld [vmem:[%s12867_s3 + $0x84] ss:$16 sps:$4 sm:$0xff] (!%p9089_p5)   ;;  %v10693_v1 = vld [vmem:[%s12867_s3 + $0x8c] ss:$16 sps:$4 sm:$0xff] (!%p9089_p5)   ;;  %v10695_v51 = vld [vmem:[%s12867_s3 + $0x80] ss:$16 sps:$4 sm:$0xff] (!%p9089_p5)  }
 0x405   : > { %7080 = vmatprep.subr.bf16.mxu0 (!%p9089_p5), %v10679_v39  ;;  %7162 = vmatprep.subr.bf16.mxu1 (!%p9089_p5), %v10681_v56  ;;  %v10696_v2 = vld [vmem:[%s12867_s3 + $0x88] ss:$16 sps:$4 sm:$0xff] (!%p9089_p5)   ;;  %v10697_v4 = vld [vmem:[%s12867_s3 + $0xa4] ss:$16 sps:$4 sm:$0xff] (!%p9089_p5)   ;;  %v10699_v58 = vld [vmem:[%s12867_s3 + $0xac] ss:$16 sps:$4 sm:$0xff] (!%p9089_p5)  }
 0x406   : > { %v10701_v5 = vld [vmem:[%s12867_s3 + $0xa0] ss:$16 sps:$4 sm:$0xff]   ;;  %v10702_v6 = vld [vmem:[%s12867_s3 + $0xa8] ss:$16 sps:$4 sm:$0xff]   ;;  %v10703_v57 = vld [vmem:[%s12867_s3 + $0xc4] ss:$16 sps:$4 sm:$0xff]  }
 0x407   : > { %v10705_v49 = vld [vmem:[%s12867_s3 + $0xcc] ss:$16 sps:$4 sm:$0xff]   ;;  %v10707_v7 = vld [vmem:[%s12867_s3 + $0xc0] ss:$16 sps:$4 sm:$0xff]   ;;  %v10708_v8 = vld [vmem:[%s12867_s3 + $0xc8] ss:$16 sps:$4 sm:$0xff]  }
 0x408   : > { %7081 = vmatpush1.bf16.msra.mxu0 %v10683_v47  ;;  %7163 = vmatpush1.bf16.msra.mxu1 %v10684_v59  ;;  %v10709_v9 = vld [vmem:[%s12867_s3 + $0xe4] ss:$16 sps:$4 sm:$0xff]   ;;  %v10711_v10 = vld [vmem:[%s12867_s3 + $0xec] ss:$16 sps:$4 sm:$0xff]   ;;  %v10713_v61 = vld [vmem:[%s12867_s3 + $0xe0] ss:$16 sps:$4 sm:$0xff]  }
 0x409   : > { %7082 = vmatprep.subr.bf16.mxu0 %v10685_v60  ;;  %7164 = vmatprep.subr.bf16.mxu1 %v10687_v46  ;;  %v10714_v11 = vld [vmem:[%s12867_s3 + $0xe8] ss:$16 sps:$4 sm:$0xff]   ;;  %v10715_v13 = vld [vmem:[%s12867_s3 + $0x104] ss:$16 sps:$4 sm:$0xff]   ;;  %v10717_v3 = vld [vmem:[%s12867_s3 + $0x10c] ss:$16 sps:$4 sm:$0xff]  }
 0x40a   : > { %v10719_v14 = vld [vmem:[%s12867_s3 + $0x100] ss:$16 sps:$4 sm:$0xff]   ;;  %v10720_v15 = vld [vmem:[%s12867_s3 + $0x108] ss:$16 sps:$4 sm:$0xff]   ;;  %v10721_v16 = vld [vmem:[%s12867_s3 + $0x124] ss:$16 sps:$4 sm:$0xff]  }
 0x40b   : > { %v10723_v17 = vld [vmem:[%s12867_s3 + $0x12c] ss:$16 sps:$4 sm:$0xff]   ;;  %v10725_v18 = vld [vmem:[%s12867_s3 + $0x120] ss:$16 sps:$4 sm:$0xff]   ;;  %v10726_v23 = vld [vmem:[%s12867_s3 + $0x128] ss:$16 sps:$4 sm:$0xff]  }
 0x40c   : > { %7083 = vmatpush1.bf16.msra.mxu0 %v10689_v62  ;;  %7165 = vmatpush1.bf16.msra.mxu1 %v10690_v63  ;;  %v10727_v27 = vld [vmem:[%s12867_s3 + $0x144] ss:$16 sps:$4 sm:$0xff]   ;;  %v10729_v12 = vld [vmem:[%s12867_s3 + $0x14c] ss:$16 sps:$4 sm:$0xff]   ;;  %v10731_v28 = vld [vmem:[%s12867_s3 + $0x140] ss:$16 sps:$4 sm:$0xff]  }
 0x40d   : > { %7084 = vmatprep.subr.bf16.mxu0 %v10691_v0  ;;  %7166 = vmatprep.subr.bf16.mxu1 %v10693_v1  ;;  %v10732_v30 = vld [vmem:[%s12867_s3 + $0x148] ss:$16 sps:$4 sm:$0xff]   ;;  %v10733_v31 = vld [vmem:[%s12867_s3 + $0x164] ss:$16 sps:$4 sm:$0xff]   ;;  %v10735_v32 = vld [vmem:[%s12867_s3 + $0x16c] ss:$16 sps:$4 sm:$0xff]  }
 0x40e   : > { %v10737_v34 = vld [vmem:[%s12867_s3 + $0x160] ss:$16 sps:$4 sm:$0xff]   ;;  %v10738_v19 = vld [vmem:[%s12867_s3 + $0x168] ss:$16 sps:$4 sm:$0xff]   ;;  %v10739_v37 = vld [vmem:[%s12867_s3 + $0x184] ss:$16 sps:$4 sm:$0xff]  }
 0x40f   : > { %v10741_v42 = vld [vmem:[%s12867_s3 + $0x18c] ss:$16 sps:$4 sm:$0xff]   ;;  %v10743_v25 = vld [vmem:[%s12867_s3 + $0x180] ss:$16 sps:$4 sm:$0xff]   ;;  %v10744_v40 = vld [vmem:[%s12867_s3 + $0x188] ss:$16 sps:$4 sm:$0xff]  }
 0x410   : > { %7085 = vmatpush1.bf16.msra.mxu0 %v10695_v51  ;;  %7167 = vmatpush1.bf16.msra.mxu1 %v10696_v2  ;;  %v10745_v41 = vld [vmem:[%s12867_s3 + $0x1a4] ss:$16 sps:$4 sm:$0xff]   ;;  %v10747_v43 = vld [vmem:[%s12867_s3 + $0x1ac] ss:$16 sps:$4 sm:$0xff]   ;;  %v10749_v44 = vld [vmem:[%s12867_s3 + $0x1a0] ss:$16 sps:$4 sm:$0xff]  }
 0x411   : > { %7086 = vmatprep.subr.bf16.mxu0 %v10697_v4  ;;  %7168 = vmatprep.subr.bf16.mxu1 %v10699_v58  ;;  %v10750_v29 = vld [vmem:[%s12867_s3 + $0x1a8] ss:$16 sps:$4 sm:$0xff]   ;;  %v10751_v45 = vld [vmem:[%s12867_s3 + $0x1c4] ss:$16 sps:$4 sm:$0xff]   ;;  %v10753_v36 = vld [vmem:[%s12867_s3 + $0x1cc] ss:$16 sps:$4 sm:$0xff]  }
 0x412   : > { %v10755_v48 = vld [vmem:[%s12867_s3 + $0x1c0] ss:$16 sps:$4 sm:$0xff]   ;;  %v10756_v50 = vld [vmem:[%s12867_s3 + $0x1c8] ss:$16 sps:$4 sm:$0xff]   ;;  %v10757_v35 = vld [vmem:[%s12867_s3 + $0x1e4] ss:$16 sps:$4 sm:$0xff]  }
 0x413   : > { %v10759_v52 = vld [vmem:[%s12867_s3 + $0x1ec] ss:$16 sps:$4 sm:$0xff]   ;;  %v10761_v53 = vld [vmem:[%s12867_s3 + $0x1e0] ss:$16 sps:$4 sm:$0xff]   ;;  %v10762_v54 = vld [vmem:[%s12867_s3 + $0x1e8] ss:$16 sps:$4 sm:$0xff]  }
 0x414   : > { %7087 = vmatpush1.bf16.msra.mxu0 %v10701_v5  ;;  %7169 = vmatpush1.bf16.msra.mxu1 %v10702_v6  ;;  %v6278_v55 = vmax.f32 %v12052_v33, 0.0  ;;  %v10765_v39 = vld [vmem:[%s12867_s3 + $0x204] ss:$16 sps:$4 sm:$0xff]   ;;  %v10768_v56 = vld [vmem:[%s12867_s3 + $0x20c] ss:$16 sps:$4 sm:$0xff]   ;;  %v6281_v47 = vmax.f32 %v12056_v38, 0.0 }
 0x415   : > { %7088 = vmatprep.subr.bf16.mxu0 %v10703_v57  ;;  %7170 = vmatprep.subr.bf16.mxu1 %v10705_v49  ;;  %v10763_v59 = vld [vmem:[%s12867_s3 + $0x200] ss:$16 sps:$4 sm:$0xff]   ;;  %v10766_v33 = vld [vmem:[%s12867_s3 + $0x208] ss:$16 sps:$4 sm:$0xff]   ;;  %v10771_v46 = vld [vmem:[%s12867_s3 + $0x224] ss:$16 sps:$4 sm:$0xff]  }
 0x416   : > { %v6282_v60 = vpack.c.bf16 %v6278_v55, %v6278_v55  ;;  %v10774_v38 = vld [vmem:[%s12867_s3 + $0x22c] ss:$16 sps:$4 sm:$0xff]   ;;  %v6285_v62 = vpack.c.bf16 %v6281_v47, %v6281_v47  ;;  %v10769_v63 = vld [vmem:[%s12867_s3 + $0x220] ss:$16 sps:$4 sm:$0xff]   ;;  %v10772_v0 = vld [vmem:[%s12867_s3 + $0x228] ss:$16 sps:$4 sm:$0xff]  }
 0x417   : > { %v10777_v1 = vld [vmem:[%s12867_s3 + $0x244] ss:$16 sps:$4 sm:$0xff]   ;;  %v10780_v51 = vld [vmem:[%s12867_s3 + $0x24c] ss:$16 sps:$4 sm:$0xff]   ;;  %v10775_v2 = vld [vmem:[%s12867_s3 + $0x240] ss:$16 sps:$4 sm:$0xff]  }
 0x418   : > { %7089 = vmatpush1.bf16.msra.mxu0 %v10707_v7  ;;  %7171 = vmatpush1.bf16.msra.mxu1 %v10708_v8  ;;  %v10778_v4 = vld [vmem:[%s12867_s3 + $0x248] ss:$16 sps:$4 sm:$0xff]   ;;  %v10783_v58 = vld [vmem:[%s12867_s3 + $0x264] ss:$16 sps:$4 sm:$0xff]   ;;  %v10786_v5 = vld [vmem:[%s12867_s3 + $0x26c] ss:$16 sps:$4 sm:$0xff]  }
 0x419   : > { %7090 = vmatprep.subr.bf16.mxu0 %v10709_v9  ;;  %7172 = vmatprep.subr.bf16.mxu1 %v10711_v10  ;;  %v10781_v6 = vld [vmem:[%s12867_s3 + $0x260] ss:$16 sps:$4 sm:$0xff]   ;;  %v10784_v57 = vld [vmem:[%s12867_s3 + $0x268] ss:$16 sps:$4 sm:$0xff]   ;;  %v10789_v49 = vld [vmem:[%s12867_s3 + $0x284] ss:$16 sps:$4 sm:$0xff]  }
 0x41a   : > { %v10792_v7 = vld [vmem:[%s12867_s3 + $0x28c] ss:$16 sps:$4 sm:$0xff]   ;;  %v10787_v8 = vld [vmem:[%s12867_s3 + $0x280] ss:$16 sps:$4 sm:$0xff]   ;;  %v10790_v9 = vld [vmem:[%s12867_s3 + $0x288] ss:$16 sps:$4 sm:$0xff]  }
 0x41b   : > { %v10795_v10 = vld [vmem:[%s12867_s3 + $0x2a4] ss:$16 sps:$4 sm:$0xff]   ;;  %v10844_v55 = vld [vmem:[%s12867_s3 + $0x3a8] ss:$16 sps:$4 sm:$0xff]   ;;  %v10847_v47 = vld [vmem:[%s12867_s3 + $0x3c0] ss:$16 sps:$4 sm:$0xff]  }
 0x41c   : > { %7091 = vmatpush1.bf16.msra.mxu0 %v10713_v61  ;;  %7173 = vmatpush1.bf16.msra.mxu1 %v10714_v11  ;;  %v10798_v61 = vld [vmem:[%s12867_s3 + $0x2ac] ss:$16 sps:$4 sm:$0xff]   ;;  %v10793_v11 = vld [vmem:[%s12867_s3 + $0x2a0] ss:$16 sps:$4 sm:$0xff]  }
 0x41d   : > { %7092 = vmatprep.subr.bf16.mxu0 %v10715_v13  ;;  %7174 = vmatprep.subr.bf16.mxu1 %v10717_v3  ;;  %v10796_v13 = vld [vmem:[%s12867_s3 + $0x2a8] ss:$16 sps:$4 sm:$0xff]   ;;  %v10801_v3 = vld [vmem:[%s12867_s3 + $0x2c4] ss:$16 sps:$4 sm:$0xff]  }
 0x420   : > { %7093 = vmatpush1.bf16.msra.mxu0 %v10719_v14  ;;  %7175 = vmatpush1.bf16.msra.mxu1 %v10720_v15  ;;  %v10804_v14 = vld [vmem:[%s12867_s3 + $0x2cc] ss:$16 sps:$4 sm:$0xff]   ;;  %v10799_v15 = vld [vmem:[%s12867_s3 + $0x2c0] ss:$16 sps:$4 sm:$0xff]  }
 0x421   : > { %7094 = vmatprep.subr.bf16.mxu0 %v10721_v16  ;;  %7176 = vmatprep.subr.bf16.mxu1 %v10723_v17  ;;  %v10802_v16 = vld [vmem:[%s12867_s3 + $0x2c8] ss:$16 sps:$4 sm:$0xff]   ;;  %v10807_v17 = vld [vmem:[%s12867_s3 + $0x2e4] ss:$16 sps:$4 sm:$0xff]  }
 0x424   : > { %7095 = vmatpush1.bf16.msra.mxu0 %v10725_v18  ;;  %7177 = vmatpush1.bf16.msra.mxu1 %v10726_v23  ;;  %v10810_v18 = vld [vmem:[%s12867_s3 + $0x2ec] ss:$16 sps:$4 sm:$0xff]   ;;  %v10805_v23 = vld [vmem:[%s12867_s3 + $0x2e0] ss:$16 sps:$4 sm:$0xff]  }
 0x425   : > { %7096 = vmatprep.subr.bf16.mxu0 %v10727_v27  ;;  %7178 = vmatprep.subr.bf16.mxu1 %v10729_v12  ;;  %v10808_v27 = vld [vmem:[%s12867_s3 + $0x2e8] ss:$16 sps:$4 sm:$0xff]   ;;  %v10813_v12 = vld [vmem:[%s12867_s3 + $0x304] ss:$16 sps:$4 sm:$0xff]  }
 0x428   : > { %7097 = vmatpush1.bf16.msra.mxu0 %v10731_v28  ;;  %7179 = vmatpush1.bf16.msra.mxu1 %v10732_v30  ;;  %v10816_v28 = vld [vmem:[%s12867_s3 + $0x30c] ss:$16 sps:$4 sm:$0xff]   ;;  %v10811_v30 = vld [vmem:[%s12867_s3 + $0x300] ss:$16 sps:$4 sm:$0xff]  }
 0x429   : > { %7098 = vmatprep.subr.bf16.mxu0 %v10733_v31  ;;  %7180 = vmatprep.subr.bf16.mxu1 %v10735_v32  ;;  %v10814_v31 = vld [vmem:[%s12867_s3 + $0x308] ss:$16 sps:$4 sm:$0xff]   ;;  %v10819_v32 = vld [vmem:[%s12867_s3 + $0x324] ss:$16 sps:$4 sm:$0xff]  }
 0x42c   : > { %7099 = vmatpush1.bf16.msra.mxu0 %v10737_v34  ;;  %7181 = vmatpush1.bf16.msra.mxu1 %v10738_v19  ;;  %v10822_v34 = vld [vmem:[%s12867_s3 + $0x32c] ss:$16 sps:$4 sm:$0xff]   ;;  %v10817_v19 = vld [vmem:[%s12867_s3 + $0x320] ss:$16 sps:$4 sm:$0xff]  }
 0x42d   : > { %7100 = vmatprep.subr.bf16.mxu0 %v10739_v37  ;;  %7182 = vmatprep.subr.bf16.mxu1 %v10741_v42  ;;  %v10820_v37 = vld [vmem:[%s12867_s3 + $0x328] ss:$16 sps:$4 sm:$0xff]   ;;  %v10825_v42 = vld [vmem:[%s12867_s3 + $0x344] ss:$16 sps:$4 sm:$0xff]  }
 0x430   : > { %7101 = vmatpush1.bf16.msra.mxu0 %v10743_v25  ;;  %7183 = vmatpush1.bf16.msra.mxu1 %v10744_v40  ;;  %v10828_v25 = vld [vmem:[%s12867_s3 + $0x34c] ss:$16 sps:$4 sm:$0xff]   ;;  %v10823_v40 = vld [vmem:[%s12867_s3 + $0x340] ss:$16 sps:$4 sm:$0xff]  }
 0x431   : > { %7102 = vmatprep.subr.bf16.mxu0 %v10745_v41  ;;  %7184 = vmatprep.subr.bf16.mxu1 %v10747_v43  ;;  %v10826_v41 = vld [vmem:[%s12867_s3 + $0x348] ss:$16 sps:$4 sm:$0xff]   ;;  %v10831_v43 = vld [vmem:[%s12867_s3 + $0x364] ss:$16 sps:$4 sm:$0xff]  }
 0x434   : > { %7103 = vmatpush1.bf16.msra.mxu0 %v10749_v44  ;;  %7185 = vmatpush1.bf16.msra.mxu1 %v10750_v29  ;;  %v10834_v44 = vld [vmem:[%s12867_s3 + $0x36c] ss:$16 sps:$4 sm:$0xff]   ;;  %v10829_v29 = vld [vmem:[%s12867_s3 + $0x360] ss:$16 sps:$4 sm:$0xff]  }
 0x435   : > { %7104 = vmatprep.subr.bf16.mxu0 %v10751_v45  ;;  %7186 = vmatprep.subr.bf16.mxu1 %v10753_v36  ;;  %v10832_v45 = vld [vmem:[%s12867_s3 + $0x368] ss:$16 sps:$4 sm:$0xff]   ;;  %v10837_v36 = vld [vmem:[%s12867_s3 + $0x384] ss:$16 sps:$4 sm:$0xff]  }
 0x438   : > { %7105 = vmatpush1.bf16.msra.mxu0 %v10755_v48  ;;  %7187 = vmatpush1.bf16.msra.mxu1 %v10756_v50  ;;  %v10840_v48 = vld [vmem:[%s12867_s3 + $0x38c] ss:$16 sps:$4 sm:$0xff]   ;;  %v10835_v50 = vld [vmem:[%s12867_s3 + $0x380] ss:$16 sps:$4 sm:$0xff]  }
 0x439   : > { %7106 = vmatprep.subr.bf16.mxu0 %v10757_v35  ;;  %7188 = vmatprep.subr.bf16.mxu1 %v10759_v52  ;;  %v10838_v35 = vld [vmem:[%s12867_s3 + $0x388] ss:$16 sps:$4 sm:$0xff]   ;;  %v10843_v52 = vld [vmem:[%s12867_s3 + $0x3a4] ss:$16 sps:$4 sm:$0xff]  }
 0x43c   : > { %7107 = vmatpush1.bf16.msra.mxu0 %v10761_v53  ;;  %7189 = vmatpush1.bf16.msra.mxu1 %v10762_v54  ;;  %v10846_v53 = vld [vmem:[%s12867_s3 + $0x3ac] ss:$16 sps:$4 sm:$0xff]   ;;  %v10841_v54 = vld [vmem:[%s12867_s3 + $0x3a0] ss:$16 sps:$4 sm:$0xff]  }
 0x43d   : > { %7117 = vmatprep.subr.bf16.mxu0 %v10765_v39  ;;  %7199 = vmatprep.subr.bf16.mxu1 %v10768_v56  ;;  %v10849_v39 = vld [vmem:[%s12867_s3 + $0x3c4] ss:$16 sps:$4 sm:$0xff]   ;;  %v10852_v56 = vld [vmem:[%s12867_s3 + $0x3cc] ss:$16 sps:$4 sm:$0xff]  }
 0x43f   : > { %7109 = vmatmul.mubr.bf16.vlgmr.msra.gmra.mrb[0].mxu0 %v6282_v60  ;;  %7191 = vmatmul.mubr.bf16.vlgmr.msra.gmra.mrb[0].mxu1 %v6282_v60  ;;  %v10858_v60 = vld [vmem:[%s12867_s3 + $0x3ec] ss:$16 sps:$4 sm:$0xff]  }
 0x440   : > { %7118 = vmatpush1.bf16.msra.mxu0 %v10763_v59  ;;  %7200 = vmatpush1.bf16.msra.mxu1 %v10766_v33  ;;  %v10850_v59 = vld [vmem:[%s12867_s3 + $0x3c8] ss:$16 sps:$4 sm:$0xff]   ;;  %v10855_v33 = vld [vmem:[%s12867_s3 + $0x3e4] ss:$16 sps:$4 sm:$0xff]  }
 0x441   : > { %7119 = vmatprep.subr.bf16.mxu0 %v10771_v46  ;;  %7201 = vmatprep.subr.bf16.mxu1 %v10774_v38  ;;  %v10853_v46 = vld [vmem:[%s12867_s3 + $0x3e0] ss:$16 sps:$4 sm:$0xff]   ;;  %v10856_v38 = vld [vmem:[%s12867_s3 + $0x3e8] ss:$16 sps:$4 sm:$0xff]  }
 0x442   : > { %7149 = vmatprep.mubr.bf16.mxu0 %v6285_v62  ;;  %7231 = vmatprep.mubr.bf16.mxu1 %v6285_v62  ;;  %v6280_v62 = vmax.f32 %v12054_v22, 0.0  ;;  %v10862_v22 = vld [vmem:[%s12869_s5 + $0x8] ss:$16 sps:$4 sm:$0xff]  }
 0x444   : > { %7120 = vmatpush1.bf16.msra.mxu0 %v10769_v63  ;;  %7202 = vmatpush1.bf16.msra.mxu1 %v10772_v0  ;;  %v10861_v63 = vld [vmem:[%s12869_s5 + $0x4] ss:$16 sps:$4 sm:$0xff]   ;;  %v10864_v0 = vld [vmem:[%s12869_s5 + $0xc] ss:$16 sps:$4 sm:$0xff]  }
 0x445   : > { %7121 = vmatprep.subr.bf16.mxu0 %v10777_v1  ;;  %7203 = vmatprep.subr.bf16.mxu1 %v10780_v51  ;;  %v10859_v1 = vld [vmem:[%s12869_s5] ss:$16 sps:$4 sm:$0xff]   ;;  %v6284_v51 = vpack.c.bf16 %v6280_v62, %v6280_v62 }
 0x446   : > { %v10943_v62 = vld [vmem:[%s12869_s5 + $0x1c0] ss:$16 sps:$4 sm:$0xff]  }
 0x448   : > { %7122 = vmatpush1.bf16.msra.mxu0 %v10775_v2  ;;  %7204 = vmatpush1.bf16.msra.mxu1 %v10778_v4  ;;  %v10867_v2 = vld [vmem:[%s12869_s5 + $0x24] ss:$16 sps:$4 sm:$0xff]   ;;  %v10870_v4 = vld [vmem:[%s12869_s5 + $0x2c] ss:$16 sps:$4 sm:$0xff]  }
 0x449   : > { %7123 = vmatprep.subr.bf16.mxu0 %v10783_v58  ;;  %7205 = vmatprep.subr.bf16.mxu1 %v10786_v5  ;;  %v10865_v58 = vld [vmem:[%s12869_s5 + $0x20] ss:$16 sps:$4 sm:$0xff]   ;;  %v10868_v5 = vld [vmem:[%s12869_s5 + $0x28] ss:$16 sps:$4 sm:$0xff]  }
 0x44c   : > { %7124 = vmatpush1.bf16.msra.mxu0 %v10781_v6  ;;  %7206 = vmatpush1.bf16.msra.mxu1 %v10784_v57  ;;  %v10873_v6 = vld [vmem:[%s12869_s5 + $0x44] ss:$16 sps:$4 sm:$0xff]   ;;  %v10876_v57 = vld [vmem:[%s12869_s5 + $0x4c] ss:$16 sps:$4 sm:$0xff]  }
 0x44d   : > { %7125 = vmatprep.subr.bf16.mxu0 %v10789_v49  ;;  %7207 = vmatprep.subr.bf16.mxu1 %v10792_v7  ;;  %v10871_v49 = vld [vmem:[%s12869_s5 + $0x40] ss:$16 sps:$4 sm:$0xff]   ;;  %v10874_v7 = vld [vmem:[%s12869_s5 + $0x48] ss:$16 sps:$4 sm:$0xff]  }
 0x450   : > { %7126 = vmatpush1.bf16.msra.mxu0 %v10787_v8  ;;  %7208 = vmatpush1.bf16.msra.mxu1 %v10790_v9  ;;  %v10879_v8 = vld [vmem:[%s12869_s5 + $0x64] ss:$16 sps:$4 sm:$0xff]   ;;  %v10882_v9 = vld [vmem:[%s12869_s5 + $0x6c] ss:$16 sps:$4 sm:$0xff]  }
 0x451   : > { %7127 = vmatprep.subr.bf16.mxu0 %v10795_v10  ;;  %7209 = vmatprep.subr.bf16.mxu1 %v10798_v61  ;;  %v10877_v10 = vld [vmem:[%s12869_s5 + $0x60] ss:$16 sps:$4 sm:$0xff]   ;;  %v10880_v61 = vld [vmem:[%s12869_s5 + $0x68] ss:$16 sps:$4 sm:$0xff]  }
 0x454   : > { %7128 = vmatpush1.bf16.msra.mxu0 %v10793_v11  ;;  %7210 = vmatpush1.bf16.msra.mxu1 %v10796_v13  ;;  %v10885_v11 = vld [vmem:[%s12869_s5 + $0x84] ss:$16 sps:$4 sm:$0xff]   ;;  %v10888_v13 = vld [vmem:[%s12869_s5 + $0x8c] ss:$16 sps:$4 sm:$0xff]  }
 0x455   : > { %7129 = vmatprep.subr.bf16.mxu0 %v10801_v3  ;;  %7211 = vmatprep.subr.bf16.mxu1 %v10804_v14  ;;  %v10883_v3 = vld [vmem:[%s12869_s5 + $0x80] ss:$16 sps:$4 sm:$0xff]   ;;  %v10886_v14 = vld [vmem:[%s12869_s5 + $0x88] ss:$16 sps:$4 sm:$0xff]  }
 0x458   : > { %7130 = vmatpush1.bf16.msra.mxu0 %v10799_v15  ;;  %7212 = vmatpush1.bf16.msra.mxu1 %v10802_v16  ;;  %v10891_v15 = vld [vmem:[%s12869_s5 + $0xa4] ss:$16 sps:$4 sm:$0xff]   ;;  %v10894_v16 = vld [vmem:[%s12869_s5 + $0xac] ss:$16 sps:$4 sm:$0xff]  }
 0x459   : > { %7131 = vmatprep.subr.bf16.mxu0 %v10807_v17  ;;  %7213 = vmatprep.subr.bf16.mxu1 %v10810_v18  ;;  %v10889_v17 = vld [vmem:[%s12869_s5 + $0xa0] ss:$16 sps:$4 sm:$0xff]   ;;  %v10892_v18 = vld [vmem:[%s12869_s5 + $0xa8] ss:$16 sps:$4 sm:$0xff]  }
 0x45c   : > { %7132 = vmatpush1.bf16.msra.mxu0 %v10805_v23  ;;  %7214 = vmatpush1.bf16.msra.mxu1 %v10808_v27  ;;  %v10897_v23 = vld [vmem:[%s12869_s5 + $0xc4] ss:$16 sps:$4 sm:$0xff]   ;;  %v10900_v27 = vld [vmem:[%s12869_s5 + $0xcc] ss:$16 sps:$4 sm:$0xff]  }
 0x45d   : > { %7133 = vmatprep.subr.bf16.mxu0 %v10813_v12  ;;  %7215 = vmatprep.subr.bf16.mxu1 %v10816_v28  ;;  %v10895_v12 = vld [vmem:[%s12869_s5 + $0xc0] ss:$16 sps:$4 sm:$0xff]   ;;  %v10898_v28 = vld [vmem:[%s12869_s5 + $0xc8] ss:$16 sps:$4 sm:$0xff]  }
 0x460   : > { %7134 = vmatpush1.bf16.msra.mxu0 %v10811_v30  ;;  %7216 = vmatpush1.bf16.msra.mxu1 %v10814_v31  ;;  %v10903_v30 = vld [vmem:[%s12869_s5 + $0xe4] ss:$16 sps:$4 sm:$0xff]   ;;  %v10906_v31 = vld [vmem:[%s12869_s5 + $0xec] ss:$16 sps:$4 sm:$0xff]  }
 0x461   : > { %7135 = vmatprep.subr.bf16.mxu0 %v10819_v32  ;;  %7217 = vmatprep.subr.bf16.mxu1 %v10822_v34  ;;  %v10901_v32 = vld [vmem:[%s12869_s5 + $0xe0] ss:$16 sps:$4 sm:$0xff]   ;;  %v10904_v34 = vld [vmem:[%s12869_s5 + $0xe8] ss:$16 sps:$4 sm:$0xff]  }
 0x464   : > { %7136 = vmatpush1.bf16.msra.mxu0 %v10817_v19  ;;  %7218 = vmatpush1.bf16.msra.mxu1 %v10820_v37  ;;  %v10909_v19 = vld [vmem:[%s12869_s5 + $0x104] ss:$16 sps:$4 sm:$0xff]   ;;  %v10912_v37 = vld [vmem:[%s12869_s5 + $0x10c] ss:$16 sps:$4 sm:$0xff]  }
 0x465   : > { %7137 = vmatprep.subr.bf16.mxu0 %v10825_v42  ;;  %7219 = vmatprep.subr.bf16.mxu1 %v10828_v25  ;;  %v10907_v42 = vld [vmem:[%s12869_s5 + $0x100] ss:$16 sps:$4 sm:$0xff]   ;;  %v10910_v25 = vld [vmem:[%s12869_s5 + $0x108] ss:$16 sps:$4 sm:$0xff]  }
 0x468   : > { %7138 = vmatpush1.bf16.msra.mxu0 %v10823_v40  ;;  %7220 = vmatpush1.bf16.msra.mxu1 %v10826_v41  ;;  %v10915_v40 = vld [vmem:[%s12869_s5 + $0x124] ss:$16 sps:$4 sm:$0xff]   ;;  %v10918_v41 = vld [vmem:[%s12869_s5 + $0x12c] ss:$16 sps:$4 sm:$0xff]  }
 0x469   : > { %7139 = vmatprep.subr.bf16.mxu0 %v10831_v43  ;;  %7221 = vmatprep.subr.bf16.mxu1 %v10834_v44  ;;  %v10913_v43 = vld [vmem:[%s12869_s5 + $0x120] ss:$16 sps:$4 sm:$0xff]   ;;  %v10916_v44 = vld [vmem:[%s12869_s5 + $0x128] ss:$16 sps:$4 sm:$0xff]  }
 0x46c   : > { %7140 = vmatpush1.bf16.msra.mxu0 %v10829_v29  ;;  %7222 = vmatpush1.bf16.msra.mxu1 %v10832_v45  ;;  %v10921_v29 = vld [vmem:[%s12869_s5 + $0x144] ss:$16 sps:$4 sm:$0xff]   ;;  %v10924_v45 = vld [vmem:[%s12869_s5 + $0x14c] ss:$16 sps:$4 sm:$0xff]  }
 0x46d   : > { %7141 = vmatprep.subr.bf16.mxu0 %v10837_v36  ;;  %7223 = vmatprep.subr.bf16.mxu1 %v10840_v48  ;;  %v10919_v36 = vld [vmem:[%s12869_s5 + $0x140] ss:$16 sps:$4 sm:$0xff]   ;;  %v10922_v48 = vld [vmem:[%s12869_s5 + $0x148] ss:$16 sps:$4 sm:$0xff]  }
 0x470   : > { %7142 = vmatpush1.bf16.msra.mxu0 %v10835_v50  ;;  %7224 = vmatpush1.bf16.msra.mxu1 %v10838_v35  ;;  %v10927_v50 = vld [vmem:[%s12869_s5 + $0x164] ss:$16 sps:$4 sm:$0xff]   ;;  %v10930_v35 = vld [vmem:[%s12869_s5 + $0x16c] ss:$16 sps:$4 sm:$0xff]  }
 0x471   : > { %7143 = vmatprep.subr.bf16.mxu0 %v10843_v52  ;;  %7225 = vmatprep.subr.bf16.mxu1 %v10846_v53  ;;  %v10925_v52 = vld [vmem:[%s12869_s5 + $0x160] ss:$16 sps:$4 sm:$0xff]   ;;  %v10928_v53 = vld [vmem:[%s12869_s5 + $0x168] ss:$16 sps:$4 sm:$0xff]  }
 0x474   : > { %7144 = vmatpush1.bf16.msra.mxu0 %v10841_v54  ;;  %7226 = vmatpush1.bf16.msra.mxu1 %v10844_v55  ;;  %v10933_v54 = vld [vmem:[%s12869_s5 + $0x184] ss:$16 sps:$4 sm:$0xff]   ;;  %v10936_v55 = vld [vmem:[%s12869_s5 + $0x18c] ss:$16 sps:$4 sm:$0xff]  }
 0x475   : > { %7145 = vmatprep.subr.bf16.mxu0 %v10849_v39  ;;  %7227 = vmatprep.subr.bf16.mxu1 %v10852_v56  ;;  %v10931_v39 = vld [vmem:[%s12869_s5 + $0x180] ss:$16 sps:$4 sm:$0xff]   ;;  %v10934_v56 = vld [vmem:[%s12869_s5 + $0x188] ss:$16 sps:$4 sm:$0xff]  }
 0x478   : > { %7146 = vmatpush1.bf16.msra.mxu0 %v10847_v47  ;;  %7228 = vmatpush1.bf16.msra.mxu1 %v10850_v59  ;;  %v10939_v47 = vld [vmem:[%s12869_s5 + $0x1a4] ss:$16 sps:$4 sm:$0xff]   ;;  %v10942_v59 = vld [vmem:[%s12869_s5 + $0x1ac] ss:$16 sps:$4 sm:$0xff]  }
 0x479   : > { %7147 = vmatprep.subr.bf16.mxu0 %v10855_v33  ;;  %7229 = vmatprep.subr.bf16.mxu1 %v10858_v60  ;;  %v10937_v33 = vld [vmem:[%s12869_s5 + $0x1a0] ss:$16 sps:$4 sm:$0xff]   ;;  %v10940_v60 = vld [vmem:[%s12869_s5 + $0x1a8] ss:$16 sps:$4 sm:$0xff]  }
 0x47c   : > { %7148 = vmatpush1.bf16.msra.mxu0 %v10853_v46  ;;  %7230 = vmatpush1.bf16.msra.mxu1 %v10856_v38  ;;  %v10945_v46 = vld [vmem:[%s12869_s5 + $0x1c4] ss:$16 sps:$4 sm:$0xff]   ;;  %v10948_v38 = vld [vmem:[%s12869_s5 + $0x1cc] ss:$16 sps:$4 sm:$0xff]  }
 0x47d   : > { %8038 = vmatprep.subr.bf16.mxu0 %v10861_v63  ;;  %8120 = vmatprep.subr.bf16.mxu1 %v10864_v0  ;;  %v10946_v63 = vld [vmem:[%s12869_s5 + $0x1c8] ss:$16 sps:$4 sm:$0xff]   ;;  %v10951_v0 = vld [vmem:[%s12869_s5 + $0x1e4] ss:$16 sps:$4 sm:$0xff]  }
 0x47f   : > { %7150 = vmatmul.mubr.bf16.vlgmr.msra.gmra.mrb[0].mxu0 %v6284_v51  ;;  %7232 = vmatmul.mubr.bf16.vlgmr.msra.gmra.mrb[0].mxu1 %v6284_v51  ;;  %v10952_v51 = vld [vmem:[%s12869_s5 + $0x1e8] ss:$16 sps:$4 sm:$0xff]  }
 0x480   : > { %8039 = vmatpush1.bf16.msra.mxu0 %v10859_v1  ;;  %8121 = vmatpush1.bf16.msra.mxu1 %v10862_v22  ;;  %v10954_v1 = vld [vmem:[%s12869_s5 + $0x1ec] ss:$16 sps:$4 sm:$0xff]   ;;  %v10949_v22 = vld [vmem:[%s12869_s5 + $0x1e0] ss:$16 sps:$4 sm:$0xff]  }
 0x481   : > { %8040 = vmatprep.subr.bf16.mxu0 %v10867_v2  ;;  %8122 = vmatprep.subr.bf16.mxu1 %v10870_v4  ;;  %v10957_v2 = vld [vmem:[%s12869_s5 + $0x204] ss:$16 sps:$4 sm:$0xff]   ;;  %v10960_v4 = vld [vmem:[%s12869_s5 + $0x20c] ss:$16 sps:$4 sm:$0xff]  }
 0x484   : > { %8041 = vmatpush1.bf16.msra.mxu0 %v10865_v58  ;;  %8123 = vmatpush1.bf16.msra.mxu1 %v10868_v5  ;;  %v12653_v58 = vld [vmem:[%s12868_s4] sm:$0xf] }
 0x485   : > { %8042 = vmatprep.subr.bf16.mxu0 %v10873_v6  ;;  %8124 = vmatprep.subr.bf16.mxu1 %v10876_v57  ;;  %v6419_v5 = vrot.slane %v12653_v58, %v12037_v20  ;;  %v6423_v6 = vrot.slane %v12653_v58, %v12043_v24  ;;  %v6431_v57 = vrot.slane %v12653_v58, %v12046_v26 }
 0x488   : > { %8043 = vmatpush1.bf16.msra.mxu0 %v10871_v49  ;;  %8125 = vmatpush1.bf16.msra.mxu1 %v10874_v7 }
 0x489   : > { %8044 = vmatprep.subr.bf16.mxu0 %v10879_v8  ;;  %8126 = vmatprep.subr.bf16.mxu1 %v10882_v9 }
 0x48c   : > { %8045 = vmatpush1.bf16.msra.mxu0 %v10877_v10  ;;  %8127 = vmatpush1.bf16.msra.mxu1 %v10880_v61 }
 0x48d   : > { %8046 = vmatprep.subr.bf16.mxu0 %v10885_v11  ;;  %8128 = vmatprep.subr.bf16.mxu1 %v10888_v13 }
 0x490   : > { %8047 = vmatpush1.bf16.msra.mxu0 %v10883_v3  ;;  %8129 = vmatpush1.bf16.msra.mxu1 %v10886_v14 }
 0x491   : > { %8048 = vmatprep.subr.bf16.mxu0 %v10891_v15  ;;  %8130 = vmatprep.subr.bf16.mxu1 %v10894_v16 }
 0x494   : > { %8049 = vmatpush1.bf16.msra.mxu0 %v10889_v17  ;;  %8131 = vmatpush1.bf16.msra.mxu1 %v10892_v18 }
 0x495   : > { %8050 = vmatprep.subr.bf16.mxu0 %v10897_v23  ;;  %8132 = vmatprep.subr.bf16.mxu1 %v10900_v27  ;;  %v10955_v27 = vld [vmem:[%s12869_s5 + $0x200] ss:$16 sps:$4 sm:$0xff]  }
 0x498   : > { %8051 = vmatpush1.bf16.msra.mxu0 %v10895_v12  ;;  %8133 = vmatpush1.bf16.msra.mxu1 %v10898_v28  ;;  %v10958_v12 = vld [vmem:[%s12869_s5 + $0x208] ss:$16 sps:$4 sm:$0xff]  }
 0x499   : > { %8052 = vmatprep.subr.bf16.mxu0 %v10903_v30  ;;  %8134 = vmatprep.subr.bf16.mxu1 %v10906_v31  ;;  %v10963_v30 = vld [vmem:[%s12869_s5 + $0x224] ss:$16 sps:$4 sm:$0xff]   ;;  %v10966_v31 = vld [vmem:[%s12869_s5 + $0x22c] ss:$16 sps:$4 sm:$0xff]  }
 0x49c   : > { %8053 = vmatpush1.bf16.msra.mxu0 %v10901_v32  ;;  %8135 = vmatpush1.bf16.msra.mxu1 %v10904_v34  ;;  %v10961_v34 = vld [vmem:[%s12869_s5 + $0x220] ss:$16 sps:$4 sm:$0xff]  }
 0x49d   : > { %8054 = vmatprep.subr.bf16.mxu0 %v10909_v19  ;;  %8136 = vmatprep.subr.bf16.mxu1 %v10912_v37  ;;  %v10964_v19 = vld [vmem:[%s12869_s5 + $0x228] ss:$16 sps:$4 sm:$0xff]   ;;  %v10969_v37 = vld [vmem:[%s12869_s5 + $0x244] ss:$16 sps:$4 sm:$0xff]  }
 0x4a0   : > { %8055 = vmatpush1.bf16.msra.mxu0 %v10907_v42  ;;  %8137 = vmatpush1.bf16.msra.mxu1 %v10910_v25  ;;  %v10972_v42 = vld [vmem:[%s12869_s5 + $0x24c] ss:$16 sps:$4 sm:$0xff]   ;;  %v10967_v25 = vld [vmem:[%s12869_s5 + $0x240] ss:$16 sps:$4 sm:$0xff]  }
 0x4a1   : > { %8056 = vmatprep.subr.bf16.mxu0 %v10915_v40  ;;  %8138 = vmatprep.subr.bf16.mxu1 %v10918_v41  ;;  %v10970_v40 = vld [vmem:[%s12869_s5 + $0x248] ss:$16 sps:$4 sm:$0xff]   ;;  %v10975_v41 = vld [vmem:[%s12869_s5 + $0x264] ss:$16 sps:$4 sm:$0xff]  }
 0x4a4   : > { %8057 = vmatpush1.bf16.msra.mxu0 %v10913_v43  ;;  %8139 = vmatpush1.bf16.msra.mxu1 %v10916_v44  ;;  %v10978_v43 = vld [vmem:[%s12869_s5 + $0x26c] ss:$16 sps:$4 sm:$0xff]   ;;  %v10973_v44 = vld [vmem:[%s12869_s5 + $0x260] ss:$16 sps:$4 sm:$0xff]  }
 0x4a5   : > { %8058 = vmatprep.subr.bf16.mxu0 %v10921_v29  ;;  %8140 = vmatprep.subr.bf16.mxu1 %v10924_v45  ;;  %v10976_v29 = vld [vmem:[%s12869_s5 + $0x268] ss:$16 sps:$4 sm:$0xff]   ;;  %v10981_v45 = vld [vmem:[%s12869_s5 + $0x284] ss:$16 sps:$4 sm:$0xff]  }
 0x4a8   : > { %8059 = vmatpush1.bf16.msra.mxu0 %v10919_v36  ;;  %8141 = vmatpush1.bf16.msra.mxu1 %v10922_v48  ;;  %v10984_v36 = vld [vmem:[%s12869_s5 + $0x28c] ss:$16 sps:$4 sm:$0xff]   ;;  %v10979_v48 = vld [vmem:[%s12869_s5 + $0x280] ss:$16 sps:$4 sm:$0xff]  }
 0x4a9   : > { %8060 = vmatprep.subr.bf16.mxu0 %v10927_v50  ;;  %8142 = vmatprep.subr.bf16.mxu1 %v10930_v35  ;;  %v10982_v50 = vld [vmem:[%s12869_s5 + $0x288] ss:$16 sps:$4 sm:$0xff]   ;;  %v10987_v35 = vld [vmem:[%s12869_s5 + $0x2a4] ss:$16 sps:$4 sm:$0xff]  }
 0x4ac   : > { %8061 = vmatpush1.bf16.msra.mxu0 %v10925_v52  ;;  %8143 = vmatpush1.bf16.msra.mxu1 %v10928_v53  ;;  %v10990_v52 = vld [vmem:[%s12869_s5 + $0x2ac] ss:$16 sps:$4 sm:$0xff]   ;;  %v10985_v53 = vld [vmem:[%s12869_s5 + $0x2a0] ss:$16 sps:$4 sm:$0xff]  }
 0x4ad   : > { %8062 = vmatprep.subr.bf16.mxu0 %v10933_v54  ;;  %8144 = vmatprep.subr.bf16.mxu1 %v10936_v55  ;;  %v10988_v54 = vld [vmem:[%s12869_s5 + $0x2a8] ss:$16 sps:$4 sm:$0xff]   ;;  %v10993_v55 = vld [vmem:[%s12869_s5 + $0x2c4] ss:$16 sps:$4 sm:$0xff]  }
 0x4b0   : > { %8063 = vmatpush1.bf16.msra.mxu0 %v10931_v39  ;;  %8145 = vmatpush1.bf16.msra.mxu1 %v10934_v56  ;;  %v10996_v39 = vld [vmem:[%s12869_s5 + $0x2cc] ss:$16 sps:$4 sm:$0xff]   ;;  %v10991_v56 = vld [vmem:[%s12869_s5 + $0x2c0] ss:$16 sps:$4 sm:$0xff]  }
 0x4b1   : > { %8064 = vmatprep.subr.bf16.mxu0 %v10939_v47  ;;  %8146 = vmatprep.subr.bf16.mxu1 %v10942_v59  ;;  %v10994_v47 = vld [vmem:[%s12869_s5 + $0x2c8] ss:$16 sps:$4 sm:$0xff]   ;;  %v10999_v59 = vld [vmem:[%s12869_s5 + $0x2e4] ss:$16 sps:$4 sm:$0xff]  }
 0x4b4   : > { %8065 = vmatpush1.bf16.msra.mxu0 %v10937_v33  ;;  %8147 = vmatpush1.bf16.msra.mxu1 %v10940_v60  ;;  %v11002_v33 = vld [vmem:[%s12869_s5 + $0x2ec] ss:$16 sps:$4 sm:$0xff]   ;;  %v10997_v60 = vld [vmem:[%s12869_s5 + $0x2e0] ss:$16 sps:$4 sm:$0xff]  }
 0x4b5   : > { %8066 = vmatprep.subr.bf16.mxu0 %v10945_v46  ;;  %8148 = vmatprep.subr.bf16.mxu1 %v10948_v38  ;;  %v11000_v46 = vld [vmem:[%s12869_s5 + $0x2e8] ss:$16 sps:$4 sm:$0xff]   ;;  %v11005_v38 = vld [vmem:[%s12869_s5 + $0x304] ss:$16 sps:$4 sm:$0xff]  }
 0x4b8   : > { %8067 = vmatpush1.bf16.msra.mxu0 %v10943_v62  ;;  %8149 = vmatpush1.bf16.msra.mxu1 %v10946_v63  ;;  %v11008_v62 = vld [vmem:[%s12869_s5 + $0x30c] ss:$16 sps:$4 sm:$0xff]   ;;  %v11003_v63 = vld [vmem:[%s12869_s5 + $0x300] ss:$16 sps:$4 sm:$0xff]  }
 0x4b9   : > { %8068 = vmatprep.subr.bf16.mxu0 %v10951_v0  ;;  %8150 = vmatprep.subr.bf16.mxu1 %v10954_v1  ;;  %v11006_v0 = vld [vmem:[%s12869_s5 + $0x308] ss:$16 sps:$4 sm:$0xff]   ;;  %v11011_v1 = vld [vmem:[%s12869_s5 + $0x324] ss:$16 sps:$4 sm:$0xff]  }
 0x4bc   : > { %8069 = vmatpush1.bf16.msra.mxu0 %v10949_v22  ;;  %8151 = vmatpush1.bf16.msra.mxu1 %v10952_v51  ;;  %v11014_v22 = vld [vmem:[%s12869_s5 + $0x32c] ss:$16 sps:$4 sm:$0xff]   ;;  %v11009_v51 = vld [vmem:[%s12869_s5 + $0x320] ss:$16 sps:$4 sm:$0xff]  }
 0x4bd   : > { %8079 = vmatprep.subr.bf16.mxu0 %v10957_v2  ;;  %8161 = vmatprep.subr.bf16.mxu1 %v10960_v4  ;;  %v11012_v2 = vld [vmem:[%s12869_s5 + $0x328] ss:$16 sps:$4 sm:$0xff]   ;;  %v11017_v4 = vld [vmem:[%s12869_s5 + $0x344] ss:$16 sps:$4 sm:$0xff]  }
 0x552   : > { %v7151_v49 = vpop.f32.mrb[0].mxu0  ;;  %v12661_v7 = vpop.f32.mrb[0].mxu1 }
 0x553   : > { %v9449_v8 = vadd.f32 %v7151_v49, %v6419_v5  ;;  %v7153_v9 = vpop.f32.mrb[1].mxu0  ;;  %v7235_v10 = vpop.f32.mrb[1].mxu1  ;;  %v11020_v5 = vld [vmem:[%s12869_s5 + $0x34c] ss:$16 sps:$4 sm:$0xff]   ;;  %v11023_v49 = vld [vmem:[%s12869_s5 + $0x364] ss:$16 sps:$4 sm:$0xff]  }
 0x554   : > { %v9450_v61 = vadd.f32 %v7153_v9, %v6423_v6  ;;  %v9452_v11 = vadd.f32 %v7235_v10, %v6431_v57  ;;  %v7155_v13 = vpop.f32.mrb[2].mxu0  ;;  %v7237_v3 = vpop.f32.mrb[2].mxu1  ;;  %v11015_v6 = vld [vmem:[%s12869_s5 + $0x340] ss:$16 sps:$4 sm:$0xff]   ;;  %v11018_v57 = vld [vmem:[%s12869_s5 + $0x348] ss:$16 sps:$4 sm:$0xff]  }
 0x555   : > { %v7240_v14 = vmax.f32 %v9449_v8, 0.0  ;;  %v7156_v15 = vpop.f32.mrb[3].mxu0  ;;  %v7238_v16 = vpop.f32.mrb[3].mxu1  ;;  %v11026_v8 = vld [vmem:[%s12869_s5 + $0x36c] ss:$16 sps:$4 sm:$0xff]  }
 0x556   : > { %v7241_v17 = vmax.f32 %v9450_v61, 0.0  ;;  %v7243_v18 = vmax.f32 %v9452_v11, 0.0  ;;  %v11021_v9 = vld [vmem:[%s12869_s5 + $0x360] ss:$16 sps:$4 sm:$0xff]   ;;  %v11024_v10 = vld [vmem:[%s12869_s5 + $0x368] ss:$16 sps:$4 sm:$0xff]  }
 0x557   : > { %v7244_v28 = vpack.c.bf16 %v7240_v14, %v7240_v14  ;;  %v11029_v61 = vld [vmem:[%s12869_s5 + $0x384] ss:$16 sps:$4 sm:$0xff]   ;;  %v11032_v11 = vld [vmem:[%s12869_s5 + $0x38c] ss:$16 sps:$4 sm:$0xff]   ;;  %v11027_v13 = vld [vmem:[%s12869_s5 + $0x380] ss:$16 sps:$4 sm:$0xff]  }
 0x558   : > { %v7245_v23 = vpack.c.bf16 %v7241_v17, %v7241_v17  ;;  %v7247_v32 = vpack.c.bf16 %v7243_v18, %v7243_v18  ;;  %v11030_v3 = vld [vmem:[%s12869_s5 + $0x388] ss:$16 sps:$4 sm:$0xff]   ;;  %v11035_v14 = vld [vmem:[%s12869_s5 + $0x3a4] ss:$16 sps:$4 sm:$0xff]   ;;  %v11038_v15 = vld [vmem:[%s12869_s5 + $0x3ac] ss:$16 sps:$4 sm:$0xff]   ;;  %v6427_v18 = vrot.slane %v12653_v58, %v12040_v21 }
 0x559   : > { %v11033_v16 = vld [vmem:[%s12869_s5 + $0x3a0] ss:$16 sps:$4 sm:$0xff]   ;;  %v11036_v17 = vld [vmem:[%s12869_s5 + $0x3a8] ss:$16 sps:$4 sm:$0xff]  }
 0x55a   : > { %8070 = vmatprep.mubr.bf16.mxu0 %v7245_v23  ;;  %8152 = vmatprep.mubr.bf16.mxu1 %v7245_v23  ;;  %v11041_v23 = vld [vmem:[%s12869_s5 + $0x3c4] ss:$16 sps:$4 sm:$0xff]   ;;  %v11042_v58 = vld [vmem:[%s12869_s5 + $0x3c8] ss:$16 sps:$4 sm:$0xff]  }
 0x55b   : > { %8071 = vmatmul.mubr.bf16.vlgmr.msra.gmra.mrb[4].mxu0 %v7244_v28  ;;  %8153 = vmatmul.mubr.bf16.vlgmr.msra.gmra.mrb[4].mxu1 %v7244_v28  ;;  %v9451_v28 = vadd.f32 %v12661_v7, %v6427_v18  ;;  %v11048_v7 = vld [vmem:[%s12869_s5 + $0x3e8] ss:$16 sps:$4 sm:$0xff]  }
 0x55c   : > { %8080 = vmatpush1.bf16.msra.mxu0 %v10955_v27  ;;  %8162 = vmatpush1.bf16.msra.mxu1 %v10958_v12  ;;  %v11044_v27 = vld [vmem:[%s12869_s5 + $0x3cc] ss:$16 sps:$4 sm:$0xff]   ;;  %v11039_v12 = vld [vmem:[%s12869_s5 + $0x3c0] ss:$16 sps:$4 sm:$0xff]  }
 0x55d   : > { %8111 = vmatprep.mubr.bf16.mxu0 %v7247_v32  ;;  %8193 = vmatprep.mubr.bf16.mxu1 %v7247_v32  ;;  %v11045_v32 = vld [vmem:[%s12869_s5 + $0x3e0] ss:$16 sps:$4 sm:$0xff]  }
 0x55e   : > { %8081 = vmatprep.subr.bf16.mxu0 %v10963_v30  ;;  %8163 = vmatprep.subr.bf16.mxu1 %v10966_v31  ;;  %v11047_v30 = vld [vmem:[%s12869_s5 + $0x3e4] ss:$16 sps:$4 sm:$0xff]   ;;  %v11050_v31 = vld [vmem:[%s12869_s5 + $0x3ec] ss:$16 sps:$4 sm:$0xff]  }
 0x560   : > { %8082 = vmatpush1.bf16.msra.mxu0 %v10961_v34  ;;  %8164 = vmatpush1.bf16.msra.mxu1 %v10964_v19  ;;  %v7242_v34 = vmax.f32 %v9451_v28, 0.0 }
 0x561   : > { %8083 = vmatprep.subr.bf16.mxu0 %v10969_v37  ;;  %8165 = vmatprep.subr.bf16.mxu1 %v10972_v42  ;;  %v7376_v37 = vld [vmem:[%s12870_s6] sm:$0xf] }
 0x562   : > { %v7246_v19 = vpack.c.bf16 %v7242_v34, %v7242_v34  ;;  %v7381_v42 = vrot.slane %v7376_v37, %v12037_v20 }
 0x564   : > { %8084 = vmatpush1.bf16.msra.mxu0 %v10967_v25  ;;  %8166 = vmatpush1.bf16.msra.mxu1 %v10970_v40  ;;  %v7389_v25 = vrot.slane %v7376_v37, %v12040_v21  ;;  %v7385_v40 = vrot.slane %v7376_v37, %v12043_v24 }
 0x565   : > { %8085 = vmatprep.subr.bf16.mxu0 %v10975_v41  ;;  %8167 = vmatprep.subr.bf16.mxu1 %v10978_v43  ;;  %v7393_v41 = vrot.slane %v7376_v37, %v12046_v26 }
 0x568   : > { %8086 = vmatpush1.bf16.msra.mxu0 %v10973_v44  ;;  %8168 = vmatpush1.bf16.msra.mxu1 %v10976_v29 }
 0x569   : > { %8087 = vmatprep.subr.bf16.mxu0 %v10981_v45  ;;  %8169 = vmatprep.subr.bf16.mxu1 %v10984_v36 }
 0x56c   : > { %8088 = vmatpush1.bf16.msra.mxu0 %v10979_v48  ;;  %8170 = vmatpush1.bf16.msra.mxu1 %v10982_v50 }
 0x56d   : > { %8089 = vmatprep.subr.bf16.mxu0 %v10987_v35  ;;  %8171 = vmatprep.subr.bf16.mxu1 %v10990_v52 }
 0x570   : > { %8090 = vmatpush1.bf16.msra.mxu0 %v10985_v53  ;;  %8172 = vmatpush1.bf16.msra.mxu1 %v10988_v54 }
 0x571   : > { %8091 = vmatprep.subr.bf16.mxu0 %v10993_v55  ;;  %8173 = vmatprep.subr.bf16.mxu1 %v10996_v39 }
 0x574   : > { %8092 = vmatpush1.bf16.msra.mxu0 %v10991_v56  ;;  %8174 = vmatpush1.bf16.msra.mxu1 %v10994_v47 }
 0x575   : > { %8093 = vmatprep.subr.bf16.mxu0 %v10999_v59  ;;  %8175 = vmatprep.subr.bf16.mxu1 %v11002_v33 }
 0x578   : > { %8094 = vmatpush1.bf16.msra.mxu0 %v10997_v60  ;;  %8176 = vmatpush1.bf16.msra.mxu1 %v11000_v46 }
 0x579   : > { %8095 = vmatprep.subr.bf16.mxu0 %v11005_v38  ;;  %8177 = vmatprep.subr.bf16.mxu1 %v11008_v62 }
 0x57c   : > { %8096 = vmatpush1.bf16.msra.mxu0 %v11003_v63  ;;  %8178 = vmatpush1.bf16.msra.mxu1 %v11006_v0 }
 0x57d   : > { %8097 = vmatprep.subr.bf16.mxu0 %v11011_v1  ;;  %8179 = vmatprep.subr.bf16.mxu1 %v11014_v22 }
 0x580   : > { %8098 = vmatpush1.bf16.msra.mxu0 %v11009_v51  ;;  %8180 = vmatpush1.bf16.msra.mxu1 %v11012_v2 }
 0x581   : > { %8099 = vmatprep.subr.bf16.mxu0 %v11017_v4  ;;  %8181 = vmatprep.subr.bf16.mxu1 %v11020_v5 }
 0x584   : > { %8100 = vmatpush1.bf16.msra.mxu0 %v11015_v6  ;;  %8182 = vmatpush1.bf16.msra.mxu1 %v11018_v57 }
 0x585   : > { %8101 = vmatprep.subr.bf16.mxu0 %v11023_v49  ;;  %8183 = vmatprep.subr.bf16.mxu1 %v11026_v8 }
 0x588   : > { %8102 = vmatpush1.bf16.msra.mxu0 %v11021_v9  ;;  %8184 = vmatpush1.bf16.msra.mxu1 %v11024_v10 }
 0x589   : > { %8103 = vmatprep.subr.bf16.mxu0 %v11029_v61  ;;  %8185 = vmatprep.subr.bf16.mxu1 %v11032_v11 }
 0x58c   : > { %8104 = vmatpush1.bf16.msra.mxu0 %v11027_v13  ;;  %8186 = vmatpush1.bf16.msra.mxu1 %v11030_v3 }
 0x58d   : > { %8105 = vmatprep.subr.bf16.mxu0 %v11035_v14  ;;  %8187 = vmatprep.subr.bf16.mxu1 %v11038_v15 }
 0x590   : > { %8106 = vmatpush1.bf16.msra.mxu0 %v11033_v16  ;;  %8188 = vmatpush1.bf16.msra.mxu1 %v11036_v17 }
 0x591   : > { %8107 = vmatprep.subr.bf16.mxu0 %v11041_v23  ;;  %8189 = vmatprep.subr.bf16.mxu1 %v11044_v27 }
 0x594   : > { %8108 = vmatpush1.bf16.msra.mxu0 %v11039_v12  ;;  %8190 = vmatpush1.bf16.msra.mxu1 %v11042_v58 }
 0x595   : > { %8109 = vmatprep.subr.bf16.mxu0 %v11047_v30  ;;  %8191 = vmatprep.subr.bf16.mxu1 %v11050_v31 }
 0x598   : > { %8110 = vmatpush1.bf16.msra.mxu0 %v11045_v32  ;;  %8192 = vmatpush1.bf16.msra.mxu1 %v11048_v7 }
 0x59b   : > { %8112 = vmatmul.mubr.bf16.vlgmr.msra.gmra.mrb[4].mxu0 %v7246_v19  ;;  %8194 = vmatmul.mubr.bf16.vlgmr.msra.gmra.mrb[4].mxu1 %v7246_v19 }
 0x66e   : > { %v8113_v43 = vpop.f32.mrb[4].mxu0  ;;  %v8195_v44 = vpop.f32.mrb[4].mxu1 }
 0x66f   : > { %v9453_v29 = vadd.f32 %v8113_v43, %v7381_v42  ;;  %v9455_v45 = vadd.f32 %v8195_v44, %v7389_v25  ;;  %v8115_v36 = vpop.f32.mrb[5].mxu0  ;;  %v8197_v48 = vpop.f32.mrb[5].mxu1 }
 0x670   : > { %v9454_v50 = vadd.f32 %v8115_v36, %v7385_v40  ;;  %v9456_v35 = vadd.f32 %v8197_v48, %v7393_v41  ;;  %v8117_v52 = vpop.f32.mrb[6].mxu0  ;;  %v8199_v53 = vpop.f32.mrb[6].mxu1 }
 0x671   : > { %v8118_v54 = vpop.f32.mrb[7].mxu0  ;;  %v8200_v20 = vpop.f32.mrb[7].mxu1 }
 0x672   : > { %v8206_v55 = vcombine.low %v9453_v29, %v9454_v50  ;;  %v8207_v21 = vcombine.low %v9455_v45, %v9456_v35 }
 0x674   : > { %8210 = vst [vmem:[%s11120_s8] sm:$0xff] %v8206_v55  ;;  %8211 = vst [vmem:[%s11120_s8 + $0x8] sm:$0xff] %v8207_v21 }
 0x675 PF: > { %s17_s24 = sadd.s32 1, %s11057_s24  }
 0x676   : > { %p14_p6 = scmp.ge.s32.totalorder %s17_s24, 4  }
 0x678   :  { %16 = sbr.rel (!%p14_p6) target bundleno = 1 (0x1), region = 92 }

</bundles_post_ra>
